<compile_context>
chip_gen: v7x
topology: tpu7x:2x2x1
jax: 0.10.0
libtpu: 0.0.40
codegen_flags: <defaults>
</compile_context>

<pallas_src>
import functools

import numpy as np

import jax
import jax.numpy as jnp
from jax.experimental import pallas as pl
from jax.experimental.pallas import tpu as pltpu

_HI = jax.lax.Precision.HIGHEST


# ------------------------- fused whole-network kernel -------------------------

def _deepnet_kernel(fmaps_ref, init_ref,                      # per-block inputs
                    cw_ref, cb_ref,                           # CompressUnit (block-diag)
                    t1_ref, b1_ref,                           # ResBlock conv1 Toeplitz
                    t2_ref, b2_ref,                           # ResBlock conv2 (+fuse) Toeplitz
                    fall_ref, finit_ref,                      # per-unit fuse fold terms
                    fu1t_ref, fu1b_ref,                       # FuseUnit conv1 Toeplitz
                    pst_ref, psb_ref,                         # folded PixelShuffle+conv Toeplitz
                    out_ref,
                    *, n_units, n_recurrent, B, Ho, Wo, C):
    WC = Wo * C
    M = B * Ho

    def mm(a, w):
        return jnp.dot(a, w, preferred_element_type=jnp.float32, precision=_HI)

    def conv3x3(x, wfn, bias, relu=False):
        """3x3 / stride-1 / pad-1 conv in the lane-dense (B, Ho, Wo*Cin) layout.

        Column (W) padding and the W-shifts are pre-folded into the three per-kh
        Toeplitz weights wfn(kh) of shape (Wo*Cin, Wo*Cout); row (H) padding is a
        register-level zero-row concat.  The conv is 3 accumulated MXU matmuls with
        lane-dense operands -- no im2col scratch, no masked column stores.
        """
        zrow = jnp.zeros((B, 1, WC), jnp.float32)
        x_mid = x.reshape(M, WC)
        x_dn = jnp.concatenate([zrow, x[:, :Ho - 1, :]], axis=1).reshape(M, WC)  # row h-1
        x_up = jnp.concatenate([x[:, 1:, :], zrow], axis=1).reshape(M, WC)       # row h+1
        acc = mm(x_dn, wfn(0)) + mm(x_mid, wfn(1)) + mm(x_up, wfn(2)) + bias
        if relu:
            acc = jnp.maximum(acc, 0.0)
        return acc.reshape(B, Ho, -1)

    # --- CompressUnit: Conv2d(8, C, 2, 2) + ReLU as one matmul on the
    #     space-to-depth input against a block-diagonal (Wo*32, Wo*C) weight. ---
    x0 = mm(fmaps_ref[...].reshape(M, -1), cw_ref[...]) + cb_ref[...]
    fmaps_c = jnp.maximum(x0, 0.0).reshape(B, Ho, WC)

    # --- RecurrentUnit: n_units BasicUnits; the 1x1 fuse conv is algebraically
    #     folded into conv2 (wide output) + one per-unit xr_0 matmul + a constant. ---
    cur = fmaps_c
    for u in range(n_units):
        b1 = jnp.broadcast_to(b1_ref[u], (M, WC))           # hoisted out of recurrences
        b2w = jnp.broadcast_to(b2_ref[u], (M, 2 * WC))
        # fused = fb + b2 @ H (host-folded)  +  xr_0 @ (sum_r fw_r)
        fused = (mm(cur.reshape(M, WC), fall_ref[u]) + finit_ref[u]).reshape(B, Ho, WC)
        xr = cur
        for r in range(n_recurrent):
            t = conv3x3(xr, lambda k, _u=u: t1_ref[_u, k], b1, relu=True)
            y = conv3x3(t, lambda k, _u=u, _r=r: t2_ref[_u, _r, k], b2w, relu=False)
            xr = xr + y[:, :, :WC]        # ResBlock output (conv2 + b2 + residual)
            fused = fused + y[:, :, WC:]  # this recurrence's fuse-conv contribution
        cur = fused

    # --- FuseUnit: 3x3 conv + ReLU, then PixelShuffle(2)+Conv2d(C//4,1,3,1,1)
    #     folded into one 4-parity-channel 3x3 conv; init_img add fused in. ---
    s = cur + fmaps_c
    yf = conv3x3(s, lambda k: fu1t_ref[k], fu1b_ref[...], relu=True)
    o = conv3x3(yf, lambda k: pst_ref[k], psb_ref[...], relu=False)   # (B, Ho, Wo*4)
    out_ref[...] = (o + init_ref[...]).astype(out_ref.dtype)


# --------------------- host-side weight folding helpers ---------------------

def _row_toeplitz(w_hwio, Wo):
    """3x3 HWIO weight -> per-kh W-Toeplitz stack (3, Wo*Cin, Wo*Cout).

    T[kh][w_in*Cin+ci, w_out*Cout+co] = w[kh, kw, ci, co] with w_in = w_out + kw - 1;
    out-of-range w_in rows stay zero, so W-direction zero padding is built in.
    Built with kron against shifted identities (exact, no host matmuls)."""
    _, _, cin, cout = w_hwio.shape
    mats = []
    for kh in range(3):
        t = jnp.zeros((Wo * cin, Wo * cout), jnp.float32)
        for kw in range(3):
            shift = jnp.asarray(np.eye(Wo, k=1 - kw), jnp.float32)
            t = t + jnp.kron(shift, w_hwio[kh, kw].astype(jnp.float32))
        mats.append(t)
    return jnp.stack(mats)


def _pixelshuffle_conv_fold(fu_w2, n_feat):
    """Fold PixelShuffle(2) + Conv2d(n_feat//4, 1, 3, 1, 1) into an equivalent 3x3
    conv on the PRE-shuffle low-res feature map with 4 output channels; output
    channel 2*i+j is the (h%2, w%2) = (i, j) high-resolution parity plane."""
    cc = n_feat // 4
    idx = np.zeros((3, 3, n_feat, 4), np.int32)
    msk = np.zeros((3, 3, n_feat, 4), bool)
    for i in range(2):
        for j in range(2):
            col = 2 * i + j
            for dh in range(3):
                ah = i + dh - 1                      # high-res row offset
                eh, i2 = ah // 2, ah % 2             # low-res row offset, row parity
                for dw in range(3):
                    aw = j + dw - 1
                    ew, j2 = aw // 2, aw % 2
                    for c in range(cc):
                        idx[eh + 1, ew + 1, 4 * c + 2 * i2 + j2, col] = (dh * 3 + dw) * cc + c
                        msk[eh + 1, ew + 1, 4 * c + 2 * i2 + j2, col] = True
    return jnp.where(jnp.asarray(msk),
                     jnp.take(fu_w2.reshape(-1).astype(jnp.float32), jnp.asarray(idx)),
                     0.0)                            # (3, 3, n_feat, 4) HWIO


# ------------------------------- forward wrapper -------------------------------

def deepnet_forward(params, init_img, fmaps, *, n_units, n_feat, n_recurrent,
                    grid_blocks=1):
    N, H, W, Cin = fmaps.shape
    C, R = n_feat, n_recurrent
    assert Cin == 8 and H % 2 == 0 and W % 2 == 0 and C % 4 == 0
    assert N % grid_blocks == 0
    Ho, Wo = H // 2, W // 2
    WC = Wo * C
    B = N // grid_blocks                 # images per grid step (whole batch by default)

    # -- input layout glue (tiny XLA reshapes): space-to-depth for the 2x2/s2 compress
    #    conv, and parity (s2d) layout for init_img so the final add fuses in-kernel. --
    fmaps_s2d = (fmaps.reshape(N, Ho, 2, Wo, 2, 8)
                      .transpose(0, 1, 3, 2, 4, 5)
                      .reshape(N, Ho, Wo * 32))
    init_s2d = (init_img.reshape(N, Ho, 2, Wo, 2)
                        .transpose(0, 1, 3, 2, 4)
                        .reshape(N, Ho, Wo * 4))

    # -- weight packing: per-kh W-Toeplitz matrices (lane-dense), block-diagonal 1x1
    #    expansions, biases pre-tiled to the (w, c) lane layout, fuse-conv fold. --
    def tile_row(b):
        return jnp.tile(b.astype(jnp.float32), Wo).reshape(1, -1)

    eyeW = jnp.eye(Wo, dtype=jnp.float32)
    cw_bd = jnp.kron(eyeW, params["compress_w"].reshape(2 * 2 * 8, C).astype(jnp.float32))
    cb_row = tile_row(params["compress_b"])

    t1, b1row, t2w, b2wrow, fall_bd, finit_row = [], [], [], [], [], []
    for up in params["units"]:
        fwb = [up["fuse_w"][r * C:(r + 1) * C, :] for r in range(R)]   # 1x1 fuse blocks
        g = [sum(fwb[r:]) for r in range(R)]                           # G_r = sum_{r'>=r}
        f_all = g[0]
        h_mat = sum((r + 1) * fwb[r] for r in range(R))
        t1.append(_row_toeplitz(up["rb_w1"], Wo))
        b1row.append(tile_row(up["rb_b1"]))
        t2_main = _row_toeplitz(up["rb_w2"], Wo)
        per_r = []
        for r in range(R):
            w2g = jnp.einsum("hwio,oj->hwij", up["rb_w2"], g[r], precision=_HI)
            per_r.append(jnp.concatenate([t2_main, _row_toeplitz(w2g, Wo)], axis=-1))
        t2w.append(jnp.stack(per_r))                                   # (R, 3, WC, 2WC)
        b2wrow.append(jnp.concatenate([tile_row(up["rb_b2"]),
                                       jnp.zeros((1, WC), jnp.float32)], axis=-1))
        fall_bd.append(jnp.kron(eyeW, f_all.astype(jnp.float32)))
        fb_eff = up["fuse_b"] + jnp.dot(up["rb_b2"], h_mat, precision=_HI)
        finit_row.append(tile_row(fb_eff))
    t1 = jnp.stack(t1); b1row = jnp.stack(b1row); t2w = jnp.stack(t2w)
    b2wrow = jnp.stack(b2wrow); fall_bd = jnp.stack(fall_bd); finit_row = jnp.stack(finit_row)

    fu1_t = _row_toeplitz(params["fu_w1"], Wo)
    fu1_brow = tile_row(params["fu_b1"])
    ps_t = _row_toeplitz(_pixelshuffle_conv_fold(params["fu_w2"], C), Wo)  # (3, WC, Wo*4)
    ps_brow = jnp.tile(params["fu_b2"].astype(jnp.float32), Wo * 4).reshape(1, Wo * 4)

    def resident(shape):
        nd = len(shape)
        return pl.BlockSpec(shape, lambda n, _nd=nd: (0,) * _nd)

    kernel = functools.partial(_deepnet_kernel, n_units=n_units, n_recurrent=R,
                               B=B, Ho=Ho, Wo=Wo, C=C)
    out = pl.pallas_call(
        kernel,
        out_shape=jax.ShapeDtypeStruct((N, Ho, Wo * 4), jnp.float32),
        grid=(grid_blocks,),
        in_specs=[
            pl.BlockSpec((B, Ho, Wo * 32), lambda n: (n, 0, 0)),   # fmaps (s2d, lane-dense)
            pl.BlockSpec((B, Ho, Wo * 4), lambda n: (n, 0, 0)),    # init_img (parity layout)
            resident((Wo * 32, WC)), resident((1, WC)),            # compress
            resident((n_units, 3, WC, WC)), resident((n_units, 1, WC)),          # rb conv1
            resident((n_units, R, 3, WC, 2 * WC)), resident((n_units, 1, 2 * WC)),  # rb conv2+fuse
            resident((n_units, WC, WC)), resident((n_units, 1, WC)),             # fuse fold
            resident((3, WC, WC)), resident((1, WC)),              # FuseUnit conv1
            resident((3, WC, Wo * 4)), resident((1, Wo * 4)),      # folded PS + final conv
        ],
        out_specs=pl.BlockSpec((B, Ho, Wo * 4), lambda n: (n, 0, 0)),
        compiler_params=pltpu.CompilerParams(dimension_semantics=("parallel",)),
    )(fmaps_s2d, init_s2d, cw_bd, cb_row, t1, b1row, t2w, b2wrow,
      fall_bd, finit_row, fu1_t, fu1_brow, ps_t, ps_brow)

    # -- output layout glue: parity channels (2*i+j) -> full-resolution image. --
    return (out.reshape(N, Ho, Wo, 2, 2)
               .transpose(0, 1, 3, 2, 4)
               .reshape(N, H, W, 1))


# ------------------------------ plain-JAX reference ------------------------------

def pixel_shuffle_nhwc(x, r):
    # NHWC analog of torch.nn.PixelShuffle: channel index = c*r*r + i*r + j.
    N, H, W, C = x.shape
    c = C // (r * r)
    x = x.reshape(N, H, W, c, r, r)
    x = x.transpose(0, 1, 4, 2, 5, 3)
    return x.reshape(N, H * r, W * r, c)


def deepnet_reference(params, init_img, fmaps, *, n_units, n_feat, n_recurrent):
    """Plain-JAX (lax.conv) reference of the PyTorch DeepNet forward (NHWC/HWIO)."""
    conv = functools.partial(jax.lax.conv_general_dilated,
                             dimension_numbers=("NHWC", "HWIO", "NHWC"),
                             precision=_HI)
    x = conv(fmaps, params["compress_w"], (2, 2), ((0, 0), (0, 0))) + params["compress_b"]
    fmaps_c = jnp.maximum(x, 0.0)

    cur = fmaps_c
    for u in range(n_units):
        p = params["units"][u]
        xr = cur
        feats = []
        for _ in range(n_recurrent):
            t = jnp.maximum(
                conv(xr, p["rb_w1"], (1, 1), ((1, 1), (1, 1))) + p["rb_b1"], 0.0)
            xr = conv(t, p["rb_w2"], (1, 1), ((1, 1), (1, 1))) + p["rb_b2"] + xr
            feats.append(xr)
        cat = jnp.concatenate(feats, axis=-1)
        cur = conv(cat, p["fuse_w"].reshape(1, 1, n_feat * n_recurrent, n_feat),
                   (1, 1), ((0, 0), (0, 0))) + p["fuse_b"]

    s = cur + fmaps_c
    y = jnp.maximum(
        conv(s, params["fu_w1"], (1, 1), ((1, 1), (1, 1))) + params["fu_b1"], 0.0)
    y = pixel_shuffle_nhwc(y, 2)
    res_img = conv(y, params["fu_w2"], (1, 1), ((1, 1), (1, 1))) + params["fu_b2"]
    return res_img + init_img


# ----------------------------------- params -----------------------------------

def init_params(key, n_units, n_feat, n_recurrent):
    def nrm(k, shape, scale=0.1):
        return scale * jax.random.normal(k, shape, dtype=jnp.float32)

    keys = jax.random.split(key, 6 + 6 * n_units)
    ki = iter(keys)
    params = {
        "compress_w": nrm(next(ki), (2, 2, 8, n_feat)),           # Conv2d(8, C, 2, 2)
        "compress_b": nrm(next(ki), (n_feat,)),
        "fu_w1": nrm(next(ki), (3, 3, n_feat, n_feat)),           # FuseUnit conv 3x3
        "fu_b1": nrm(next(ki), (n_feat,)),
        "fu_w2": nrm(next(ki), (3, 3, n_feat // 4, 1)),           # FuseUnit conv -> 1ch
        "fu_b2": nrm(next(ki), (1,)),
        "units": [],
    }
    for _ in range(n_units):
        params["units"].append({
            "rb_w1": nrm(next(ki), (3, 3, n_feat, n_feat)),
            "rb_b1": nrm(next(ki), (n_feat,)),
            "rb_w2": nrm(next(ki), (3, 3, n_feat, n_feat)),
            "rb_b2": nrm(next(ki), (n_feat,)),
            "fuse_w": nrm(next(ki), (n_feat * n_recurrent, n_feat)),   # 1x1 conv
            "fuse_b": nrm(next(ki), (n_feat,)),
        })
    return params


# ------------------------------------ main ------------------------------------

if __name__ == "__main__":
    n_units, n_feat, n_recurrent = 2, 8, 2
    N, H, W = 2, 16, 16

    key = jax.random.PRNGKey(0)
    kp, k1, k2 = jax.random.split(key, 3)
    params = init_params(kp, n_units, n_feat, n_recurrent)
    init_img = jax.random.normal(k1, (N, H, W, 1), dtype=jnp.float32)
    fmaps = jax.random.normal(k2, (N, H, W, 8), dtype=jnp.float32)

    # grid_blocks=1: whole batch in one grid step (best for single-TC v5e/v6e).
    # On v7x use grid_blocks=2 so each TensorCore processes half the batch.
    fwd = jax.jit(functools.partial(deepnet_forward, n_units=n_units,
                                    n_feat=n_feat, n_recurrent=n_recurrent,
                                    grid_blocks=1))
    out = jax.block_until_ready(fwd(params, init_img, fmaps))
    assert out.shape == (N, H, W, 1), out.shape
    assert bool(jnp.all(jnp.isfinite(out)))

    ref = jax.block_until_ready(
        deepnet_reference(params, init_img, fmaps, n_units=n_units,
                          n_feat=n_feat, n_recurrent=n_recurrent))
    max_err = float(jnp.max(jnp.abs(out - ref)))
    assert max_err < 2e-4, f"mismatch vs reference: {max_err}"
    print("KERNEL_OK")
</pallas_src>

<mosaic_0001>
module attributes {stable_mosaic.version = 11 : i64} {
  func.func @_deepnet_kernel(%arg0: i32, %arg1: memref<2x8x256xf32, #tpu.memory_space<vmem>>, %arg2: memref<2x8x32xf32, #tpu.memory_space<vmem>>, %arg3: memref<256x64xf32, #tpu.memory_space<vmem>>, %arg4: memref<1x64xf32, #tpu.memory_space<vmem>>, %arg5: memref<2x3x64x64xf32, #tpu.memory_space<vmem>>, %arg6: memref<2x1x64xf32, #tpu.memory_space<vmem>>, %arg7: memref<2x2x3x64x128xf32, #tpu.memory_space<vmem>>, %arg8: memref<2x1x128xf32, #tpu.memory_space<vmem>>, %arg9: memref<2x64x64xf32, #tpu.memory_space<vmem>>, %arg10: memref<2x1x64xf32, #tpu.memory_space<vmem>>, %arg11: memref<3x64x64xf32, #tpu.memory_space<vmem>>, %arg12: memref<1x64xf32, #tpu.memory_space<vmem>>, %arg13: memref<3x64x32xf32, #tpu.memory_space<vmem>>, %arg14: memref<1x32xf32, #tpu.memory_space<vmem>>, %arg15: memref<2x8x32xf32, #tpu.memory_space<vmem>>) attributes {dimension_semantics = [#tpu.dimension_semantics<parallel>], iteration_bounds = array<i64: 1>, scalar_prefetch = 0 : i64, scratch_operands = 0 : i64, tpu.core_type = #tpu.core_type<tc>, window_params = [{transform_indices = @transform_0, window_bounds = array<i64: 2, 8, 256>}, {transform_indices = @transform_1, window_bounds = array<i64: 2, 8, 32>}, {pipeline_mode = #tpu.pipeline_mode<synchronous>, transform_indices = @transform_2, window_bounds = array<i64: 256, 64>}, {pipeline_mode = #tpu.pipeline_mode<synchronous>, transform_indices = @transform_3, window_bounds = array<i64: 1, 64>}, {pipeline_mode = #tpu.pipeline_mode<synchronous>, transform_indices = @transform_4, window_bounds = array<i64: 2, 3, 64, 64>}, {pipeline_mode = #tpu.pipeline_mode<synchronous>, transform_indices = @transform_5, window_bounds = array<i64: 2, 1, 64>}, {pipeline_mode = #tpu.pipeline_mode<synchronous>, transform_indices = @transform_6, window_bounds = array<i64: 2, 2, 3, 64, 128>}, {pipeline_mode = #tpu.pipeline_mode<synchronous>, transform_indices = @transform_7, window_bounds = array<i64: 2, 1, 128>}, {pipeline_mode = #tpu.pipeline_mode<synchronous>, transform_indices = @transform_8, window_bounds = array<i64: 2, 64, 64>}, {pipeline_mode = #tpu.pipeline_mode<synchronous>, transform_indices = @transform_9, window_bounds = array<i64: 2, 1, 64>}, {pipeline_mode = #tpu.pipeline_mode<synchronous>, transform_indices = @transform_10, window_bounds = array<i64: 3, 64, 64>}, {pipeline_mode = #tpu.pipeline_mode<synchronous>, transform_indices = @transform_11, window_bounds = array<i64: 1, 64>}, {pipeline_mode = #tpu.pipeline_mode<synchronous>, transform_indices = @transform_12, window_bounds = array<i64: 3, 64, 32>}, {pipeline_mode = #tpu.pipeline_mode<synchronous>, transform_indices = @transform_13, window_bounds = array<i64: 1, 32>}, {transform_indices = @transform_14, window_bounds = array<i64: 2, 8, 32>}]} {
    %c0 = arith.constant 0 : index
    %c0_0 = arith.constant 0 : index
    %c0_1 = arith.constant 0 : index
    %0 = vector.load %arg1[%c0, %c0_0, %c0_1] : memref<2x8x256xf32, #tpu.memory_space<vmem>>, vector<2x8x256xf32>
    %1 = vector.shape_cast %0 : vector<2x8x256xf32> to vector<16x256xf32>
    %c0_2 = arith.constant 0 : index
    %c0_3 = arith.constant 0 : index
    %2 = vector.load %arg3[%c0_2, %c0_3] : memref<256x64xf32, #tpu.memory_space<vmem>>, vector<256x64xf32>
    %cst = arith.constant dense<0.000000e+00> : vector<16x64xf32>
    %3 = tpu.matmul %1, %2, %cst {dimension_numbers = #tpu.dot_dimension_numbers<[1], [0], [0], [1], [0, 0, 1, 1], [], []>, precision = #tpu.contract_precision<fp32>} : vector<16x256xf32>, vector<256x64xf32>, vector<16x64xf32> -> vector<16x64xf32>
    %c0_4 = arith.constant 0 : index
    %c0_5 = arith.constant 0 : index
    %4 = vector.load %arg4[%c0_4, %c0_5] : memref<1x64xf32, #tpu.memory_space<vmem>>, vector<1x64xf32>
    %5 = vector.broadcast %4 : vector<1x64xf32> to vector<16x64xf32>
    %6 = arith.addf %3, %5 : vector<16x64xf32>
    %cst_6 = arith.constant 0.000000e+00 : f32
    %7 = vector.broadcast %cst_6 : f32 to vector<16x64xf32>
    %8 = arith.maximumf %6, %7 : vector<16x64xf32>
    %9 = vector.shape_cast %8 : vector<16x64xf32> to vector<2x8x64xf32>
    %c0_7 = arith.constant 0 : index
    %c0_8 = arith.constant 0 : index
    %c0_9 = arith.constant 0 : index
    %10 = vector.load %arg6[%c0_7, %c0_8, %c0_9] : memref<2x1x64xf32, #tpu.memory_space<vmem>>, vector<1x1x64xf32>
    %11 = vector.shape_cast %10 : vector<1x1x64xf32> to vector<1x64xf32>
    %12 = vector.shape_cast %11 : vector<1x64xf32> to vector<1x64xf32>
    %13 = vector.broadcast %12 : vector<1x64xf32> to vector<16x64xf32>
    %c0_10 = arith.constant 0 : index
    %c0_11 = arith.constant 0 : index
    %c0_12 = arith.constant 0 : index
    %14 = vector.load %arg8[%c0_10, %c0_11, %c0_12] : memref<2x1x128xf32, #tpu.memory_space<vmem>>, vector<1x1x128xf32>
    %15 = vector.shape_cast %14 : vector<1x1x128xf32> to vector<1x128xf32>
    %16 = vector.shape_cast %15 : vector<1x128xf32> to vector<1x128xf32>
    %17 = vector.broadcast %16 : vector<1x128xf32> to vector<16x128xf32>
    %18 = vector.shape_cast %9 : vector<2x8x64xf32> to vector<16x64xf32>
    %c0_13 = arith.constant 0 : index
    %c0_14 = arith.constant 0 : index
    %c0_15 = arith.constant 0 : index
    %19 = vector.load %arg9[%c0_13, %c0_14, %c0_15] : memref<2x64x64xf32, #tpu.memory_space<vmem>>, vector<1x64x64xf32>
    %20 = vector.shape_cast %19 : vector<1x64x64xf32> to vector<64x64xf32>
    %cst_16 = arith.constant dense<0.000000e+00> : vector<16x64xf32>
    %21 = tpu.matmul %18, %20, %cst_16 {dimension_numbers = #tpu.dot_dimension_numbers<[1], [0], [0], [1], [0, 0, 1, 1], [], []>, precision = #tpu.contract_precision<fp32>} : vector<16x64xf32>, vector<64x64xf32>, vector<16x64xf32> -> vector<16x64xf32>
    %c0_17 = arith.constant 0 : index
    %c0_18 = arith.constant 0 : index
    %c0_19 = arith.constant 0 : index
    %22 = vector.load %arg10[%c0_17, %c0_18, %c0_19] : memref<2x1x64xf32, #tpu.memory_space<vmem>>, vector<1x1x64xf32>
    %23 = vector.shape_cast %22 : vector<1x1x64xf32> to vector<1x64xf32>
    %24 = vector.broadcast %23 : vector<1x64xf32> to vector<16x64xf32>
    %25 = arith.addf %21, %24 : vector<16x64xf32>
    %26 = vector.shape_cast %25 : vector<16x64xf32> to vector<2x8x64xf32>
    %cst_20 = arith.constant 0.000000e+00 : f32
    %27 = vector.broadcast %cst_20 : f32 to vector<2x1x64xf32>
    %28 = vector.shape_cast %9 : vector<2x8x64xf32> to vector<16x64xf32>
    %29 = vector.extract_strided_slice %9 {offsets = [0, 0, 0], sizes = [2, 7, 64], strides = [1, 1, 1]} : vector<2x8x64xf32> to vector<2x7x64xf32>
    %30 = tpu.concatenate %27, %29 in 1 : vector<2x1x64xf32>, vector<2x7x64xf32> -> vector<2x8x64xf32>
    %31 = vector.shape_cast %30 : vector<2x8x64xf32> to vector<16x64xf32>
    %32 = vector.extract_strided_slice %9 {offsets = [0, 1, 0], sizes = [2, 7, 64], strides = [1, 1, 1]} : vector<2x8x64xf32> to vector<2x7x64xf32>
    %33 = tpu.concatenate %32, %27 in 1 : vector<2x7x64xf32>, vector<2x1x64xf32> -> vector<2x8x64xf32>
    %34 = vector.shape_cast %33 : vector<2x8x64xf32> to vector<16x64xf32>
    %c0_21 = arith.constant 0 : index
    %c0_22 = arith.constant 0 : index
    %c0_23 = arith.constant 0 : index
    %c0_24 = arith.constant 0 : index
    %35 = vector.load %arg5[%c0_21, %c0_22, %c0_23, %c0_24] : memref<2x3x64x64xf32, #tpu.memory_space<vmem>>, vector<1x1x64x64xf32>
    %36 = vector.shape_cast %35 : vector<1x1x64x64xf32> to vector<64x64xf32>
    %cst_25 = arith.constant dense<0.000000e+00> : vector<16x64xf32>
    %37 = tpu.matmul %31, %36, %cst_25 {dimension_numbers = #tpu.dot_dimension_numbers<[1], [0], [0], [1], [0, 0, 1, 1], [], []>, precision = #tpu.contract_precision<fp32>} : vector<16x64xf32>, vector<64x64xf32>, vector<16x64xf32> -> vector<16x64xf32>
    %c0_26 = arith.constant 0 : index
    %c1 = arith.constant 1 : index
    %c0_27 = arith.constant 0 : index
    %c0_28 = arith.constant 0 : index
    %38 = vector.load %arg5[%c0_26, %c1, %c0_27, %c0_28] : memref<2x3x64x64xf32, #tpu.memory_space<vmem>>, vector<1x1x64x64xf32>
    %39 = vector.shape_cast %38 : vector<1x1x64x64xf32> to vector<64x64xf32>
    %cst_29 = arith.constant dense<0.000000e+00> : vector<16x64xf32>
    %40 = tpu.matmul %28, %39, %cst_29 {dimension_numbers = #tpu.dot_dimension_numbers<[1], [0], [0], [1], [0, 0, 1, 1], [], []>, precision = #tpu.contract_precision<fp32>} : vector<16x64xf32>, vector<64x64xf32>, vector<16x64xf32> -> vector<16x64xf32>
    %41 = arith.addf %37, %40 : vector<16x64xf32>
    %c0_30 = arith.constant 0 : index
    %c2 = arith.constant 2 : index
    %c0_31 = arith.constant 0 : index
    %c0_32 = arith.constant 0 : index
    %42 = vector.load %arg5[%c0_30, %c2, %c0_31, %c0_32] : memref<2x3x64x64xf32, #tpu.memory_space<vmem>>, vector<1x1x64x64xf32>
    %43 = vector.shape_cast %42 : vector<1x1x64x64xf32> to vector<64x64xf32>
    %cst_33 = arith.constant dense<0.000000e+00> : vector<16x64xf32>
    %44 = tpu.matmul %34, %43, %cst_33 {dimension_numbers = #tpu.dot_dimension_numbers<[1], [0], [0], [1], [0, 0, 1, 1], [], []>, precision = #tpu.contract_precision<fp32>} : vector<16x64xf32>, vector<64x64xf32>, vector<16x64xf32> -> vector<16x64xf32>
    %45 = arith.addf %41, %44 : vector<16x64xf32>
    %46 = arith.addf %45, %13 : vector<16x64xf32>
    %cst_34 = arith.constant 0.000000e+00 : f32
    %47 = vector.broadcast %cst_34 : f32 to vector<16x64xf32>
    %48 = arith.maximumf %46, %47 : vector<16x64xf32>
    %49 = vector.shape_cast %48 : vector<16x64xf32> to vector<2x8x64xf32>
    %cst_35 = arith.constant 0.000000e+00 : f32
    %50 = vector.broadcast %cst_35 : f32 to vector<2x1x64xf32>
    %51 = vector.shape_cast %49 : vector<2x8x64xf32> to vector<16x64xf32>
    %52 = vector.extract_strided_slice %49 {offsets = [0, 0, 0], sizes = [2, 7, 64], strides = [1, 1, 1]} : vector<2x8x64xf32> to vector<2x7x64xf32>
    %53 = tpu.concatenate %50, %52 in 1 : vector<2x1x64xf32>, vector<2x7x64xf32> -> vector<2x8x64xf32>
    %54 = vector.shape_cast %53 : vector<2x8x64xf32> to vector<16x64xf32>
    %55 = vector.extract_strided_slice %49 {offsets = [0, 1, 0], sizes = [2, 7, 64], strides = [1, 1, 1]} : vector<2x8x64xf32> to vector<2x7x64xf32>
    %56 = tpu.concatenate %55, %50 in 1 : vector<2x7x64xf32>, vector<2x1x64xf32> -> vector<2x8x64xf32>
    %57 = vector.shape_cast %56 : vector<2x8x64xf32> to vector<16x64xf32>
    %c0_36 = arith.constant 0 : index
    %c0_37 = arith.constant 0 : index
    %c0_38 = arith.constant 0 : index
    %c0_39 = arith.constant 0 : index
    %c0_40 = arith.constant 0 : index
    %58 = vector.load %arg7[%c0_36, %c0_37, %c0_38, %c0_39, %c0_40] : memref<2x2x3x64x128xf32, #tpu.memory_space<vmem>>, vector<1x1x1x64x128xf32>
    %59 = vector.shape_cast %58 : vector<1x1x1x64x128xf32> to vector<64x128xf32>
    %cst_41 = arith.constant dense<0.000000e+00> : vector<16x128xf32>
    %60 = tpu.matmul %54, %59, %cst_41 {dimension_numbers = #tpu.dot_dimension_numbers<[1], [0], [0], [1], [0, 0, 1, 1], [], []>, precision = #tpu.contract_precision<fp32>} : vector<16x64xf32>, vector<64x128xf32>, vector<16x128xf32> -> vector<16x128xf32>
    %c0_42 = arith.constant 0 : index
    %c0_43 = arith.constant 0 : index
    %c1_44 = arith.constant 1 : index
    %c0_45 = arith.constant 0 : index
    %c0_46 = arith.constant 0 : index
    %61 = vector.load %arg7[%c0_42, %c0_43, %c1_44, %c0_45, %c0_46] : memref<2x2x3x64x128xf32, #tpu.memory_space<vmem>>, vector<1x1x1x64x128xf32>
    %62 = vector.shape_cast %61 : vector<1x1x1x64x128xf32> to vector<64x128xf32>
    %cst_47 = arith.constant dense<0.000000e+00> : vector<16x128xf32>
    %63 = tpu.matmul %51, %62, %cst_47 {dimension_numbers = #tpu.dot_dimension_numbers<[1], [0], [0], [1], [0, 0, 1, 1], [], []>, precision = #tpu.contract_precision<fp32>} : vector<16x64xf32>, vector<64x128xf32>, vector<16x128xf32> -> vector<16x128xf32>
    %64 = arith.addf %60, %63 : vector<16x128xf32>
    %c0_48 = arith.constant 0 : index
    %c0_49 = arith.constant 0 : index
    %c2_50 = arith.constant 2 : index
    %c0_51 = arith.constant 0 : index
    %c0_52 = arith.constant 0 : index
    %65 = vector.load %arg7[%c0_48, %c0_49, %c2_50, %c0_51, %c0_52] : memref<2x2x3x64x128xf32, #tpu.memory_space<vmem>>, vector<1x1x1x64x128xf32>
    %66 = vector.shape_cast %65 : vector<1x1x1x64x128xf32> to vector<64x128xf32>
    %cst_53 = arith.constant dense<0.000000e+00> : vector<16x128xf32>
    %67 = tpu.matmul %57, %66, %cst_53 {dimension_numbers = #tpu.dot_dimension_numbers<[1], [0], [0], [1], [0, 0, 1, 1], [], []>, precision = #tpu.contract_precision<fp32>} : vector<16x64xf32>, vector<64x128xf32>, vector<16x128xf32> -> vector<16x128xf32>
    %68 = arith.addf %64, %67 : vector<16x128xf32>
    %69 = arith.addf %68, %17 : vector<16x128xf32>
    %70 = vector.shape_cast %69 : vector<16x128xf32> to vector<2x8x128xf32>
    %71 = vector.extract_strided_slice %70 {offsets = [0, 0, 0], sizes = [2, 8, 64], strides = [1, 1, 1]} : vector<2x8x128xf32> to vector<2x8x64xf32>
    %72 = arith.addf %9, %71 : vector<2x8x64xf32>
    %73 = vector.extract_strided_slice %70 {offsets = [0, 0, 64], sizes = [2, 8, 64], strides = [1, 1, 1]} : vector<2x8x128xf32> to vector<2x8x64xf32>
    %74 = arith.addf %26, %73 : vector<2x8x64xf32>
    %cst_54 = arith.constant 0.000000e+00 : f32
    %75 = vector.broadcast %cst_54 : f32 to vector<2x1x64xf32>
    %76 = vector.shape_cast %72 : vector<2x8x64xf32> to vector<16x64xf32>
    %77 = vector.extract_strided_slice %72 {offsets = [0, 0, 0], sizes = [2, 7, 64], strides = [1, 1, 1]} : vector<2x8x64xf32> to vector<2x7x64xf32>
    %78 = tpu.concatenate %75, %77 in 1 : vector<2x1x64xf32>, vector<2x7x64xf32> -> vector<2x8x64xf32>
    %79 = vector.shape_cast %78 : vector<2x8x64xf32> to vector<16x64xf32>
    %80 = vector.extract_strided_slice %72 {offsets = [0, 1, 0], sizes = [2, 7, 64], strides = [1, 1, 1]} : vector<2x8x64xf32> to vector<2x7x64xf32>
    %81 = tpu.concatenate %80, %75 in 1 : vector<2x7x64xf32>, vector<2x1x64xf32> -> vector<2x8x64xf32>
    %82 = vector.shape_cast %81 : vector<2x8x64xf32> to vector<16x64xf32>
    %c0_55 = arith.constant 0 : index
    %c0_56 = arith.constant 0 : index
    %c0_57 = arith.constant 0 : index
    %c0_58 = arith.constant 0 : index
    %83 = vector.load %arg5[%c0_55, %c0_56, %c0_57, %c0_58] : memref<2x3x64x64xf32, #tpu.memory_space<vmem>>, vector<1x1x64x64xf32>
    %84 = vector.shape_cast %83 : vector<1x1x64x64xf32> to vector<64x64xf32>
    %cst_59 = arith.constant dense<0.000000e+00> : vector<16x64xf32>
    %85 = tpu.matmul %79, %84, %cst_59 {dimension_numbers = #tpu.dot_dimension_numbers<[1], [0], [0], [1], [0, 0, 1, 1], [], []>, precision = #tpu.contract_precision<fp32>} : vector<16x64xf32>, vector<64x64xf32>, vector<16x64xf32> -> vector<16x64xf32>
    %c0_60 = arith.constant 0 : index
    %c1_61 = arith.constant 1 : index
    %c0_62 = arith.constant 0 : index
    %c0_63 = arith.constant 0 : index
    %86 = vector.load %arg5[%c0_60, %c1_61, %c0_62, %c0_63] : memref<2x3x64x64xf32, #tpu.memory_space<vmem>>, vector<1x1x64x64xf32>
    %87 = vector.shape_cast %86 : vector<1x1x64x64xf32> to vector<64x64xf32>
    %cst_64 = arith.constant dense<0.000000e+00> : vector<16x64xf32>
    %88 = tpu.matmul %76, %87, %cst_64 {dimension_numbers = #tpu.dot_dimension_numbers<[1], [0], [0], [1], [0, 0, 1, 1], [], []>, precision = #tpu.contract_precision<fp32>} : vector<16x64xf32>, vector<64x64xf32>, vector<16x64xf32> -> vector<16x64xf32>
    %89 = arith.addf %85, %88 : vector<16x64xf32>
    %c0_65 = arith.constant 0 : index
    %c2_66 = arith.constant 2 : index
    %c0_67 = arith.constant 0 : index
    %c0_68 = arith.constant 0 : index
    %90 = vector.load %arg5[%c0_65, %c2_66, %c0_67, %c0_68] : memref<2x3x64x64xf32, #tpu.memory_space<vmem>>, vector<1x1x64x64xf32>
    %91 = vector.shape_cast %90 : vector<1x1x64x64xf32> to vector<64x64xf32>
    %cst_69 = arith.constant dense<0.000000e+00> : vector<16x64xf32>
    %92 = tpu.matmul %82, %91, %cst_69 {dimension_numbers = #tpu.dot_dimension_numbers<[1], [0], [0], [1], [0, 0, 1, 1], [], []>, precision = #tpu.contract_precision<fp32>} : vector<16x64xf32>, vector<64x64xf32>, vector<16x64xf32> -> vector<16x64xf32>
    %93 = arith.addf %89, %92 : vector<16x64xf32>
    %94 = arith.addf %93, %13 : vector<16x64xf32>
    %cst_70 = arith.constant 0.000000e+00 : f32
    %95 = vector.broadcast %cst_70 : f32 to vector<16x64xf32>
    %96 = arith.maximumf %94, %95 : vector<16x64xf32>
    %97 = vector.shape_cast %96 : vector<16x64xf32> to vector<2x8x64xf32>
    %cst_71 = arith.constant 0.000000e+00 : f32
    %98 = vector.broadcast %cst_71 : f32 to vector<2x1x64xf32>
    %99 = vector.shape_cast %97 : vector<2x8x64xf32> to vector<16x64xf32>
    %100 = vector.extract_strided_slice %97 {offsets = [0, 0, 0], sizes = [2, 7, 64], strides = [1, 1, 1]} : vector<2x8x64xf32> to vector<2x7x64xf32>
    %101 = tpu.concatenate %98, %100 in 1 : vector<2x1x64xf32>, vector<2x7x64xf32> -> vector<2x8x64xf32>
    %102 = vector.shape_cast %101 : vector<2x8x64xf32> to vector<16x64xf32>
    %103 = vector.extract_strided_slice %97 {offsets = [0, 1, 0], sizes = [2, 7, 64], strides = [1, 1, 1]} : vector<2x8x64xf32> to vector<2x7x64xf32>
    %104 = tpu.concatenate %103, %98 in 1 : vector<2x7x64xf32>, vector<2x1x64xf32> -> vector<2x8x64xf32>
    %105 = vector.shape_cast %104 : vector<2x8x64xf32> to vector<16x64xf32>
    %c0_72 = arith.constant 0 : index
    %c1_73 = arith.constant 1 : index
    %c0_74 = arith.constant 0 : index
    %c0_75 = arith.constant 0 : index
    %c0_76 = arith.constant 0 : index
    %106 = vector.load %arg7[%c0_72, %c1_73, %c0_74, %c0_75, %c0_76] : memref<2x2x3x64x128xf32, #tpu.memory_space<vmem>>, vector<1x1x1x64x128xf32>
    %107 = vector.shape_cast %106 : vector<1x1x1x64x128xf32> to vector<64x128xf32>
    %cst_77 = arith.constant dense<0.000000e+00> : vector<16x128xf32>
    %108 = tpu.matmul %102, %107, %cst_77 {dimension_numbers = #tpu.dot_dimension_numbers<[1], [0], [0], [1], [0, 0, 1, 1], [], []>, precision = #tpu.contract_precision<fp32>} : vector<16x64xf32>, vector<64x128xf32>, vector<16x128xf32> -> vector<16x128xf32>
    %c0_78 = arith.constant 0 : index
    %c1_79 = arith.constant 1 : index
    %c1_80 = arith.constant 1 : index
    %c0_81 = arith.constant 0 : index
    %c0_82 = arith.constant 0 : index
    %109 = vector.load %arg7[%c0_78, %c1_79, %c1_80, %c0_81, %c0_82] : memref<2x2x3x64x128xf32, #tpu.memory_space<vmem>>, vector<1x1x1x64x128xf32>
    %110 = vector.shape_cast %109 : vector<1x1x1x64x128xf32> to vector<64x128xf32>
    %cst_83 = arith.constant dense<0.000000e+00> : vector<16x128xf32>
    %111 = tpu.matmul %99, %110, %cst_83 {dimension_numbers = #tpu.dot_dimension_numbers<[1], [0], [0], [1], [0, 0, 1, 1], [], []>, precision = #tpu.contract_precision<fp32>} : vector<16x64xf32>, vector<64x128xf32>, vector<16x128xf32> -> vector<16x128xf32>
    %112 = arith.addf %108, %111 : vector<16x128xf32>
    %c0_84 = arith.constant 0 : index
    %c1_85 = arith.constant 1 : index
    %c2_86 = arith.constant 2 : index
    %c0_87 = arith.constant 0 : index
    %c0_88 = arith.constant 0 : index
    %113 = vector.load %arg7[%c0_84, %c1_85, %c2_86, %c0_87, %c0_88] : memref<2x2x3x64x128xf32, #tpu.memory_space<vmem>>, vector<1x1x1x64x128xf32>
    %114 = vector.shape_cast %113 : vector<1x1x1x64x128xf32> to vector<64x128xf32>
    %cst_89 = arith.constant dense<0.000000e+00> : vector<16x128xf32>
    %115 = tpu.matmul %105, %114, %cst_89 {dimension_numbers = #tpu.dot_dimension_numbers<[1], [0], [0], [1], [0, 0, 1, 1], [], []>, precision = #tpu.contract_precision<fp32>} : vector<16x64xf32>, vector<64x128xf32>, vector<16x128xf32> -> vector<16x128xf32>
    %116 = arith.addf %112, %115 : vector<16x128xf32>
    %117 = arith.addf %116, %17 : vector<16x128xf32>
    %118 = vector.shape_cast %117 : vector<16x128xf32> to vector<2x8x128xf32>
    %119 = vector.extract_strided_slice %118 {offsets = [0, 0, 64], sizes = [2, 8, 64], strides = [1, 1, 1]} : vector<2x8x128xf32> to vector<2x8x64xf32>
    %120 = arith.addf %74, %119 : vector<2x8x64xf32>
    %c1_90 = arith.constant 1 : index
    %c0_91 = arith.constant 0 : index
    %c0_92 = arith.constant 0 : index
    %121 = vector.load %arg6[%c1_90, %c0_91, %c0_92] : memref<2x1x64xf32, #tpu.memory_space<vmem>>, vector<1x1x64xf32>
    %122 = vector.shape_cast %121 : vector<1x1x64xf32> to vector<1x64xf32>
    %123 = vector.shape_cast %122 : vector<1x64xf32> to vector<1x64xf32>
    %124 = vector.broadcast %123 : vector<1x64xf32> to vector<16x64xf32>
    %c1_93 = arith.constant 1 : index
    %c0_94 = arith.constant 0 : index
    %c0_95 = arith.constant 0 : index
    %125 = vector.load %arg8[%c1_93, %c0_94, %c0_95] : memref<2x1x128xf32, #tpu.memory_space<vmem>>, vector<1x1x128xf32>
    %126 = vector.shape_cast %125 : vector<1x1x128xf32> to vector<1x128xf32>
    %127 = vector.shape_cast %126 : vector<1x128xf32> to vector<1x128xf32>
    %128 = vector.broadcast %127 : vector<1x128xf32> to vector<16x128xf32>
    %129 = vector.shape_cast %120 : vector<2x8x64xf32> to vector<16x64xf32>
    %c1_96 = arith.constant 1 : index
    %c0_97 = arith.constant 0 : index
    %c0_98 = arith.constant 0 : index
    %130 = vector.load %arg9[%c1_96, %c0_97, %c0_98] : memref<2x64x64xf32, #tpu.memory_space<vmem>>, vector<1x64x64xf32>
    %131 = vector.shape_cast %130 : vector<1x64x64xf32> to vector<64x64xf32>
    %cst_99 = arith.constant dense<0.000000e+00> : vector<16x64xf32>
    %132 = tpu.matmul %129, %131, %cst_99 {dimension_numbers = #tpu.dot_dimension_numbers<[1], [0], [0], [1], [0, 0, 1, 1], [], []>, precision = #tpu.contract_precision<fp32>} : vector<16x64xf32>, vector<64x64xf32>, vector<16x64xf32> -> vector<16x64xf32>
    %c1_100 = arith.constant 1 : index
    %c0_101 = arith.constant 0 : index
    %c0_102 = arith.constant 0 : index
    %133 = vector.load %arg10[%c1_100, %c0_101, %c0_102] : memref<2x1x64xf32, #tpu.memory_space<vmem>>, vector<1x1x64xf32>
    %134 = vector.shape_cast %133 : vector<1x1x64xf32> to vector<1x64xf32>
    %135 = vector.broadcast %134 : vector<1x64xf32> to vector<16x64xf32>
    %136 = arith.addf %132, %135 : vector<16x64xf32>
    %137 = vector.shape_cast %136 : vector<16x64xf32> to vector<2x8x64xf32>
    %cst_103 = arith.constant 0.000000e+00 : f32
    %138 = vector.broadcast %cst_103 : f32 to vector<2x1x64xf32>
    %139 = vector.shape_cast %120 : vector<2x8x64xf32> to vector<16x64xf32>
    %140 = vector.extract_strided_slice %120 {offsets = [0, 0, 0], sizes = [2, 7, 64], strides = [1, 1, 1]} : vector<2x8x64xf32> to vector<2x7x64xf32>
    %141 = tpu.concatenate %138, %140 in 1 : vector<2x1x64xf32>, vector<2x7x64xf32> -> vector<2x8x64xf32>
    %142 = vector.shape_cast %141 : vector<2x8x64xf32> to vector<16x64xf32>
    %143 = vector.extract_strided_slice %120 {offsets = [0, 1, 0], sizes = [2, 7, 64], strides = [1, 1, 1]} : vector<2x8x64xf32> to vector<2x7x64xf32>
    %144 = tpu.concatenate %143, %138 in 1 : vector<2x7x64xf32>, vector<2x1x64xf32> -> vector<2x8x64xf32>
    %145 = vector.shape_cast %144 : vector<2x8x64xf32> to vector<16x64xf32>
    %c1_104 = arith.constant 1 : index
    %c0_105 = arith.constant 0 : index
    %c0_106 = arith.constant 0 : index
    %c0_107 = arith.constant 0 : index
    %146 = vector.load %arg5[%c1_104, %c0_105, %c0_106, %c0_107] : memref<2x3x64x64xf32, #tpu.memory_space<vmem>>, vector<1x1x64x64xf32>
    %147 = vector.shape_cast %146 : vector<1x1x64x64xf32> to vector<64x64xf32>
    %cst_108 = arith.constant dense<0.000000e+00> : vector<16x64xf32>
    %148 = tpu.matmul %142, %147, %cst_108 {dimension_numbers = #tpu.dot_dimension_numbers<[1], [0], [0], [1], [0, 0, 1, 1], [], []>, precision = #tpu.contract_precision<fp32>} : vector<16x64xf32>, vector<64x64xf32>, vector<16x64xf32> -> vector<16x64xf32>
    %c1_109 = arith.constant 1 : index
    %c1_110 = arith.constant 1 : index
    %c0_111 = arith.constant 0 : index
    %c0_112 = arith.constant 0 : index
    %149 = vector.load %arg5[%c1_109, %c1_110, %c0_111, %c0_112] : memref<2x3x64x64xf32, #tpu.memory_space<vmem>>, vector<1x1x64x64xf32>
    %150 = vector.shape_cast %149 : vector<1x1x64x64xf32> to vector<64x64xf32>
    %cst_113 = arith.constant dense<0.000000e+00> : vector<16x64xf32>
    %151 = tpu.matmul %139, %150, %cst_113 {dimension_numbers = #tpu.dot_dimension_numbers<[1], [0], [0], [1], [0, 0, 1, 1], [], []>, precision = #tpu.contract_precision<fp32>} : vector<16x64xf32>, vector<64x64xf32>, vector<16x64xf32> -> vector<16x64xf32>
    %152 = arith.addf %148, %151 : vector<16x64xf32>
    %c1_114 = arith.constant 1 : index
    %c2_115 = arith.constant 2 : index
    %c0_116 = arith.constant 0 : index
    %c0_117 = arith.constant 0 : index
    %153 = vector.load %arg5[%c1_114, %c2_115, %c0_116, %c0_117] : memref<2x3x64x64xf32, #tpu.memory_space<vmem>>, vector<1x1x64x64xf32>
    %154 = vector.shape_cast %153 : vector<1x1x64x64xf32> to vector<64x64xf32>
    %cst_118 = arith.constant dense<0.000000e+00> : vector<16x64xf32>
    %155 = tpu.matmul %145, %154, %cst_118 {dimension_numbers = #tpu.dot_dimension_numbers<[1], [0], [0], [1], [0, 0, 1, 1], [], []>, precision = #tpu.contract_precision<fp32>} : vector<16x64xf32>, vector<64x64xf32>, vector<16x64xf32> -> vector<16x64xf32>
    %156 = arith.addf %152, %155 : vector<16x64xf32>
    %157 = arith.addf %156, %124 : vector<16x64xf32>
    %cst_119 = arith.constant 0.000000e+00 : f32
    %158 = vector.broadcast %cst_119 : f32 to vector<16x64xf32>
    %159 = arith.maximumf %157, %158 : vector<16x64xf32>
    %160 = vector.shape_cast %159 : vector<16x64xf32> to vector<2x8x64xf32>
    %cst_120 = arith.constant 0.000000e+00 : f32
    %161 = vector.broadcast %cst_120 : f32 to vector<2x1x64xf32>
    %162 = vector.shape_cast %160 : vector<2x8x64xf32> to vector<16x64xf32>
    %163 = vector.extract_strided_slice %160 {offsets = [0, 0, 0], sizes = [2, 7, 64], strides = [1, 1, 1]} : vector<2x8x64xf32> to vector<2x7x64xf32>
    %164 = tpu.concatenate %161, %163 in 1 : vector<2x1x64xf32>, vector<2x7x64xf32> -> vector<2x8x64xf32>
    %165 = vector.shape_cast %164 : vector<2x8x64xf32> to vector<16x64xf32>
    %166 = vector.extract_strided_slice %160 {offsets = [0, 1, 0], sizes = [2, 7, 64], strides = [1, 1, 1]} : vector<2x8x64xf32> to vector<2x7x64xf32>
    %167 = tpu.concatenate %166, %161 in 1 : vector<2x7x64xf32>, vector<2x1x64xf32> -> vector<2x8x64xf32>
    %168 = vector.shape_cast %167 : vector<2x8x64xf32> to vector<16x64xf32>
    %c1_121 = arith.constant 1 : index
    %c0_122 = arith.constant 0 : index
    %c0_123 = arith.constant 0 : index
    %c0_124 = arith.constant 0 : index
    %c0_125 = arith.constant 0 : index
    %169 = vector.load %arg7[%c1_121, %c0_122, %c0_123, %c0_124, %c0_125] : memref<2x2x3x64x128xf32, #tpu.memory_space<vmem>>, vector<1x1x1x64x128xf32>
    %170 = vector.shape_cast %169 : vector<1x1x1x64x128xf32> to vector<64x128xf32>
    %cst_126 = arith.constant dense<0.000000e+00> : vector<16x128xf32>
    %171 = tpu.matmul %165, %170, %cst_126 {dimension_numbers = #tpu.dot_dimension_numbers<[1], [0], [0], [1], [0, 0, 1, 1], [], []>, precision = #tpu.contract_precision<fp32>} : vector<16x64xf32>, vector<64x128xf32>, vector<16x128xf32> -> vector<16x128xf32>
    %c1_127 = arith.constant 1 : index
    %c0_128 = arith.constant 0 : index
    %c1_129 = arith.constant 1 : index
    %c0_130 = arith.constant 0 : index
    %c0_131 = arith.constant 0 : index
    %172 = vector.load %arg7[%c1_127, %c0_128, %c1_129, %c0_130, %c0_131] : memref<2x2x3x64x128xf32, #tpu.memory_space<vmem>>, vector<1x1x1x64x128xf32>
    %173 = vector.shape_cast %172 : vector<1x1x1x64x128xf32> to vector<64x128xf32>
    %cst_132 = arith.constant dense<0.000000e+00> : vector<16x128xf32>
    %174 = tpu.matmul %162, %173, %cst_132 {dimension_numbers = #tpu.dot_dimension_numbers<[1], [0], [0], [1], [0, 0, 1, 1], [], []>, precision = #tpu.contract_precision<fp32>} : vector<16x64xf32>, vector<64x128xf32>, vector<16x128xf32> -> vector<16x128xf32>
    %175 = arith.addf %171, %174 : vector<16x128xf32>
    %c1_133 = arith.constant 1 : index
    %c0_134 = arith.constant 0 : index
    %c2_135 = arith.constant 2 : index
    %c0_136 = arith.constant 0 : index
    %c0_137 = arith.constant 0 : index
    %176 = vector.load %arg7[%c1_133, %c0_134, %c2_135, %c0_136, %c0_137] : memref<2x2x3x64x128xf32, #tpu.memory_space<vmem>>, vector<1x1x1x64x128xf32>
    %177 = vector.shape_cast %176 : vector<1x1x1x64x128xf32> to vector<64x128xf32>
    %cst_138 = arith.constant dense<0.000000e+00> : vector<16x128xf32>
    %178 = tpu.matmul %168, %177, %cst_138 {dimension_numbers = #tpu.dot_dimension_numbers<[1], [0], [0], [1], [0, 0, 1, 1], [], []>, precision = #tpu.contract_precision<fp32>} : vector<16x64xf32>, vector<64x128xf32>, vector<16x128xf32> -> vector<16x128xf32>
    %179 = arith.addf %175, %178 : vector<16x128xf32>
    %180 = arith.addf %179, %128 : vector<16x128xf32>
    %181 = vector.shape_cast %180 : vector<16x128xf32> to vector<2x8x128xf32>
    %182 = vector.extract_strided_slice %181 {offsets = [0, 0, 0], sizes = [2, 8, 64], strides = [1, 1, 1]} : vector<2x8x128xf32> to vector<2x8x64xf32>
    %183 = arith.addf %120, %182 : vector<2x8x64xf32>
    %184 = vector.extract_strided_slice %181 {offsets = [0, 0, 64], sizes = [2, 8, 64], strides = [1, 1, 1]} : vector<2x8x128xf32> to vector<2x8x64xf32>
    %185 = arith.addf %137, %184 : vector<2x8x64xf32>
    %cst_139 = arith.constant 0.000000e+00 : f32
    %186 = vector.broadcast %cst_139 : f32 to vector<2x1x64xf32>
    %187 = vector.shape_cast %183 : vector<2x8x64xf32> to vector<16x64xf32>
    %188 = vector.extract_strided_slice %183 {offsets = [0, 0, 0], sizes = [2, 7, 64], strides = [1, 1, 1]} : vector<2x8x64xf32> to vector<2x7x64xf32>
    %189 = tpu.concatenate %186, %188 in 1 : vector<2x1x64xf32>, vector<2x7x64xf32> -> vector<2x8x64xf32>
    %190 = vector.shape_cast %189 : vector<2x8x64xf32> to vector<16x64xf32>
    %191 = vector.extract_strided_slice %183 {offsets = [0, 1, 0], sizes = [2, 7, 64], strides = [1, 1, 1]} : vector<2x8x64xf32> to vector<2x7x64xf32>
    %192 = tpu.concatenate %191, %186 in 1 : vector<2x7x64xf32>, vector<2x1x64xf32> -> vector<2x8x64xf32>
    %193 = vector.shape_cast %192 : vector<2x8x64xf32> to vector<16x64xf32>
    %c1_140 = arith.constant 1 : index
    %c0_141 = arith.constant 0 : index
    %c0_142 = arith.constant 0 : index
    %c0_143 = arith.constant 0 : index
    %194 = vector.load %arg5[%c1_140, %c0_141, %c0_142, %c0_143] : memref<2x3x64x64xf32, #tpu.memory_space<vmem>>, vector<1x1x64x64xf32>
    %195 = vector.shape_cast %194 : vector<1x1x64x64xf32> to vector<64x64xf32>
    %cst_144 = arith.constant dense<0.000000e+00> : vector<16x64xf32>
    %196 = tpu.matmul %190, %195, %cst_144 {dimension_numbers = #tpu.dot_dimension_numbers<[1], [0], [0], [1], [0, 0, 1, 1], [], []>, precision = #tpu.contract_precision<fp32>} : vector<16x64xf32>, vector<64x64xf32>, vector<16x64xf32> -> vector<16x64xf32>
    %c1_145 = arith.constant 1 : index
    %c1_146 = arith.constant 1 : index
    %c0_147 = arith.constant 0 : index
    %c0_148 = arith.constant 0 : index
    %197 = vector.load %arg5[%c1_145, %c1_146, %c0_147, %c0_148] : memref<2x3x64x64xf32, #tpu.memory_space<vmem>>, vector<1x1x64x64xf32>
    %198 = vector.shape_cast %197 : vector<1x1x64x64xf32> to vector<64x64xf32>
    %cst_149 = arith.constant dense<0.000000e+00> : vector<16x64xf32>
    %199 = tpu.matmul %187, %198, %cst_149 {dimension_numbers = #tpu.dot_dimension_numbers<[1], [0], [0], [1], [0, 0, 1, 1], [], []>, precision = #tpu.contract_precision<fp32>} : vector<16x64xf32>, vector<64x64xf32>, vector<16x64xf32> -> vector<16x64xf32>
    %200 = arith.addf %196, %199 : vector<16x64xf32>
    %c1_150 = arith.constant 1 : index
    %c2_151 = arith.constant 2 : index
    %c0_152 = arith.constant 0 : index
    %c0_153 = arith.constant 0 : index
    %201 = vector.load %arg5[%c1_150, %c2_151, %c0_152, %c0_153] : memref<2x3x64x64xf32, #tpu.memory_space<vmem>>, vector<1x1x64x64xf32>
    %202 = vector.shape_cast %201 : vector<1x1x64x64xf32> to vector<64x64xf32>
    %cst_154 = arith.constant dense<0.000000e+00> : vector<16x64xf32>
    %203 = tpu.matmul %193, %202, %cst_154 {dimension_numbers = #tpu.dot_dimension_numbers<[1], [0], [0], [1], [0, 0, 1, 1], [], []>, precision = #tpu.contract_precision<fp32>} : vector<16x64xf32>, vector<64x64xf32>, vector<16x64xf32> -> vector<16x64xf32>
    %204 = arith.addf %200, %203 : vector<16x64xf32>
    %205 = arith.addf %204, %124 : vector<16x64xf32>
    %cst_155 = arith.constant 0.000000e+00 : f32
    %206 = vector.broadcast %cst_155 : f32 to vector<16x64xf32>
    %207 = arith.maximumf %205, %206 : vector<16x64xf32>
    %208 = vector.shape_cast %207 : vector<16x64xf32> to vector<2x8x64xf32>
    %cst_156 = arith.constant 0.000000e+00 : f32
    %209 = vector.broadcast %cst_156 : f32 to vector<2x1x64xf32>
    %210 = vector.shape_cast %208 : vector<2x8x64xf32> to vector<16x64xf32>
    %211 = vector.extract_strided_slice %208 {offsets = [0, 0, 0], sizes = [2, 7, 64], strides = [1, 1, 1]} : vector<2x8x64xf32> to vector<2x7x64xf32>
    %212 = tpu.concatenate %209, %211 in 1 : vector<2x1x64xf32>, vector<2x7x64xf32> -> vector<2x8x64xf32>
    %213 = vector.shape_cast %212 : vector<2x8x64xf32> to vector<16x64xf32>
    %214 = vector.extract_strided_slice %208 {offsets = [0, 1, 0], sizes = [2, 7, 64], strides = [1, 1, 1]} : vector<2x8x64xf32> to vector<2x7x64xf32>
    %215 = tpu.concatenate %214, %209 in 1 : vector<2x7x64xf32>, vector<2x1x64xf32> -> vector<2x8x64xf32>
    %216 = vector.shape_cast %215 : vector<2x8x64xf32> to vector<16x64xf32>
    %c1_157 = arith.constant 1 : index
    %c1_158 = arith.constant 1 : index
    %c0_159 = arith.constant 0 : index
    %c0_160 = arith.constant 0 : index
    %c0_161 = arith.constant 0 : index
    %217 = vector.load %arg7[%c1_157, %c1_158, %c0_159, %c0_160, %c0_161] : memref<2x2x3x64x128xf32, #tpu.memory_space<vmem>>, vector<1x1x1x64x128xf32>
    %218 = vector.shape_cast %217 : vector<1x1x1x64x128xf32> to vector<64x128xf32>
    %cst_162 = arith.constant dense<0.000000e+00> : vector<16x128xf32>
    %219 = tpu.matmul %213, %218, %cst_162 {dimension_numbers = #tpu.dot_dimension_numbers<[1], [0], [0], [1], [0, 0, 1, 1], [], []>, precision = #tpu.contract_precision<fp32>} : vector<16x64xf32>, vector<64x128xf32>, vector<16x128xf32> -> vector<16x128xf32>
    %c1_163 = arith.constant 1 : index
    %c1_164 = arith.constant 1 : index
    %c1_165 = arith.constant 1 : index
    %c0_166 = arith.constant 0 : index
    %c0_167 = arith.constant 0 : index
    %220 = vector.load %arg7[%c1_163, %c1_164, %c1_165, %c0_166, %c0_167] : memref<2x2x3x64x128xf32, #tpu.memory_space<vmem>>, vector<1x1x1x64x128xf32>
    %221 = vector.shape_cast %220 : vector<1x1x1x64x128xf32> to vector<64x128xf32>
    %cst_168 = arith.constant dense<0.000000e+00> : vector<16x128xf32>
    %222 = tpu.matmul %210, %221, %cst_168 {dimension_numbers = #tpu.dot_dimension_numbers<[1], [0], [0], [1], [0, 0, 1, 1], [], []>, precision = #tpu.contract_precision<fp32>} : vector<16x64xf32>, vector<64x128xf32>, vector<16x128xf32> -> vector<16x128xf32>
    %223 = arith.addf %219, %222 : vector<16x128xf32>
    %c1_169 = arith.constant 1 : index
    %c1_170 = arith.constant 1 : index
    %c2_171 = arith.constant 2 : index
    %c0_172 = arith.constant 0 : index
    %c0_173 = arith.constant 0 : index
    %224 = vector.load %arg7[%c1_169, %c1_170, %c2_171, %c0_172, %c0_173] : memref<2x2x3x64x128xf32, #tpu.memory_space<vmem>>, vector<1x1x1x64x128xf32>
    %225 = vector.shape_cast %224 : vector<1x1x1x64x128xf32> to vector<64x128xf32>
    %cst_174 = arith.constant dense<0.000000e+00> : vector<16x128xf32>
    %226 = tpu.matmul %216, %225, %cst_174 {dimension_numbers = #tpu.dot_dimension_numbers<[1], [0], [0], [1], [0, 0, 1, 1], [], []>, precision = #tpu.contract_precision<fp32>} : vector<16x64xf32>, vector<64x128xf32>, vector<16x128xf32> -> vector<16x128xf32>
    %227 = arith.addf %223, %226 : vector<16x128xf32>
    %228 = arith.addf %227, %128 : vector<16x128xf32>
    %229 = vector.shape_cast %228 : vector<16x128xf32> to vector<2x8x128xf32>
    %230 = vector.extract_strided_slice %229 {offsets = [0, 0, 64], sizes = [2, 8, 64], strides = [1, 1, 1]} : vector<2x8x128xf32> to vector<2x8x64xf32>
    %231 = arith.addf %185, %230 : vector<2x8x64xf32>
    %232 = arith.addf %231, %9 : vector<2x8x64xf32>
    %c0_175 = arith.constant 0 : index
    %c0_176 = arith.constant 0 : index
    %233 = vector.load %arg12[%c0_175, %c0_176] : memref<1x64xf32, #tpu.memory_space<vmem>>, vector<1x64xf32>
    %cst_177 = arith.constant 0.000000e+00 : f32
    %234 = vector.broadcast %cst_177 : f32 to vector<2x1x64xf32>
    %235 = vector.shape_cast %232 : vector<2x8x64xf32> to vector<16x64xf32>
    %236 = vector.extract_strided_slice %232 {offsets = [0, 0, 0], sizes = [2, 7, 64], strides = [1, 1, 1]} : vector<2x8x64xf32> to vector<2x7x64xf32>
    %237 = tpu.concatenate %234, %236 in 1 : vector<2x1x64xf32>, vector<2x7x64xf32> -> vector<2x8x64xf32>
    %238 = vector.shape_cast %237 : vector<2x8x64xf32> to vector<16x64xf32>
    %239 = vector.extract_strided_slice %232 {offsets = [0, 1, 0], sizes = [2, 7, 64], strides = [1, 1, 1]} : vector<2x8x64xf32> to vector<2x7x64xf32>
    %240 = tpu.concatenate %239, %234 in 1 : vector<2x7x64xf32>, vector<2x1x64xf32> -> vector<2x8x64xf32>
    %241 = vector.shape_cast %240 : vector<2x8x64xf32> to vector<16x64xf32>
    %c0_178 = arith.constant 0 : index
    %c0_179 = arith.constant 0 : index
    %c0_180 = arith.constant 0 : index
    %242 = vector.load %arg11[%c0_178, %c0_179, %c0_180] : memref<3x64x64xf32, #tpu.memory_space<vmem>>, vector<1x64x64xf32>
    %243 = vector.shape_cast %242 : vector<1x64x64xf32> to vector<64x64xf32>
    %cst_181 = arith.constant dense<0.000000e+00> : vector<16x64xf32>
    %244 = tpu.matmul %238, %243, %cst_181 {dimension_numbers = #tpu.dot_dimension_numbers<[1], [0], [0], [1], [0, 0, 1, 1], [], []>, precision = #tpu.contract_precision<fp32>} : vector<16x64xf32>, vector<64x64xf32>, vector<16x64xf32> -> vector<16x64xf32>
    %c1_182 = arith.constant 1 : index
    %c0_183 = arith.constant 0 : index
    %c0_184 = arith.constant 0 : index
    %245 = vector.load %arg11[%c1_182, %c0_183, %c0_184] : memref<3x64x64xf32, #tpu.memory_space<vmem>>, vector<1x64x64xf32>
    %246 = vector.shape_cast %245 : vector<1x64x64xf32> to vector<64x64xf32>
    %cst_185 = arith.constant dense<0.000000e+00> : vector<16x64xf32>
    %247 = tpu.matmul %235, %246, %cst_185 {dimension_numbers = #tpu.dot_dimension_numbers<[1], [0], [0], [1], [0, 0, 1, 1], [], []>, precision = #tpu.contract_precision<fp32>} : vector<16x64xf32>, vector<64x64xf32>, vector<16x64xf32> -> vector<16x64xf32>
    %248 = arith.addf %244, %247 : vector<16x64xf32>
    %c2_186 = arith.constant 2 : index
    %c0_187 = arith.constant 0 : index
    %c0_188 = arith.constant 0 : index
    %249 = vector.load %arg11[%c2_186, %c0_187, %c0_188] : memref<3x64x64xf32, #tpu.memory_space<vmem>>, vector<1x64x64xf32>
    %250 = vector.shape_cast %249 : vector<1x64x64xf32> to vector<64x64xf32>
    %cst_189 = arith.constant dense<0.000000e+00> : vector<16x64xf32>
    %251 = tpu.matmul %241, %250, %cst_189 {dimension_numbers = #tpu.dot_dimension_numbers<[1], [0], [0], [1], [0, 0, 1, 1], [], []>, precision = #tpu.contract_precision<fp32>} : vector<16x64xf32>, vector<64x64xf32>, vector<16x64xf32> -> vector<16x64xf32>
    %252 = arith.addf %248, %251 : vector<16x64xf32>
    %253 = vector.broadcast %233 : vector<1x64xf32> to vector<16x64xf32>
    %254 = arith.addf %252, %253 : vector<16x64xf32>
    %cst_190 = arith.constant 0.000000e+00 : f32
    %255 = vector.broadcast %cst_190 : f32 to vector<16x64xf32>
    %256 = arith.maximumf %254, %255 : vector<16x64xf32>
    %257 = vector.shape_cast %256 : vector<16x64xf32> to vector<2x8x64xf32>
    %c0_191 = arith.constant 0 : index
    %c0_192 = arith.constant 0 : index
    %258 = vector.load %arg14[%c0_191, %c0_192] : memref<1x32xf32, #tpu.memory_space<vmem>>, vector<1x32xf32>
    %cst_193 = arith.constant 0.000000e+00 : f32
    %259 = vector.broadcast %cst_193 : f32 to vector<2x1x64xf32>
    %260 = vector.shape_cast %257 : vector<2x8x64xf32> to vector<16x64xf32>
    %261 = vector.extract_strided_slice %257 {offsets = [0, 0, 0], sizes = [2, 7, 64], strides = [1, 1, 1]} : vector<2x8x64xf32> to vector<2x7x64xf32>
    %262 = tpu.concatenate %259, %261 in 1 : vector<2x1x64xf32>, vector<2x7x64xf32> -> vector<2x8x64xf32>
    %263 = vector.shape_cast %262 : vector<2x8x64xf32> to vector<16x64xf32>
    %264 = vector.extract_strided_slice %257 {offsets = [0, 1, 0], sizes = [2, 7, 64], strides = [1, 1, 1]} : vector<2x8x64xf32> to vector<2x7x64xf32>
    %265 = tpu.concatenate %264, %259 in 1 : vector<2x7x64xf32>, vector<2x1x64xf32> -> vector<2x8x64xf32>
    %266 = vector.shape_cast %265 : vector<2x8x64xf32> to vector<16x64xf32>
    %c0_194 = arith.constant 0 : index
    %c0_195 = arith.constant 0 : index
    %c0_196 = arith.constant 0 : index
    %267 = vector.load %arg13[%c0_194, %c0_195, %c0_196] : memref<3x64x32xf32, #tpu.memory_space<vmem>>, vector<1x64x32xf32>
    %268 = vector.shape_cast %267 : vector<1x64x32xf32> to vector<64x32xf32>
    %cst_197 = arith.constant dense<0.000000e+00> : vector<16x32xf32>
    %269 = tpu.matmul %263, %268, %cst_197 {dimension_numbers = #tpu.dot_dimension_numbers<[1], [0], [0], [1], [0, 0, 1, 1], [], []>, precision = #tpu.contract_precision<fp32>} : vector<16x64xf32>, vector<64x32xf32>, vector<16x32xf32> -> vector<16x32xf32>
    %c1_198 = arith.constant 1 : index
    %c0_199 = arith.constant 0 : index
    %c0_200 = arith.constant 0 : index
    %270 = vector.load %arg13[%c1_198, %c0_199, %c0_200] : memref<3x64x32xf32, #tpu.memory_space<vmem>>, vector<1x64x32xf32>
    %271 = vector.shape_cast %270 : vector<1x64x32xf32> to vector<64x32xf32>
    %cst_201 = arith.constant dense<0.000000e+00> : vector<16x32xf32>
    %272 = tpu.matmul %260, %271, %cst_201 {dimension_numbers = #tpu.dot_dimension_numbers<[1], [0], [0], [1], [0, 0, 1, 1], [], []>, precision = #tpu.contract_precision<fp32>} : vector<16x64xf32>, vector<64x32xf32>, vector<16x32xf32> -> vector<16x32xf32>
    %273 = arith.addf %269, %272 : vector<16x32xf32>
    %c2_202 = arith.constant 2 : index
    %c0_203 = arith.constant 0 : index
    %c0_204 = arith.constant 0 : index
    %274 = vector.load %arg13[%c2_202, %c0_203, %c0_204] : memref<3x64x32xf32, #tpu.memory_space<vmem>>, vector<1x64x32xf32>
    %275 = vector.shape_cast %274 : vector<1x64x32xf32> to vector<64x32xf32>
    %cst_205 = arith.constant dense<0.000000e+00> : vector<16x32xf32>
    %276 = tpu.matmul %266, %275, %cst_205 {dimension_numbers = #tpu.dot_dimension_numbers<[1], [0], [0], [1], [0, 0, 1, 1], [], []>, precision = #tpu.contract_precision<fp32>} : vector<16x64xf32>, vector<64x32xf32>, vector<16x32xf32> -> vector<16x32xf32>
    %277 = arith.addf %273, %276 : vector<16x32xf32>
    %278 = vector.broadcast %258 : vector<1x32xf32> to vector<16x32xf32>
    %279 = arith.addf %277, %278 : vector<16x32xf32>
    %280 = vector.shape_cast %279 : vector<16x32xf32> to vector<2x8x32xf32>
    %c0_206 = arith.constant 0 : index
    %c0_207 = arith.constant 0 : index
    %c0_208 = arith.constant 0 : index
    %281 = vector.load %arg2[%c0_206, %c0_207, %c0_208] : memref<2x8x32xf32, #tpu.memory_space<vmem>>, vector<2x8x32xf32>
    %282 = arith.addf %280, %281 : vector<2x8x32xf32>
    %c0_209 = arith.constant 0 : index
    %c0_210 = arith.constant 0 : index
    %c0_211 = arith.constant 0 : index
    %283 = vector.load %arg15[%c0_209, %c0_210, %c0_211] : memref<2x8x32xf32, #tpu.memory_space<vmem>>, vector<2x8x32xf32>
    tpu.vector_store %arg15[%c0_209, %c0_210, %c0_211], %282 {strides = array<i32>} : memref<2x8x32xf32, #tpu.memory_space<vmem>>, vector<2x8x32xf32>,
    return
  }
  func.func @transform_0(%arg0: i32) -> (i32, i32, i32) {
    %c0_i32 = arith.constant 0 : i32
    %c0_i32_0 = arith.constant 0 : i32
    %c0_i32_1 = arith.constant 0 : i32
    return %arg0, %c0_i32, %c0_i32_0 : i32, i32, i32
  }
  func.func @transform_1(%arg0: i32) -> (i32, i32, i32) {
    %c0_i32 = arith.constant 0 : i32
    %c0_i32_0 = arith.constant 0 : i32
    %c0_i32_1 = arith.constant 0 : i32
    return %arg0, %c0_i32, %c0_i32_0 : i32, i32, i32
  }
  func.func @transform_2(%arg0: i32) -> (i32, i32) {
    %c0_i32 = arith.constant 0 : i32
    %c0_i32_0 = arith.constant 0 : i32
    %c0_i32_1 = arith.constant 0 : i32
    return %c0_i32, %c0_i32_0 : i32, i32
  }
  func.func @transform_3(%arg0: i32) -> (i32, i32) {
    %c0_i32 = arith.constant 0 : i32
    %c0_i32_0 = arith.constant 0 : i32
    %c0_i32_1 = arith.constant 0 : i32
    return %c0_i32, %c0_i32_0 : i32, i32
  }
  func.func @transform_4(%arg0: i32) -> (i32, i32, i32, i32) {
    %c0_i32 = arith.constant 0 : i32
    %c0_i32_0 = arith.constant 0 : i32
    %c0_i32_1 = arith.constant 0 : i32
    %c0_i32_2 = arith.constant 0 : i32
    %c0_i32_3 = arith.constant 0 : i32
    return %c0_i32, %c0_i32_0, %c0_i32_1, %c0_i32_2 : i32, i32, i32, i32
  }
  func.func @transform_5(%arg0: i32) -> (i32, i32, i32) {
    %c0_i32 = arith.constant 0 : i32
    %c0_i32_0 = arith.constant 0 : i32
    %c0_i32_1 = arith.constant 0 : i32
    %c0_i32_2 = arith.constant 0 : i32
    return %c0_i32, %c0_i32_0, %c0_i32_1 : i32, i32, i32
  }
  func.func @transform_6(%arg0: i32) -> (i32, i32, i32, i32, i32) {
    %c0_i32 = arith.constant 0 : i32
    %c0_i32_0 = arith.constant 0 : i32
    %c0_i32_1 = arith.constant 0 : i32
    %c0_i32_2 = arith.constant 0 : i32
    %c0_i32_3 = arith.constant 0 : i32
    %c0_i32_4 = arith.constant 0 : i32
    return %c0_i32, %c0_i32_0, %c0_i32_1, %c0_i32_2, %c0_i32_3 : i32, i32, i32, i32, i32
  }
  func.func @transform_7(%arg0: i32) -> (i32, i32, i32) {
    %c0_i32 = arith.constant 0 : i32
    %c0_i32_0 = arith.constant 0 : i32
    %c0_i32_1 = arith.constant 0 : i32
    %c0_i32_2 = arith.constant 0 : i32
    return %c0_i32, %c0_i32_0, %c0_i32_1 : i32, i32, i32
  }
  func.func @transform_8(%arg0: i32) -> (i32, i32, i32) {
    %c0_i32 = arith.constant 0 : i32
    %c0_i32_0 = arith.constant 0 : i32
    %c0_i32_1 = arith.constant 0 : i32
    %c0_i32_2 = arith.constant 0 : i32
    return %c0_i32, %c0_i32_0, %c0_i32_1 : i32, i32, i32
  }
  func.func @transform_9(%arg0: i32) -> (i32, i32, i32) {
    %c0_i32 = arith.constant 0 : i32
    %c0_i32_0 = arith.constant 0 : i32
    %c0_i32_1 = arith.constant 0 : i32
    %c0_i32_2 = arith.constant 0 : i32
    return %c0_i32, %c0_i32_0, %c0_i32_1 : i32, i32, i32
  }
  func.func @transform_10(%arg0: i32) -> (i32, i32, i32) {
    %c0_i32 = arith.constant 0 : i32
    %c0_i32_0 = arith.constant 0 : i32
    %c0_i32_1 = arith.constant 0 : i32
    %c0_i32_2 = arith.constant 0 : i32
    return %c0_i32, %c0_i32_0, %c0_i32_1 : i32, i32, i32
  }
  func.func @transform_11(%arg0: i32) -> (i32, i32) {
    %c0_i32 = arith.constant 0 : i32
    %c0_i32_0 = arith.constant 0 : i32
    %c0_i32_1 = arith.constant 0 : i32
    return %c0_i32, %c0_i32_0 : i32, i32
  }
  func.func @transform_12(%arg0: i32) -> (i32, i32, i32) {
    %c0_i32 = arith.constant 0 : i32
    %c0_i32_0 = arith.constant 0 : i32
    %c0_i32_1 = arith.constant 0 : i32
    %c0_i32_2 = arith.constant 0 : i32
    return %c0_i32, %c0_i32_0, %c0_i32_1 : i32, i32, i32
  }
  func.func @transform_13(%arg0: i32) -> (i32, i32) {
    %c0_i32 = arith.constant 0 : i32
    %c0_i32_0 = arith.constant 0 : i32
    %c0_i32_1 = arith.constant 0 : i32
    return %c0_i32, %c0_i32_0 : i32, i32
  }
  func.func @transform_14(%arg0: i32) -> (i32, i32, i32) {
    %c0_i32 = arith.constant 0 : i32
    %c0_i32_0 = arith.constant 0 : i32
    %c0_i32_1 = arith.constant 0 : i32
    return %arg0, %c0_i32, %c0_i32_0 : i32, i32, i32
  }
}

</mosaic_0001>

<bundles_post_ra>
// kernel: tile.48
= control target key start
LH: loop header
LB: loop body
LE: loop exit
PB: predicated region body
PF: predicated region fallthrough
CT: control target
= control target key end

     0   :  { %s22_s0 = inlined_call_operand.vmem [shape: f32[8], index: 0, kind: input, shape index: {}]   ;;  %s23_s1 = inlined_call_operand.vmem [shape: f32[8,8], index: 1, kind: output, shape index: {}]  }
   0x1   :  { %v4_v0 = vld [vmem:[%s22_s0] ss:$0 sm:$0xff] }
   0x2   :  { %5 = vst [vmem:[%s23_s1] sm:$0xff] %v4_v0 }

// kernel: tile.49
= control target key start
LH: loop header
LB: loop body
LE: loop exit
PB: predicated region body
PF: predicated region fallthrough
CT: control target
= control target key end

     0   :  { %s67_s10 = smov 56   ;;  %s68_s11 = smov 40   ;;  %vm3_vm0 = vcmask 64512   ;;  %vm9_vm1 = vcmask 523712   ;;  %vm15_vm2 = vcmask 458112   ;;  %vm21_vm3 = vcmask 392512   ;;  %s111_s0 = inlined_call_operand.vmem [shape: f32[8,8], index: 0, kind: input, shape index: {}]   ;;  %s112_s1 = inlined_call_operand.vmem [shape: f32[1,64], index: 1, kind: output, shape index: {}]  }
   0x1   :  { %v53_v0 = vld [vmem:[%s111_s0 + $0x7] sm:$0x1]   ;;  %v55_v1 = vld [vmem:[%s111_s0 + $0x5] sm:$0x1]   ;;  %v54_v2 = vld [vmem:[%s111_s0 + $0x6] sm:$0x1]  }
   0x2   :  { %7 = vrot.lane.b32.xlu0 %v53_v0, %s67_s10  ;;  %19 = vrot.lane.b32.xlu1 %v55_v1, %s68_s11  ;;  %v56_v3 = vld [vmem:[%s111_s0 + $0x4] sm:$0x1]   ;;  %v2_v4 = vld [vmem:[%s111_s0] sm:$0x1]   ;;  %s69_s18 = smov 48   ;;  %s70_s19 = smov 32  }
   0x3   :  { %4 = vst.msk [vmem:[#allocation0] sm:$0x1] %vm3_vm0, %v2_v4   ;;  %v57_v5 = vld [vmem:[%s111_s0 + $0x3] sm:$0x1]   ;;  %v58_v6 = vld [vmem:[%s111_s0 + $0x2] sm:$0x1]  }
   0x4   :  { %s71_s24 = smov 24   ;;  %s72_s25 = smov 16   ;;  %v59_v7 = vld [vmem:[%s111_s0 + $0x1] sm:$0x1]   ;;  %vm27_vm4 = vcmask 326912   ;;  %vm33_vm5 = vcmask 261312  }
   0x5   :  { %s73_s0 = smov 8   ;;  %vm39_vm6 = vcmask 195712   ;;  %vm45_vm7 = vcmask 130112  }
   0x6   :  { %13 = vrot.lane.b32.xlu0 %v54_v2, %s69_s18  ;;  %25 = vrot.lane.b32.xlu1 %v56_v3, %s70_s19 }
   0xa   :  { %31 = vrot.lane.b32.xlu0 %v57_v5, %s71_s24  ;;  %37 = vrot.lane.b32.xlu1 %v58_v6, %s72_s25 }
   0xe   :  { %43 = vrot.lane.b32.xlu0 %v59_v7, %s73_s0 }
  0x74   :  { %v8_v8 = vpop.permute.xlu0 %7   ;;  %v20_v9 = vpop.permute.xlu1 %19  }
  0x75   :  { %10 = vst.msk [vmem:[#allocation0] sm:$0x1] %vm9_vm1, %v8_v8  }
  0x78   :  { %v14_v10 = vpop.permute.xlu0 %13   ;;  %v26_v11 = vpop.permute.xlu1 %25  }
  0x79   :  { %16 = vst.msk [vmem:[#allocation0] sm:$0x1] %vm15_vm2, %v14_v10  }
  0x7a   :  { %22 = vst.msk [vmem:[#allocation0] sm:$0x1] %vm21_vm3, %v20_v9  }
  0x7b   :  { %28 = vst.msk [vmem:[#allocation0] sm:$0x1] %vm27_vm4, %v26_v11  }
  0x7c   :  { %v32_v12 = vpop.permute.xlu0 %31   ;;  %v38_v13 = vpop.permute.xlu1 %37  }
  0x7d   :  { %34 = vst.msk [vmem:[#allocation0] sm:$0x1] %vm33_vm5, %v32_v12  }
  0x7e   :  { %40 = vst.msk [vmem:[#allocation0] sm:$0x1] %vm39_vm6, %v38_v13  }
  0x80   :  { %v44_v14 = vpop.permute.xlu0 %43  }
  0x81   :  { %46 = vst.msk [vmem:[#allocation0] sm:$0x1] %vm45_vm7, %v44_v14  }
  0x88   :  { %v50_v15 = vld [vmem:[#allocation0] sm:$0x1] }
  0x89   :  { %52 = vst [vmem:[%s112_s1] sm:$0x1] %v50_v15 }

// kernel: tile.76
= control target key start
LH: loop header
LB: loop body
LE: loop exit
PB: predicated region body
PF: predicated region fallthrough
CT: control target
= control target key end

     0   :  { %s67_s10 = smov 56   ;;  %s68_s11 = smov 40   ;;  %vm3_vm0 = vcmask 64512   ;;  %vm9_vm1 = vcmask 523712   ;;  %vm15_vm2 = vcmask 458112   ;;  %vm21_vm3 = vcmask 392512   ;;  %s111_s0 = inlined_call_operand.vmem [shape: f32[8,8], index: 0, kind: input, shape index: {}]   ;;  %s112_s1 = inlined_call_operand.vmem [shape: f32[1,1,64], index: 1, kind: output, shape index: {}]  }
   0x1   :  { %v53_v0 = vld [vmem:[%s111_s0 + $0x7] sm:$0x1]   ;;  %v55_v1 = vld [vmem:[%s111_s0 + $0x5] sm:$0x1]   ;;  %v54_v2 = vld [vmem:[%s111_s0 + $0x6] sm:$0x1]  }
   0x2   :  { %7 = vrot.lane.b32.xlu0 %v53_v0, %s67_s10  ;;  %19 = vrot.lane.b32.xlu1 %v55_v1, %s68_s11  ;;  %v56_v3 = vld [vmem:[%s111_s0 + $0x4] sm:$0x1]   ;;  %v2_v4 = vld [vmem:[%s111_s0] sm:$0x1]   ;;  %s69_s18 = smov 48   ;;  %s70_s19 = smov 32  }
   0x3   :  { %4 = vst.msk [vmem:[#allocation0] sm:$0x1] %vm3_vm0, %v2_v4   ;;  %v57_v5 = vld [vmem:[%s111_s0 + $0x3] sm:$0x1]   ;;  %v58_v6 = vld [vmem:[%s111_s0 + $0x2] sm:$0x1]  }
   0x4   :  { %s71_s24 = smov 24   ;;  %s72_s25 = smov 16   ;;  %v59_v7 = vld [vmem:[%s111_s0 + $0x1] sm:$0x1]   ;;  %vm27_vm4 = vcmask 326912   ;;  %vm33_vm5 = vcmask 261312  }
   0x5   :  { %s73_s0 = smov 8   ;;  %vm39_vm6 = vcmask 195712   ;;  %vm45_vm7 = vcmask 130112  }
   0x6   :  { %13 = vrot.lane.b32.xlu0 %v54_v2, %s69_s18  ;;  %25 = vrot.lane.b32.xlu1 %v56_v3, %s70_s19 }
   0xa   :  { %31 = vrot.lane.b32.xlu0 %v57_v5, %s71_s24  ;;  %37 = vrot.lane.b32.xlu1 %v58_v6, %s72_s25 }
   0xe   :  { %43 = vrot.lane.b32.xlu0 %v59_v7, %s73_s0 }
  0x74   :  { %v8_v8 = vpop.permute.xlu0 %7   ;;  %v20_v9 = vpop.permute.xlu1 %19  }
  0x75   :  { %10 = vst.msk [vmem:[#allocation0] sm:$0x1] %vm9_vm1, %v8_v8  }
  0x78   :  { %v14_v10 = vpop.permute.xlu0 %13   ;;  %v26_v11 = vpop.permute.xlu1 %25  }
  0x79   :  { %16 = vst.msk [vmem:[#allocation0] sm:$0x1] %vm15_vm2, %v14_v10  }
  0x7a   :  { %22 = vst.msk [vmem:[#allocation0] sm:$0x1] %vm21_vm3, %v20_v9  }
  0x7b   :  { %28 = vst.msk [vmem:[#allocation0] sm:$0x1] %vm27_vm4, %v26_v11  }
  0x7c   :  { %v32_v12 = vpop.permute.xlu0 %31   ;;  %v38_v13 = vpop.permute.xlu1 %37  }
  0x7d   :  { %34 = vst.msk [vmem:[#allocation0] sm:$0x1] %vm33_vm5, %v32_v12  }
  0x7e   :  { %40 = vst.msk [vmem:[#allocation0] sm:$0x1] %vm39_vm6, %v38_v13  }
  0x80   :  { %v44_v14 = vpop.permute.xlu0 %43  }
  0x81   :  { %46 = vst.msk [vmem:[#allocation0] sm:$0x1] %vm45_vm7, %v44_v14  }
  0x88   :  { %v50_v15 = vld [vmem:[#allocation0] sm:$0x1] }
  0x89   :  { %52 = vst [vmem:[%s112_s1] sm:$0x1] %v50_v15 }

// kernel: deepnet_forward.1
= control target key start
LH: loop header
LB: loop body
LE: loop exit
PB: predicated region body
PF: predicated region fallthrough
CT: control target
= control target key end

     0   :  { %vm1039_vm0 = vcmask 523264   ;;  %vm1630_vm1 = vcmask 1040384   ;;  %vm1637_vm2 = vcmask 1046528   ;;  %s29877_s24 = smov 64   ;;  %vm20261_vm3 = vcmask 261120   ;;  %s34785_s2 = inlined_call_operand.vmem [shape: f32[256,64], index: 2, kind: input, shape index: {}]   ;;  %s34786_s0 = inlined_call_operand.vmem [shape: f32[2,8,256], index: 0, kind: input, shape index: {}]   ;;  %s34787_s8 = inlined_call_operand.vmem [shape: f32[2,64,64], index: 8, kind: input, shape index: {}]   ;;  %s34788_s4 = inlined_call_operand.vmem [shape: f32[2,3,64,64], index: 4, kind: input, shape index: {}]   ;;  %s34789_s3 = inlined_call_operand.vmem [shape: f32[1,64], index: 3, kind: input, shape index: {}]   ;;  %s34790_s6 = inlined_call_operand.vmem [shape: f32[2,2,3,64,128], index: 6, kind: input, shape index: {}]   ;;  %s34791_s5 = inlined_call_operand.vmem [shape: f32[2,1,64], index: 5, kind: input, shape index: {}]   ;;  %s34792_s7 = inlined_call_operand.vmem [shape: f32[2,1,128], index: 7, kind: input, shape index: {}]   ;;  %s34793_s9 = inlined_call_operand.vmem [shape: f32[2,1,64], index: 9, kind: input, shape index: {}]   ;;  %s34794_s10 = inlined_call_operand.vmem [shape: f32[3,64,64], index: 10, kind: input, shape index: {}]   ;;  %s34795_s12 = inlined_call_operand.vmem [shape: f32[3,64,32], index: 12, kind: input, shape index: {}]   ;;  %s34796_s11 = inlined_call_operand.vmem [shape: f32[1,64], index: 11, kind: input, shape index: {}]   ;;  %s34797_s13 = inlined_call_operand.vmem [shape: f32[1,32], index: 13, kind: input, shape index: {}]   ;;  %s34798_s1 = inlined_call_operand.vmem [shape: f32[2,8,32], index: 1, kind: input, shape index: {}]   ;;  %s34799_s14 = inlined_call_operand.vmem [shape: f32[2,8,32], index: 14, kind: output, shape index: {}]  }
   0x1   :  { %v67_v0 = vld [vmem:[%s34785_s2 + $0x80] sm:$0xff]  ;;  %v68_v1 = vld [vmem:[%s34785_s2 + $0x88] sm:$0xff]  ;;  %v69_v7 = vld [vmem:[%s34785_s2 + $0x90] sm:$0xff] }
   0x2   :  { %v51_v2 = vld [vmem:[%s34785_s2] sm:$0xff]  ;;  %v139_v3 = vand.u32 4294901760, %v67_v0  ;;  %v142_v4 = vand.u32 4294901760, %v68_v1  ;;  %v52_v5 = vld [vmem:[%s34785_s2 + $0x8] sm:$0xff]  ;;  %v70_v8 = vld [vmem:[%s34785_s2 + $0x98] sm:$0xff]  ;;  %v145_v10 = vand.u32 4294901760, %v69_v7 }
   0x3   :  { %v91_v6 = vand.u32 4294901760, %v51_v2  ;;  %v94_v9 = vand.u32 4294901760, %v52_v5  ;;  %v148_v11 = vand.u32 4294901760, %v70_v8  ;;  %v53_v12 = vld [vmem:[%s34785_s2 + $0x10] sm:$0xff]  ;;  %v54_v13 = vld [vmem:[%s34785_s2 + $0x18] sm:$0xff]  ;;  %v71_v18 = vld [vmem:[%s34785_s2 + $0xa0] sm:$0xff] }
   0x4   :  { %v29977_v14 = vpack.c.bf16 %v142_v4, %v139_v3  ;;  %v97_v16 = vand.u32 4294901760, %v53_v12  ;;  %v100_v17 = vand.u32 4294901760, %v54_v13  ;;  %v72_v19 = vld [vmem:[%s34785_s2 + $0xa8] sm:$0xff]  ;;  %v55_v23 = vld [vmem:[%s34785_s2 + $0x20] sm:$0xff]  ;;  %v30000_v25 = vsub.f32 %v69_v7, %v145_v10  ;;  %v73_v37 = vld [vmem:[%s34785_s2 + $0xb0] sm:$0xff] }
   0x5   :  { %v29979_v15 = vsub.f32 %v51_v2, %v91_v6  ;;  %v29987_v20 = vpack.c.bf16 %v94_v9, %v91_v6  ;;  %v29989_v21 = vsub.f32 %v52_v5, %v94_v9  ;;  %v29991_v22 = vpack.c.bf16 %v148_v11, %v145_v10  ;;  %v56_v24 = vld [vmem:[%s34785_s2 + $0x28] sm:$0xff]  ;;  %v74_v42 = vld [vmem:[%s34785_s2 + $0xb8] sm:$0xff]  ;;  %v57_v55 = vld [vmem:[%s34785_s2 + $0x30] sm:$0xff] }
   0x6   :  { %26245 = vmatprep.subr.bf16.mxu0 %v29977_v14  ;;  %v30002_v26 = vsub.f32 %v70_v8, %v148_v11  ;;  %v30004_v27 = vpack.c.bf16 %v100_v17, %v97_v16  ;;  %v30006_v28 = vsub.f32 %v53_v12, %v97_v16  ;;  %v151_v29 = vand.u32 4294901760, %v71_v18  ;;  %v58_v56 = vld [vmem:[%s34785_s2 + $0x38] sm:$0xff]  ;;  %v75_v5 = vld [vmem:[%s34785_s2 + $0xc0] sm:$0xff]  ;;  %v76_v6 = vld [vmem:[%s34785_s2 + $0xc8] sm:$0xff] }
   0x7   :  { %26247 = vmatpush3.bf16.msra.mxu0 %v29987_v20  ;;  %v154_v30 = vand.u32 4294901760, %v72_v19  ;;  %v30009_v31 = vsub.f32 %v67_v0, %v139_v3  ;;  %v30011_v32 = vsub.f32 %v68_v1, %v142_v4  ;;  %v103_v33 = vand.u32 4294901760, %v55_v23  ;;  %v59_v11 = vld [vmem:[%s34785_s2 + $0x40] sm:$0xff] }
   0x8   :  { %26249 = vmatprep.subr.bf16.mxu0 %v29991_v22  ;;  %v106_v34 = vand.u32 4294901760, %v56_v24  ;;  %v34816_v35 = vand.u32 4294901760, %v29979_v15  ;;  %v34815_v36 = vand.u32 4294901760, %v29989_v21  ;;  %v30019_v38 = vsub.f32 %v54_v13, %v100_v17 }
   0x9   :  { %v30021_v39 = vpack.c.bf16 %v154_v30, %v151_v29  ;;  %v30023_v40 = vsub.f32 %v71_v18, %v151_v29  ;;  %v34821_v41 = vand.u32 4294901760, %v30009_v31  ;;  %v30029_v43 = vsub.f32 %v72_v19, %v154_v30  ;;  %v60_v29 = vld [vmem:[%s34785_s2 + $0x48] sm:$0xff] }
   0xa   :  { %v34818_v44 = vand.u32 4294901760, %v30011_v32  ;;  %v30032_v45 = vpack.c.bf16 %v106_v34, %v103_v33  ;;  %v30034_v46 = vsub.f32 %v55_v23, %v103_v33  ;;  %v221_v48 = vsub.f32 %v29979_v15, %v34816_v35 }
   0xb   :  { %26251 = vmatpush3.bf16.msra.mxu0 %v30004_v27  ;;  %v333_v47 = vsub.f32 %v30009_v31, %v34821_v41  ;;  %v228_v49 = vsub.f32 %v29989_v21, %v34815_v36  ;;  %v157_v50 = vand.u32 4294901760, %v73_v37  ;;  %v160_v52 = vand.u32 4294901760, %v74_v42 }
   0xc   :  { %26253 = vmatprep.subr.bf16.mxu0 %v30021_v39  ;;  %v340_v51 = vsub.f32 %v30011_v32, %v34818_v44  ;;  %v34813_v53 = vand.u32 4294901760, %v30000_v25  ;;  %v34812_v54 = vand.u32 4294901760, %v30002_v26  ;;  %v30058_v58 = vsub.f32 %v56_v24, %v106_v34 }
   0xd   :  { %v334_v57 = vand.u32 4294901760, %v333_v47  ;;  %v222_v59 = vand.u32 4294901760, %v221_v48  ;;  %v229_v60 = vand.u32 4294901760, %v228_v49  ;;  %v30060_v62 = vpack.c.bf16 %v160_v52, %v157_v50 }
   0xe   :  { %v341_v61 = vand.u32 4294901760, %v340_v51  ;;  %v30062_v63 = vsub.f32 %v73_v37, %v157_v50  ;;  %v347_v0 = vsub.f32 %v30000_v25, %v34813_v53  ;;  %v354_v2 = vsub.f32 %v30002_v26, %v34812_v54 }
   0xf   :  { %26255 = vmatpush3.bf16.msra.mxu0 %v30032_v45  ;;  %v26278_v1 = vpack.c.bf16 %v229_v60, %v222_v59  ;;  %v109_v3 = vand.u32 4294901760, %v57_v55  ;;  %v112_v4 = vand.u32 4294901760, %v58_v56  ;;  %v34811_v9 = vand.u32 4294901760, %v30006_v28 }
  0x10   :  { %v26276_v7 = vpack.c.bf16 %v341_v61, %v334_v57  ;;  %26257 = vmatprep.subr.bf16.mxu0 %v30060_v62  ;;  %v348_v8 = vand.u32 4294901760, %v347_v0  ;;  %v34808_v10 = vand.u32 4294901760, %v30019_v38  ;;  %v30083_v12 = vsub.f32 %v74_v42, %v160_v52  ;;  %v78_v57 = vld [vmem:[%s34785_s2 + $0xd8] sm:$0xff] }
  0x11   :  { %v355_v13 = vand.u32 4294901760, %v354_v2  ;;  %v30085_v16 = vpack.c.bf16 %v112_v4, %v109_v3  ;;  %v30087_v17 = vsub.f32 %v57_v55, %v109_v3  ;;  %v235_v18 = vsub.f32 %v30006_v28, %v34811_v9 }
  0x12   :  { %26277 = vmatprep.subr.bf16.mxu1 %v26276_v7  ;;  %v242_v19 = vsub.f32 %v30019_v38, %v34808_v10  ;;  %v163_v23 = vand.u32 4294901760, %v75_v5  ;;  %v166_v24 = vand.u32 4294901760, %v76_v6  ;;  %v34806_v33 = vand.u32 4294901760, %v30023_v40 }
  0x13   :  { %26279 = vmatpush3.bf16.msra.mxu1 %v26278_v1  ;;  %v26280_v30 = vpack.c.bf16 %v355_v13, %v348_v8  ;;  %26259 = vmatpush3.bf16.msra.mxu0 %v30085_v16  ;;  %v34805_v34 = vand.u32 4294901760, %v30029_v43  ;;  %v115_v37 = vand.u32 4294901760, %v59_v11  ;;  %v30101_v42 = vsub.f32 %v58_v56, %v112_v4  ;;  %v77_v56 = vld [vmem:[%s34785_s2 + $0xd0] sm:$0xff] }
  0x14   :  { %v236_v47 = vand.u32 4294901760, %v235_v18  ;;  %v243_v48 = vand.u32 4294901760, %v242_v19  ;;  %v30103_v49 = vpack.c.bf16 %v166_v24, %v163_v23  ;;  %v30105_v50 = vsub.f32 %v75_v5, %v163_v23  ;;  %v61_v1 = vld [vmem:[%s34785_s2 + $0x50] sm:$0xff]  ;;  %v62_v18 = vld [vmem:[%s34785_s2 + $0x58] sm:$0xff] }
  0x15   :  { %26281 = vmatprep.subr.bf16.mxu1 %v26280_v30  ;;  %v361_v51 = vsub.f32 %v30023_v40, %v34806_v33  ;;  %v368_v52 = vsub.f32 %v30029_v43, %v34805_v34  ;;  %v118_v55 = vand.u32 4294901760, %v60_v29  ;;  %v30120_v60 = vsub.f32 %v76_v6, %v166_v24 }
  0x16   :  { %v26282_v59 = vpack.c.bf16 %v243_v48, %v236_v47  ;;  %26261 = vmatprep.subr.bf16.mxu0 %v30103_v49  ;;  %v34803_v61 = vand.u32 4294901760, %v30034_v46  ;;  %v34802_v0 = vand.u32 4294901760, %v30058_v58  ;;  %v30129_v5 = vsub.f32 %v59_v11, %v115_v37 }
  0x17   :  { %v362_v2 = vand.u32 4294901760, %v361_v51  ;;  %v369_v3 = vand.u32 4294901760, %v368_v52  ;;  %v30127_v4 = vpack.c.bf16 %v118_v55, %v115_v37  ;;  %v169_v8 = vand.u32 4294901760, %v77_v56 }
  0x18   :  { %26283 = vmatpush3.bf16.msra.mxu1 %v26282_v59  ;;  %v249_v6 = vsub.f32 %v30034_v46, %v34803_v61  ;;  %v256_v7 = vsub.f32 %v30058_v58, %v34802_v0  ;;  %v172_v13 = vand.u32 4294901760, %v78_v57  ;;  %v34801_v11 = vand.u32 4294901760, %v30062_v63 }
  0x19   :  { %v26284_v19 = vpack.c.bf16 %v369_v3, %v362_v2  ;;  %26263 = vmatpush3.bf16.msra.mxu0 %v30127_v4  ;;  %v34800_v23 = vand.u32 4294901760, %v30083_v12  ;;  %v121_v24 = vand.u32 4294901760, %v61_v1  ;;  %v30143_v30 = vsub.f32 %v60_v29, %v118_v55  ;;  %v79_v29 = vld [vmem:[%s34785_s2 + $0xe0] sm:$0xff]  ;;  %v80_v55 = vld [vmem:[%s34785_s2 + $0xe8] sm:$0xff] }
  0x1a   :  { %v250_v37 = vand.u32 4294901760, %v249_v6  ;;  %v257_v47 = vand.u32 4294901760, %v256_v7  ;;  %v30145_v48 = vpack.c.bf16 %v172_v13, %v169_v8  ;;  %v30147_v51 = vsub.f32 %v77_v56, %v169_v8  ;;  %v63_v8 = vld [vmem:[%s34785_s2 + $0x60] sm:$0xff] }
  0x1b   :  { %26285 = vmatprep.subr.bf16.mxu1 %v26284_v19  ;;  %v375_v52 = vsub.f32 %v30062_v63, %v34801_v11  ;;  %v382_v59 = vsub.f32 %v30083_v12, %v34800_v23  ;;  %v124_v2 = vand.u32 4294901760, %v62_v18  ;;  %v30162_v56 = vsub.f32 %v78_v57, %v172_v13 }
  0x1c   :  { %34989 = vst [vmem:[#allocation2_spill] sm:$0xff] %v30145_v48  ;;  %v26286_v3 = vpack.c.bf16 %v257_v47, %v250_v37  ;;  %26265 = vmatprep.subr.bf16.mxu0 %v30145_v48  ;;  %v34804_v6 = vand.u32 4294901760, %v30087_v17  ;;  %v34807_v7 = vand.u32 4294901760, %v30101_v42  ;;  %v30171_v0 = vsub.f32 %v61_v1, %v121_v24 }
  0x1d   :  { %v376_v19 = vand.u32 4294901760, %v375_v52  ;;  %v383_v23 = vand.u32 4294901760, %v382_v59  ;;  %v30169_v11 = vpack.c.bf16 %v124_v2, %v121_v24  ;;  %v175_v37 = vand.u32 4294901760, %v79_v29  ;;  %v64_v52 = vld [vmem:[%s34785_s2 + $0x68] sm:$0xff] }
  0x1e   :  { %26287 = vmatpush3.bf16.msra.mxu1 %v26286_v3  ;;  %v263_v57 = vsub.f32 %v30087_v17, %v34804_v6  ;;  %v270_v13 = vsub.f32 %v30101_v42, %v34807_v7  ;;  %v178_v47 = vand.u32 4294901760, %v80_v55  ;;  %v34810_v1 = vand.u32 4294901760, %v30105_v50 }
  0x1f   :  { %34990 = vst [vmem:[#allocation3_spill] sm:$0xff] %v30169_v11  ;;  %v26288_v59 = vpack.c.bf16 %v383_v23, %v376_v19  ;;  %26267 = vmatpush3.bf16.msra.mxu0 %v30169_v11  ;;  %v34809_v24 = vand.u32 4294901760, %v30120_v60  ;;  %v127_v3 = vand.u32 4294901760, %v63_v8  ;;  %v30185_v61 = vsub.f32 %v62_v18, %v124_v2  ;;  %v81_v18 = vld [vmem:[%s34785_s2 + $0xf0] sm:$0xff]  ;;  %v82_v2 = vld [vmem:[%s34785_s2 + $0xf8] sm:$0xff] }
  0x20   :  { %v264_v6 = vand.u32 4294901760, %v263_v57  ;;  %v271_v34 = vand.u32 4294901760, %v270_v13  ;;  %v30187_v33 = vpack.c.bf16 %v178_v47, %v175_v37  ;;  %v30189_v7 = vsub.f32 %v79_v29, %v175_v37 }
  0x21   :  { %26289 = vmatprep.subr.bf16.mxu1 %v26288_v59  ;;  %v389_v23 = vsub.f32 %v30105_v50, %v34810_v1  ;;  %v396_v19 = vsub.f32 %v30120_v60, %v34809_v24  ;;  %v130_v10 = vand.u32 4294901760, %v64_v52  ;;  %v30204_v29 = vsub.f32 %v80_v55, %v178_v47  ;;  %v65_v59 = vld [vmem:[%s34785_s2 + $0x70] sm:$0xff] }
  0x22   :  { %34991 = vst [vmem:[#allocation4_spill] sm:$0xff] %v30187_v33  ;;  %v26290_v57 = vpack.c.bf16 %v271_v34, %v264_v6  ;;  %26269 = vmatprep.subr.bf16.mxu0 %v30187_v33  ;;  %v34814_v13 = vand.u32 4294901760, %v30129_v5  ;;  %v34817_v37 = vand.u32 4294901760, %v30143_v30  ;;  %v30213_v54 = vsub.f32 %v63_v8, %v127_v3 }
  0x23   :  { %v390_v24 = vand.u32 4294901760, %v389_v23  ;;  %v397_v1 = vand.u32 4294901760, %v396_v19  ;;  %v30211_v9 = vpack.c.bf16 %v130_v10, %v127_v3  ;;  %v181_v6 = vand.u32 4294901760, %v81_v18  ;;  %v66_v23 = vld [vmem:[%s34785_s2 + $0x78] sm:$0xff] }
  0x24   :  { %26291 = vmatpush3.bf16.msra.mxu1 %v26290_v57  ;;  %v277_v34 = vsub.f32 %v30129_v5, %v34814_v13  ;;  %v284_v55 = vsub.f32 %v30143_v30, %v34817_v37  ;;  %v184_v47 = vand.u32 4294901760, %v82_v2  ;;  %v34820_v8 = vand.u32 4294901760, %v30147_v51 }
  0x25   :  { %34992 = vst [vmem:[#allocation5_spill] sm:$0xff] %v30211_v9  ;;  %v26292_v19 = vpack.c.bf16 %v397_v1, %v390_v24  ;;  %26271 = vmatpush3.bf16.msra.mxu0 %v30211_v9  ;;  %v34819_v3 = vand.u32 4294901760, %v30162_v56  ;;  %v133_v57 = vand.u32 4294901760, %v65_v59  ;;  %v30227_v53 = vsub.f32 %v64_v52, %v130_v10  ;;  %v48_v10 = vld [vmem:[%s34786_s0 + $0x8] sm:$0xff] }
  0x26   :  { %v278_v13 = vand.u32 4294901760, %v277_v34  ;;  %v285_v36 = vand.u32 4294901760, %v284_v55  ;;  %v30229_v35 = vpack.c.bf16 %v184_v47, %v181_v6  ;;  %v30231_v37 = vsub.f32 %v81_v18, %v181_v6  ;;  %v47_v6 = vld [vmem:[%s34786_s0] sm:$0xff] }
  0x27   :  { %26293 = vmatprep.subr.bf16.mxu1 %v26292_v19  ;;  %v403_v1 = vsub.f32 %v30147_v51, %v34820_v8  ;;  %v410_v24 = vsub.f32 %v30162_v56, %v34819_v3  ;;  %v136_v44 = vand.u32 4294901760, %v66_v23  ;;  %v30243_v34 = vsub.f32 %v82_v2, %v184_v47 }
  0x28   :  { %34993 = vst [vmem:[#allocation6_spill] sm:$0xff] %v30229_v35  ;;  %v26294_v52 = vpack.c.bf16 %v285_v36, %v278_v13  ;;  %26273 = vmatprep.subr.bf16.mxu0 %v30229_v35  ;;  %v34824_v18 = vand.u32 4294901760, %v30171_v0  ;;  %v34825_v55 = vand.u32 4294901760, %v30185_v61  ;;  %v30252_v41 = vsub.f32 %v65_v59, %v133_v57 }
  0x29   :  { %v404_v19 = vand.u32 4294901760, %v403_v1  ;;  %v411_v3 = vand.u32 4294901760, %v410_v24  ;;  %v30250_v8 = vpack.c.bf16 %v136_v44, %v133_v57  ;;  %v30260_v13 = vand.u32 4294901760, %v48_v10 }
  0x2a   :  { %26295 = vmatpush3.bf16.msra.mxu1 %v26294_v52  ;;  %v291_v36 = vsub.f32 %v30171_v0, %v34824_v18  ;;  %v298_v2 = vsub.f32 %v30185_v61, %v34825_v55  ;;  %v34828_v47 = vand.u32 4294901760, %v30189_v7  ;;  %v34834_v1 = vand.u32 4294901760, %v30204_v29 }
  0x2b   :  { %34994 = vst [vmem:[#allocation7_spill] sm:$0xff] %v30250_v8  ;;  %34995 = vst [vmem:[#allocation8_spill] sm:$0xff] %v30260_v13  ;;  %v26296_v35 = vpack.c.bf16 %v411_v3, %v404_v19  ;;  %26275 = vmatpush3.bf16.msra.mxu0 %v30250_v8  ;;  %v26308_v59 = vpack.c.bf16 %v30011_v32, %v30009_v31  ;;  %v30267_v57 = vand.u32 4294901760, %v47_v6  ;;  %442 = vmatprep.mubr.f32.mxu1 %v30260_v13 }
  0x2c   :  { %v292_v24 = vand.u32 4294901760, %v291_v36  ;;  %v299_v52 = vand.u32 4294901760, %v298_v2  ;;  %v30270_v18 = vsub.f32 %v48_v10, %v30260_v13  ;;  %v417_v55 = vsub.f32 %v30189_v7, %v34828_v47 }
  0x2d   :  { %26297 = vmatprep.subr.bf16.mxu1 %v26296_v35  ;;  %v424_v3 = vsub.f32 %v30204_v29, %v34834_v1  ;;  %26309 = vmatprep.subr.bf16.mxu0 %v26308_v59  ;;  %v30280_v19 = vsub.f32 %v47_v6, %v30267_v57  ;;  %v34833_v36 = vand.u32 4294901760, %v30213_v54  ;;  %v34835_v10 = vand.u32 4294901760, %v30227_v53 }
  0x2e   :  { %v30284_v2 = vsub.f32 %v66_v23, %v136_v44  ;;  %v26298_v8 = vpack.c.bf16 %v299_v52, %v292_v24  ;;  %v34836_v47 = vand.u32 4294901760, %v30270_v18  ;;  %v418_v9 = vand.u32 4294901760, %v417_v55 }
  0x2f   :  { %34996 = vst [vmem:[#allocation9_spill] sm:$0xff] %v30280_v19  ;;  %v425_v13 = vand.u32 4294901760, %v424_v3  ;;  %v34839_v35 = vand.u32 4294901760, %v30280_v19  ;;  %v305_v59 = vsub.f32 %v30213_v54, %v34833_v36  ;;  %v312_v6 = vsub.f32 %v30227_v53, %v34835_v10 }
  0x30   :  { %26299 = vmatpush3.bf16.msra.mxu1 %v26298_v8  ;;  %v189_v44 = vsub.f32 %v30270_v18, %v34836_v47  ;;  %v26310_v23 = vpack.c.bf16 %v29989_v21, %v29979_v15  ;;  %v34840_v55 = vand.u32 4294901760, %v30231_v37  ;;  %v34841_v24 = vand.u32 4294901760, %v30243_v34 }
  0x31   :  { %v26300_v52 = vpack.c.bf16 %v425_v13, %v418_v9  ;;  %v195_v3 = vsub.f32 %v30280_v19, %v34839_v35  ;;  %v306_v36 = vand.u32 4294901760, %v305_v59  ;;  %v313_v1 = vand.u32 4294901760, %v312_v6  ;;  %v50_v9 = vld [vmem:[%s34786_s0 + $0x18] sm:$0xff] }
  0x32   :  { %v190_v10 = vand.u32 4294901760, %v189_v44  ;;  %v431_v8 = vsub.f32 %v30231_v37, %v34840_v55  ;;  %v438_v47 = vsub.f32 %v30243_v34, %v34841_v24  ;;  %v34843_v33 = vand.u32 4294901760, %v30252_v41 }
  0x33   :  { %26301 = vmatprep.subr.bf16.mxu1 %v26300_v52  ;;  %v196_v13 = vand.u32 4294901760, %v195_v3  ;;  %v26302_v35 = vpack.c.bf16 %v313_v1, %v306_v36  ;;  %v26312_v59 = vpack.c.bf16 %v30002_v26, %v30000_v25  ;;  %v34842_v6 = vand.u32 4294901760, %v30284_v2  ;;  %v49_v1 = vld [vmem:[%s34786_s0 + $0x10] sm:$0xff] }
  0x34   :  { %191 = vmatprep.mubr.f32.mxu0 %v190_v10  ;;  %v432_v44 = vand.u32 4294901760, %v431_v8  ;;  %v439_v55 = vand.u32 4294901760, %v438_v47  ;;  %v319_v24 = vsub.f32 %v30252_v41, %v34843_v33  ;;  %v30323_v3 = vand.u32 4294901760, %v50_v9 }
  0x35   :  { %197 = vmatmul.mubr.f32.vlgmr.msra.gmra.mrb[0].mxu0 %v196_v13  ;;  %26303 = vmatpush3.bf16.msra.mxu1 %v26302_v35  ;;  %v326_v52 = vsub.f32 %v30284_v2, %v34842_v6  ;;  %v26314_v47 = vpack.c.bf16 %v30019_v38, %v30006_v28  ;;  %v26316_v35 = vpack.c.bf16 %v30029_v43, %v30023_v40  ;;  %v30335_v6 = vand.u32 4294901760, %v49_v1 }
  0x36   :  { %26311 = vmatpush3.bf16.msra.mxu0 %v26310_v23  ;;  %v26304_v36 = vpack.c.bf16 %v439_v55, %v432_v44  ;;  %v320_v10 = vand.u32 4294901760, %v319_v24  ;;  %v30333_v13 = vsub.f32 %v50_v9, %v30323_v3  ;;  %v26318_v23 = vpack.c.bf16 %v30058_v58, %v30034_v46 }
  0x37   :  { %26313 = vmatprep.subr.bf16.mxu0 %v26312_v59  ;;  %v327_v8 = vand.u32 4294901760, %v326_v52  ;;  %v26320_v55 = vpack.c.bf16 %v30083_v12, %v30062_v63  ;;  %v34997_v24 = vand.u32 4294901760, %v30009_v31  ;;  %v34998_v59 = vand.u32 4294901760, %v30011_v32 }
  0x38   :  { %26305 = vmatprep.subr.bf16.mxu1 %v26304_v36  ;;  %v203_v52 = vand.u32 4294901760, %v30333_v13  ;;  %v30347_v9 = vsub.f32 %v49_v1, %v30335_v6  ;;  %v34999_v36 = vand.u32 4294901760, %v29979_v15  ;;  %v35001_v19 = vand.u32 4294901760, %v30000_v25 }
  0x39   :  { %v26306_v33 = vpack.c.bf16 %v327_v8, %v320_v10  ;;  %v26372_v44 = vpack.c.bf16 %v34998_v59, %v34997_v24  ;;  %v35000_v10 = vand.u32 4294901760, %v29989_v21  ;;  %v35002_v11 = vand.u32 4294901760, %v30002_v26 }
  0x3a   :  { %26315 = vmatpush3.bf16.msra.mxu0 %v26314_v47  ;;  %v35003_v31 = vand.u32 4294901760, %v30006_v28  ;;  %v35004_v32 = vand.u32 4294901760, %v30019_v38  ;;  %v35005_v1 = vand.u32 4294901760, %v30023_v40  ;;  %v35006_v24 = vand.u32 4294901760, %v30029_v43 }
  0x3b   :  { %v26374_v8 = vpack.c.bf16 %v35000_v10, %v34999_v36  ;;  %v26376_v48 = vpack.c.bf16 %v35002_v11, %v35001_v19  ;;  %26307 = vmatpush3.bf16.msra.mxu1 %v26306_v33  ;;  %26317 = vmatprep.subr.bf16.mxu0 %v26316_v35  ;;  %v35007_v21 = vand.u32 4294901760, %v30034_v46  ;;  %v35008_v59 = vand.u32 4294901760, %v30058_v58 }
  0x3c   :  { %v26378_v47 = vpack.c.bf16 %v35004_v32, %v35003_v31  ;;  %v26380_v15 = vpack.c.bf16 %v35006_v24, %v35005_v1  ;;  %26341 = vmatprep.subr.bf16.mxu1 %v29977_v14  ;;  %v204_v26 = vsub.f32 %v30333_v13, %v203_v52  ;;  %v209_v28 = vand.u32 4294901760, %v30347_v9 }
  0x3d   :  { %v30369_v25 = vpack.c.bf16 %v35008_v59, %v35007_v21  ;;  %v35009_v38 = vand.u32 4294901760, %v30062_v63  ;;  %v35010_v40 = vand.u32 4294901760, %v30083_v12  ;;  %v35011_v33 = vand.u32 4294901760, %v30087_v17  ;;  %v35019_v21 = vld [vmem:[#allocation3_spill] sm:$0xff]  ;;  %v35020_v59 = vld [vmem:[#allocation4_spill] sm:$0xff] }
  0x3e   :  { %v35012_v46 = vand.u32 4294901760, %v30101_v42  ;;  %v35013_v11 = vand.u32 4294901760, %v30105_v50  ;;  %v35014_v19 = vand.u32 4294901760, %v30120_v60  ;;  %v35015_v36 = vand.u32 4294901760, %v30129_v5  ;;  %444 = vmatmul.mubr.f32.vlgmr.msra.gmra.mrb[0].mxu1 %v30267_v57  ;;  %26319 = vmatpush3.bf16.msra.mxu0 %v26318_v23 }
  0x3f   :  { %v26384_v43 = vpack.c.bf16 %v35010_v40, %v35009_v38  ;;  %v35016_v10 = vand.u32 4294901760, %v30143_v30  ;;  %v26322_v12 = vpack.c.bf16 %v30101_v42, %v30087_v17  ;;  %v205_v31 = vand.u32 4294901760, %v204_v26  ;;  %26343 = vmatpush3.bf16.msra.mxu1 %v29987_v20  ;;  %26321 = vmatprep.subr.bf16.mxu0 %v26320_v55  ;;  %v35018_v55 = vld [vmem:[#allocation2_spill] sm:$0xff]  ;;  %v35021_v26 = vld [vmem:[#allocation9_spill] sm:$0xff] }
  0x40   :  { %v30384_v58 = vpack.c.bf16 %v35012_v46, %v35011_v33  ;;  %v30390_v35 = vpack.c.bf16 %v35014_v19, %v35013_v11  ;;  %v210_v32 = vsub.f32 %v30347_v9, %v209_v28  ;;  %v26324_v1 = vpack.c.bf16 %v30120_v60, %v30105_v50  ;;  %26345 = vmatprep.subr.bf16.mxu1 %v29991_v22  ;;  %v35022_v38 = vld [vmem:[#allocation5_spill] sm:$0xff]  ;;  %v35023_v40 = vld [vmem:[#allocation6_spill] sm:$0xff]  ;;  %v35024_v33 = vld [vmem:[#allocation8_spill] sm:$0xff] }
  0x41   :  { %v30396_v63 = vpack.c.bf16 %v35016_v10, %v35015_v36  ;;  %206 = vmatprep.mubr.f32.mxu0 %v205_v31  ;;  %449 = vmatprep.mubr.f32.mxu1 %v30323_v3  ;;  %v26326_v17 = vpack.c.bf16 %v30143_v30, %v30129_v5  ;;  %v26328_v42 = vpack.c.bf16 %v30162_v56, %v30147_v51  ;;  %v35017_v50 = vand.u32 4294901760, %v30270_v18  ;;  %v35025_v46 = vld [vmem:[#allocation7_spill] sm:$0xff]  ;;  %v30546_v10 = vld [vmem:[%s34788_s4 + $0x60] sm:$0xff] }
  0x42   :  { %v211_v24 = vand.u32 4294901760, %v210_v32  ;;  %26323 = vmatpush3.bf16.msra.mxu0 %v26322_v12  ;;  %451 = vmatmul.mubr.f32.gmra.mrb[2].mxu1 %v30335_v6  ;;  %v26330_v60 = vpack.c.bf16 %v30185_v61, %v30171_v0  ;;  %v26332_v5 = vpack.c.bf16 %v30204_v29, %v30189_v7  ;;  %v26334_v30 = vpack.c.bf16 %v30227_v53, %v30213_v54  ;;  %v1029_v36 = vld [vmem:[%s34787_s8 + $0x28] sm:$0xff] }
  0x43   :  { %26347 = vmatpush3.bf16.msra.mxu1 %v30004_v27  ;;  %26325 = vmatprep.subr.bf16.mxu0 %v26324_v1  ;;  %v26338_v23 = vpack.c.bf16 %v30284_v2, %v30252_v41  ;;  %v1062_v12 = vand.u32 4294901760, %v1029_v36  ;;  %v20277_v31 = vld [vmem:[%s34788_s4 + $0x68] sm:$0xff]  ;;  %v1670_v32 = vand.u32 4294901760, %v30546_v10 }
  0x44   :  { %26349 = vmatprep.subr.bf16.mxu1 %v30021_v39  ;;  %212 = vmatmul.mubr.f32.gmra.mrb[2].mxu0 %v211_v24  ;;  %v1673_v1 = vand.u32 4294901760, %v20277_v31 }
  0x45   :  { %586 = vmatprep.mubr.f32.mxu0 %v30270_v18  ;;  %702 = vmatprep.mubr.f32.mxu1 %v35017_v50  ;;  %v26336_v18 = vpack.c.bf16 %v30243_v34, %v30231_v37 }
  0x46   :  { %26327 = vmatpush3.bf16.msra.mxu0 %v26326_v17 }
  0x47   :  { %26351 = vmatpush3.bf16.msra.mxu1 %v30032_v45  ;;  %26329 = vmatprep.subr.bf16.mxu0 %v26328_v42 }
  0x48   :  { %26353 = vmatprep.subr.bf16.mxu1 %v30060_v62 }
  0x4a   :  { %26331 = vmatpush3.bf16.msra.mxu0 %v26330_v60  ;;  %v30564_v60 = vpack.c.bf16 %v1673_v1, %v1670_v32 }
  0x4b   :  { %26355 = vmatpush3.bf16.msra.mxu1 %v30085_v16  ;;  %26333 = vmatprep.subr.bf16.mxu0 %v26332_v5  ;;  %v1030_v5 = vld [vmem:[%s34787_s8 + $0x30] sm:$0xff] }
  0x4c   :  { %26357 = vmatprep.subr.bf16.mxu1 %v30103_v49 }
  0x4e   :  { %26335 = vmatpush3.bf16.msra.mxu0 %v26334_v30  ;;  %v1031_v30 = vld [vmem:[%s34787_s8 + $0x38] sm:$0xff] }
  0x4f   :  { %26359 = vmatpush3.bf16.msra.mxu1 %v30127_v4  ;;  %26337 = vmatprep.subr.bf16.mxu0 %v26336_v18  ;;  %v30575_v18 = vld [vmem:[%s34788_s4 + $0x70] sm:$0xff] }
  0x50   :  { %26361 = vmatprep.subr.bf16.mxu1 %v35018_v55 }
  0x52   :  { %26339 = vmatpush3.bf16.msra.mxu0 %v26338_v23 }
  0x53   :  { %26363 = vmatpush3.bf16.msra.mxu1 %v35019_v21  ;;  %26373 = vmatprep.subr.bf16.mxu0 %v26372_v44  ;;  %v35026_v44 = vand.u32 4294901760, %v35021_v26 }
  0x54   :  { %26365 = vmatprep.subr.bf16.mxu1 %v35020_v59 }
  0x55   :  { %589 = vmatmul.mubr.f32.vlgmr.msra.gmra.mrb[4].mxu0 %v35021_v26  ;;  %v1676_v26 = vand.u32 4294901760, %v30575_v18 }
  0x56   :  { %26375 = vmatpush3.bf16.msra.mxu0 %v26374_v8  ;;  %595 = vmatprep.mubr.f32.mxu0 %v30333_v13  ;;  %v35030_v13 = vand.u32 4294901760, %v30185_v61  ;;  %v35035_v61 = vand.u32 4294901760, %v30231_v37 }
  0x57   :  { %26367 = vmatpush3.bf16.msra.mxu1 %v35022_v38  ;;  %26377 = vmatprep.subr.bf16.mxu0 %v26376_v48  ;;  %v35028_v48 = vand.u32 4294901760, %v30162_v56 }
  0x58   :  { %26369 = vmatprep.subr.bf16.mxu1 %v35023_v40 }
  0x59   :  { %598 = vmatmul.mubr.f32.gmra.mrb[6].mxu0 %v30347_v9  ;;  %v35034_v9 = vand.u32 4294901760, %v30227_v53  ;;  %v1025_v53 = vld [vmem:[%s34787_s8 + $0x8] sm:$0xff] }
  0x5a   :  { %26379 = vmatpush3.bf16.msra.mxu0 %v26378_v47  ;;  %883 = vmatprep.mubr.f32.mxu0 %v35024_v33  ;;  %v20274_v47 = vld [vmem:[%s34788_s4 + $0x50] sm:$0xff] }
  0x5b   :  { %26371 = vmatpush3.bf16.msra.mxu1 %v35025_v46  ;;  %26381 = vmatprep.subr.bf16.mxu0 %v26380_v15 }
  0x5c   :  { %26405 = vmatprep.subr.bf16.mxu1 %v29977_v14  ;;  %v35027_v14 = vand.u32 4294901760, %v30147_v51  ;;  %v35032_v51 = vand.u32 4294901760, %v30204_v29 }
  0x5e   :  { %706 = vmatmul.mubr.f32.vlgmr.msra.gmra.mrb[4].mxu1 %v35026_v44  ;;  %26383 = vmatpush3.bf16.msra.mxu0 %v30369_v25 }
  0x5f   :  { %26407 = vmatpush3.bf16.msra.mxu1 %v29987_v20  ;;  %713 = vmatprep.mubr.f32.mxu1 %v203_v52  ;;  %v26392_v20 = vpack.c.bf16 %v35028_v48, %v35027_v14 }
  0x60   :  { %26385 = vmatprep.subr.bf16.mxu0 %v26384_v43  ;;  %26409 = vmatprep.subr.bf16.mxu1 %v29991_v22  ;;  %v35029_v22 = vand.u32 4294901760, %v30171_v0  ;;  %v1664_v43 = vand.u32 4294901760, %v20274_v47 }
  0x62   :  { %717 = vmatmul.mubr.f32.gmra.mrb[6].mxu1 %v209_v28  ;;  %26387 = vmatpush3.bf16.msra.mxu0 %v30384_v58  ;;  %v26394_v52 = vpack.c.bf16 %v35030_v13, %v35029_v22  ;;  %v20275_v28 = vld [vmem:[%s34788_s4 + $0x58] sm:$0xff] }
  0x63   :  { %26411 = vmatpush3.bf16.msra.mxu1 %v30004_v27  ;;  %26389 = vmatprep.subr.bf16.mxu0 %v30390_v35  ;;  %v35031_v27 = vand.u32 4294901760, %v30189_v7  ;;  %v35037_v7 = vand.u32 4294901760, %v30252_v41  ;;  %v1024_v41 = vld [vmem:[%s34787_s8] sm:$0xff]  ;;  %v1667_v58 = vand.u32 4294901760, %v20275_v28 }
  0x64   :  { %26413 = vmatprep.subr.bf16.mxu1 %v30021_v39  ;;  %994 = vmatprep.mubr.f32.mxu1 %v35024_v33  ;;  %v35033_v39 = vand.u32 4294901760, %v30213_v54  ;;  %v20272_v54 = vld [vmem:[%s34788_s4 + $0x40] sm:$0xff] }
  0x65   :  { %v26396_v56 = vpack.c.bf16 %v35032_v51, %v35031_v27  ;;  %v1658_v37 = vand.u32 4294901760, %v20272_v54  ;;  %v30535_v19 = vpack.c.bf16 %v1667_v58, %v1664_v43  ;;  %v1028_v35 = vld [vmem:[%s34787_s8 + $0x20] sm:$0xff] }
  0x66   :  { %26391 = vmatpush3.bf16.msra.mxu0 %v30396_v63  ;;  %v26398_v8 = vpack.c.bf16 %v35034_v9, %v35033_v39  ;;  %v1059_v63 = vand.u32 4294901760, %v1028_v35  ;;  %v30617_v39 = vsub.f32 %v20274_v47, %v1664_v43  ;;  %v30654_v47 = vsub.f32 %v20277_v31, %v1673_v1 }
  0x67   :  { %26415 = vmatpush3.bf16.msra.mxu1 %v30032_v45  ;;  %26393 = vmatprep.subr.bf16.mxu0 %v26392_v20  ;;  %v35036_v45 = vand.u32 4294901760, %v30243_v34  ;;  %v30562_v50 = vsub.f32 %v20272_v54, %v1658_v37 }
  0x68   :  { %26417 = vmatprep.subr.bf16.mxu1 %v30060_v62  ;;  %v35038_v62 = vand.u32 4294901760, %v30284_v2  ;;  %v30556_v24 = vpack.c.bf16 %v1062_v12, %v1059_v63  ;;  %v30632_v54 = vsub.f32 %v1028_v35, %v1059_v63  ;;  %v1788_v63 = vand.u32 4294901760, %v30654_v47 }
  0x69   :  { %v26400_v0 = vpack.c.bf16 %v35036_v45, %v35035_v61  ;;  %v30621_v45 = vsub.f32 %v20275_v28, %v1667_v58 }
  0x6a   :  { %26395 = vmatpush3.bf16.msra.mxu0 %v26394_v52  ;;  %v26402_v29 = vpack.c.bf16 %v35038_v62, %v35037_v7  ;;  %v1767_v62 = vand.u32 4294901760, %v30617_v39 }
  0x6b   :  { %26419 = vmatpush3.bf16.msra.mxu1 %v30085_v16  ;;  %26397 = vmatprep.subr.bf16.mxu0 %v26396_v56  ;;  %v1047_v16 = vand.u32 4294901760, %v1024_v41 }
  0x6c   :  { %26421 = vmatprep.subr.bf16.mxu1 %v30103_v49  ;;  %v1050_v49 = vand.u32 4294901760, %v1025_v53 }
  0x6d   :  { %v30558_v17 = vsub.f32 %v1024_v41, %v1047_v16 }
  0x6e   :  { %26399 = vmatpush3.bf16.msra.mxu0 %v26398_v8  ;;  %v30560_v42 = vsub.f32 %v1025_v53, %v1050_v49  ;;  %v34852_v53 = vand.u32 4294901760, %v30621_v45 }
  0x6f   :  { %26423 = vmatpush3.bf16.msra.mxu1 %v30127_v4  ;;  %26401 = vmatprep.subr.bf16.mxu0 %v26400_v0  ;;  %v20273_v4 = vld [vmem:[%s34788_s4 + $0x48] sm:$0xff] }
  0x70   :  { %26425 = vmatprep.subr.bf16.mxu1 %v35018_v55  ;;  %v1661_v34 = vand.u32 4294901760, %v20273_v4  ;;  %v1065_v55 = vand.u32 4294901760, %v1030_v5  ;;  %v1149_v33 = vand.u32 4294901760, %v30560_v42 }
  0x72   :  { %26403 = vmatpush3.bf16.msra.mxu0 %v26402_v29  ;;  %v30515_v2 = vpack.c.bf16 %v1661_v34, %v1658_v37  ;;  %v30577_v23 = vsub.f32 %v20273_v4, %v1661_v34  ;;  %v1150_v22 = vsub.f32 %v30560_v42, %v1149_v33  ;;  %v1768_v4 = vsub.f32 %v30617_v39, %v1767_v62 }
  0x73   :  { %26427 = vmatpush3.bf16.msra.mxu1 %v35019_v21  ;;  %v1068_v21 = vand.u32 4294901760, %v1031_v30  ;;  %v30643_v37 = vsub.f32 %v1029_v36, %v1062_v12  ;;  %v1775_v34 = vsub.f32 %v30621_v45, %v34852_v53  ;;  %v1183_v31 = vsub.f32 %v1030_v5, %v1065_v55 }
  0x74   :  { %26429 = vmatprep.subr.bf16.mxu1 %v35020_v59  ;;  %v30583_v59 = vld [vmem:[%s34788_s4 + $0x78] sm:$0xff]  ;;  %v1760_v44 = vand.u32 4294901760, %v30577_v23  ;;  %v1151_v9 = vand.u32 4294901760, %v1150_v22  ;;  %v1769_v28 = vand.u32 4294901760, %v1768_v4 }
  0x75   :  { %885 = vmatmul.mubr.f32.vlgmr.msra.gmra.mrb[8].mxu0 %v30267_v57  ;;  %v30594_v14 = vpack.c.bf16 %v1068_v21, %v1065_v55  ;;  %v34850_v43 = vand.u32 4294901760, %v30643_v37  ;;  %v1776_v58 = vand.u32 4294901760, %v1775_v34 }
  0x76   :  { %890 = vmatprep.mubr.f32.mxu0 %v30323_v3  ;;  %v1761_v52 = vsub.f32 %v30577_v23, %v1760_v44 }
  0x77   :  { %26431 = vmatpush3.bf16.msra.mxu1 %v35022_v38  ;;  %v1142_v38 = vand.u32 4294901760, %v30558_v17  ;;  %v30667_v1 = vpack.c.bf16 %v1776_v58, %v1769_v28 }
  0x78   :  { %26433 = vmatprep.subr.bf16.mxu1 %v35023_v40  ;;  %v1679_v40 = vand.u32 4294901760, %v30583_v59  ;;  %v1762_v61 = vand.u32 4294901760, %v1761_v52 }
  0x79   :  { %892 = vmatmul.mubr.f32.gmra.mrb[10].mxu0 %v30335_v6  ;;  %v1143_v48 = vsub.f32 %v30558_v17, %v1142_v38 }
  0x7a   :  { %v30601_v20 = vpack.c.bf16 %v1679_v40, %v1676_v26 }
  0x7b   :  { %26435 = vmatpush3.bf16.msra.mxu1 %v35025_v46  ;;  %v1753_v46 = vand.u32 4294901760, %v30562_v50  ;;  %v1144_v27 = vand.u32 4294901760, %v1143_v48 }
  0x7c   :  { %26533 = vmatprep.subr.bf16.mxu1 %v30515_v2 }
  0x7d   :  { %v1754_v13 = vsub.f32 %v30562_v50, %v1753_v46  ;;  %v30627_v29 = vpack.c.bf16 %v1151_v9, %v1144_v27  ;;  %v1184_v27 = vand.u32 4294901760, %v1183_v31 }
  0x7e   :  { %996 = vmatmul.mubr.f32.vlgmr.msra.gmra.mrb[8].mxu1 %v30267_v57  ;;  %v30513_v57 = vpack.c.bf16 %v1050_v49, %v1047_v16 }
  0x7f   :  { %1001 = vmatprep.mubr.f32.mxu1 %v30323_v3  ;;  %v1027_v3 = vld [vmem:[%s34787_s8 + $0x18] sm:$0xff]  ;;  %26535 = vmatpush3.bf16.msra.mxu1 %v30515_v2  ;;  %v1755_v8 = vand.u32 4294901760, %v1754_v13  ;;  %v1789_v13 = vsub.f32 %v30654_v47, %v1788_v63 }
  0x80   :  { %26437 = vmatprep.subr.bf16.mxu0 %v30513_v57  ;;  %v1056_v25 = vand.u32 4294901760, %v1027_v3  ;;  %26537 = vmatprep.subr.bf16.mxu1 %v30535_v19 }
  0x81   :  { %26439 = vmatpush3.bf16.msra.mxu0 %v30513_v57  ;;  %v30629_v41 = vpack.c.bf16 %v1762_v61, %v1755_v8  ;;  %v1794_v8 = vsub.f32 %v30575_v18, %v1676_v26 }
  0x82   :  { %1003 = vmatmul.mubr.f32.gmra.mrb[10].mxu1 %v30335_v6  ;;  %v1026_v6 = vld [vmem:[%s34787_s8 + $0x10] sm:$0xff]  ;;  %v30615_v56 = vsub.f32 %v1027_v3, %v1056_v25  ;;  %v30652_v3 = vsub.f32 %v30546_v10, %v1670_v32  ;;  %v1178_v10 = vsub.f32 %v30643_v37, %v34850_v43  ;;  %v1190_v32 = vsub.f32 %v1031_v30, %v1068_v21 }
  0x83   :  { %v1053_v15 = vand.u32 4294901760, %v1026_v6  ;;  %26539 = vmatpush3.bf16.msra.mxu1 %v30535_v19  ;;  %v1185_v30 = vsub.f32 %v1183_v31, %v1184_v27  ;;  %v1795_v21 = vand.u32 4294901760, %v1794_v8 }
  0x84   :  { %26541 = vmatprep.subr.bf16.mxu1 %v30564_v60  ;;  %v1163_v7 = vand.u32 4294901760, %v30615_v56  ;;  %v1781_v36 = vand.u32 4294901760, %v30652_v3  ;;  %v1179_v52 = vand.u32 4294901760, %v1178_v10  ;;  %v1191_v9 = vand.u32 4294901760, %v1190_v32 }
  0x85   :  { %v30533_v11 = vpack.c.bf16 %v1056_v25, %v1053_v15  ;;  %v30613_v51 = vsub.f32 %v1026_v6, %v1053_v15  ;;  %v34851_v6 = vand.u32 4294901760, %v30632_v54  ;;  %v1796_v28 = vsub.f32 %v1794_v8, %v1795_v21 }
  0x86   :  { %v1164_v49 = vsub.f32 %v30615_v56, %v1163_v7  ;;  %v1782_v22 = vsub.f32 %v30652_v3, %v1781_v36  ;;  %v1192_v55 = vsub.f32 %v1190_v32, %v1191_v9 }
  0x87   :  { %26441 = vmatprep.subr.bf16.mxu0 %v30533_v11  ;;  %26543 = vmatpush3.bf16.msra.mxu1 %v30564_v60  ;;  %v1156_v0 = vand.u32 4294901760, %v30613_v51  ;;  %v1171_v35 = vsub.f32 %v30632_v54, %v34851_v6  ;;  %v1797_v10 = vand.u32 4294901760, %v1796_v28 }
  0x88   :  { %26443 = vmatpush3.bf16.msra.mxu0 %v30533_v11  ;;  %26545 = vmatprep.subr.bf16.mxu1 %v30601_v20  ;;  %v1165_v25 = vand.u32 4294901760, %v1164_v49  ;;  %v1783_v61 = vand.u32 4294901760, %v1782_v22  ;;  %v1801_v49 = vsub.f32 %v30583_v59, %v1679_v40  ;;  %v30685_v59 = vpack.c.bf16 %v30560_v42, %v30558_v17 }
  0x89   :  { %26445 = vmatprep.subr.bf16.mxu0 %v30556_v24  ;;  %v1157_v16 = vsub.f32 %v30613_v51, %v1156_v0  ;;  %v1172_v48 = vand.u32 4294901760, %v1171_v35  ;;  %v30689_v40 = vpack.c.bf16 %v30577_v23, %v30562_v50  ;;  %v30697_v22 = vpack.c.bf16 %v30621_v45, %v30617_v39 }
  0x8a   :  { %v1802_v34 = vand.u32 4294901760, %v1801_v49  ;;  %v35039_v17 = vand.u32 4294901760, %v30621_v45  ;;  %v35040_v50 = vand.u32 4294901760, %v30632_v54  ;;  %v35041_v23 = vand.u32 4294901760, %v30643_v37 }
  0x8b   :  { %26547 = vmatpush3.bf16.msra.mxu1 %v30601_v20  ;;  %v1158_v15 = vand.u32 4294901760, %v1157_v16  ;;  %v1790_v16 = vand.u32 4294901760, %v1789_v13  ;;  %v30675_v5 = vpack.c.bf16 %v1179_v52, %v1172_v48  ;;  %v30693_v48 = vpack.c.bf16 %v30615_v56, %v30613_v51 }
  0x8c   :  { %26447 = vmatpush3.bf16.msra.mxu0 %v30556_v24  ;;  %26549 = vmatprep.subr.bf16.mxu1 %v30629_v41  ;;  %v1803_v58 = vsub.f32 %v1801_v49, %v1802_v34  ;;  %v30701_v13 = vpack.c.bf16 %v30643_v37, %v30632_v54  ;;  %v30705_v52 = vpack.c.bf16 %v30654_v47, %v30652_v3 }
  0x8d   :  { %26449 = vmatprep.subr.bf16.mxu0 %v30594_v14  ;;  %v30662_v12 = vpack.c.bf16 %v1165_v25, %v1158_v15  ;;  %v30677_v4 = vpack.c.bf16 %v1790_v16, %v1783_v61  ;;  %v1186_v15 = vand.u32 4294901760, %v1185_v30  ;;  %v1193_v25 = vand.u32 4294901760, %v1192_v55 }
  0x8e   :  { %v1804_v18 = vand.u32 4294901760, %v1803_v58  ;;  %v30707_v61 = vpack.c.bf16 %v1190_v32, %v1183_v31  ;;  %v30709_v16 = vpack.c.bf16 %v1801_v49, %v1794_v8  ;;  %v30718_v32 = vpack.c.bf16 %v1149_v33, %v1142_v38 }
  0x8f   :  { %v30679_v35 = vpack.c.bf16 %v1193_v25, %v1186_v15  ;;  %v20268_v25 = vld [vmem:[%s34789_s3] ss:$0 sm:$0xff]  ;;  %v30724_v8 = vpack.c.bf16 %v1760_v44, %v1753_v46  ;;  %v30736_v42 = vpack.c.bf16 %v35039_v17, %v1767_v62  ;;  %v30742_v33 = vpack.c.bf16 %v35041_v23, %v35040_v50 }
  0x90   :  { %26451 = vmatpush3.bf16.msra.mxu0 %v30594_v14  ;;  %v30681_v26 = vpack.c.bf16 %v1804_v18, %v1797_v10  ;;  %v30744_v46 = vpack.c.bf16 %v1788_v63, %v1781_v36  ;;  %v30746_v44 = vpack.c.bf16 %v1191_v9, %v1184_v27  ;;  %v30748_v51 = vpack.c.bf16 %v1802_v34, %v1795_v21 }
  0x91   :  { %26453 = vmatprep.subr.bf16.mxu0 %v30627_v29 }
 0x108   :  { %v20480_v30 = vpop.f32.mrb[0].mxu0 }
 0x109   :  { %v20481_v55 = vpop.f32.mrb[1].mxu0 }
 0x10a   :  { %v20482_v15 = vadd.f32 %v20481_v55, %v20480_v30 }
 0x10c   :  { %v199_v28 = vadd.f32 %v20482_v15, %v20268_v25 }
 0x111   :  { %v20518_v58 = vpop.f32.mrb[0].mxu1 }
 0x112   :  { %v20519_v10 = vpop.f32.mrb[1].mxu1 }
 0x113   :  { %v20520_v18 = vadd.f32 %v20519_v10, %v20518_v58 }
 0x115   :  { %v446_v43 = vadd.f32 %v20520_v18, %v199_v28  ;;  %v20521_v6 = vpop.f32.mrb[2].mxu1 }
 0x116   :  { %v20522_v53 = vpop.f32.mrb[3].mxu1 }
 0x117   :  { %v20483_v3 = vpop.f32.mrb[2].mxu0  ;;  %v20523_v47 = vadd.f32 %v20522_v53, %v20521_v6  ;;  %v30730_v53 = vpack.c.bf16 %v1163_v7, %v1156_v0 }
 0x118   :  { %v20484_v31 = vpop.f32.mrb[3].mxu0 }
 0x119   :  { %v20485_v49 = vadd.f32 %v20484_v31, %v20483_v3 }
 0x11b   :  { %v214_v30 = vadd.f32 %v20485_v49, %v20268_v25 }
 0x11d   :  { %v453_v38 = vadd.f32 %v20523_v47, %v214_v30 }
 0x128   :  { %v20556_v56 = vpop.f32.mrb[4].mxu0 }
 0x129   :  { %v20557_v0 = vpop.f32.mrb[5].mxu0 }
 0x12a   :  { %v20558_v39 = vadd.f32 %v20557_v0, %v20556_v56 }
 0x12c   :  { %v591_v7 = vadd.f32 %v20558_v39, %v446_v43  ;;  %v20559_v45 = vpop.f32.mrb[6].mxu0 }
 0x12d   :  { %v20560_v62 = vpop.f32.mrb[7].mxu0 }
 0x12e   :  { %v20561_v6 = vadd.f32 %v20560_v62, %v20559_v45 }
 0x130   :  { %v600_v55 = vadd.f32 %v20561_v6, %v453_v38 }
 0x131   :  { %v20594_v15 = vpop.f32.mrb[4].mxu1 }
 0x132   :  { %v20595_v54 = vpop.f32.mrb[5].mxu1 }
 0x133   :  { %v20596_v25 = vadd.f32 %v20595_v54, %v20594_v15 }
 0x135   :  { %v708_v37 = vadd.f32 %v20596_v25, %v591_v7  ;;  %v20597_v28 = vpop.f32.mrb[6].mxu1 }
 0x136   :  { %v20598_v58 = vpop.f32.mrb[7].mxu1 }
 0x137   :  { %v20599_v36 = vadd.f32 %v20598_v58, %v20597_v28 }
 0x139   :  { %v719_v63 = vadd.f32 %v20599_v36, %v600_v55 }
 0x148   :  { %v20632_v27 = vpop.f32.mrb[8].mxu0 }
 0x149   :  { %v20633_v9 = vpop.f32.mrb[9].mxu0 }
 0x14a   :  { %v20634_v21 = vadd.f32 %v20633_v9, %v20632_v27 }
 0x14c   :  { %v887_v34 = vadd.f32 %v20634_v21, %v708_v37  ;;  %v20635_v10 = vpop.f32.mrb[10].mxu0 }
 0x14d   :  { %v20636_v18 = vpop.f32.mrb[11].mxu0 }
 0x14e   :  { %v20637_v3 = vadd.f32 %v20636_v18, %v20635_v10  ;;  %v1645_v10 = vld [vmem:[%s34788_s4 + $0x28] sm:$0xff] }
 0x150   :  { %v894_v43 = vadd.f32 %v20637_v3, %v719_v63 }
 0x151   :  { %v20670_v47 = vpop.f32.mrb[8].mxu1 }
 0x152   :  { %v20671_v31 = vpop.f32.mrb[9].mxu1 }
 0x153   :  { %v20672_v49 = vadd.f32 %v20671_v31, %v20670_v47  ;;  %v1647_v47 = vld [vmem:[%s34788_s4 + $0x38] sm:$0xff] }
 0x155   :  { %v998_v30 = vadd.f32 %v20672_v49, %v887_v34  ;;  %v20673_v17 = vpop.f32.mrb[10].mxu1  ;;  %v1644_v34 = vld [vmem:[%s34788_s4 + $0x20] sm:$0xff] }
 0x156   :  { %v20674_v38 = vpop.f32.mrb[11].mxu1 }
 0x157   :  { %v30750_v50 = vmax.f32 %v998_v30, 0.0  ;;  %v20675_v23 = vadd.f32 %v20674_v38, %v20673_v17  ;;  %v2256_v17 = vand.u32 4294901760, %v1644_v34  ;;  %v2259_v38 = vand.u32 4294901760, %v1645_v10 }
 0x159   :  { %35042 = vst [vmem:[#allocation2_spill] sm:$0xff] %v30750_v50  ;;  %v1005_v56 = vadd.f32 %v20675_v23, %v894_v43  ;;  %v1041_v0 = vsel %vm1039_vm0, %v30750_v50, 0  ;;  %v1646_v43 = vld [vmem:[%s34788_s4 + $0x30] sm:$0xff] }
 0x15a   :  { %v30754_v39 = vand.u32 4294901760, %v1041_v0 }
 0x15b   :  { %v30756_v7 = vmax.f32 %v1005_v56, 0.0 }
 0x15c   :  { %v1120_v45 = vsub.f32 %v1041_v0, %v30754_v39  ;;  %v2262_v0 = vand.u32 4294901760, %v1646_v43 }
 0x15d   :  { %35043 = vst [vmem:[#allocation3_spill] sm:$0xff] %v30756_v7  ;;  %v1044_v62 = vsel %vm1039_vm0, %v30756_v7, 0 }
 0x15e   :  { %v30761_v6 = vand.u32 4294901760, %v1044_v62  ;;  %v1121_v55 = vand.u32 4294901760, %v1120_v45 }
 0x160   :  { %v1130_v15 = vsub.f32 %v1044_v62, %v30761_v6  ;;  %v1122_v54 = vsub.f32 %v1120_v45, %v1121_v55 }
 0x162   :  { %v1123_v25 = vand.u32 4294901760, %v1122_v54  ;;  %v30764_v37 = vand.u32 4294901760, %v1130_v15  ;;  %v30924_v54 = vsub.f32 %v1644_v34, %v2256_v17 }
 0x164   :  { %22612 = vmatprep.mubr.f32.mxu0 %v1123_v25  ;;  %22726 = vmatprep.mubr.f32.mxu1 %v1123_v25  ;;  %v1132_v28 = vsub.f32 %v1130_v15, %v30764_v37 }
 0x166   :  { %v1133_v58 = vand.u32 4294901760, %v1132_v28 }
 0x168   :  { %22613 = vmatmul.mubr.f32.vlgmr.msra.gmra.mrb[12].mxu0 %v1133_v58  ;;  %22727 = vmatmul.mubr.f32.vlgmr.msra.gmra.mrb[12].mxu1 %v1133_v58 }
 0x169   :  { %26455 = vmatpush3.bf16.msra.mxu0 %v30627_v29  ;;  %26551 = vmatpush3.bf16.msra.mxu1 %v30629_v41  ;;  %v1626_v29 = vrot.slane %v30750_v50, 7 }
 0x16a   :  { %22631 = vmatprep.mubr.f32.mxu0 %v30754_v39  ;;  %22745 = vmatprep.mubr.f32.mxu1 %v30754_v39 }
 0x16b   :  { %26457 = vmatprep.subr.bf16.mxu0 %v30662_v12  ;;  %26553 = vmatprep.subr.bf16.mxu1 %v30667_v1 }
 0x16d   :  { %26459 = vmatpush3.bf16.msra.mxu0 %v30662_v12  ;;  %26555 = vmatpush3.bf16.msra.mxu1 %v30667_v1  ;;  %v1631_v12 = vsel %vm1630_vm1, 0.0, %v1626_v29 }
 0x16e   :  { %26461 = vmatprep.subr.bf16.mxu0 %v30675_v5  ;;  %26557 = vmatprep.subr.bf16.mxu1 %v30677_v4 }
 0x171   :  { %26463 = vmatpush3.bf16.msra.mxu0 %v30675_v5  ;;  %26559 = vmatpush3.bf16.msra.mxu1 %v30677_v4  ;;  %v2238_v5 = vsel %vm1039_vm0, %v1631_v12, 0 }
 0x172   :  { %26465 = vmatprep.subr.bf16.mxu0 %v30679_v35  ;;  %26561 = vmatprep.subr.bf16.mxu1 %v30681_v26 }
 0x175   :  { %26467 = vmatpush3.bf16.msra.mxu0 %v30679_v35  ;;  %26563 = vmatpush3.bf16.msra.mxu1 %v30681_v26  ;;  %v30843_v35 = vand.u32 4294901760, %v2238_v5 }
 0x176   :  { %26469 = vmatprep.subr.bf16.mxu0 %v30685_v59  ;;  %26565 = vmatprep.subr.bf16.mxu1 %v30689_v40 }
 0x178   :  { %22632 = vmatmul.mubr.f32.vlgmr.msra.gmra.mrb[12].mxu0 %v30761_v6  ;;  %22746 = vmatmul.mubr.f32.vlgmr.msra.gmra.mrb[12].mxu1 %v30761_v6 }
 0x179   :  { %26471 = vmatpush3.bf16.msra.mxu0 %v30685_v59  ;;  %22650 = vmatprep.mubr.f32.mxu0 %v1120_v45  ;;  %v1640_v59 = vld [vmem:[%s34788_s4] sm:$0xff] }
 0x17a   :  { %26567 = vmatpush3.bf16.msra.mxu1 %v30689_v40  ;;  %22764 = vmatprep.mubr.f32.mxu1 %v1120_v45 }
 0x17b   :  { %26473 = vmatprep.subr.bf16.mxu0 %v30693_v48  ;;  %26569 = vmatprep.subr.bf16.mxu1 %v30697_v22 }
 0x17d   :  { %26475 = vmatpush3.bf16.msra.mxu0 %v30693_v48  ;;  %v1641_v48 = vld [vmem:[%s34788_s4 + $0x8] sm:$0xff] }
 0x17e   :  { %26571 = vmatpush3.bf16.msra.mxu1 %v30697_v22  ;;  %26477 = vmatprep.subr.bf16.mxu0 %v30701_v13 }
 0x17f   :  { %26573 = vmatprep.subr.bf16.mxu1 %v30705_v52 }
 0x181   :  { %26479 = vmatpush3.bf16.msra.mxu0 %v30701_v13  ;;  %v1627_v13 = vrot.slane %v30756_v7, 7 }
 0x182   :  { %26575 = vmatpush3.bf16.msra.mxu1 %v30705_v52  ;;  %26481 = vmatprep.subr.bf16.mxu0 %v30707_v61 }
 0x183   :  { %26577 = vmatprep.subr.bf16.mxu1 %v30709_v16 }
 0x185   :  { %26483 = vmatpush3.bf16.msra.mxu0 %v30707_v61  ;;  %v2244_v61 = vand.u32 4294901760, %v1640_v59 }
 0x186   :  { %26579 = vmatpush3.bf16.msra.mxu1 %v30709_v16  ;;  %26485 = vmatprep.subr.bf16.mxu0 %v30513_v57 }
 0x187   :  { %26581 = vmatprep.subr.bf16.mxu1 %v30515_v2  ;;  %v30875_v36 = vsub.f32 %v1640_v59, %v2244_v61  ;;  %v2367_v59 = vand.u32 4294901760, %v30924_v54 }
 0x188   :  { %22651 = vmatmul.mubr.f32.vlgmr.msra.gmra.mrb[12].mxu0 %v1130_v15 }
 0x189   :  { %22765 = vmatmul.mubr.f32.vlgmr.msra.gmra.mrb[12].mxu1 %v1130_v15  ;;  %26487 = vmatpush3.bf16.msra.mxu0 %v30513_v57  ;;  %v2339_v3 = vand.u32 4294901760, %v30875_v36 }
 0x18a   :  { %22669 = vmatprep.mubr.f32.mxu0 %v1121_v55  ;;  %26583 = vmatpush3.bf16.msra.mxu1 %v30515_v2 }
 0x18b   :  { %22783 = vmatprep.mubr.f32.mxu1 %v1121_v55  ;;  %26489 = vmatprep.subr.bf16.mxu0 %v30533_v11  ;;  %v2340_v45 = vsub.f32 %v30875_v36, %v2339_v3 }
 0x18c   :  { %26585 = vmatprep.subr.bf16.mxu1 %v30535_v19 }
 0x18d   :  { %26491 = vmatpush3.bf16.msra.mxu0 %v30533_v11  ;;  %v2341_v58 = vand.u32 4294901760, %v2340_v45 }
 0x18e   :  { %26587 = vmatpush3.bf16.msra.mxu1 %v30535_v19  ;;  %26493 = vmatprep.subr.bf16.mxu0 %v30556_v24 }
 0x18f   :  { %26589 = vmatprep.subr.bf16.mxu1 %v30564_v60 }
 0x191   :  { %26495 = vmatpush3.bf16.msra.mxu0 %v30556_v24 }
 0x192   :  { %26591 = vmatpush3.bf16.msra.mxu1 %v30564_v60  ;;  %26497 = vmatprep.subr.bf16.mxu0 %v30594_v14 }
 0x193   :  { %26593 = vmatprep.subr.bf16.mxu1 %v30601_v20 }
 0x195   :  { %26499 = vmatpush3.bf16.msra.mxu0 %v30594_v14 }
 0x196   :  { %26595 = vmatpush3.bf16.msra.mxu1 %v30601_v20  ;;  %26501 = vmatprep.subr.bf16.mxu0 %v30718_v32 }
 0x197   :  { %26597 = vmatprep.subr.bf16.mxu1 %v30724_v8 }
 0x198   :  { %22670 = vmatmul.mubr.f32.vlgmr.msra.gmra.mrb[12].mxu0 %v30764_v37 }
 0x199   :  { %22784 = vmatmul.mubr.f32.vlgmr.msra.gmra.mrb[12].mxu1 %v30764_v37  ;;  %26503 = vmatpush3.bf16.msra.mxu0 %v30718_v32  ;;  %v2247_v32 = vand.u32 4294901760, %v1641_v48  ;;  %v30932_v37 = vsub.f32 %v1645_v10, %v2259_v38 }
 0x19a   :  { %22688 = vmatprep.mubr.f32.mxu0 %v30754_v39  ;;  %26599 = vmatpush3.bf16.msra.mxu1 %v30724_v8 }
 0x19b   :  { %22802 = vmatprep.mubr.f32.mxu1 %v30754_v39  ;;  %26505 = vmatprep.subr.bf16.mxu0 %v30730_v53  ;;  %v30879_v63 = vsub.f32 %v1641_v48, %v2247_v32  ;;  %v30882_v27 = vpack.c.bf16 %v2247_v32, %v2244_v61  ;;  %v30947_v61 = vsub.f32 %v1646_v43, %v2262_v0 }
 0x19c   :  { %26601 = vmatprep.subr.bf16.mxu1 %v30736_v42 }
 0x19d   :  { %26507 = vmatpush3.bf16.msra.mxu0 %v30730_v53  ;;  %v2346_v31 = vand.u32 4294901760, %v30879_v63  ;;  %v2381_v34 = vand.u32 4294901760, %v30947_v61 }
 0x19e   :  { %26603 = vmatpush3.bf16.msra.mxu1 %v30736_v42  ;;  %26509 = vmatprep.subr.bf16.mxu0 %v30742_v33 }
 0x19f   :  { %26605 = vmatprep.subr.bf16.mxu1 %v30744_v46  ;;  %v2347_v62 = vsub.f32 %v30879_v63, %v2346_v31 }
 0x1a1   :  { %26511 = vmatpush3.bf16.msra.mxu0 %v30742_v33  ;;  %v1642_v33 = vld [vmem:[%s34788_s4 + $0x10] sm:$0xff]  ;;  %v2348_v29 = vand.u32 4294901760, %v2347_v62 }
 0x1a2   :  { %26607 = vmatpush3.bf16.msra.mxu1 %v30744_v46  ;;  %26513 = vmatprep.subr.bf16.mxu0 %v30746_v44  ;;  %v2250_v9 = vand.u32 4294901760, %v1642_v33 }
 0x1a3   :  { %26609 = vmatprep.subr.bf16.mxu1 %v30748_v51 }
 0x1a4   :  { %v30904_v49 = vsub.f32 %v1642_v33, %v2250_v9  ;;  %v30952_v33 = vpack.c.bf16 %v2348_v29, %v2341_v58  ;;  %v30983_v58 = vpack.c.bf16 %v30879_v63, %v30875_v36  ;;  %v1633_v36 = vrot.slane %v30750_v50, 1 }
 0x1a5   :  { %26515 = vmatpush3.bf16.msra.mxu0 %v30746_v44  ;;  %v1643_v44 = vld [vmem:[%s34788_s4 + $0x18] sm:$0xff] }
 0x1a6   :  { %26611 = vmatpush3.bf16.msra.mxu1 %v30748_v51  ;;  %26517 = vmatprep.subr.bf16.mxu0 %v30513_v57  ;;  %v2253_v21 = vand.u32 4294901760, %v1643_v44  ;;  %v2353_v55 = vand.u32 4294901760, %v30904_v49  ;;  %35046 = vst [vmem:[#allocation5_spill] sm:$0xff] %v30952_v33  ;;  %35050 = vst [vmem:[#allocation10_spill] sm:$0xff] %v30983_v58 }
 0x1a7   :  { %26613 = vmatprep.subr.bf16.mxu1 %v30515_v2 }
 0x1a8   :  { %22689 = vmatmul.mubr.f32.vlgmr.msra.gmra.mrb[12].mxu0 %v30761_v6  ;;  %v30906_v30 = vsub.f32 %v1643_v44, %v2253_v21  ;;  %v2354_v12 = vsub.f32 %v30904_v49, %v2353_v55 }
 0x1a9   :  { %22803 = vmatmul.mubr.f32.vlgmr.msra.gmra.mrb[12].mxu1 %v30761_v6  ;;  %26519 = vmatpush3.bf16.msra.mxu0 %v30513_v57  ;;  %v30859_v57 = vsub.f32 %v2238_v5, %v30843_v35 }
 0x1aa   :  { %22707 = vmatprep.mubr.f32.mxu0 %v30754_v39  ;;  %26615 = vmatpush3.bf16.msra.mxu1 %v30515_v2  ;;  %v2360_v15 = vand.u32 4294901760, %v30906_v30  ;;  %v2355_v44 = vand.u32 4294901760, %v2354_v12  ;;  %v30989_v29 = vpack.c.bf16 %v30906_v30, %v30904_v49  ;;  %v30997_v12 = vpack.c.bf16 %v30932_v37, %v30924_v54 }
 0x1ab   :  { %22821 = vmatprep.mubr.f32.mxu1 %v30754_v39  ;;  %26521 = vmatprep.subr.bf16.mxu0 %v30533_v11  ;;  %v2318_v53 = vand.u32 4294901760, %v30859_v57  ;;  %v2265_v39 = vand.u32 4294901760, %v1647_v47 }
 0x1ac   :  { %26617 = vmatprep.subr.bf16.mxu1 %v30535_v19  ;;  %v2361_v5 = vsub.f32 %v30906_v30, %v2360_v15  ;;  %35051 = vst [vmem:[#allocation11_spill] sm:$0xff] %v30989_v29  ;;  %35052 = vst [vmem:[#allocation12_spill] sm:$0xff] %v30997_v12  ;;  %v1634_v30 = vrot.slane %v30756_v7, 1 }
 0x1ad   :  { %26523 = vmatpush3.bf16.msra.mxu0 %v30533_v11  ;;  %v1632_v11 = vsel %vm1630_vm1, 0.0, %v1627_v13  ;;  %v30934_v28 = vpack.c.bf16 %v2265_v39, %v2262_v0  ;;  %v2374_v13 = vand.u32 4294901760, %v30932_v37  ;;  %v30949_v32 = vsub.f32 %v1647_v47, %v2265_v39 }
 0x1ae   :  { %26619 = vmatpush3.bf16.msra.mxu1 %v30535_v19  ;;  %26525 = vmatprep.subr.bf16.mxu0 %v30556_v24  ;;  %v2241_v18 = vsel %vm1039_vm0, %v1632_v11, 0  ;;  %v2362_v11 = vand.u32 4294901760, %v2361_v5 }
 0x1af   :  { %26621 = vmatprep.subr.bf16.mxu1 %v30564_v60  ;;  %v30911_v23 = vand.u32 4294901760, %v2241_v18  ;;  %35045 = vst [vmem:[#allocation9_spill] sm:$0xff] %v30934_v28  ;;  %v2388_v10 = vand.u32 4294901760, %v30949_v32  ;;  %v31003_v5 = vpack.c.bf16 %v30949_v32, %v30947_v61 }
 0x1b1   :  { %26527 = vmatpush3.bf16.msra.mxu0 %v30556_v24  ;;  %v2319_v24 = vsub.f32 %v30859_v57, %v2318_v53  ;;  %v30930_v25 = vsub.f32 %v2241_v18, %v30911_v23  ;;  %v30965_v18 = vpack.c.bf16 %v2362_v11, %v2355_v44  ;;  %35053 = vst [vmem:[#allocation13_spill] sm:$0xff] %v31003_v5 }
 0x1b2   :  { %26623 = vmatpush3.bf16.msra.mxu1 %v30564_v60  ;;  %26529 = vmatprep.subr.bf16.mxu0 %v30594_v14  ;;  %v31044_v63 = vpack.c.bf16 %v2388_v10, %v2381_v34 }
 0x1b3   :  { %26625 = vmatprep.subr.bf16.mxu1 %v30601_v20  ;;  %v2320_v56 = vand.u32 4294901760, %v2319_v24  ;;  %v2328_v48 = vand.u32 4294901760, %v30930_v25  ;;  %v2375_v24 = vsub.f32 %v30932_v37, %v2374_v13  ;;  %35047 = vst [vmem:[#allocation6_spill] sm:$0xff] %v30965_v18 }
 0x1b4   :  { %35057 = vst [vmem:[#allocation17_spill] sm:$0xff] %v31044_v63 }
 0x1b5   :  { %26531 = vmatpush3.bf16.msra.mxu0 %v30594_v14  ;;  %v30909_v14 = vpack.c.bf16 %v2253_v21, %v2250_v9  ;;  %v2368_v9 = vsub.f32 %v30924_v54, %v2367_v59  ;;  %v2329_v21 = vsub.f32 %v30930_v25, %v2328_v48 }
 0x1b6   :  { %26627 = vmatpush3.bf16.msra.mxu1 %v30601_v20 }
 0x1b7   :  { %26629 = vmatprep.subr.bf16.mxu1 %v30882_v27  ;;  %v2369_v43 = vand.u32 4294901760, %v2368_v9  ;;  %v2330_v47 = vand.u32 4294901760, %v2329_v21 }
 0x1b8   :  { %22708 = vmatmul.mubr.f32.vlgmr.msra.gmra.mrb[12].mxu0 %v30761_v6 }
 0x1b9   :  { %22822 = vmatmul.mubr.f32.vlgmr.msra.gmra.mrb[12].mxu1 %v30761_v6  ;;  %v30927_v6 = vpack.c.bf16 %v2259_v38, %v2256_v17  ;;  %v2376_v17 = vand.u32 4294901760, %v2375_v24  ;;  %v2382_v38 = vsub.f32 %v30947_v61, %v2381_v34  ;;  %v20283_v61 = vld [vmem:[%s34788_s4 + $0x98] sm:$0xff] }
 0x1ba   :  { %26631 = vmatpush3.bf16.msra.mxu1 %v30882_v27  ;;  %22840 = vmatprep.mubr.f32.mxu1 %v2320_v56  ;;  %v2389_v56 = vsub.f32 %v30949_v32, %v2388_v10  ;;  %v2848_v24 = vand.u32 4294901760, %v20283_v61  ;;  %v20284_v10 = vld [vmem:[%s34788_s4 + $0xa0] sm:$0xff] }
 0x1bb   :  { %26633 = vmatprep.subr.bf16.mxu1 %v30909_v14  ;;  %35044 = vst [vmem:[#allocation4_spill] sm:$0xff] %v30927_v6  ;;  %v30973_v0 = vpack.c.bf16 %v2376_v17, %v2369_v43  ;;  %v2383_v39 = vand.u32 4294901760, %v2382_v38  ;;  %v20285_v43 = vld [vmem:[%s34788_s4 + $0xa8] sm:$0xff]  ;;  %v20286_v17 = vld [vmem:[%s34788_s4 + $0xb0] sm:$0xff]  ;;  %v20287_v38 = vld [vmem:[%s34788_s4 + $0xb8] sm:$0xff] }
 0x1bc   :  { %v2390_v45 = vand.u32 4294901760, %v2389_v56 }
 0x1bd   :  { %35048 = vst [vmem:[#allocation8_spill] sm:$0xff] %v30973_v0 }
 0x1be   :  { %26635 = vmatpush3.bf16.msra.mxu1 %v30909_v14  ;;  %v30977_v62 = vpack.c.bf16 %v2390_v45, %v2383_v39 }
 0x1bf   :  { %26637 = vmatprep.subr.bf16.mxu1 %v30927_v6 }
 0x1c0   :  { %35049 = vst [vmem:[#allocation7_spill] sm:$0xff] %v30977_v62 }
 0x1c2   :  { %26639 = vmatpush3.bf16.msra.mxu1 %v30927_v6 }
 0x1c3   :  { %26641 = vmatprep.subr.bf16.mxu1 %v30934_v28 }
 0x1c6   :  { %26643 = vmatpush3.bf16.msra.mxu1 %v30934_v28 }
 0x1c7   :  { %26645 = vmatprep.subr.bf16.mxu1 %v30952_v33 }
 0x1c9   :  { %22841 = vmatmul.mubr.f32.vlgmr.msra.gmra.mrb[12].mxu1 %v2330_v47 }
 0x1ca   :  { %26647 = vmatpush3.bf16.msra.mxu1 %v30952_v33  ;;  %22859 = vmatprep.mubr.f32.mxu1 %v30843_v35 }
 0x1cb   :  { %26649 = vmatprep.subr.bf16.mxu1 %v30965_v18 }
 0x1ce   :  { %26651 = vmatpush3.bf16.msra.mxu1 %v30965_v18 }
 0x1cf   :  { %26653 = vmatprep.subr.bf16.mxu1 %v30973_v0 }
 0x1d2   :  { %26655 = vmatpush3.bf16.msra.mxu1 %v30973_v0 }
 0x1d3   :  { %26657 = vmatprep.subr.bf16.mxu1 %v30977_v62 }
 0x1d6   :  { %26659 = vmatpush3.bf16.msra.mxu1 %v30977_v62 }
 0x1d7   :  { %26661 = vmatprep.subr.bf16.mxu1 %v30983_v58 }
 0x1d9   :  { %22860 = vmatmul.mubr.f32.vlgmr.msra.gmra.mrb[12].mxu1 %v30911_v23 }
 0x1da   :  { %26663 = vmatpush3.bf16.msra.mxu1 %v30983_v58  ;;  %22878 = vmatprep.mubr.f32.mxu1 %v30859_v57  ;;  %v31030_v57 = vpack.c.bf16 %v2360_v15, %v2353_v55  ;;  %v20280_v55 = vld [vmem:[%s34788_s4 + $0x80] sm:$0xff]  ;;  %v20281_v15 = vld [vmem:[%s34788_s4 + $0x88] sm:$0xff] }
 0x1db   :  { %26665 = vmatprep.subr.bf16.mxu1 %v30989_v29  ;;  %v2842_v37 = vand.u32 4294901760, %v20281_v15 }
 0x1dc   :  { %35055 = vst [vmem:[#allocation15_spill] sm:$0xff] %v31030_v57 }
 0x1dd   :  { %v31082_v11 = vsub.f32 %v20281_v15, %v2842_v37  ;;  %v2857_v15 = vand.u32 4294901760, %v20286_v17 }
 0x1de   :  { %26667 = vmatpush3.bf16.msra.mxu1 %v30989_v29 }
 0x1df   :  { %26669 = vmatprep.subr.bf16.mxu1 %v30997_v12  ;;  %v34854_v39 = vand.u32 4294901760, %v31082_v11 }
 0x1e2   :  { %26671 = vmatpush3.bf16.msra.mxu1 %v30997_v12 }
 0x1e3   :  { %26673 = vmatprep.subr.bf16.mxu1 %v31003_v5 }
 0x1e6   :  { %26675 = vmatpush3.bf16.msra.mxu1 %v31003_v5 }
 0x1e7   :  { %26677 = vmatprep.subr.bf16.mxu1 %v30882_v27 }
 0x1e9   :  { %22879 = vmatmul.mubr.f32.vlgmr.msra.gmra.mrb[12].mxu1 %v30930_v25  ;;  %v31022_v25 = vpack.c.bf16 %v2346_v31, %v2339_v3  ;;  %v1638_v3 = vsel %vm1637_vm2, %v1633_v36, 0.0  ;;  %v31109_v36 = vsub.f32 %v20283_v61, %v2848_v24 }
 0x1ea   :  { %26679 = vmatpush3.bf16.msra.mxu1 %v30882_v27  ;;  %22897 = vmatprep.mubr.f32.mxu1 %v2318_v53  ;;  %v31039_v53 = vpack.c.bf16 %v2374_v13, %v2367_v59  ;;  %v2833_v31 = vsel %vm1039_vm0, %v1638_v3, 0  ;;  %v1639_v59 = vsel %vm1637_vm2, %v1634_v30, 0.0  ;;  %v20282_v13 = vld [vmem:[%s34788_s4 + $0x90] sm:$0xff]  ;;  %v2854_v30 = vand.u32 4294901760, %v20285_v43 }
 0x1eb   :  { %26681 = vmatprep.subr.bf16.mxu1 %v30909_v14  ;;  %35054 = vst [vmem:[#allocation14_spill] sm:$0xff] %v31022_v25  ;;  %v31052_v49 = vand.u32 4294901760, %v2833_v31  ;;  %v2836_v32 = vsel %vm1039_vm0, %v1639_v59, 0  ;;  %v2845_v21 = vand.u32 4294901760, %v20282_v13 }
 0x1ec   :  { %35056 = vst [vmem:[#allocation16_spill] sm:$0xff] %v31039_v53  ;;  %v31096_v47 = vand.u32 4294901760, %v2836_v32 }
 0x1ed   :  { %v31066_v54 = vsub.f32 %v2833_v31, %v31052_v49  ;;  %v31107_v45 = vsub.f32 %v20282_v13, %v2845_v21  ;;  %v31112_v3 = vpack.c.bf16 %v2848_v24, %v2845_v21  ;;  %v2851_v31 = vand.u32 4294901760, %v20284_v10 }
 0x1ee   :  { %26683 = vmatpush3.bf16.msra.mxu1 %v30909_v14  ;;  %v2942_v13 = vsub.f32 %v31082_v11, %v34854_v39  ;;  %v31132_v24 = vsub.f32 %v20285_v43, %v2854_v30 }
 0x1ef   :  { %26685 = vmatprep.subr.bf16.mxu1 %v30927_v6  ;;  %35059 = vst [vmem:[#allocation19_spill] sm:$0xff] %v31112_v3  ;;  %v34858_v61 = vand.u32 4294901760, %v31107_v45  ;;  %v31128_v21 = vpack.c.bf16 %v2854_v30, %v2851_v31 }
 0x1f0   :  { %v2943_v39 = vand.u32 4294901760, %v2942_v13 }
 0x1f1   :  { %35060 = vst [vmem:[#allocation20_spill] sm:$0xff] %v31128_v21 }
 0x1f2   :  { %26687 = vmatpush3.bf16.msra.mxu1 %v30927_v6 }
 0x1f3   :  { %26689 = vmatprep.subr.bf16.mxu1 %v30934_v28 }
 0x1f6   :  { %26691 = vmatpush3.bf16.msra.mxu1 %v30934_v28 }
 0x1f7   :  { %26693 = vmatprep.subr.bf16.mxu1 %v31022_v25 }
 0x1f9   :  { %22898 = vmatmul.mubr.f32.vlgmr.msra.gmra.mrb[12].mxu1 %v2328_v48  ;;  %v34855_v48 = vand.u32 4294901760, %v31066_v54 }
 0x1fa   :  { %26695 = vmatpush3.bf16.msra.mxu1 %v31022_v25  ;;  %22916 = vmatprep.mubr.f32.mxu1 %v30843_v35 }
 0x1fb   :  { %26697 = vmatprep.subr.bf16.mxu1 %v31030_v57  ;;  %v2914_v34 = vsub.f32 %v31066_v54, %v34855_v48  ;;  %v2949_v48 = vsub.f32 %v31107_v45, %v34858_v61 }
 0x1fd   :  { %v2950_v61 = vand.u32 4294901760, %v2949_v48 }
 0x1fe   :  { %26699 = vmatpush3.bf16.msra.mxu1 %v31030_v57 }
 0x1ff   :  { %26701 = vmatprep.subr.bf16.mxu1 %v31039_v53 }
 0x202   :  { %26703 = vmatpush3.bf16.msra.mxu1 %v31039_v53 }
 0x203   :  { %26705 = vmatprep.subr.bf16.mxu1 %v31044_v63 }
 0x206   :  { %26707 = vmatpush3.bf16.msra.mxu1 %v31044_v63 }
 0x207   :  { %26709 = vmatprep.subr.bf16.mxu1 %v30882_v27 }
 0x209   :  { %22917 = vmatmul.mubr.f32.vlgmr.msra.gmra.mrb[12].mxu1 %v30911_v23 }
 0x20a   :  { %26711 = vmatpush3.bf16.msra.mxu1 %v30882_v27  ;;  %22935 = vmatprep.mubr.f32.mxu1 %v30843_v35  ;;  %v2839_v35 = vand.u32 4294901760, %v20280_v55 }
 0x20b   :  { %26713 = vmatprep.subr.bf16.mxu1 %v30909_v14 }
 0x20c   :  { %v31080_v44 = vsub.f32 %v20280_v55, %v2839_v35  ;;  %v31085_v9 = vpack.c.bf16 %v2842_v37, %v2839_v35  ;;  %v2915_v55 = vand.u32 4294901760, %v2914_v34  ;;  %v2860_v35 = vand.u32 4294901760, %v20287_v38 }
 0x20d   :  { %v31116_v37 = vsub.f32 %v2836_v32, %v31096_v47  ;;  %v31130_v32 = vsub.f32 %v20284_v10, %v2851_v31  ;;  %v31147_v31 = vsub.f32 %v20286_v17, %v2857_v15  ;;  %v35063_v17 = vand.u32 4294901760, %v31132_v24 }
 0x20e   :  { %26715 = vmatpush3.bf16.msra.mxu1 %v30909_v14  ;;  %35058 = vst [vmem:[#allocation18_spill] sm:$0xff] %v31085_v9  ;;  %v34853_v56 = vand.u32 4294901760, %v31080_v44  ;;  %v31134_v34 = vpack.c.bf16 %v2860_v35, %v2857_v15  ;;  %v31149_v30 = vsub.f32 %v20287_v38, %v2860_v35 }
 0x20f   :  { %26717 = vmatprep.subr.bf16.mxu1 %v30927_v6  ;;  %v34861_v10 = vand.u32 4294901760, %v31130_v32  ;;  %v2970_v38 = vsub.f32 %v31132_v24, %v35063_v17  ;;  %v2976_v15 = vand.u32 4294901760, %v31147_v31 }
 0x210   :  { %v2935_v59 = vsub.f32 %v31080_v44, %v34853_v56  ;;  %35061 = vst [vmem:[#allocation21_spill] sm:$0xff] %v31134_v34  ;;  %v2983_v35 = vand.u32 4294901760, %v31149_v30 }
 0x211   :  { %v2963_v43 = vsub.f32 %v31130_v32, %v34861_v10  ;;  %v2971_v48 = vand.u32 4294901760, %v2970_v38  ;;  %v31205_v38 = vpack.c.bf16 %v31149_v30, %v31147_v31 }
 0x212   :  { %26719 = vmatpush3.bf16.msra.mxu1 %v30927_v6  ;;  %v2936_v56 = vand.u32 4294901760, %v2935_v59  ;;  %v2984_v10 = vsub.f32 %v31149_v30, %v2983_v35  ;;  %v35073_v30 = vand.u32 4294901760, %v31082_v11 }
 0x213   :  { %26721 = vmatprep.subr.bf16.mxu1 %v30934_v28  ;;  %35070 = vst [vmem:[#allocation29_spill] sm:$0xff] %v31205_v38 }
 0x214   :  { %v31155_v13 = vpack.c.bf16 %v2943_v39, %v2936_v56 }
 0x216   :  { %26723 = vmatpush3.bf16.msra.mxu1 %v30934_v28  ;;  %35062 = vst [vmem:[#allocation22_spill] sm:$0xff] %v31155_v13 }
 0x217   :  { %26725 = vmatprep.subr.bf16.mxu1 %v31085_v9 }
 0x219   :  { %22936 = vmatmul.mubr.f32.vlgmr.msra.gmra.mrb[12].mxu1 %v30911_v23  ;;  %v34859_v23 = vand.u32 4294901760, %v31109_v36 }
 0x21a   :  { %26727 = vmatpush3.bf16.msra.mxu1 %v31085_v9  ;;  %22954 = vmatprep.mubr.f32.mxu1 %v2915_v55  ;;  %v34860_v55 = vand.u32 4294901760, %v31116_v37 }
 0x21b   :  { %26729 = vmatprep.subr.bf16.mxu1 %v31112_v3  ;;  %v2956_v63 = vsub.f32 %v31109_v36, %v34859_v23 }
 0x21c   :  { %v2924_v59 = vsub.f32 %v31116_v37, %v34860_v55  ;;  %v2977_v55 = vsub.f32 %v31147_v31, %v2976_v15  ;;  %v35072_v31 = vand.u32 4294901760, %v31080_v44 }
 0x21d   :  { %v2957_v23 = vand.u32 4294901760, %v2956_v63  ;;  %v2964_v63 = vand.u32 4294901760, %v2963_v43  ;;  %v31185_v43 = vpack.c.bf16 %v31082_v11, %v31080_v44  ;;  %v35079_v44 = vand.u32 4294901760, %v31130_v32 }
 0x21e   :  { %26731 = vmatpush3.bf16.msra.mxu1 %v31112_v3  ;;  %v2925_v56 = vand.u32 4294901760, %v2924_v59  ;;  %v2978_v59 = vand.u32 4294901760, %v2977_v55  ;;  %v31191_v55 = vpack.c.bf16 %v31109_v36, %v31107_v45  ;;  %v35080_v11 = vand.u32 4294901760, %v31132_v24 }
 0x21f   :  { %26733 = vmatprep.subr.bf16.mxu1 %v31128_v21  ;;  %v31167_v39 = vpack.c.bf16 %v2957_v23, %v2950_v61  ;;  %v31175_v17 = vpack.c.bf16 %v2971_v48, %v2964_v63  ;;  %v2985_v61 = vand.u32 4294901760, %v2984_v10  ;;  %35067 = vst [vmem:[#allocation26_spill] sm:$0xff] %v31185_v43  ;;  %v31199_v10 = vpack.c.bf16 %v31132_v24, %v31130_v32 }
 0x220   :  { %35068 = vst [vmem:[#allocation27_spill] sm:$0xff] %v31191_v55  ;;  %v31224_v63 = vpack.c.bf16 %v35073_v30, %v35072_v31  ;;  %v35076_v48 = vand.u32 4294901760, %v31109_v36  ;;  %v20291_v31 = vld [vmem:[%s34790_s6 + $0x58] sm:$0xff] }
 0x221   :  { %35064 = vst [vmem:[#allocation23_spill] sm:$0xff] %v31167_v39  ;;  %35065 = vst [vmem:[#allocation24_spill] sm:$0xff] %v31175_v17  ;;  %v31179_v23 = vpack.c.bf16 %v2985_v61, %v2978_v59  ;;  %v35078_v61 = vand.u32 4294901760, %v31116_v37 }
 0x222   :  { %26735 = vmatpush3.bf16.msra.mxu1 %v31128_v21  ;;  %35069 = vst [vmem:[#allocation28_spill] sm:$0xff] %v31199_v10  ;;  %35074 = vst [vmem:[#allocation30_spill] sm:$0xff] %v31224_v63 }
 0x223   :  { %26737 = vmatprep.subr.bf16.mxu1 %v31134_v34  ;;  %35066 = vst [vmem:[#allocation25_spill] sm:$0xff] %v31179_v23 }
 0x226   :  { %26739 = vmatpush3.bf16.msra.mxu1 %v31134_v34 }
 0x227   :  { %26741 = vmatprep.subr.bf16.mxu1 %v31155_v13 }
 0x229   :  { %22955 = vmatmul.mubr.f32.vlgmr.msra.gmra.mrb[12].mxu1 %v2925_v56  ;;  %v35071_v56 = vand.u32 4294901760, %v31066_v54 }
 0x22a   :  { %26743 = vmatpush3.bf16.msra.mxu1 %v31155_v13  ;;  %22973 = vmatprep.mubr.f32.mxu1 %v31052_v49 }
 0x22b   :  { %26745 = vmatprep.subr.bf16.mxu1 %v31167_v39 }
 0x22e   :  { %26747 = vmatpush3.bf16.msra.mxu1 %v31167_v39 }
 0x22f   :  { %26749 = vmatprep.subr.bf16.mxu1 %v31175_v17 }
 0x232   :  { %26751 = vmatpush3.bf16.msra.mxu1 %v31175_v17 }
 0x233   :  { %26753 = vmatprep.subr.bf16.mxu1 %v31179_v23 }
 0x236   :  { %26755 = vmatpush3.bf16.msra.mxu1 %v31179_v23 }
 0x237   :  { %26757 = vmatprep.subr.bf16.mxu1 %v31185_v43 }
 0x239   :  { %22974 = vmatmul.mubr.f32.vlgmr.msra.gmra.mrb[12].mxu1 %v31096_v47 }
 0x23a   :  { %26759 = vmatpush3.bf16.msra.mxu1 %v31185_v43  ;;  %22992 = vmatprep.mubr.f32.mxu1 %v31066_v54  ;;  %v35075_v54 = vand.u32 4294901760, %v31107_v45  ;;  %v31247_v45 = vpack.c.bf16 %v2983_v35, %v2976_v15  ;;  %v20290_v35 = vld [vmem:[%s34790_s6 + $0x50] sm:$0xff] }
 0x23b   :  { %26761 = vmatprep.subr.bf16.mxu1 %v31191_v55  ;;  %v3466_v30 = vand.u32 4294901760, %v20290_v35 }
 0x23c   :  { %v31232_v59 = vpack.c.bf16 %v35076_v48, %v35075_v54  ;;  %35082 = vst [vmem:[#allocation33_spill] sm:$0xff] %v31247_v45  ;;  %v3469_v54 = vand.u32 4294901760, %v20291_v31 }
 0x23e   :  { %26763 = vmatpush3.bf16.msra.mxu1 %v31191_v55  ;;  %35077 = vst [vmem:[#allocation31_spill] sm:$0xff] %v31232_v59  ;;  %v31292_v48 = vpack.c.bf16 %v3469_v54, %v3466_v30 }
 0x23f   :  { %26765 = vmatprep.subr.bf16.mxu1 %v31199_v10 }
 0x242   :  { %26767 = vmatpush3.bf16.msra.mxu1 %v31199_v10 }
 0x243   :  { %26769 = vmatprep.subr.bf16.mxu1 %v31205_v38 }
 0x246   :  { %26771 = vmatpush3.bf16.msra.mxu1 %v31205_v38 }
 0x247   :  { %26773 = vmatprep.subr.bf16.mxu1 %v31085_v9 }
 0x249   :  { %22993 = vmatmul.mubr.f32.vlgmr.msra.gmra.mrb[12].mxu1 %v31116_v37  ;;  %v20289_v37 = vld [vmem:[%s34790_s6 + $0x48] sm:$0xff] }
 0x24a   :  { %26775 = vmatpush3.bf16.msra.mxu1 %v31085_v9  ;;  %23011 = vmatprep.mubr.f32.mxu1 %v35071_v56  ;;  %v31243_v56 = vpack.c.bf16 %v35080_v11, %v35079_v44  ;;  %v3463_v24 = vand.u32 4294901760, %v20289_v37  ;;  %v20293_v44 = vld [vmem:[%s34790_s6 + $0x68] sm:$0xff] }
 0x24b   :  { %26777 = vmatprep.subr.bf16.mxu1 %v31112_v3 }
 0x24c   :  { %35081 = vst [vmem:[#allocation32_spill] sm:$0xff] %v31243_v56 }
 0x24e   :  { %26779 = vmatpush3.bf16.msra.mxu1 %v31112_v3 }
 0x24f   :  { %26781 = vmatprep.subr.bf16.mxu1 %v31128_v21 }
 0x252   :  { %26783 = vmatpush3.bf16.msra.mxu1 %v31128_v21 }
 0x253   :  { %26785 = vmatprep.subr.bf16.mxu1 %v31134_v34 }
 0x256   :  { %26787 = vmatpush3.bf16.msra.mxu1 %v31134_v34 }
 0x257   :  { %26789 = vmatprep.subr.bf16.mxu1 %v31224_v63 }
 0x259   :  { %23012 = vmatmul.mubr.f32.vlgmr.msra.gmra.mrb[12].mxu1 %v35078_v61  ;;  %v20292_v61 = vld [vmem:[%s34790_s6 + $0x60] sm:$0xff] }
 0x25a   :  { %26791 = vmatpush3.bf16.msra.mxu1 %v31224_v63  ;;  %23030 = vmatprep.mubr.f32.mxu1 %v31052_v49  ;;  %v3472_v11 = vand.u32 4294901760, %v20292_v61  ;;  %v20295_v63 = vld [vmem:[%s34790_s6 + $0x78] sm:$0xff] }
 0x25b   :  { %26793 = vmatprep.subr.bf16.mxu1 %v31232_v59  ;;  %v3481_v10 = vand.u32 4294901760, %v20295_v63 }
 0x25c   :  { %v3582_v53 = vsub.f32 %v20292_v61, %v3472_v11 }
 0x25e   :  { %26795 = vmatpush3.bf16.msra.mxu1 %v31232_v59  ;;  %v20294_v59 = vld [vmem:[%s34790_s6 + $0x70] sm:$0xff]  ;;  %v3583_v12 = vand.u32 4294901760, %v3582_v53 }
 0x25f   :  { %26797 = vmatprep.subr.bf16.mxu1 %v31243_v56  ;;  %v3478_v38 = vand.u32 4294901760, %v20294_v59 }
 0x261   :  { %v31312_v23 = vpack.c.bf16 %v3481_v10, %v3478_v38 }
 0x262   :  { %26799 = vmatpush3.bf16.msra.mxu1 %v31243_v56  ;;  %v3561_v56 = vsub.f32 %v20289_v37, %v3463_v24 }
 0x263   :  { %26801 = vmatprep.subr.bf16.mxu1 %v31247_v45 }
 0x264   :  { %v3562_v43 = vand.u32 4294901760, %v3561_v56 }
 0x266   :  { %26803 = vmatpush3.bf16.msra.mxu1 %v31247_v45  ;;  %v3563_v37 = vsub.f32 %v3561_v56, %v3562_v43 }
 0x267   :  { %26805 = vmatprep.subr.bf16.mxu1 %v31085_v9 }
 0x268   :  { %v3564_v39 = vand.u32 4294901760, %v3563_v37 }
 0x269   :  { %23031 = vmatmul.mubr.f32.vlgmr.msra.gmra.mrb[12].mxu1 %v31096_v47 }
 0x26a   :  { %26807 = vmatpush3.bf16.msra.mxu1 %v31085_v9  ;;  %23049 = vmatprep.mubr.f32.mxu1 %v31052_v49 }
 0x26b   :  { %26809 = vmatprep.subr.bf16.mxu1 %v31112_v3 }
 0x26e   :  { %26811 = vmatpush3.bf16.msra.mxu1 %v31112_v3 }
 0x26f   :  { %26813 = vmatprep.subr.bf16.mxu1 %v31128_v21 }
 0x272   :  { %26815 = vmatpush3.bf16.msra.mxu1 %v31128_v21 }
 0x273   :  { %26817 = vmatprep.subr.bf16.mxu1 %v31134_v34 }
 0x276   :  { %26819 = vmatpush3.bf16.msra.mxu1 %v31134_v34 }
 0x277   :  { %27109 = vmatprep.subr.bf16.mxu1 %v30515_v2 }
 0x279   :  { %23050 = vmatmul.mubr.f32.vlgmr.msra.gmra.mrb[12].mxu1 %v31096_v47  ;;  %v20288_v47 = vld [vmem:[%s34790_s6 + $0x40] sm:$0xff] }
 0x27a   :  { %27111 = vmatpush3.bf16.msra.mxu1 %v30515_v2  ;;  %v3460_v32 = vand.u32 4294901760, %v20288_v47 }
 0x27b   :  { %27113 = vmatprep.subr.bf16.mxu1 %v30535_v19 }
 0x27c   :  { %v31282_v15 = vpack.c.bf16 %v3463_v24, %v3460_v32  ;;  %v3554_v45 = vsub.f32 %v20288_v47, %v3460_v32  ;;  %v3568_v32 = vsub.f32 %v20290_v35, %v3466_v30  ;;  %v3575_v24 = vsub.f32 %v20291_v31, %v3469_v54 }
 0x27d   :  { %v3584_v31 = vsub.f32 %v3582_v53, %v3583_v12  ;;  %v3596_v54 = vsub.f32 %v20294_v59, %v3478_v38 }
 0x27e   :  { %27115 = vmatpush3.bf16.msra.mxu1 %v30535_v19  ;;  %26821 = vmatprep.subr.bf16.mxu0 %v31282_v15  ;;  %v3555_v55 = vand.u32 4294901760, %v3554_v45  ;;  %v3569_v13 = vand.u32 4294901760, %v3568_v32  ;;  %v3576_v34 = vand.u32 4294901760, %v3575_v24 }
 0x27f   :  { %27117 = vmatprep.subr.bf16.mxu1 %v30564_v60  ;;  %26823 = vmatpush3.bf16.msra.mxu0 %v31282_v15  ;;  %v3585_v37 = vand.u32 4294901760, %v3584_v31  ;;  %v3597_v62 = vand.u32 4294901760, %v3596_v54 }
 0x280   :  { %26825 = vmatprep.subr.bf16.mxu0 %v31292_v48  ;;  %v3556_v47 = vsub.f32 %v3554_v45, %v3555_v55  ;;  %v3570_v3 = vsub.f32 %v3568_v32, %v3569_v13  ;;  %v3577_v9 = vsub.f32 %v3575_v24, %v3576_v34  ;;  %v26884_v28 = vpack.c.bf16 %v3562_v43, %v3555_v55 }
 0x282   :  { %27119 = vmatpush3.bf16.msra.mxu1 %v30564_v60  ;;  %v3557_v17 = vand.u32 4294901760, %v3556_v47  ;;  %v3571_v25 = vand.u32 4294901760, %v3570_v3  ;;  %v3578_v5 = vand.u32 4294901760, %v3577_v9  ;;  %v3603_v47 = vsub.f32 %v20295_v63, %v3481_v10  ;;  %v20269_v10 = vld [vmem:[%s34791_s5] ss:$0 sm:$0xff] }
 0x283   :  { %27121 = vmatprep.subr.bf16.mxu1 %v30601_v20  ;;  %26827 = vmatpush3.bf16.msra.mxu0 %v31292_v48  ;;  %v26856_v3 = vpack.c.bf16 %v3575_v24, %v3568_v32 }
 0x284   :  { %v26836_v21 = vpack.c.bf16 %v3564_v39, %v3557_v17  ;;  %v26840_v35 = vpack.c.bf16 %v3578_v5, %v3571_v25  ;;  %v3604_v0 = vand.u32 4294901760, %v3603_v47  ;;  %v3598_v39 = vsub.f32 %v3596_v54, %v3597_v62 }
 0x285   :  { %v26888_v5 = vpack.c.bf16 %v3576_v34, %v3569_v13 }
 0x286   :  { %27123 = vmatpush3.bf16.msra.mxu1 %v30601_v20  ;;  %v3605_v17 = vsub.f32 %v3603_v47, %v3604_v0  ;;  %v3599_v33 = vand.u32 4294901760, %v3598_v39  ;;  %v31316_v6 = vpack.c.bf16 %v3604_v0, %v3597_v62  ;;  %v3441_v39 = vld [vmem:[%s34790_s6 + $0x18] sm:$0xff] }
 0x287   :  { %27125 = vmatprep.subr.bf16.mxu1 %v30629_v41 }
 0x288   :  { %v3606_v61 = vand.u32 4294901760, %v3605_v17 }
 0x28b   :  { %v31272_v49 = vpop.f32.mrb[12].mxu0 }
 0x28c   :  { %35083 = vst [vmem:[#allocation34_spill] sm:$0xff] %v31272_v49  ;;  %v31274_v36 = vpop.f32.mrb[13].mxu0  ;;  %v3475_v49 = vand.u32 4294901760, %v20293_v44 }
 0x28d   :  { %35084 = vst [vmem:[#allocation35_spill] sm:$0xff] %v31274_v36 }
 0x28e   :  { %v31302_v36 = vpack.c.bf16 %v3475_v49, %v3472_v11  ;;  %v3589_v57 = vsub.f32 %v20293_v44, %v3475_v49  ;;  %v26848_v49 = vpack.c.bf16 %v3606_v61, %v3599_v33  ;;  %v26852_v44 = vpack.c.bf16 %v3561_v56, %v3554_v45 }
 0x28f   :  { %v26864_v11 = vpack.c.bf16 %v3603_v47, %v3596_v54 }
 0x290   :  { %26829 = vmatprep.subr.bf16.mxu0 %v31302_v36  ;;  %v3590_v29 = vand.u32 4294901760, %v3589_v57  ;;  %v26860_v9 = vpack.c.bf16 %v3589_v57, %v3582_v53 }
 0x291   :  { %26831 = vmatpush3.bf16.msra.mxu0 %v31302_v36 }
 0x292   :  { %26833 = vmatprep.subr.bf16.mxu0 %v31312_v23  ;;  %v3591_v30 = vsub.f32 %v3589_v57, %v3590_v29  ;;  %v26892_v25 = vpack.c.bf16 %v3590_v29, %v3583_v12 }
 0x294   :  { %v3592_v58 = vand.u32 4294901760, %v3591_v30 }
 0x295   :  { %26835 = vmatpush3.bf16.msra.mxu0 %v31312_v23 }
 0x296   :  { %26837 = vmatprep.subr.bf16.mxu0 %v26836_v21  ;;  %v26844_v18 = vpack.c.bf16 %v3592_v58, %v3585_v37  ;;  %v3440_v37 = vld [vmem:[%s34790_s6 + $0x10] sm:$0xff] }
 0x34c   :  { %v23051_v38 = vpop.f32.mrb[12].mxu1 }
 0x34d   :  { %v3421_v58 = vadd.f32 %v23051_v38, %v20269_v10  ;;  %v3408_v63 = vpop.f32.mrb[13].mxu1  ;;  %v3445_v38 = vld [vmem:[%s34790_s6 + $0x38] sm:$0xff] }
 0x34e   :  { %v3420_v59 = vadd.f32 %v20269_v10, %v3408_v63  ;;  %v3444_v10 = vld [vmem:[%s34790_s6 + $0x30] sm:$0xff] }
 0x34f   :  { %v31321_v31 = vmax.f32 %v3421_v58, 0.0 }
 0x350   :  { %v31323_v33 = vmax.f32 %v3420_v59, 0.0 }
 0x351   :  { %v3457_v57 = vsel %vm1039_vm0, %v31321_v31, 0  ;;  %v3427_v30 = vrot.slane %v31321_v31, 7 }
 0x352   :  { %v31327_v53 = vand.u32 4294901760, %v3457_v57  ;;  %v3455_v0 = vsel %vm1039_vm0, %v31323_v33, 0 }
 0x353   :  { %v3532_v62 = vand.u32 4294901760, %v3455_v0  ;;  %v3431_v17 = vsel %vm1630_vm1, 0.0, %v3427_v30 }
 0x354   :  { %v3543_v29 = vsub.f32 %v3457_v57, %v31327_v53 }
 0x355   :  { %v3533_v12 = vsub.f32 %v3455_v0, %v3532_v62 }
 0x356   :  { %v3544_v34 = vand.u32 4294901760, %v3543_v29 }
 0x357   :  { %v3534_v13 = vand.u32 4294901760, %v3533_v12 }
 0x358   :  { %v3545_v43 = vsub.f32 %v3543_v29, %v3544_v34 }
 0x359   :  { %v3535_v55 = vsub.f32 %v3533_v12, %v3534_v13 }
 0x35a   :  { %v3546_v45 = vand.u32 4294901760, %v3545_v43 }
 0x35b   :  { %v3536_v56 = vand.u32 4294901760, %v3535_v55 }
 0x35d   :  { %23068 = vmatprep.mubr.f32.mxu0 %v3536_v56 }
 0x35e   :  { %23069 = vmatmul.mubr.f32.vlgmr.msra.gmra.mrb[14].mxu0 %v3546_v45 }
 0x35f   :  { %26839 = vmatpush3.bf16.msra.mxu0 %v26836_v21  ;;  %23087 = vmatprep.mubr.f32.mxu0 %v3532_v62 }
 0x360   :  { %26841 = vmatprep.subr.bf16.mxu0 %v26840_v35 }
 0x363   :  { %26843 = vmatpush3.bf16.msra.mxu0 %v26840_v35  ;;  %v3439_v35 = vld [vmem:[%s34790_s6 + $0x8] sm:$0xff] }
 0x364   :  { %26845 = vmatprep.subr.bf16.mxu0 %v26844_v18  ;;  %v4049_v54 = vand.u32 4294901760, %v3439_v35 }
 0x367   :  { %26847 = vmatpush3.bf16.msra.mxu0 %v26844_v18  ;;  %v3426_v18 = vrot.slane %v31323_v33, 7 }
 0x368   :  { %26849 = vmatprep.subr.bf16.mxu0 %v26848_v49 }
 0x369   :  { %v3430_v21 = vsel %vm1630_vm1, 0.0, %v3426_v18 }
 0x36a   :  { %v4040_v32 = vsel %vm1039_vm0, %v3430_v21, 0 }
 0x36b   :  { %26851 = vmatpush3.bf16.msra.mxu0 %v26848_v49  ;;  %v31347_v24 = vand.u32 4294901760, %v4040_v32 }
 0x36c   :  { %26853 = vmatprep.subr.bf16.mxu0 %v26852_v44 }
 0x36e   :  { %23088 = vmatmul.mubr.f32.vlgmr.msra.gmra.mrb[14].mxu0 %v31327_v53 }
 0x36f   :  { %26855 = vmatpush3.bf16.msra.mxu0 %v26852_v44  ;;  %23106 = vmatprep.mubr.f32.mxu0 %v3533_v12  ;;  %v4052_v44 = vand.u32 4294901760, %v3440_v37  ;;  %v4064_v12 = vand.u32 4294901760, %v3444_v10 }
 0x370   :  { %26857 = vmatprep.subr.bf16.mxu0 %v26856_v3 }
 0x371   :  { %v31399_v63 = vsub.f32 %v3440_v37, %v4052_v44 }
 0x373   :  { %26859 = vmatpush3.bf16.msra.mxu0 %v26856_v3  ;;  %v4055_v3 = vand.u32 4294901760, %v3441_v39  ;;  %v4155_v55 = vand.u32 4294901760, %v31399_v63 }
 0x374   :  { %26861 = vmatprep.subr.bf16.mxu0 %v26860_v9 }
 0x375   :  { %v31401_v59 = vsub.f32 %v3441_v39, %v4055_v3  ;;  %v31406_v0 = vpack.c.bf16 %v4055_v3, %v4052_v44  ;;  %v4156_v30 = vsub.f32 %v31399_v63, %v4155_v55 }
 0x377   :  { %26863 = vmatpush3.bf16.msra.mxu0 %v26860_v9  ;;  %v4043_v9 = vsel %vm1039_vm0, %v3431_v17, 0  ;;  %v4162_v56 = vand.u32 4294901760, %v31401_v59  ;;  %v31441_v17 = vsub.f32 %v3444_v10, %v4064_v12 }
 0x378   :  { %26865 = vmatprep.subr.bf16.mxu0 %v26864_v11  ;;  %v31403_v57 = vand.u32 4294901760, %v4043_v9 }
 0x37b   :  { %26867 = vmatpush3.bf16.msra.mxu0 %v26864_v11 }
 0x37c   :  { %26869 = vmatprep.subr.bf16.mxu0 %v31282_v15 }
 0x37e   :  { %23107 = vmatmul.mubr.f32.vlgmr.msra.gmra.mrb[14].mxu0 %v3543_v29 }
 0x37f   :  { %26871 = vmatpush3.bf16.msra.mxu0 %v31282_v15  ;;  %23125 = vmatprep.mubr.f32.mxu0 %v3534_v13 }
 0x380   :  { %26873 = vmatprep.subr.bf16.mxu0 %v31292_v48 }
 0x383   :  { %26875 = vmatpush3.bf16.msra.mxu0 %v31292_v48 }
 0x384   :  { %26877 = vmatprep.subr.bf16.mxu0 %v31302_v36 }
 0x387   :  { %26879 = vmatpush3.bf16.msra.mxu0 %v31302_v36 }
 0x388   :  { %26881 = vmatprep.subr.bf16.mxu0 %v31312_v23 }
 0x38b   :  { %26883 = vmatpush3.bf16.msra.mxu0 %v31312_v23 }
 0x38c   :  { %26885 = vmatprep.subr.bf16.mxu0 %v26884_v28 }
 0x38e   :  { %23126 = vmatmul.mubr.f32.vlgmr.msra.gmra.mrb[14].mxu0 %v3544_v34  ;;  %v4067_v34 = vand.u32 4294901760, %v3445_v38 }
 0x38f   :  { %26887 = vmatpush3.bf16.msra.mxu0 %v26884_v28  ;;  %23144 = vmatprep.mubr.f32.mxu0 %v3532_v62  ;;  %v3438_v28 = vld [vmem:[%s34790_s6] sm:$0xff] }
 0x390   :  { %26889 = vmatprep.subr.bf16.mxu0 %v26888_v5  ;;  %v31443_v44 = vsub.f32 %v3445_v38, %v4067_v34  ;;  %v4183_v38 = vand.u32 4294901760, %v31441_v17 }
 0x393   :  { %26891 = vmatpush3.bf16.msra.mxu0 %v26888_v5  ;;  %v3442_v5 = vld [vmem:[%s34790_s6 + $0x20] sm:$0xff] }
 0x394   :  { %26893 = vmatprep.subr.bf16.mxu0 %v26892_v25 }
 0x397   :  { %26895 = vmatpush3.bf16.msra.mxu0 %v26892_v25 }
 0x398   :  { %26897 = vmatprep.subr.bf16.mxu0 %v31316_v6 }
 0x39b   :  { %26899 = vmatpush3.bf16.msra.mxu0 %v31316_v6  ;;  %v31359_v6 = vsub.f32 %v4040_v32, %v31347_v24  ;;  %v31428_v32 = vpack.c.bf16 %v4067_v34, %v4064_v12 }
 0x39c   :  { %26901 = vmatprep.subr.bf16.mxu0 %v31282_v15 }
 0x39d   :  { %v4120_v47 = vand.u32 4294901760, %v31359_v6 }
 0x39e   :  { %23145 = vmatmul.mubr.f32.vlgmr.msra.gmra.mrb[14].mxu0 %v31327_v53 }
 0x39f   :  { %26903 = vmatpush3.bf16.msra.mxu0 %v31282_v15  ;;  %23163 = vmatprep.mubr.f32.mxu0 %v3532_v62  ;;  %v4046_v15 = vand.u32 4294901760, %v3438_v28  ;;  %v4121_v11 = vsub.f32 %v31359_v6, %v4120_v47 }
 0x3a0   :  { %26905 = vmatprep.subr.bf16.mxu0 %v31292_v48 }
 0x3a1   :  { %v31372_v61 = vsub.f32 %v3438_v28, %v4046_v15  ;;  %v31378_v49 = vpack.c.bf16 %v4049_v54, %v4046_v15  ;;  %v4122_v29 = vand.u32 4294901760, %v4121_v11  ;;  %v4163_v15 = vsub.f32 %v31401_v59, %v4162_v56 }
 0x3a3   :  { %26907 = vmatpush3.bf16.msra.mxu0 %v31292_v48  ;;  %v31375_v48 = vsub.f32 %v3439_v35, %v4049_v54  ;;  %v4141_v25 = vand.u32 4294901760, %v31372_v61  ;;  %v4164_v11 = vand.u32 4294901760, %v4163_v15 }
 0x3a4   :  { %26909 = vmatprep.subr.bf16.mxu0 %v31302_v36 }
 0x3a5   :  { %v4148_v58 = vand.u32 4294901760, %v31375_v48  ;;  %v4142_v13 = vsub.f32 %v31372_v61, %v4141_v25 }
 0x3a7   :  { %26911 = vmatpush3.bf16.msra.mxu0 %v31302_v36  ;;  %v3443_v36 = vld [vmem:[%s34790_s6 + $0x28] sm:$0xff]  ;;  %v4149_v43 = vsub.f32 %v31375_v48, %v4148_v58  ;;  %v4143_v28 = vand.u32 4294901760, %v4142_v13  ;;  %v4184_v13 = vsub.f32 %v31441_v17, %v4183_v38 }
 0x3a8   :  { %26913 = vmatprep.subr.bf16.mxu0 %v31312_v23  ;;  %v4061_v62 = vand.u32 4294901760, %v3443_v36 }
 0x3a9   :  { %v4150_v35 = vand.u32 4294901760, %v4149_v43 }
 0x3aa   :  { %v31426_v21 = vsub.f32 %v3443_v36, %v4061_v62 }
 0x3ab   :  { %26915 = vmatpush3.bf16.msra.mxu0 %v31312_v23  ;;  %v4058_v23 = vand.u32 4294901760, %v3442_v5  ;;  %v26932_v3 = vpack.c.bf16 %v4150_v35, %v4143_v28  ;;  %v4185_v35 = vand.u32 4294901760, %v4184_v13 }
 0x3ac   :  { %26917 = vmatprep.subr.bf16.mxu0 %v31378_v49  ;;  %v4176_v39 = vand.u32 4294901760, %v31426_v21 }
 0x3ad   :  { %v31418_v45 = vsub.f32 %v3442_v5, %v4058_v23  ;;  %v31424_v18 = vpack.c.bf16 %v4061_v62, %v4058_v23  ;;  %v4190_v23 = vand.u32 4294901760, %v31443_v44 }
 0x3ae   :  { %23164 = vmatmul.mubr.f32.vlgmr.msra.gmra.mrb[14].mxu0 %v31327_v53  ;;  %v31421_v53 = vsub.f32 %v4043_v9, %v31403_v57  ;;  %v4157_v9 = vand.u32 4294901760, %v4156_v30  ;;  %v4177_v10 = vsub.f32 %v31426_v21, %v4176_v39 }
 0x3af   :  { %26919 = vmatpush3.bf16.msra.mxu0 %v31378_v49  ;;  %23182 = vmatprep.mubr.f32.mxu0 %v4122_v29  ;;  %v4169_v54 = vand.u32 4294901760, %v31418_v45  ;;  %v4191_v43 = vsub.f32 %v31443_v44, %v4190_v23 }
 0x3b0   :  { %26921 = vmatprep.subr.bf16.mxu0 %v31406_v0  ;;  %v4130_v37 = vand.u32 4294901760, %v31421_v53  ;;  %v26936_v62 = vpack.c.bf16 %v4164_v11, %v4157_v9  ;;  %v4178_v34 = vand.u32 4294901760, %v4177_v10  ;;  %v26948_v9 = vpack.c.bf16 %v31375_v48, %v31372_v61 }
 0x3b1   :  { %v4170_v5 = vsub.f32 %v31418_v45, %v4169_v54  ;;  %v4192_v30 = vand.u32 4294901760, %v4191_v43  ;;  %v26952_v11 = vpack.c.bf16 %v31401_v59, %v31399_v63  ;;  %v3432_v61 = vrot.slane %v31323_v33, 1  ;;  %v20296_v59 = vld [vmem:[%s34790_s6 + $0x80] sm:$0xff] }
 0x3b2   :  { %v4131_v36 = vsub.f32 %v31421_v53, %v4130_v37  ;;  %v26992_v48 = vpack.c.bf16 %v4190_v23, %v4183_v38  ;;  %v3433_v33 = vrot.slane %v31321_v31, 1  ;;  %v4641_v31 = vand.u32 4294901760, %v20296_v59  ;;  %v20300_v38 = vld [vmem:[%s34790_s6 + $0xa0] sm:$0xff] }
 0x3b3   :  { %26923 = vmatpush3.bf16.msra.mxu0 %v31406_v0  ;;  %v4171_v29 = vand.u32 4294901760, %v4170_v5  ;;  %v26944_v15 = vpack.c.bf16 %v4192_v30, %v4185_v35  ;;  %v26960_v5 = vpack.c.bf16 %v31443_v44, %v31441_v17 }
 0x3b4   :  { %26925 = vmatprep.subr.bf16.mxu0 %v31424_v18  ;;  %v4132_v12 = vand.u32 4294901760, %v4131_v36 }
 0x3b5   :  { %v26940_v28 = vpack.c.bf16 %v4178_v34, %v4171_v29  ;;  %v20303_v29 = vld [vmem:[%s34790_s6 + $0xb8] sm:$0xff] }
 0x3b7   :  { %26927 = vmatpush3.bf16.msra.mxu0 %v31424_v18 }
 0x3b8   :  { %26929 = vmatprep.subr.bf16.mxu0 %v31428_v32 }
 0x3bb   :  { %26931 = vmatpush3.bf16.msra.mxu0 %v31428_v32 }
 0x3bc   :  { %26933 = vmatprep.subr.bf16.mxu0 %v26932_v3 }
 0x3be   :  { %23183 = vmatmul.mubr.f32.vlgmr.msra.gmra.mrb[14].mxu0 %v4132_v12 }
 0x3bf   :  { %26935 = vmatpush3.bf16.msra.mxu0 %v26932_v3  ;;  %23201 = vmatprep.mubr.f32.mxu0 %v31347_v24  ;;  %v26956_v3 = vpack.c.bf16 %v31426_v21, %v31418_v45  ;;  %v20298_v21 = vld [vmem:[%s34790_s6 + $0x90] sm:$0xff] }
 0x3c0   :  { %26937 = vmatprep.subr.bf16.mxu0 %v26936_v62  ;;  %v4647_v44 = vand.u32 4294901760, %v20298_v21 }
 0x3c2   :  { %v31553_v13 = vsub.f32 %v20298_v21, %v4647_v44 }
 0x3c3   :  { %26939 = vmatpush3.bf16.msra.mxu0 %v26936_v62  ;;  %v20302_v62 = vld [vmem:[%s34790_s6 + $0xb0] sm:$0xff] }
 0x3c4   :  { %26941 = vmatprep.subr.bf16.mxu0 %v26940_v28 }
 0x3c7   :  { %26943 = vmatpush3.bf16.msra.mxu0 %v26940_v28 }
 0x3c8   :  { %26945 = vmatprep.subr.bf16.mxu0 %v26944_v15 }
 0x3cb   :  { %26947 = vmatpush3.bf16.msra.mxu0 %v26944_v15 }
 0x3cc   :  { %26949 = vmatprep.subr.bf16.mxu0 %v26948_v9 }
 0x3ce   :  { %23202 = vmatmul.mubr.f32.vlgmr.msra.gmra.mrb[14].mxu0 %v31403_v57 }
 0x3cf   :  { %26951 = vmatpush3.bf16.msra.mxu0 %v26948_v9  ;;  %23220 = vmatprep.mubr.f32.mxu0 %v31359_v6  ;;  %v26984_v6 = vpack.c.bf16 %v4162_v56, %v4155_v55  ;;  %v20297_v55 = vld [vmem:[%s34790_s6 + $0x88] sm:$0xff]  ;;  %v4659_v9 = vand.u32 4294901760, %v20302_v62 }
 0x3d0   :  { %26953 = vmatprep.subr.bf16.mxu0 %v26952_v11 }
 0x3d3   :  { %26955 = vmatpush3.bf16.msra.mxu0 %v26952_v11  ;;  %v4662_v11 = vand.u32 4294901760, %v20303_v29 }
 0x3d4   :  { %26957 = vmatprep.subr.bf16.mxu0 %v26956_v3 }
 0x3d5   :  { %v31595_v21 = vsub.f32 %v20303_v29, %v4662_v11 }
 0x3d7   :  { %26959 = vmatpush3.bf16.msra.mxu0 %v26956_v3 }
 0x3d8   :  { %26961 = vmatprep.subr.bf16.mxu0 %v26960_v5 }
 0x3db   :  { %26963 = vmatpush3.bf16.msra.mxu0 %v26960_v5 }
 0x3dc   :  { %26965 = vmatprep.subr.bf16.mxu0 %v31378_v49 }
 0x3de   :  { %23221 = vmatmul.mubr.f32.vlgmr.msra.gmra.mrb[14].mxu0 %v31421_v53  ;;  %v26980_v53 = vpack.c.bf16 %v4148_v58, %v4141_v25  ;;  %v3436_v25 = vsel %vm1637_vm2, %v3432_v61, 0.0 }
 0x3df   :  { %26967 = vmatpush3.bf16.msra.mxu0 %v31378_v49  ;;  %23239 = vmatprep.mubr.f32.mxu0 %v4120_v47  ;;  %v26988_v47 = vpack.c.bf16 %v4176_v39, %v4169_v54  ;;  %v4635_v58 = vsel %vm1039_vm0, %v3436_v25, 0  ;;  %v20299_v54 = vld [vmem:[%s34790_s6 + $0x98] sm:$0xff] }
 0x3e0   :  { %26969 = vmatprep.subr.bf16.mxu0 %v31406_v0  ;;  %v31498_v63 = vand.u32 4294901760, %v4635_v58  ;;  %v4650_v36 = vand.u32 4294901760, %v20299_v54 }
 0x3e2   :  { %v31512_v56 = vsub.f32 %v4635_v58, %v31498_v63  ;;  %v31555_v43 = vsub.f32 %v20299_v54, %v4650_v36  ;;  %v31558_v28 = vpack.c.bf16 %v4650_v36, %v4647_v44 }
 0x3e3   :  { %26971 = vmatpush3.bf16.msra.mxu0 %v31406_v0 }
 0x3e4   :  { %26973 = vmatprep.subr.bf16.mxu0 %v31424_v18  ;;  %v4715_v45 = vand.u32 4294901760, %v31512_v56 }
 0x3e6   :  { %v4716_v10 = vsub.f32 %v31512_v56, %v4715_v45 }
 0x3e7   :  { %26975 = vmatpush3.bf16.msra.mxu0 %v31424_v18 }
 0x3e8   :  { %26977 = vmatprep.subr.bf16.mxu0 %v31428_v32  ;;  %v4717_v30 = vand.u32 4294901760, %v4716_v10 }
 0x3eb   :  { %26979 = vmatpush3.bf16.msra.mxu0 %v31428_v32 }
 0x3ec   :  { %26981 = vmatprep.subr.bf16.mxu0 %v26980_v53 }
 0x3ee   :  { %23240 = vmatmul.mubr.f32.vlgmr.msra.gmra.mrb[14].mxu0 %v4130_v37 }
 0x3ef   :  { %26983 = vmatpush3.bf16.msra.mxu0 %v26980_v53  ;;  %23258 = vmatprep.mubr.f32.mxu0 %v31347_v24  ;;  %v4750_v53 = vand.u32 4294901760, %v31553_v13 }
 0x3f0   :  { %26985 = vmatprep.subr.bf16.mxu0 %v26984_v6 }
 0x3f3   :  { %26987 = vmatpush3.bf16.msra.mxu0 %v26984_v6  ;;  %v4757_v6 = vand.u32 4294901760, %v31555_v43 }
 0x3f4   :  { %26989 = vmatprep.subr.bf16.mxu0 %v26988_v47 }
 0x3f7   :  { %26991 = vmatpush3.bf16.msra.mxu0 %v26988_v47 }
 0x3f8   :  { %26993 = vmatprep.subr.bf16.mxu0 %v26992_v48 }
 0x3fb   :  { %26995 = vmatpush3.bf16.msra.mxu0 %v26992_v48  ;;  %v31580_v48 = vpack.c.bf16 %v4662_v11, %v4659_v9 }
 0x3fc   :  { %26997 = vmatprep.subr.bf16.mxu0 %v31378_v49 }
 0x3fe   :  { %23259 = vmatmul.mubr.f32.vlgmr.msra.gmra.mrb[14].mxu0 %v31403_v57 }
 0x3ff   :  { %26999 = vmatpush3.bf16.msra.mxu0 %v31378_v49  ;;  %23277 = vmatprep.mubr.f32.mxu0 %v31347_v24  ;;  %v3437_v49 = vsel %vm1637_vm2, %v3433_v33, 0.0  ;;  %v4644_v24 = vand.u32 4294901760, %v20297_v55 }
 0x400   :  { %27001 = vmatprep.subr.bf16.mxu0 %v31406_v0  ;;  %v4638_v37 = vsel %vm1039_vm0, %v3437_v49, 0 }
 0x401   :  { %v31528_v39 = vsub.f32 %v20297_v55, %v4644_v24  ;;  %v31531_v17 = vpack.c.bf16 %v4644_v24, %v4641_v31  ;;  %v31542_v23 = vand.u32 4294901760, %v4638_v37  ;;  %v4758_v55 = vsub.f32 %v31555_v43, %v4757_v6 }
 0x402   :  { %v31593_v24 = vsub.f32 %v20302_v62, %v4659_v9  ;;  %v4785_v62 = vand.u32 4294901760, %v31595_v21 }
 0x403   :  { %27003 = vmatpush3.bf16.msra.mxu0 %v31406_v0  ;;  %v31526_v0 = vsub.f32 %v20296_v59, %v4641_v31  ;;  %v4743_v34 = vand.u32 4294901760, %v31528_v39  ;;  %v31561_v15 = vsub.f32 %v4638_v37, %v31542_v23  ;;  %v4751_v59 = vsub.f32 %v31553_v13, %v4750_v53 }
 0x404   :  { %27005 = vmatprep.subr.bf16.mxu0 %v31424_v18  ;;  %v4759_v36 = vand.u32 4294901760, %v4758_v55  ;;  %v4786_v11 = vsub.f32 %v31595_v21, %v4785_v62  ;;  %v27048_v55 = vpack.c.bf16 %v31555_v43, %v31553_v13 }
 0x405   :  { %v4736_v12 = vand.u32 4294901760, %v31526_v0  ;;  %v4744_v5 = vsub.f32 %v31528_v39, %v4743_v34  ;;  %v4725_v25 = vand.u32 4294901760, %v31561_v15  ;;  %v4752_v44 = vand.u32 4294901760, %v4751_v59 }
 0x406   :  { %v27044_v59 = vpack.c.bf16 %v31528_v39, %v31526_v0  ;;  %v20270_v39 = vld [vmem:[%s34792_s7] ss:$0 sm:$0xff] }
 0x407   :  { %27007 = vmatpush3.bf16.msra.mxu0 %v31424_v18  ;;  %v20301_v18 = vld [vmem:[%s34790_s6 + $0xa8] sm:$0xff]  ;;  %v4737_v3 = vsub.f32 %v31526_v0, %v4736_v12  ;;  %v4745_v33 = vand.u32 4294901760, %v4744_v5  ;;  %v4726_v54 = vsub.f32 %v31561_v15, %v4725_v25 }
 0x408   :  { %27009 = vmatprep.subr.bf16.mxu0 %v31428_v32  ;;  %v4656_v35 = vand.u32 4294901760, %v20301_v18 }
 0x409   :  { %v4738_v58 = vand.u32 4294901760, %v4737_v3  ;;  %v4727_v29 = vand.u32 4294901760, %v4726_v54 }
 0x40a   :  { %v31578_v61 = vsub.f32 %v20301_v18, %v4656_v35  ;;  %v4778_v18 = vand.u32 4294901760, %v31593_v24 }
 0x40b   :  { %27011 = vmatpush3.bf16.msra.mxu0 %v31428_v32  ;;  %v4653_v32 = vand.u32 4294901760, %v20300_v38  ;;  %v27028_v37 = vpack.c.bf16 %v4745_v33, %v4738_v58  ;;  %v4787_v58 = vand.u32 4294901760, %v4786_v11 }
 0x40c   :  { %27013 = vmatprep.subr.bf16.mxu0 %v31531_v17  ;;  %v4771_v31 = vand.u32 4294901760, %v31578_v61  ;;  %v4779_v9 = vsub.f32 %v31593_v24, %v4778_v18  ;;  %v27088_v0 = vpack.c.bf16 %v4785_v62, %v4778_v18  ;;  %v35090_v18 = vld [vmem:[#allocation7_spill] sm:$0xff]  ;;  %v35091_v62 = vld [vmem:[#allocation10_spill] sm:$0xff] }
 0x40d   :  { %v31576_v47 = vsub.f32 %v20300_v38, %v4653_v32 }
 0x40e   :  { %23278 = vmatmul.mubr.f32.vlgmr.msra.gmra.mrb[14].mxu0 %v31403_v57  ;;  %v31574_v57 = vpack.c.bf16 %v4656_v35, %v4653_v32  ;;  %v4772_v38 = vsub.f32 %v31578_v61, %v4771_v31  ;;  %v27032_v32 = vpack.c.bf16 %v4759_v36, %v4752_v44  ;;  %v4780_v5 = vand.u32 4294901760, %v4779_v9  ;;  %v35087_v36 = vld [vmem:[#allocation5_spill] sm:$0xff]  ;;  %v35096_v9 = vld [vmem:[#allocation15_spill] sm:$0xff] }
 0x40f   :  { %27015 = vmatpush3.bf16.msra.mxu0 %v31531_v17  ;;  %23296 = vmatprep.mubr.f32.mxu0 %v4717_v30  ;;  %v4764_v49 = vand.u32 4294901760, %v31576_v47  ;;  %v27052_v54 = vpack.c.bf16 %v31578_v61, %v31576_v47 }
 0x410   :  { %27017 = vmatprep.subr.bf16.mxu0 %v31558_v28  ;;  %v4773_v30 = vand.u32 4294901760, %v4772_v38  ;;  %v27040_v33 = vpack.c.bf16 %v4787_v58, %v4780_v5  ;;  %v35089_v38 = vld [vmem:[#allocation8_spill] sm:$0xff]  ;;  %v35098_v58 = vld [vmem:[#allocation17_spill] sm:$0xff] }
 0x411   :  { %v4765_v10 = vsub.f32 %v31576_v47, %v4764_v49 }
 0x413   :  { %27019 = vmatpush3.bf16.msra.mxu0 %v31558_v28  ;;  %v4766_v35 = vand.u32 4294901760, %v4765_v10  ;;  %v35088_v10 = vld [vmem:[#allocation6_spill] sm:$0xff] }
 0x414   :  { %27021 = vmatprep.subr.bf16.mxu0 %v31574_v57 }
 0x415   :  { %v27036_v3 = vpack.c.bf16 %v4773_v30, %v4766_v35  ;;  %v35094_v35 = vld [vmem:[#allocation13_spill] sm:$0xff]  ;;  %v35095_v30 = vld [vmem:[#allocation14_spill] sm:$0xff] }
 0x417   :  { %27023 = vmatpush3.bf16.msra.mxu0 %v31574_v57 }
 0x418   :  { %27025 = vmatprep.subr.bf16.mxu0 %v31580_v48 }
 0x41b   :  { %27027 = vmatpush3.bf16.msra.mxu0 %v31580_v48 }
 0x41c   :  { %27029 = vmatprep.subr.bf16.mxu0 %v27028_v37 }
 0x41e   :  { %23297 = vmatmul.mubr.f32.vlgmr.msra.gmra.mrb[14].mxu0 %v4727_v29  ;;  %v35092_v29 = vld [vmem:[#allocation11_spill] sm:$0xff] }
 0x41f   :  { %27031 = vmatpush3.bf16.msra.mxu0 %v27028_v37  ;;  %23315 = vmatprep.mubr.f32.mxu0 %v31498_v63  ;;  %v27056_v37 = vpack.c.bf16 %v31595_v21, %v31593_v24  ;;  %v27076_v24 = vpack.c.bf16 %v4743_v34, %v4736_v12 }
 0x420   :  { %27033 = vmatprep.subr.bf16.mxu0 %v27032_v32 }
 0x423   :  { %27035 = vmatpush3.bf16.msra.mxu0 %v27032_v32  ;;  %v35093_v32 = vld [vmem:[#allocation12_spill] sm:$0xff] }
 0x424   :  { %27037 = vmatprep.subr.bf16.mxu0 %v27036_v3 }
 0x427   :  { %27039 = vmatpush3.bf16.msra.mxu0 %v27036_v3  ;;  %v35097_v3 = vld [vmem:[#allocation16_spill] sm:$0xff] }
 0x428   :  { %27041 = vmatprep.subr.bf16.mxu0 %v27040_v33 }
 0x42b   :  { %27043 = vmatpush3.bf16.msra.mxu0 %v27040_v33 }
 0x42c   :  { %27045 = vmatprep.subr.bf16.mxu0 %v27044_v59 }
 0x42e   :  { %23316 = vmatmul.mubr.f32.vlgmr.msra.gmra.mrb[14].mxu0 %v31542_v23 }
 0x42f   :  { %27047 = vmatpush3.bf16.msra.mxu0 %v27044_v59  ;;  %23334 = vmatprep.mubr.f32.mxu0 %v31512_v56  ;;  %v27080_v56 = vpack.c.bf16 %v4757_v6, %v4750_v53 }
 0x430   :  { %27049 = vmatprep.subr.bf16.mxu0 %v27048_v55 }
 0x433   :  { %27051 = vmatpush3.bf16.msra.mxu0 %v27048_v55 }
 0x434   :  { %27053 = vmatprep.subr.bf16.mxu0 %v27052_v54 }
 0x437   :  { %27055 = vmatpush3.bf16.msra.mxu0 %v27052_v54 }
 0x438   :  { %27057 = vmatprep.subr.bf16.mxu0 %v27056_v37 }
 0x43b   :  { %27059 = vmatpush3.bf16.msra.mxu0 %v27056_v37 }
 0x43c   :  { %27061 = vmatprep.subr.bf16.mxu0 %v31531_v17 }
 0x43e   :  { %23335 = vmatmul.mubr.f32.vlgmr.msra.gmra.mrb[14].mxu0 %v31561_v15 }
 0x43f   :  { %27063 = vmatpush3.bf16.msra.mxu0 %v31531_v17  ;;  %23353 = vmatprep.mubr.f32.mxu0 %v4715_v45  ;;  %v27084_v45 = vpack.c.bf16 %v4771_v31, %v4764_v49 }
 0x440   :  { %27065 = vmatprep.subr.bf16.mxu0 %v31558_v28 }
 0x443   :  { %27067 = vmatpush3.bf16.msra.mxu0 %v31558_v28 }
 0x444   :  { %27069 = vmatprep.subr.bf16.mxu0 %v31574_v57 }
 0x447   :  { %27071 = vmatpush3.bf16.msra.mxu0 %v31574_v57 }
 0x448   :  { %27073 = vmatprep.subr.bf16.mxu0 %v31580_v48 }
 0x44b   :  { %27075 = vmatpush3.bf16.msra.mxu0 %v31580_v48 }
 0x44c   :  { %27077 = vmatprep.subr.bf16.mxu0 %v27076_v24 }
 0x44e   :  { %23354 = vmatmul.mubr.f32.vlgmr.msra.gmra.mrb[14].mxu0 %v4725_v25 }
 0x44f   :  { %27079 = vmatpush3.bf16.msra.mxu0 %v27076_v24  ;;  %23372 = vmatprep.mubr.f32.mxu0 %v31498_v63 }
 0x450   :  { %27081 = vmatprep.subr.bf16.mxu0 %v27080_v56 }
 0x453   :  { %27083 = vmatpush3.bf16.msra.mxu0 %v27080_v56 }
 0x454   :  { %27085 = vmatprep.subr.bf16.mxu0 %v27084_v45 }
 0x457   :  { %27087 = vmatpush3.bf16.msra.mxu0 %v27084_v45 }
 0x458   :  { %27089 = vmatprep.subr.bf16.mxu0 %v27088_v0 }
 0x45b   :  { %27091 = vmatpush3.bf16.msra.mxu0 %v27088_v0  ;;  %v35099_v0 = vld [vmem:[#allocation18_spill] sm:$0xff] }
 0x45c   :  { %27093 = vmatprep.subr.bf16.mxu0 %v31531_v17 }
 0x45e   :  { %23373 = vmatmul.mubr.f32.vlgmr.msra.gmra.mrb[14].mxu0 %v31542_v23 }
 0x45f   :  { %27095 = vmatpush3.bf16.msra.mxu0 %v31531_v17  ;;  %23391 = vmatprep.mubr.f32.mxu0 %v31498_v63 }
 0x460   :  { %27097 = vmatprep.subr.bf16.mxu0 %v31558_v28 }
 0x463   :  { %27099 = vmatpush3.bf16.msra.mxu0 %v31558_v28 }
 0x464   :  { %27101 = vmatprep.subr.bf16.mxu0 %v31574_v57 }
 0x467   :  { %27103 = vmatpush3.bf16.msra.mxu0 %v31574_v57 }
 0x468   :  { %27105 = vmatprep.subr.bf16.mxu0 %v31580_v48 }
 0x46b   :  { %27107 = vmatpush3.bf16.msra.mxu0 %v31580_v48 }
 0x46e   :  { %23392 = vmatmul.mubr.f32.vlgmr.msra.gmra.mrb[14].mxu0 %v31542_v23 }
 0x541   :  { %v23393_v17 = vpop.f32.mrb[14].mxu0 }
 0x542   :  { %v5223_v63 = vadd.f32 %v23393_v17, %v20270_v39  ;;  %v5210_v12 = vpop.f32.mrb[15].mxu0  ;;  %v35100_v17 = vld [vmem:[#allocation19_spill] sm:$0xff] }
 0x543   :  { %v5222_v34 = vadd.f32 %v20270_v39, %v5210_v12 }
 0x544   :  { %v31665_v13 = vadd.f32 %v5223_v63, %v30756_v7 }
 0x545   :  { %v31668_v43 = vadd.f32 %v5222_v34, %v30750_v50  ;;  %5228 = vrot.lane.b32.xlu0 %v5222_v34, %s29877_s24  ;;  %v35102_v34 = vld [vmem:[#allocation21_spill] sm:$0xff] }
 0x546   :  { %v5252_v23 = vsel %vm1039_vm0, %v31665_v13, 0  ;;  %v5245_v54 = vrot.slane %v31665_v13, 1 }
 0x547   :  { %v31673_v28 = vand.u32 4294901760, %v5252_v23  ;;  %v5250_v15 = vsel %vm1039_vm0, %v31668_v43, 0  ;;  %v5244_v11 = vrot.slane %v31668_v43, 1 }
 0x548   :  { %v5327_v53 = vand.u32 4294901760, %v5250_v15  ;;  %v5249_v24 = vsel %vm1637_vm2, %v5245_v54, 0.0 }
 0x549   :  { %v5338_v6 = vsub.f32 %v5252_v23, %v31673_v28  ;;  %5230 = vrot.lane.b32.xlu0 %v5223_v63, %s29877_s24  ;;  %v5248_v5 = vsel %vm1637_vm2, %v5244_v11, 0.0  ;;  %v35101_v63 = vld [vmem:[#allocation20_spill] sm:$0xff]  ;;  %v35103_v23 = vld [vmem:[#allocation22_spill] sm:$0xff] }
 0x54a   :  { %v5328_v57 = vsub.f32 %v5250_v15, %v5327_v53  ;;  %v6421_v33 = vsel %vm1039_vm0, %v5248_v5, 0  ;;  %v35105_v15 = vld [vmem:[#allocation24_spill] sm:$0xff] }
 0x54b   :  { %v5339_v47 = vand.u32 4294901760, %v5338_v6  ;;  %v31780_v59 = vand.u32 4294901760, %v6421_v33 }
 0x54c   :  { %v5329_v61 = vand.u32 4294901760, %v5328_v57 }
 0x54d   :  { %v5340_v48 = vsub.f32 %v5338_v6, %v5339_v47  ;;  %v6500_v55 = vsub.f32 %v6421_v33, %v31780_v59 }
 0x54e   :  { %v5330_v25 = vsub.f32 %v5328_v57, %v5329_v61 }
 0x54f   :  { %v5341_v31 = vand.u32 4294901760, %v5340_v48  ;;  %v6501_v37 = vand.u32 4294901760, %v6500_v55  ;;  %v35111_v48 = vld [vmem:[#allocation30_spill] sm:$0xff] }
 0x550   :  { %v5331_v49 = vand.u32 4294901760, %v5330_v25  ;;  %v35112_v25 = vld [vmem:[#allocation31_spill] sm:$0xff] }
 0x551   :  { %v6502_v56 = vsub.f32 %v6500_v55, %v6501_v37 }
 0x552   :  { %23410 = vmatprep.mubr.f32.mxu1 %v5331_v49  ;;  %v35113_v49 = vld [vmem:[#allocation32_spill] sm:$0xff] }
 0x553   :  { %23411 = vmatmul.mubr.f32.vlgmr.msra.gmra.mrb[14].mxu1 %v5341_v31  ;;  %v6503_v39 = vand.u32 4294901760, %v6502_v56  ;;  %v35114_v31 = vld [vmem:[#allocation33_spill] sm:$0xff] }
 0x554   :  { %27127 = vmatpush3.bf16.msra.mxu1 %v30629_v41  ;;  %23429 = vmatprep.mubr.f32.mxu1 %v5327_v53  ;;  %v5238_v41 = vrot.slane %v31668_v43, 7 }
 0x555   :  { %27129 = vmatprep.subr.bf16.mxu1 %v30667_v1 }
 0x558   :  { %27131 = vmatpush3.bf16.msra.mxu1 %v30667_v1  ;;  %v5242_v1 = vsel %vm1630_vm1, 0.0, %v5238_v41  ;;  %v20312_v41 = vld [vmem:[%s34790_s6 + $0x100] sm:$0xff] }
 0x559   :  { %27133 = vmatprep.subr.bf16.mxu1 %v30677_v4 }
 0x55c   :  { %27135 = vmatpush3.bf16.msra.mxu1 %v30677_v4  ;;  %v5835_v4 = vsel %vm1039_vm0, %v5242_v1, 0  ;;  %v20313_v1 = vld [vmem:[%s34790_s6 + $0x108] sm:$0xff] }
 0x55d   :  { %27137 = vmatprep.subr.bf16.mxu1 %v30681_v26 }
 0x560   :  { %27139 = vmatpush3.bf16.msra.mxu1 %v30681_v26  ;;  %v31715_v26 = vand.u32 4294901760, %v5835_v4 }
 0x561   :  { %27141 = vmatprep.subr.bf16.mxu1 %v30689_v40 }
 0x563   :  { %23430 = vmatmul.mubr.f32.vlgmr.msra.gmra.mrb[14].mxu1 %v31673_v28 }
 0x564   :  { %27143 = vmatpush3.bf16.msra.mxu1 %v30689_v40  ;;  %23448 = vmatprep.mubr.f32.mxu1 %v5328_v57  ;;  %v5914_v40 = vsub.f32 %v5835_v4, %v31715_v26  ;;  %v35108_v57 = vld [vmem:[#allocation27_spill] sm:$0xff]  ;;  %v7049_v4 = vand.u32 4294901760, %v20312_v41 }
 0x565   :  { %27145 = vmatprep.subr.bf16.mxu1 %v30697_v22 }
 0x568   :  { %27147 = vmatpush3.bf16.msra.mxu1 %v30697_v22  ;;  %v5239_v22 = vrot.slane %v31665_v13, 7 }
 0x569   :  { %27149 = vmatprep.subr.bf16.mxu1 %v30705_v52 }
 0x56c   :  { %27151 = vmatpush3.bf16.msra.mxu1 %v30705_v52  ;;  %v5915_v52 = vand.u32 4294901760, %v5914_v40 }
 0x56d   :  { %27153 = vmatprep.subr.bf16.mxu1 %v30709_v16 }
 0x570   :  { %27155 = vmatpush3.bf16.msra.mxu1 %v30709_v16  ;;  %v5243_v16 = vsel %vm1630_vm1, 0.0, %v5239_v22  ;;  %v20314_v22 = vld [vmem:[%s34790_s6 + $0x110] sm:$0xff] }
 0x571   :  { %27157 = vmatprep.subr.bf16.mxu1 %v30515_v2 }
 0x573   :  { %23449 = vmatmul.mubr.f32.vlgmr.msra.gmra.mrb[14].mxu1 %v5338_v6  ;;  %v35107_v6 = vld [vmem:[#allocation26_spill] sm:$0xff] }
 0x574   :  { %27159 = vmatpush3.bf16.msra.mxu1 %v30515_v2  ;;  %23467 = vmatprep.mubr.f32.mxu1 %v5329_v61  ;;  %v35110_v61 = vld [vmem:[#allocation29_spill] sm:$0xff] }
 0x575   :  { %27161 = vmatprep.subr.bf16.mxu1 %v30535_v19 }
 0x578   :  { %27163 = vmatpush3.bf16.msra.mxu1 %v30535_v19 }
 0x579   :  { %27165 = vmatprep.subr.bf16.mxu1 %v30564_v60 }
 0x57c   :  { %27167 = vmatpush3.bf16.msra.mxu1 %v30564_v60 }
 0x57d   :  { %27169 = vmatprep.subr.bf16.mxu1 %v30601_v20 }
 0x580   :  { %27171 = vmatpush3.bf16.msra.mxu1 %v30601_v20 }
 0x581   :  { %27173 = vmatprep.subr.bf16.mxu1 %v30724_v8 }
 0x583   :  { %23468 = vmatmul.mubr.f32.vlgmr.msra.gmra.mrb[14].mxu1 %v5339_v47  ;;  %v35109_v47 = vld [vmem:[#allocation28_spill] sm:$0xff] }
 0x584   :  { %27175 = vmatpush3.bf16.msra.mxu1 %v30724_v8  ;;  %23486 = vmatprep.mubr.f32.mxu1 %v5327_v53  ;;  %v5916_v8 = vsub.f32 %v5914_v40, %v5915_v52 }
 0x585   :  { %27177 = vmatprep.subr.bf16.mxu1 %v30736_v42 }
 0x588   :  { %27179 = vmatpush3.bf16.msra.mxu1 %v30736_v42 }
 0x589   :  { %27181 = vmatprep.subr.bf16.mxu1 %v30744_v46 }
 0x58c   :  { %27183 = vmatpush3.bf16.msra.mxu1 %v30744_v46  ;;  %v5917_v46 = vand.u32 4294901760, %v5916_v8 }
 0x58d   :  { %27185 = vmatprep.subr.bf16.mxu1 %v30748_v51 }
 0x590   :  { %27187 = vmatpush3.bf16.msra.mxu1 %v30748_v51 }
 0x591   :  { %27189 = vmatprep.subr.bf16.mxu1 %v30515_v2 }
 0x593   :  { %23487 = vmatmul.mubr.f32.vlgmr.msra.gmra.mrb[14].mxu1 %v31673_v28 }
 0x594   :  { %27191 = vmatpush3.bf16.msra.mxu1 %v30515_v2  ;;  %23505 = vmatprep.mubr.f32.mxu1 %v5327_v53  ;;  %v5838_v2 = vsel %vm1039_vm0, %v5243_v16, 0  ;;  %v35106_v53 = vld [vmem:[#allocation25_spill] sm:$0xff]  ;;  %v7055_v16 = vand.u32 4294901760, %v20314_v22 }
 0x595   :  { %27193 = vmatprep.subr.bf16.mxu1 %v30535_v19  ;;  %v31729_v42 = vand.u32 4294901760, %v5838_v2 }
 0x598   :  { %27195 = vmatpush3.bf16.msra.mxu1 %v30535_v19  ;;  %v5924_v19 = vsub.f32 %v5838_v2, %v31729_v42 }
 0x599   :  { %27197 = vmatprep.subr.bf16.mxu1 %v30564_v60 }
 0x59a   :  { %v5925_v51 = vand.u32 4294901760, %v5924_v19 }
 0x59c   :  { %27199 = vmatpush3.bf16.msra.mxu1 %v30564_v60  ;;  %v35085_v60 = vld [vmem:[#allocation4_spill] sm:$0xff]  ;;  %v5926_v21 = vsub.f32 %v5924_v19, %v5925_v51 }
 0x59d   :  { %27201 = vmatprep.subr.bf16.mxu1 %v30601_v20 }
 0x59e   :  { %v5927_v44 = vand.u32 4294901760, %v5926_v21 }
 0x5a0   :  { %27203 = vmatpush3.bf16.msra.mxu1 %v30601_v20  ;;  %v35086_v20 = vld [vmem:[#allocation9_spill] sm:$0xff] }
 0x5a1   :  { %27205 = vmatprep.subr.bf16.mxu1 %v30882_v27 }
 0x5a3   :  { %23506 = vmatmul.mubr.f32.vlgmr.msra.gmra.mrb[14].mxu1 %v31673_v28  ;;  %v35104_v28 = vld [vmem:[#allocation23_spill] sm:$0xff] }
 0x5a4   :  { %27207 = vmatpush3.bf16.msra.mxu1 %v30882_v27  ;;  %23524 = vmatprep.mubr.f32.mxu1 %v5917_v46  ;;  %v20317_v46 = vld [vmem:[%s34790_s6 + $0x128] sm:$0xff] }
 0x5a5   :  { %27209 = vmatprep.subr.bf16.mxu1 %v30909_v14 }
 0x5a8   :  { %27211 = vmatpush3.bf16.msra.mxu1 %v30909_v14 }
 0x5a9   :  { %27213 = vmatprep.subr.bf16.mxu1 %v35085_v60 }
 0x5ac   :  { %27215 = vmatpush3.bf16.msra.mxu1 %v35085_v60 }
 0x5ad   :  { %27217 = vmatprep.subr.bf16.mxu1 %v35086_v20 }
 0x5b0   :  { %27219 = vmatpush3.bf16.msra.mxu1 %v35086_v20 }
 0x5b1   :  { %27221 = vmatprep.subr.bf16.mxu1 %v35087_v36 }
 0x5b3   :  { %23525 = vmatmul.mubr.f32.vlgmr.msra.gmra.mrb[14].mxu1 %v5927_v44  ;;  %v20318_v44 = vld [vmem:[%s34790_s6 + $0x130] sm:$0xff] }
 0x5b4   :  { %27223 = vmatpush3.bf16.msra.mxu1 %v35087_v36  ;;  %23543 = vmatprep.mubr.f32.mxu1 %v31715_v26  ;;  %v20319_v36 = vld [vmem:[%s34790_s6 + $0x138] sm:$0xff] }
 0x5b5   :  { %27225 = vmatprep.subr.bf16.mxu1 %v35088_v10 }
 0x5b8   :  { %27227 = vmatpush3.bf16.msra.mxu1 %v35088_v10  ;;  %v7067_v10 = vand.u32 4294901760, %v20318_v44 }
 0x5b9   :  { %27229 = vmatprep.subr.bf16.mxu1 %v35089_v38 }
 0x5bc   :  { %27231 = vmatpush3.bf16.msra.mxu1 %v35089_v38  ;;  %v7070_v38 = vand.u32 4294901760, %v20319_v36 }
 0x5bd   :  { %27233 = vmatprep.subr.bf16.mxu1 %v35090_v18 }
 0x5c0   :  { %27235 = vmatpush3.bf16.msra.mxu1 %v35090_v18 }
 0x5c1   :  { %27237 = vmatprep.subr.bf16.mxu1 %v35091_v62 }
 0x5c3   :  { %23544 = vmatmul.mubr.f32.vlgmr.msra.gmra.mrb[14].mxu1 %v31729_v42 }
 0x5c4   :  { %27239 = vmatpush3.bf16.msra.mxu1 %v35091_v62  ;;  %23562 = vmatprep.mubr.f32.mxu1 %v5914_v40 }
 0x5c5   :  { %27241 = vmatprep.subr.bf16.mxu1 %v35092_v29 }
 0x5c8   :  { %27243 = vmatpush3.bf16.msra.mxu1 %v35092_v29  ;;  %v31889_v29 = vpack.c.bf16 %v7070_v38, %v7067_v10 }
 0x5c9   :  { %27245 = vmatprep.subr.bf16.mxu1 %v35093_v32 }
 0x5cc   :  { %27247 = vmatpush3.bf16.msra.mxu1 %v35093_v32 }
 0x5cd   :  { %27249 = vmatprep.subr.bf16.mxu1 %v35094_v35 }
 0x5d0   :  { %27251 = vmatpush3.bf16.msra.mxu1 %v35094_v35 }
 0x5d1   :  { %27253 = vmatprep.subr.bf16.mxu1 %v30882_v27 }
 0x5d3   :  { %23563 = vmatmul.mubr.f32.vlgmr.msra.gmra.mrb[14].mxu1 %v5924_v19 }
 0x5d4   :  { %27255 = vmatpush3.bf16.msra.mxu1 %v30882_v27  ;;  %23581 = vmatprep.mubr.f32.mxu1 %v5915_v52  ;;  %v20315_v52 = vld [vmem:[%s34790_s6 + $0x118] sm:$0xff] }
 0x5d5   :  { %27257 = vmatprep.subr.bf16.mxu1 %v30909_v14  ;;  %v7058_v2 = vand.u32 4294901760, %v20315_v52 }
 0x5d7   :  { %v31869_v8 = vpack.c.bf16 %v7058_v2, %v7055_v16 }
 0x5d8   :  { %27259 = vmatpush3.bf16.msra.mxu1 %v30909_v14 }
 0x5d9   :  { %27261 = vmatprep.subr.bf16.mxu1 %v35085_v60 }
 0x5dc   :  { %27263 = vmatpush3.bf16.msra.mxu1 %v35085_v60 }
 0x5dd   :  { %27265 = vmatprep.subr.bf16.mxu1 %v35086_v20 }
 0x5e0   :  { %27267 = vmatpush3.bf16.msra.mxu1 %v35086_v20 }
 0x5e1   :  { %27269 = vmatprep.subr.bf16.mxu1 %v35095_v30 }
 0x5e3   :  { %23582 = vmatmul.mubr.f32.vlgmr.msra.gmra.mrb[14].mxu1 %v5925_v51 }
 0x5e4   :  { %27271 = vmatpush3.bf16.msra.mxu1 %v35095_v30  ;;  %23600 = vmatprep.mubr.f32.mxu1 %v31715_v26  ;;  %v7157_v30 = vsub.f32 %v20314_v22, %v7055_v16 }
 0x5e5   :  { %27273 = vmatprep.subr.bf16.mxu1 %v35096_v9 }
 0x5e6   :  { %v7158_v5 = vand.u32 4294901760, %v7157_v30 }
 0x5e8   :  { %27275 = vmatpush3.bf16.msra.mxu1 %v35096_v9  ;;  %v7164_v9 = vsub.f32 %v20315_v52, %v7058_v2 }
 0x5e9   :  { %27277 = vmatprep.subr.bf16.mxu1 %v35097_v3 }
 0x5ec   :  { %27279 = vmatpush3.bf16.msra.mxu1 %v35097_v3 }
 0x5ed   :  { %27281 = vmatprep.subr.bf16.mxu1 %v35098_v58 }
 0x5f0   :  { %27283 = vmatpush3.bf16.msra.mxu1 %v35098_v58  ;;  %v7165_v58 = vand.u32 4294901760, %v7164_v9 }
 0x5f1   :  { %27285 = vmatprep.subr.bf16.mxu1 %v30882_v27 }
 0x5f3   :  { %23601 = vmatmul.mubr.f32.vlgmr.msra.gmra.mrb[14].mxu1 %v31729_v42 }
 0x5f4   :  { %27287 = vmatpush3.bf16.msra.mxu1 %v30882_v27  ;;  %23619 = vmatprep.mubr.f32.mxu1 %v31715_v26  ;;  %v6424_v27 = vsel %vm1039_vm0, %v5249_v24, 0  ;;  %v7052_v26 = vand.u32 4294901760, %v20313_v1 }
 0x5f5   :  { %27289 = vmatprep.subr.bf16.mxu1 %v30909_v14  ;;  %v31795_v45 = vand.u32 4294901760, %v6424_v27 }
 0x5f6   :  { %v31859_v40 = vpack.c.bf16 %v7052_v26, %v7049_v4  ;;  %v7150_v21 = vsub.f32 %v20313_v1, %v7052_v26  ;;  %v29873_v26 = vld [vmem:[%s34791_s5] ss:$0 sm:$0xff] }
 0x5f8   :  { %27291 = vmatpush3.bf16.msra.mxu1 %v30909_v14  ;;  %v6510_v14 = vsub.f32 %v6424_v27, %v31795_v45  ;;  %27397 = vmatprep.subr.bf16.mxu0 %v31859_v40  ;;  %v7151_v62 = vand.u32 4294901760, %v7150_v21 }
 0x5f9   :  { %27293 = vmatprep.subr.bf16.mxu1 %v35085_v60  ;;  %27399 = vmatpush3.bf16.msra.mxu0 %v31859_v40 }
 0x5fa   :  { %v6511_v12 = vand.u32 4294901760, %v6510_v14  ;;  %27401 = vmatprep.subr.bf16.mxu0 %v31869_v8  ;;  %v7152_v35 = vsub.f32 %v7150_v21, %v7151_v62 }
 0x5fc   :  { %27295 = vmatpush3.bf16.msra.mxu1 %v35085_v60  ;;  %v6512_v13 = vsub.f32 %v6510_v14, %v6511_v12  ;;  %v7064_v60 = vand.u32 4294901760, %v20317_v46  ;;  %v7153_v3 = vand.u32 4294901760, %v7152_v35 }
 0x5fd   :  { %27297 = vmatprep.subr.bf16.mxu1 %v35086_v20  ;;  %27403 = vmatpush3.bf16.msra.mxu0 %v31869_v8 }
 0x5fe   :  { %v6513_v43 = vand.u32 4294901760, %v6512_v13 }
 0x600   :  { %27299 = vmatpush3.bf16.msra.mxu1 %v35086_v20  ;;  %v7143_v20 = vsub.f32 %v20312_v41, %v7049_v4 }
 0x601   :  { %27301 = vmatprep.subr.bf16.mxu1 %v35099_v0 }
 0x602   :  { %v7144_v18 = vand.u32 4294901760, %v7143_v20 }
 0x603   :  { %23620 = vmatmul.mubr.f32.vlgmr.msra.gmra.mrb[14].mxu1 %v31729_v42  ;;  %v20316_v42 = vld [vmem:[%s34790_s6 + $0x120] sm:$0xff] }
 0x604   :  { %27303 = vmatpush3.bf16.msra.mxu1 %v35099_v0  ;;  %23638 = vmatprep.mubr.f32.mxu1 %v6503_v39  ;;  %v7061_v19 = vand.u32 4294901760, %v20316_v42  ;;  %v7145_v32 = vsub.f32 %v7143_v20, %v7144_v18 }
 0x605   :  { %27305 = vmatprep.subr.bf16.mxu1 %v35100_v17 }
 0x606   :  { %v31879_v51 = vpack.c.bf16 %v7064_v60, %v7061_v19  ;;  %v7146_v11 = vand.u32 4294901760, %v7145_v32  ;;  %v7171_v54 = vsub.f32 %v20316_v42, %v7061_v19 }
 0x608   :  { %27307 = vmatpush3.bf16.msra.mxu1 %v35100_v17  ;;  %27405 = vmatprep.subr.bf16.mxu0 %v31879_v51  ;;  %v27412_v33 = vpack.c.bf16 %v7153_v3, %v7146_v11  ;;  %v7172_v56 = vand.u32 4294901760, %v7171_v54  ;;  %v20304_v3 = vld [vmem:[%s34790_s6 + $0xc0] sm:$0xff] }
 0x609   :  { %27309 = vmatprep.subr.bf16.mxu1 %v35101_v63  ;;  %27407 = vmatpush3.bf16.msra.mxu0 %v31879_v51 }
 0x60a   :  { %27409 = vmatprep.subr.bf16.mxu0 %v31889_v29  ;;  %v7173_v39 = vsub.f32 %v7171_v54, %v7172_v56 }
 0x60c   :  { %27311 = vmatpush3.bf16.msra.mxu1 %v35101_v63 }
 0x60d   :  { %27313 = vmatprep.subr.bf16.mxu1 %v35102_v34  ;;  %27411 = vmatpush3.bf16.msra.mxu0 %v31889_v29 }
 0x60e   :  { %27413 = vmatprep.subr.bf16.mxu0 %v27412_v33 }
 0x610   :  { %27315 = vmatpush3.bf16.msra.mxu1 %v35102_v34 }
 0x611   :  { %27317 = vmatprep.subr.bf16.mxu1 %v35103_v23 }
 0x613   :  { %23639 = vmatmul.mubr.f32.vlgmr.msra.gmra.mrb[14].mxu1 %v6513_v43 }
 0x614   :  { %27319 = vmatpush3.bf16.msra.mxu1 %v35103_v23  ;;  %23657 = vmatprep.mubr.f32.mxu1 %v31780_v59 }
 0x615   :  { %27321 = vmatprep.subr.bf16.mxu1 %v35104_v28 }
 0x618   :  { %27323 = vmatpush3.bf16.msra.mxu1 %v35104_v28 }
 0x619   :  { %27325 = vmatprep.subr.bf16.mxu1 %v35105_v15 }
 0x61c   :  { %27327 = vmatpush3.bf16.msra.mxu1 %v35105_v15 }
 0x61d   :  { %27329 = vmatprep.subr.bf16.mxu1 %v35106_v53 }
 0x620   :  { %27331 = vmatpush3.bf16.msra.mxu1 %v35106_v53 }
 0x621   :  { %27333 = vmatprep.subr.bf16.mxu1 %v35107_v6 }
 0x623   :  { %23658 = vmatmul.mubr.f32.vlgmr.msra.gmra.mrb[14].mxu1 %v31795_v45 }
 0x624   :  { %27335 = vmatpush3.bf16.msra.mxu1 %v35107_v6  ;;  %23676 = vmatprep.mubr.f32.mxu1 %v6500_v55  ;;  %v7166_v55 = vsub.f32 %v7164_v9, %v7165_v58 }
 0x625   :  { %27337 = vmatprep.subr.bf16.mxu1 %v35108_v57 }
 0x626   :  { %v7167_v27 = vand.u32 4294901760, %v7166_v55 }
 0x628   :  { %27339 = vmatpush3.bf16.msra.mxu1 %v35108_v57 }
 0x629   :  { %27341 = vmatprep.subr.bf16.mxu1 %v35109_v47 }
 0x62c   :  { %27343 = vmatpush3.bf16.msra.mxu1 %v35109_v47  ;;  %v27428_v47 = vpack.c.bf16 %v7150_v21, %v7143_v20 }
 0x62d   :  { %27345 = vmatprep.subr.bf16.mxu1 %v35110_v61 }
 0x630   :  { %27347 = vmatpush3.bf16.msra.mxu1 %v35110_v61  ;;  %v27432_v61 = vpack.c.bf16 %v7164_v9, %v7157_v30 }
 0x631   :  { %27349 = vmatprep.subr.bf16.mxu1 %v35099_v0 }
 0x633   :  { %23677 = vmatmul.mubr.f32.vlgmr.msra.gmra.mrb[14].mxu1 %v6510_v14 }
 0x634   :  { %27351 = vmatpush3.bf16.msra.mxu1 %v35099_v0  ;;  %23695 = vmatprep.mubr.f32.mxu1 %v6501_v37  ;;  %v7178_v37 = vsub.f32 %v20317_v46, %v7064_v60 }
 0x635   :  { %27353 = vmatprep.subr.bf16.mxu1 %v35100_v17 }
 0x638   :  { %27355 = vmatpush3.bf16.msra.mxu1 %v35100_v17 }
 0x639   :  { %27357 = vmatprep.subr.bf16.mxu1 %v35101_v63 }
 0x63c   :  { %27359 = vmatpush3.bf16.msra.mxu1 %v35101_v63 }
 0x63d   :  { %27361 = vmatprep.subr.bf16.mxu1 %v35102_v34 }
 0x640   :  { %27363 = vmatpush3.bf16.msra.mxu1 %v35102_v34 }
 0x641   :  { %27365 = vmatprep.subr.bf16.mxu1 %v35111_v48 }
 0x643   :  { %23696 = vmatmul.mubr.f32.vlgmr.msra.gmra.mrb[14].mxu1 %v6511_v12  ;;  %v7174_v12 = vand.u32 4294901760, %v7173_v39 }
 0x644   :  { %27367 = vmatpush3.bf16.msra.mxu1 %v35111_v48  ;;  %23714 = vmatprep.mubr.f32.mxu1 %v31780_v59  ;;  %v27436_v48 = vpack.c.bf16 %v7178_v37, %v7171_v54  ;;  %v20306_v54 = vld [vmem:[%s34790_s6 + $0xd0] sm:$0xff] }
 0x645   :  { %27369 = vmatprep.subr.bf16.mxu1 %v35112_v25 }
 0x648   :  { %27371 = vmatpush3.bf16.msra.mxu1 %v35112_v25 }
 0x649   :  { %27373 = vmatprep.subr.bf16.mxu1 %v35113_v49 }
 0x64c   :  { %27375 = vmatpush3.bf16.msra.mxu1 %v35113_v49  ;;  %v27460_v49 = vpack.c.bf16 %v7151_v62, %v7144_v18 }
 0x64d   :  { %27377 = vmatprep.subr.bf16.mxu1 %v35114_v31 }
 0x650   :  { %27379 = vmatpush3.bf16.msra.mxu1 %v35114_v31  ;;  %v27464_v31 = vpack.c.bf16 %v7165_v58, %v7158_v5 }
 0x651   :  { %27381 = vmatprep.subr.bf16.mxu1 %v35099_v0 }
 0x653   :  { %23715 = vmatmul.mubr.f32.vlgmr.msra.gmra.mrb[14].mxu1 %v31795_v45 }
 0x654   :  { %27383 = vmatpush3.bf16.msra.mxu1 %v35099_v0  ;;  %23733 = vmatprep.mubr.f32.mxu1 %v31780_v59  ;;  %v7159_v59 = vsub.f32 %v7157_v30, %v7158_v5  ;;  %v20305_v5 = vld [vmem:[%s34790_s6 + $0xc8] sm:$0xff] }
 0x655   :  { %27385 = vmatprep.subr.bf16.mxu1 %v35100_v17 }
 0x656   :  { %v7160_v24 = vand.u32 4294901760, %v7159_v59  ;;  %v7638_v59 = vand.u32 4294901760, %v20305_v5 }
 0x658   :  { %27387 = vmatpush3.bf16.msra.mxu1 %v35100_v17  ;;  %v27416_v0 = vpack.c.bf16 %v7167_v27, %v7160_v24  ;;  %v7185_v17 = vsub.f32 %v20318_v44, %v7067_v10 }
 0x659   :  { %27389 = vmatprep.subr.bf16.mxu1 %v35101_v63 }
 0x65a   :  { %v7186_v13 = vand.u32 4294901760, %v7185_v17 }
 0x65c   :  { %27391 = vmatpush3.bf16.msra.mxu1 %v35101_v63  ;;  %v7192_v63 = vsub.f32 %v20319_v36, %v7070_v38  ;;  %v7187_v28 = vsub.f32 %v7185_v17, %v7186_v13 }
 0x65d   :  { %27393 = vmatprep.subr.bf16.mxu1 %v35102_v34 }
 0x65e   :  { %v7193_v43 = vand.u32 4294901760, %v7192_v63  ;;  %v7188_v53 = vand.u32 4294901760, %v7187_v28  ;;  %v27440_v25 = vpack.c.bf16 %v7192_v63, %v7185_v17  ;;  %v20308_v17 = vld [vmem:[%s34790_s6 + $0xe0] sm:$0xff] }
 0x660   :  { %27395 = vmatpush3.bf16.msra.mxu1 %v35102_v34  ;;  %v7194_v15 = vsub.f32 %v7192_v63, %v7193_v43  ;;  %v27472_v1 = vpack.c.bf16 %v7193_v43, %v7186_v13 }
 0x662   :  { %v7195_v6 = vand.u32 4294901760, %v7194_v15 }
 0x663   :  { %23734 = vmatmul.mubr.f32.vlgmr.msra.gmra.mrb[14].mxu1 %v31795_v45  ;;  %v7179_v45 = vand.u32 4294901760, %v7178_v37 }
 0x664   :  { %v27424_v57 = vpack.c.bf16 %v7195_v6, %v7188_v53 }
 0x665   :  { %v7180_v14 = vsub.f32 %v7178_v37, %v7179_v45  ;;  %v27468_v41 = vpack.c.bf16 %v7179_v45, %v7172_v56  ;;  %v20307_v37 = vld [vmem:[%s34790_s6 + $0xd8] sm:$0xff]  ;;  %v7641_v45 = vand.u32 4294901760, %v20306_v54 }
 0x667   :  { %v7181_v34 = vand.u32 4294901760, %v7180_v14  ;;  %v31972_v43 = vsub.f32 %v20306_v54, %v7641_v45 }
 0x669   :  { %v27420_v23 = vpack.c.bf16 %v7181_v34, %v7174_v12  ;;  %v20310_v12 = vld [vmem:[%s34790_s6 + $0xf0] sm:$0xff]  ;;  %v20311_v34 = vld [vmem:[%s34790_s6 + $0xf8] sm:$0xff] }
 0x736   :  { %v23735_v4 = vpop.f32.mrb[14].mxu1 }
 0x737   :  { %v7009_v22 = vadd.f32 %v29873_v26, %v23735_v4  ;;  %v6996_v52 = vpop.f32.mrb[15].mxu1 }
 0x738   :  { %v7008_v16 = vadd.f32 %v29873_v26, %v6996_v52 }
 0x739   :  { %v31896_v2 = vmax.f32 %v7009_v22, 0.0 }
 0x73a   :  { %v31898_v42 = vmax.f32 %v7008_v16, 0.0 }
 0x73b   :  { %v7046_v46 = vsel %vm1039_vm0, %v31896_v2, 0 }
 0x73c   :  { %v31902_v19 = vand.u32 4294901760, %v7046_v46  ;;  %v7044_v60 = vsel %vm1039_vm0, %v31898_v42, 0  ;;  %v7014_v35 = vrot.slane %v31898_v42, 7 }
 0x73d   :  { %v7121_v20 = vand.u32 4294901760, %v7044_v60 }
 0x73e   :  { %v7132_v21 = vsub.f32 %v7046_v46, %v31902_v19  ;;  %v7018_v30 = vsel %vm1630_vm1, 0.0, %v7014_v35 }
 0x73f   :  { %v7122_v44 = vsub.f32 %v7044_v60, %v7121_v20  ;;  %v7629_v9 = vsel %vm1039_vm0, %v7018_v30, 0 }
 0x740   :  { %v7133_v36 = vand.u32 4294901760, %v7132_v21  ;;  %v31920_v11 = vand.u32 4294901760, %v7629_v9 }
 0x741   :  { %v7123_v10 = vand.u32 4294901760, %v7122_v44 }
 0x742   :  { %v7134_v38 = vsub.f32 %v7132_v21, %v7133_v36  ;;  %v31932_v58 = vsub.f32 %v7629_v9, %v31920_v11 }
 0x743   :  { %v7124_v18 = vsub.f32 %v7122_v44, %v7123_v10 }
 0x744   :  { %v7135_v32 = vand.u32 4294901760, %v7134_v38  ;;  %v7709_v55 = vand.u32 4294901760, %v31932_v58 }
 0x745   :  { %v7125_v62 = vand.u32 4294901760, %v7124_v18 }
 0x746   :  { %v7710_v14 = vsub.f32 %v31932_v58, %v7709_v55 }
 0x747   :  { %23752 = vmatprep.mubr.f32.mxu0 %v7125_v62 }
 0x748   :  { %23753 = vmatmul.mubr.f32.vlgmr.msra.gmra.mrb[16].mxu0 %v7135_v32  ;;  %v7711_v6 = vand.u32 4294901760, %v7710_v14 }
 0x749   :  { %27415 = vmatpush3.bf16.msra.mxu0 %v27412_v33  ;;  %23771 = vmatprep.mubr.f32.mxu0 %v7121_v20  ;;  %v7015_v33 = vrot.slane %v31896_v2, 7 }
 0x74a   :  { %27417 = vmatprep.subr.bf16.mxu0 %v27416_v0 }
 0x74b   :  { %v7019_v24 = vsel %vm1630_vm1, 0.0, %v7015_v33 }
 0x74c   :  { %v7632_v39 = vsel %vm1039_vm0, %v7019_v24, 0 }
 0x74d   :  { %27419 = vmatpush3.bf16.msra.mxu0 %v27416_v0  ;;  %v7644_v0 = vand.u32 4294901760, %v20307_v37  ;;  %v31976_v28 = vand.u32 4294901760, %v7632_v39 }
 0x74e   :  { %27421 = vmatprep.subr.bf16.mxu0 %v27420_v23 }
 0x74f   :  { %v31979_v15 = vpack.c.bf16 %v7644_v0, %v7641_v45 }
 0x751   :  { %27423 = vmatpush3.bf16.msra.mxu0 %v27420_v23  ;;  %v31974_v23 = vsub.f32 %v20307_v37, %v7644_v0 }
 0x752   :  { %27425 = vmatprep.subr.bf16.mxu0 %v27424_v57 }
 0x755   :  { %27427 = vmatpush3.bf16.msra.mxu0 %v27424_v57  ;;  %v7653_v57 = vand.u32 4294901760, %v20310_v12 }
 0x756   :  { %27429 = vmatprep.subr.bf16.mxu0 %v27428_v47 }
 0x758   :  { %23772 = vmatmul.mubr.f32.vlgmr.msra.gmra.mrb[16].mxu0 %v31902_v19 }
 0x759   :  { %27431 = vmatpush3.bf16.msra.mxu0 %v27428_v47  ;;  %23790 = vmatprep.mubr.f32.mxu0 %v7122_v44  ;;  %v7656_v47 = vand.u32 4294901760, %v20311_v34 }
 0x75a   :  { %27433 = vmatprep.subr.bf16.mxu0 %v27432_v61 }
 0x75b   :  { %v32001_v26 = vpack.c.bf16 %v7656_v47, %v7653_v57  ;;  %v32016_v44 = vsub.f32 %v20311_v34, %v7656_v47 }
 0x75d   :  { %27435 = vmatpush3.bf16.msra.mxu0 %v27432_v61  ;;  %v7779_v30 = vand.u32 4294901760, %v32016_v44 }
 0x75e   :  { %27437 = vmatprep.subr.bf16.mxu0 %v27436_v48 }
 0x761   :  { %27439 = vmatpush3.bf16.msra.mxu0 %v27436_v48 }
 0x762   :  { %27441 = vmatprep.subr.bf16.mxu0 %v27440_v25 }
 0x765   :  { %27443 = vmatpush3.bf16.msra.mxu0 %v27440_v25  ;;  %v7744_v25 = vand.u32 4294901760, %v31972_v43 }
 0x766   :  { %27445 = vmatprep.subr.bf16.mxu0 %v31859_v40 }
 0x767   :  { %v7745_v16 = vsub.f32 %v31972_v43, %v7744_v25 }
 0x768   :  { %23791 = vmatmul.mubr.f32.vlgmr.msra.gmra.mrb[16].mxu0 %v7132_v21  ;;  %v32014_v21 = vsub.f32 %v20310_v12, %v7653_v57 }
 0x769   :  { %27447 = vmatpush3.bf16.msra.mxu0 %v31859_v40  ;;  %23809 = vmatprep.mubr.f32.mxu0 %v7123_v10  ;;  %v7746_v10 = vand.u32 4294901760, %v7745_v16 }
 0x76a   :  { %27449 = vmatprep.subr.bf16.mxu0 %v31869_v8  ;;  %v7772_v35 = vand.u32 4294901760, %v32014_v21 }
 0x76d   :  { %27451 = vmatpush3.bf16.msra.mxu0 %v31869_v8 }
 0x76e   :  { %27453 = vmatprep.subr.bf16.mxu0 %v31879_v51 }
 0x771   :  { %27455 = vmatpush3.bf16.msra.mxu0 %v31879_v51 }
 0x772   :  { %27457 = vmatprep.subr.bf16.mxu0 %v31889_v29 }
 0x775   :  { %27459 = vmatpush3.bf16.msra.mxu0 %v31889_v29 }
 0x776   :  { %27461 = vmatprep.subr.bf16.mxu0 %v27460_v49 }
 0x778   :  { %23810 = vmatmul.mubr.f32.vlgmr.msra.gmra.mrb[16].mxu0 %v7133_v36 }
 0x779   :  { %27463 = vmatpush3.bf16.msra.mxu0 %v27460_v49  ;;  %23828 = vmatprep.mubr.f32.mxu0 %v7121_v20  ;;  %v7751_v49 = vand.u32 4294901760, %v31974_v23 }
 0x77a   :  { %27465 = vmatprep.subr.bf16.mxu0 %v27464_v31 }
 0x77b   :  { %v7752_v46 = vsub.f32 %v31974_v23, %v7751_v49 }
 0x77d   :  { %27467 = vmatpush3.bf16.msra.mxu0 %v27464_v31  ;;  %v7753_v38 = vand.u32 4294901760, %v7752_v46 }
 0x77e   :  { %27469 = vmatprep.subr.bf16.mxu0 %v27468_v41 }
 0x77f   :  { %v27512_v9 = vpack.c.bf16 %v7753_v38, %v7746_v10 }
 0x781   :  { %27471 = vmatpush3.bf16.msra.mxu0 %v27468_v41  ;;  %v31994_v41 = vsub.f32 %v7632_v39, %v31976_v28  ;;  %v27528_v39 = vpack.c.bf16 %v31974_v23, %v31972_v43  ;;  %v20321_v43 = vld [vmem:[%s34790_s6 + $0x148] sm:$0xff] }
 0x782   :  { %27473 = vmatprep.subr.bf16.mxu0 %v27472_v1 }
 0x783   :  { %v7719_v60 = vand.u32 4294901760, %v31994_v41 }
 0x785   :  { %27475 = vmatpush3.bf16.msra.mxu0 %v27472_v1  ;;  %v7720_v62 = vsub.f32 %v31994_v41, %v7719_v60 }
 0x786   :  { %27477 = vmatprep.subr.bf16.mxu0 %v31859_v40 }
 0x788   :  { %23829 = vmatmul.mubr.f32.vlgmr.msra.gmra.mrb[16].mxu0 %v31902_v19 }
 0x789   :  { %27479 = vmatpush3.bf16.msra.mxu0 %v31859_v40  ;;  %23847 = vmatprep.mubr.f32.mxu0 %v7121_v20  ;;  %v7635_v40 = vand.u32 4294901760, %v20304_v3 }
 0x78a   :  { %27481 = vmatprep.subr.bf16.mxu0 %v31869_v8 }
 0x78b   :  { %v31945_v27 = vsub.f32 %v20304_v3, %v7635_v40  ;;  %v31951_v56 = vpack.c.bf16 %v7638_v59, %v7635_v40  ;;  %v7773_v40 = vsub.f32 %v32014_v21, %v7772_v35 }
 0x78d   :  { %27483 = vmatpush3.bf16.msra.mxu0 %v31869_v8  ;;  %v31948_v8 = vsub.f32 %v20305_v5, %v7638_v59  ;;  %v7730_v63 = vand.u32 4294901760, %v31945_v27  ;;  %v7721_v5 = vand.u32 4294901760, %v7720_v62  ;;  %v7780_v59 = vsub.f32 %v32016_v44, %v7779_v30 }
 0x78e   :  { %27485 = vmatprep.subr.bf16.mxu0 %v31879_v51  ;;  %v7774_v37 = vand.u32 4294901760, %v7773_v40 }
 0x78f   :  { %v7737_v13 = vand.u32 4294901760, %v31948_v8  ;;  %v7731_v61 = vsub.f32 %v31945_v27, %v7730_v63  ;;  %v7781_v24 = vand.u32 4294901760, %v7780_v59  ;;  %v27524_v0 = vpack.c.bf16 %v31948_v8, %v31945_v27 }
 0x790   :  { %v7020_v27 = vrot.slane %v31898_v42, 1  ;;  %v7021_v42 = vrot.slane %v31896_v2, 1 }
 0x791   :  { %27487 = vmatpush3.bf16.msra.mxu0 %v31879_v51  ;;  %v20309_v51 = vld [vmem:[%s34790_s6 + $0xe8] sm:$0xff]  ;;  %v7738_v48 = vsub.f32 %v31948_v8, %v7737_v13  ;;  %v7732_v22 = vand.u32 4294901760, %v7731_v61  ;;  %v27520_v45 = vpack.c.bf16 %v7781_v24, %v7774_v37  ;;  %v27568_v8 = vpack.c.bf16 %v7779_v30, %v7772_v35 }
 0x792   :  { %27489 = vmatprep.subr.bf16.mxu0 %v31889_v29  ;;  %v7650_v53 = vand.u32 4294901760, %v20309_v51 }
 0x793   :  { %v7739_v52 = vand.u32 4294901760, %v7738_v48 }
 0x794   :  { %v31999_v4 = vsub.f32 %v20309_v51, %v7650_v53  ;;  %v27556_v51 = vpack.c.bf16 %v7737_v13, %v7730_v63  ;;  %v7024_v63 = vsel %vm1637_vm2, %v7020_v27, 0.0  ;;  %v20320_v13 = vld [vmem:[%s34790_s6 + $0x140] sm:$0xff] }
 0x795   :  { %27491 = vmatpush3.bf16.msra.mxu0 %v31889_v29  ;;  %v7647_v29 = vand.u32 4294901760, %v20308_v17  ;;  %v27508_v36 = vpack.c.bf16 %v7739_v52, %v7732_v22  ;;  %v8224_v12 = vsel %vm1039_vm0, %v7024_v63, 0  ;;  %v8230_v2 = vand.u32 4294901760, %v20320_v13  ;;  %v20327_v22 = vld [vmem:[%s34790_s6 + $0x178] sm:$0xff] }
 0x796   :  { %27493 = vmatprep.subr.bf16.mxu0 %v31951_v56  ;;  %v7765_v20 = vand.u32 4294901760, %v31999_v4  ;;  %v32071_v34 = vand.u32 4294901760, %v8224_v12  ;;  %v8251_v10 = vand.u32 4294901760, %v20327_v22 }
 0x797   :  { %v31991_v31 = vsub.f32 %v20308_v17, %v7647_v29  ;;  %v31997_v1 = vpack.c.bf16 %v7650_v53, %v7647_v29  ;;  %v27536_v17 = vpack.c.bf16 %v32016_v44, %v32014_v21  ;;  %v20322_v53 = vld [vmem:[%s34790_s6 + $0x150] sm:$0xff] }
 0x798   :  { %23848 = vmatmul.mubr.f32.vlgmr.msra.gmra.mrb[16].mxu0 %v31902_v19  ;;  %v7766_v32 = vsub.f32 %v31999_v4, %v7765_v20  ;;  %v32085_v23 = vsub.f32 %v8224_v12, %v32071_v34  ;;  %v8236_v48 = vand.u32 4294901760, %v20322_v53 }
 0x799   :  { %27495 = vmatpush3.bf16.msra.mxu0 %v31951_v56  ;;  %23866 = vmatprep.mubr.f32.mxu0 %v7711_v6  ;;  %v7758_v19 = vand.u32 4294901760, %v31991_v31  ;;  %v27532_v14 = vpack.c.bf16 %v31999_v4, %v31991_v31  ;;  %v20323_v6 = vld [vmem:[%s34790_s6 + $0x158] sm:$0xff]  ;;  %v20326_v4 = vld [vmem:[%s34790_s6 + $0x170] sm:$0xff] }
 0x79a   :  { %27497 = vmatprep.subr.bf16.mxu0 %v31979_v15  ;;  %v7767_v33 = vand.u32 4294901760, %v7766_v32  ;;  %v8304_v29 = vand.u32 4294901760, %v32085_v23  ;;  %v32126_v46 = vsub.f32 %v20322_v53, %v8236_v48 }
 0x79b   :  { %v7759_v18 = vsub.f32 %v31991_v31, %v7758_v19  ;;  %v20324_v31 = vld [vmem:[%s34790_s6 + $0x160] sm:$0xff] }
 0x79c   :  { %v8339_v62 = vand.u32 4294901760, %v32126_v46 }
 0x79d   :  { %27499 = vmatpush3.bf16.msra.mxu0 %v31979_v15  ;;  %v7760_v3 = vand.u32 4294901760, %v7759_v18 }
 0x79e   :  { %27501 = vmatprep.subr.bf16.mxu0 %v31997_v1  ;;  %v8340_v40 = vsub.f32 %v32126_v46, %v8339_v62 }
 0x79f   :  { %v27516_v54 = vpack.c.bf16 %v7767_v33, %v7760_v3 }
 0x7a1   :  { %27503 = vmatpush3.bf16.msra.mxu0 %v31997_v1 }
 0x7a2   :  { %27505 = vmatprep.subr.bf16.mxu0 %v32001_v26 }
 0x7a5   :  { %27507 = vmatpush3.bf16.msra.mxu0 %v32001_v26 }
 0x7a6   :  { %27509 = vmatprep.subr.bf16.mxu0 %v27508_v36 }
 0x7a8   :  { %23867 = vmatmul.mubr.f32.vlgmr.msra.gmra.mrb[16].mxu0 %v7721_v5 }
 0x7a9   :  { %27511 = vmatpush3.bf16.msra.mxu0 %v27508_v36  ;;  %23885 = vmatprep.mubr.f32.mxu0 %v31920_v11  ;;  %v8248_v36 = vand.u32 4294901760, %v20326_v4 }
 0x7aa   :  { %27513 = vmatprep.subr.bf16.mxu0 %v27512_v9 }
 0x7ab   :  { %v32166_v24 = vsub.f32 %v20326_v4, %v8248_v36  ;;  %v20351_v4 = vld [vmem:[%s34788_s4 + $0x108] sm:$0xff] }
 0x7ad   :  { %27515 = vmatpush3.bf16.msra.mxu0 %v27512_v9  ;;  %v32153_v9 = vpack.c.bf16 %v8251_v10, %v8248_v36 }
 0x7ae   :  { %27517 = vmatprep.subr.bf16.mxu0 %v27516_v54 }
 0x7b1   :  { %27519 = vmatpush3.bf16.msra.mxu0 %v27516_v54 }
 0x7b2   :  { %27521 = vmatprep.subr.bf16.mxu0 %v27520_v45 }
 0x7b5   :  { %27523 = vmatpush3.bf16.msra.mxu0 %v27520_v45  ;;  %v32168_v45 = vsub.f32 %v20327_v22, %v8251_v10 }
 0x7b6   :  { %27525 = vmatprep.subr.bf16.mxu0 %v27524_v0 }
 0x7b7   :  { %v8374_v27 = vand.u32 4294901760, %v32168_v45 }
 0x7b8   :  { %23886 = vmatmul.mubr.f32.vlgmr.msra.gmra.mrb[16].mxu0 %v31976_v28 }
 0x7b9   :  { %27527 = vmatpush3.bf16.msra.mxu0 %v27524_v0  ;;  %23904 = vmatprep.mubr.f32.mxu0 %v31932_v58  ;;  %v27560_v58 = vpack.c.bf16 %v7751_v49, %v7744_v25  ;;  %v8239_v25 = vand.u32 4294901760, %v20323_v6  ;;  %v8305_v49 = vsub.f32 %v32085_v23, %v8304_v29 }
 0x7ba   :  { %27529 = vmatprep.subr.bf16.mxu0 %v27528_v39 }
 0x7bb   :  { %v8306_v21 = vand.u32 4294901760, %v8305_v49 }
 0x7bd   :  { %27531 = vmatpush3.bf16.msra.mxu0 %v27528_v39 }
 0x7be   :  { %27533 = vmatprep.subr.bf16.mxu0 %v27532_v14 }
 0x7c1   :  { %27535 = vmatpush3.bf16.msra.mxu0 %v27532_v14  ;;  %v8341_v14 = vand.u32 4294901760, %v8340_v40 }
 0x7c2   :  { %27537 = vmatprep.subr.bf16.mxu0 %v27536_v17 }
 0x7c5   :  { %27539 = vmatpush3.bf16.msra.mxu0 %v27536_v17 }
 0x7c6   :  { %27541 = vmatprep.subr.bf16.mxu0 %v31951_v56 }
 0x7c8   :  { %23905 = vmatmul.mubr.f32.vlgmr.msra.gmra.mrb[16].mxu0 %v31994_v41  ;;  %v20325_v41 = vld [vmem:[%s34790_s6 + $0x168] sm:$0xff] }
 0x7c9   :  { %27543 = vmatpush3.bf16.msra.mxu0 %v31951_v56  ;;  %23923 = vmatprep.mubr.f32.mxu0 %v7709_v55  ;;  %v27564_v55 = vpack.c.bf16 %v7765_v20, %v7758_v19  ;;  %v32128_v19 = vsub.f32 %v20323_v6, %v8239_v25  ;;  %v8245_v20 = vand.u32 4294901760, %v20325_v41 }
 0x7ca   :  { %27545 = vmatprep.subr.bf16.mxu0 %v31979_v15 }
 0x7cb   :  { %v8346_v32 = vand.u32 4294901760, %v32128_v19  ;;  %v32151_v30 = vsub.f32 %v20325_v41, %v8245_v20 }
 0x7cd   :  { %27547 = vmatpush3.bf16.msra.mxu0 %v31979_v15  ;;  %v8347_v59 = vsub.f32 %v32128_v19, %v8346_v32  ;;  %v8360_v37 = vand.u32 4294901760, %v32151_v30 }
 0x7ce   :  { %27549 = vmatprep.subr.bf16.mxu0 %v31997_v1 }
 0x7cf   :  { %v8348_v17 = vand.u32 4294901760, %v8347_v59 }
 0x7d1   :  { %27551 = vmatpush3.bf16.msra.mxu0 %v31997_v1  ;;  %v27608_v63 = vpack.c.bf16 %v8348_v17, %v8341_v14  ;;  %v32338_v17 = vld [vmem:[%s34788_s4 + $0x138] sm:$0xff] }
 0x7d2   :  { %27553 = vmatprep.subr.bf16.mxu0 %v32001_v26 }
 0x7d5   :  { %27555 = vmatpush3.bf16.msra.mxu0 %v32001_v26 }
 0x7d6   :  { %27557 = vmatprep.subr.bf16.mxu0 %v27556_v51 }
 0x7d8   :  { %23924 = vmatmul.mubr.f32.vlgmr.msra.gmra.mrb[16].mxu0 %v7719_v60  ;;  %v32131_v60 = vpack.c.bf16 %v8239_v25, %v8236_v48  ;;  %v27632_v25 = vpack.c.bf16 %v32168_v45, %v32166_v24 }
 0x7d9   :  { %27559 = vmatpush3.bf16.msra.mxu0 %v27556_v51  ;;  %23942 = vmatprep.mubr.f32.mxu0 %v31920_v11 }
 0x7da   :  { %27561 = vmatprep.subr.bf16.mxu0 %v27560_v58 }
 0x7dd   :  { %27563 = vmatpush3.bf16.msra.mxu0 %v27560_v58  ;;  %v8361_v58 = vsub.f32 %v32151_v30, %v8360_v37 }
 0x7de   :  { %27565 = vmatprep.subr.bf16.mxu0 %v27564_v55 }
 0x7e1   :  { %27567 = vmatpush3.bf16.msra.mxu0 %v27564_v55  ;;  %v8367_v55 = vand.u32 4294901760, %v32166_v24 }
 0x7e2   :  { %27569 = vmatprep.subr.bf16.mxu0 %v27568_v8 }
 0x7e5   :  { %27571 = vmatpush3.bf16.msra.mxu0 %v27568_v8 }
 0x7e6   :  { %27573 = vmatprep.subr.bf16.mxu0 %v31951_v56 }
 0x7e8   :  { %23943 = vmatmul.mubr.f32.vlgmr.msra.gmra.mrb[16].mxu0 %v31976_v28 }
 0x7e9   :  { %27575 = vmatpush3.bf16.msra.mxu0 %v31951_v56  ;;  %23961 = vmatprep.mubr.f32.mxu0 %v31920_v11  ;;  %v7025_v56 = vsel %vm1637_vm2, %v7021_v42, 0.0  ;;  %v8233_v11 = vand.u32 4294901760, %v20321_v43  ;;  %v8362_v42 = vand.u32 4294901760, %v8361_v58 }
 0x7ea   :  { %27577 = vmatprep.subr.bf16.mxu0 %v31979_v15  ;;  %v8227_v57 = vsel %vm1039_vm0, %v7025_v56, 0 }
 0x7eb   :  { %v32101_v47 = vsub.f32 %v20321_v43, %v8233_v11  ;;  %v32104_v61 = vpack.c.bf16 %v8233_v11, %v8230_v2  ;;  %v8375_v43 = vsub.f32 %v32168_v45, %v8374_v27  ;;  %v32328_v45 = vld [vmem:[%s34788_s4 + $0x130] sm:$0xff] }
 0x7ed   :  { %27579 = vmatpush3.bf16.msra.mxu0 %v31979_v15  ;;  %v32099_v15 = vsub.f32 %v20320_v13, %v8230_v2  ;;  %v8332_v16 = vand.u32 4294901760, %v32101_v47  ;;  %v8368_v13 = vsub.f32 %v32166_v24, %v8367_v55  ;;  %v8376_v11 = vand.u32 4294901760, %v8375_v43  ;;  %v32323_v24 = vld [vmem:[%s34787_s8 + $0x78] sm:$0xff] }
 0x7ee   :  { %27581 = vmatprep.subr.bf16.mxu0 %v31997_v1  ;;  %v8884_v14 = vand.u32 4294901760, %v32323_v24 }
 0x7ef   :  { %v8325_v52 = vand.u32 4294901760, %v32099_v15  ;;  %v8333_v18 = vsub.f32 %v32101_v47, %v8332_v16  ;;  %v8369_v2 = vand.u32 4294901760, %v8368_v13  ;;  %v27620_v6 = vpack.c.bf16 %v32101_v47, %v32099_v15  ;;  %v20332_v47 = vld [vmem:[%s34787_s8 + $0x40] sm:$0xff] }
 0x7f1   :  { %27583 = vmatpush3.bf16.msra.mxu0 %v31997_v1  ;;  %v32115_v1 = vand.u32 4294901760, %v8227_v57  ;;  %v8326_v38 = vsub.f32 %v32099_v15, %v8325_v52  ;;  %v8334_v33 = vand.u32 4294901760, %v8333_v18  ;;  %v27616_v53 = vpack.c.bf16 %v8376_v11, %v8369_v2  ;;  %v32276_v18 = vld [vmem:[%s34787_s8 + $0x60] sm:$0xff] }
 0x7f2   :  { %27585 = vmatprep.subr.bf16.mxu0 %v32001_v26  ;;  %v27652_v49 = vpack.c.bf16 %v8332_v16, %v8325_v52  ;;  %v27664_v15 = vpack.c.bf16 %v8374_v27, %v8367_v55  ;;  %v9494_v27 = vand.u32 4294901760, %v32338_v17 }
 0x7f3   :  { %v32134_v44 = vsub.f32 %v8227_v57, %v32115_v1  ;;  %v8327_v5 = vand.u32 4294901760, %v8326_v38  ;;  %v27624_v57 = vpack.c.bf16 %v32128_v19, %v32126_v46  ;;  %v20334_v46 = vld [vmem:[%s34787_s8 + $0x50] sm:$0xff]  ;;  %v20335_v19 = vld [vmem:[%s34787_s8 + $0x58] sm:$0xff] }
 0x7f5   :  { %27587 = vmatpush3.bf16.msra.mxu0 %v32001_v26  ;;  %v8242_v26 = vand.u32 4294901760, %v20324_v31  ;;  %v8314_v3 = vand.u32 4294901760, %v32134_v44  ;;  %v27604_v39 = vpack.c.bf16 %v8334_v33, %v8327_v5 }
 0x7f6   :  { %27589 = vmatprep.subr.bf16.mxu0 %v32104_v61 }
 0x7f7   :  { %v32149_v35 = vsub.f32 %v20324_v31, %v8242_v26  ;;  %v8315_v0 = vsub.f32 %v32134_v44, %v8314_v3  ;;  %v8863_v31 = vand.u32 4294901760, %v20332_v47 }
 0x7f8   :  { %23962 = vmatmul.mubr.f32.vlgmr.msra.gmra.mrb[16].mxu0 %v31976_v28  ;;  %v32147_v28 = vpack.c.bf16 %v8245_v20, %v8242_v26  ;;  %v8869_v26 = vand.u32 4294901760, %v20334_v46  ;;  %v8872_v20 = vand.u32 4294901760, %v20335_v19 }
 0x7f9   :  { %27591 = vmatpush3.bf16.msra.mxu0 %v32104_v61  ;;  %23980 = vmatprep.mubr.f32.mxu0 %v8306_v21  ;;  %v8353_v54 = vand.u32 4294901760, %v32149_v35  ;;  %v8316_v8 = vand.u32 4294901760, %v8315_v0  ;;  %v27628_v48 = vpack.c.bf16 %v32151_v30, %v32149_v35  ;;  %v20353_v21 = vld [vmem:[%s34788_s4 + $0x118] sm:$0xff]  ;;  %v32294_v30 = vld [vmem:[%s34788_s4 + $0x128] sm:$0xff]  ;;  %v32303_v33 = vsub.f32 %v20332_v47, %v8863_v31 }
 0x7fa   :  { %27593 = vmatprep.subr.bf16.mxu0 %v32131_v60  ;;  %v9482_v36 = vand.u32 4294901760, %v20353_v21  ;;  %v32269_v10 = vpack.c.bf16 %v8872_v20, %v8869_v26 }
 0x7fb   :  { %v8354_v51 = vsub.f32 %v32149_v35, %v8353_v54  ;;  %v8958_v58 = vand.u32 4294901760, %v32303_v33 }
 0x7fc   :  { %v32386_v47 = vsub.f32 %v20353_v21, %v9482_v36 }
 0x7fd   :  { %27595 = vmatpush3.bf16.msra.mxu0 %v32131_v60  ;;  %v8355_v12 = vand.u32 4294901760, %v8354_v51  ;;  %v9491_v51 = vand.u32 4294901760, %v32328_v45  ;;  %v8959_v43 = vsub.f32 %v32303_v33, %v8958_v58 }
 0x7fe   :  { %27597 = vmatprep.subr.bf16.mxu0 %v32147_v28 }
 0x7ff   :  { %v27612_v56 = vpack.c.bf16 %v8362_v42, %v8355_v12  ;;  %v32365_v11 = vpack.c.bf16 %v9494_v27, %v9491_v51 }
 0x801   :  { %27599 = vmatpush3.bf16.msra.mxu0 %v32147_v28 }
 0x802   :  { %27601 = vmatprep.subr.bf16.mxu0 %v32153_v9 }
 0x805   :  { %27603 = vmatpush3.bf16.msra.mxu0 %v32153_v9 }
 0x806   :  { %27605 = vmatprep.subr.bf16.mxu0 %v27604_v39 }
 0x808   :  { %23981 = vmatmul.mubr.f32.vlgmr.msra.gmra.mrb[16].mxu0 %v8316_v8 }
 0x809   :  { %27607 = vmatpush3.bf16.msra.mxu0 %v27604_v39  ;;  %23999 = vmatprep.mubr.f32.mxu0 %v32071_v34 }
 0x80a   :  { %27609 = vmatprep.subr.bf16.mxu0 %v27608_v63 }
 0x80d   :  { %27611 = vmatpush3.bf16.msra.mxu0 %v27608_v63 }
 0x80e   :  { %27613 = vmatprep.subr.bf16.mxu0 %v27612_v56 }
 0x811   :  { %27615 = vmatpush3.bf16.msra.mxu0 %v27612_v56  ;;  %v29874_v56 = vld [vmem:[%s34792_s7] ss:$0 sm:$0xff] }
 0x812   :  { %27617 = vmatprep.subr.bf16.mxu0 %v27616_v53 }
 0x815   :  { %27619 = vmatpush3.bf16.msra.mxu0 %v27616_v53 }
 0x816   :  { %27621 = vmatprep.subr.bf16.mxu0 %v27620_v6 }
 0x818   :  { %24000 = vmatmul.mubr.f32.vlgmr.msra.gmra.mrb[16].mxu0 %v32115_v1 }
 0x819   :  { %27623 = vmatpush3.bf16.msra.mxu0 %v27620_v6  ;;  %24018 = vmatprep.mubr.f32.mxu0 %v32085_v23  ;;  %v27656_v23 = vpack.c.bf16 %v8346_v32, %v8339_v62  ;;  %v32281_v62 = vld [vmem:[%s34787_s8 + $0x68] sm:$0xff]  ;;  %v32286_v32 = vld [vmem:[%s34788_s4 + $0x120] sm:$0xff] }
 0x81a   :  { %27625 = vmatprep.subr.bf16.mxu0 %v27624_v57  ;;  %v8878_v35 = vand.u32 4294901760, %v32281_v62 }
 0x81d   :  { %27627 = vmatpush3.bf16.msra.mxu0 %v27624_v57  ;;  %v8960_v57 = vand.u32 4294901760, %v8959_v43 }
 0x81e   :  { %27629 = vmatprep.subr.bf16.mxu0 %v27628_v48 }
 0x821   :  { %27631 = vmatpush3.bf16.msra.mxu0 %v27628_v48 }
 0x822   :  { %27633 = vmatprep.subr.bf16.mxu0 %v27632_v25 }
 0x825   :  { %27635 = vmatpush3.bf16.msra.mxu0 %v27632_v25  ;;  %v32377_v25 = vsub.f32 %v20334_v46, %v8869_v26 }
 0x826   :  { %27637 = vmatprep.subr.bf16.mxu0 %v32104_v61 }
 0x828   :  { %24019 = vmatmul.mubr.f32.vlgmr.msra.gmra.mrb[16].mxu0 %v32134_v44 }
 0x829   :  { %27639 = vmatpush3.bf16.msra.mxu0 %v32104_v61  ;;  %24037 = vmatprep.mubr.f32.mxu0 %v8304_v29  ;;  %v27660_v29 = vpack.c.bf16 %v8360_v37, %v8353_v54  ;;  %v32318_v37 = vld [vmem:[%s34787_s8 + $0x70] sm:$0xff] }
 0x82a   :  { %27641 = vmatprep.subr.bf16.mxu0 %v32131_v60  ;;  %v8881_v39 = vand.u32 4294901760, %v32318_v37 }
 0x82c   :  { %v32353_v13 = vpack.c.bf16 %v8884_v14, %v8881_v39 }
 0x82d   :  { %27643 = vmatpush3.bf16.msra.mxu0 %v32131_v60 }
 0x82e   :  { %27645 = vmatprep.subr.bf16.mxu0 %v32147_v28 }
 0x831   :  { %27647 = vmatpush3.bf16.msra.mxu0 %v32147_v28 }
 0x832   :  { %27649 = vmatprep.subr.bf16.mxu0 %v32153_v9 }
 0x835   :  { %27651 = vmatpush3.bf16.msra.mxu0 %v32153_v9 }
 0x836   :  { %27653 = vmatprep.subr.bf16.mxu0 %v27652_v49 }
 0x838   :  { %24038 = vmatmul.mubr.f32.vlgmr.msra.gmra.mrb[16].mxu0 %v8314_v3  ;;  %v9488_v3 = vand.u32 4294901760, %v32294_v30 }
 0x839   :  { %27655 = vmatpush3.bf16.msra.mxu0 %v27652_v49  ;;  %24056 = vmatprep.mubr.f32.mxu0 %v32071_v34  ;;  %v32379_v49 = vsub.f32 %v20335_v19, %v8872_v20  ;;  %v8992_v20 = vsub.f32 %v32281_v62, %v8878_v35 }
 0x83a   :  { %27657 = vmatprep.subr.bf16.mxu0 %v27656_v23 }
 0x83d   :  { %27659 = vmatpush3.bf16.msra.mxu0 %v27656_v23 }
 0x83e   :  { %27661 = vmatprep.subr.bf16.mxu0 %v27660_v29 }
 0x841   :  { %27663 = vmatpush3.bf16.msra.mxu0 %v27660_v29 }
 0x842   :  { %27665 = vmatprep.subr.bf16.mxu0 %v27664_v15 }
 0x845   :  { %27667 = vmatpush3.bf16.msra.mxu0 %v27664_v15 }
 0x846   :  { %27669 = vmatprep.subr.bf16.mxu0 %v32104_v61 }
 0x848   :  { %24057 = vmatmul.mubr.f32.vlgmr.msra.gmra.mrb[16].mxu0 %v32115_v1 }
 0x849   :  { %27671 = vmatpush3.bf16.msra.mxu0 %v32104_v61  ;;  %24075 = vmatprep.mubr.f32.mxu0 %v32071_v34  ;;  %v20333_v34 = vld [vmem:[%s34787_s8 + $0x48] sm:$0xff]  ;;  %v20350_v61 = vld [vmem:[%s34788_s4 + $0x100] sm:$0xff] }
 0x84a   :  { %27673 = vmatprep.subr.bf16.mxu0 %v32131_v60  ;;  %v8866_v41 = vand.u32 4294901760, %v20333_v34  ;;  %v9473_v22 = vand.u32 4294901760, %v20350_v61 }
 0x84c   :  { %v32246_v52 = vpack.c.bf16 %v8866_v41, %v8863_v31  ;;  %v32305_v40 = vsub.f32 %v20333_v34, %v8866_v41  ;;  %v32307_v59 = vsub.f32 %v20350_v61, %v9473_v22  ;;  %v8972_v31 = vand.u32 4294901760, %v32377_v25 }
 0x84d   :  { %27675 = vmatpush3.bf16.msra.mxu0 %v32131_v60  ;;  %v32259_v60 = vld [vmem:[%s34788_s4 + $0x110] sm:$0xff]  ;;  %v8979_v41 = vand.u32 4294901760, %v32379_v49 }
 0x84e   :  { %27677 = vmatprep.subr.bf16.mxu0 %v32147_v28  ;;  %27685 = vmatprep.subr.bf16.mxu1 %v32246_v52  ;;  %v9479_v44 = vand.u32 4294901760, %v32259_v60  ;;  %v8965_v8 = vand.u32 4294901760, %v32305_v40  ;;  %v9568_v63 = vand.u32 4294901760, %v32307_v59 }
 0x84f   :  { %27687 = vmatpush3.bf16.msra.mxu1 %v32246_v52  ;;  %v8980_v26 = vsub.f32 %v32379_v49, %v8979_v41 }
 0x850   :  { %v32271_v38 = vpack.c.bf16 %v9482_v36, %v9479_v44  ;;  %27689 = vmatprep.subr.bf16.mxu1 %v32269_v10  ;;  %v8966_v53 = vsub.f32 %v32305_v40, %v8965_v8  ;;  %v9569_v6 = vsub.f32 %v32307_v59, %v9568_v63  ;;  %v32384_v15 = vsub.f32 %v32259_v60, %v9479_v44 }
 0x851   :  { %27679 = vmatpush3.bf16.msra.mxu0 %v32147_v28  ;;  %v8875_v28 = vand.u32 4294901760, %v32276_v18  ;;  %v8973_v60 = vsub.f32 %v32377_v25, %v8972_v31  ;;  %v8981_v62 = vand.u32 4294901760, %v8980_v26 }
 0x852   :  { %27681 = vmatprep.subr.bf16.mxu0 %v32153_v9  ;;  %v8967_v23 = vand.u32 4294901760, %v8966_v53  ;;  %v9570_v29 = vand.u32 4294901760, %v9569_v6 }
 0x853   :  { %27691 = vmatpush3.bf16.msra.mxu1 %v32269_v10  ;;  %v32301_v5 = vpack.c.bf16 %v8878_v35, %v8875_v28  ;;  %v32397_v46 = vsub.f32 %v32276_v18, %v8875_v28  ;;  %v8974_v28 = vand.u32 4294901760, %v8973_v60  ;;  %v8993_v35 = vand.u32 4294901760, %v8992_v20 }
 0x855   :  { %27683 = vmatpush3.bf16.msra.mxu0 %v32153_v9  ;;  %v9485_v9 = vand.u32 4294901760, %v32286_v32  ;;  %27693 = vmatprep.subr.bf16.mxu1 %v32301_v5  ;;  %v8986_v36 = vand.u32 4294901760, %v32397_v46  ;;  %v32423_v53 = vpack.c.bf16 %v8981_v62, %v8974_v28  ;;  %v8994_v6 = vsub.f32 %v8992_v20, %v8993_v35 }
 0x857   :  { %v32313_v54 = vpack.c.bf16 %v9488_v3, %v9485_v9  ;;  %27695 = vmatpush3.bf16.msra.mxu1 %v32301_v5  ;;  %v9595_v18 = vsub.f32 %v32286_v32, %v9485_v9  ;;  %v8999_v32 = vsub.f32 %v32318_v37, %v8881_v39  ;;  %v9616_v37 = vsub.f32 %v32338_v17, %v9494_v27 }
 0x858   :  { %24076 = vmatmul.mubr.f32.vlgmr.msra.gmra.mrb[16].mxu0 %v32115_v1  ;;  %v9476_v1 = vand.u32 4294901760, %v20351_v4  ;;  %27697 = vmatprep.subr.bf16.mxu1 %v32353_v13  ;;  %v32447_v17 = vpack.c.bf16 %v32305_v40, %v32303_v33  ;;  %v32492_v33 = vpack.c.bf16 %v8993_v35, %v8986_v36 }
 0x85a   :  { %v32248_v16 = vpack.c.bf16 %v9476_v1, %v9473_v22  ;;  %v32330_v0 = vsub.f32 %v20351_v4, %v9476_v1  ;;  %v32392_v4 = vpack.c.bf16 %v8967_v23, %v8960_v57  ;;  %v34920_v22 = vand.u32 4294901760, %v32384_v15 }
 0x85b   :  { %27699 = vmatpush3.bf16.msra.mxu1 %v32353_v13  ;;  %v9589_v1 = vand.u32 4294901760, %v32386_v47 }
 0x85c   :  { %27781 = vmatprep.subr.bf16.mxu0 %v32248_v16  ;;  %v9575_v12 = vand.u32 4294901760, %v32330_v0  ;;  %27701 = vmatprep.subr.bf16.mxu1 %v32392_v4  ;;  %v9583_v21 = vsub.f32 %v32384_v15, %v34920_v22  ;;  %v32451_v27 = vpack.c.bf16 %v32330_v0, %v32307_v59 }
 0x85d   :  { %27783 = vmatpush3.bf16.msra.mxu0 %v32248_v16  ;;  %v9590_v44 = vsub.f32 %v32386_v47, %v9589_v1 }
 0x85e   :  { %27785 = vmatprep.subr.bf16.mxu0 %v32271_v38  ;;  %v9576_v48 = vsub.f32 %v32330_v0, %v9575_v12  ;;  %v20271_v0 = vld [vmem:[%s34793_s9] ss:$0 sm:$0xff] }
 0x85f   :  { %v9591_v43 = vand.u32 4294901760, %v9590_v44 }
 0x860   :  { %v9577_v61 = vand.u32 4294901760, %v9576_v48 }
 0x861   :  { %27787 = vmatpush3.bf16.msra.mxu0 %v32271_v38 }
 0x862   :  { %27789 = vmatprep.subr.bf16.mxu0 %v32313_v54  ;;  %v32399_v19 = vpack.c.bf16 %v9577_v61, %v9570_v29  ;;  %v9609_v61 = vsub.f32 %v32328_v45, %v9491_v51 }
 0x864   :  { %v9610_v28 = vand.u32 4294901760, %v9609_v61 }
 0x865   :  { %27791 = vmatpush3.bf16.msra.mxu0 %v32313_v54 }
 0x866   :  { %27793 = vmatprep.subr.bf16.mxu0 %v32365_v11 }
 0x869   :  { %27795 = vmatpush3.bf16.msra.mxu0 %v32365_v11 }
 0x86a   :  { %27797 = vmatprep.subr.bf16.mxu0 %v32399_v19 }
 0x92b   :  { %v24077_v55 = vpop.f32.mrb[16].mxu0 }
 0x92c   :  { %v8799_v42 = vpop.f32.mrb[17].mxu0  ;;  %v8812_v34 = vadd.f32 %v29874_v56, %v24077_v55  ;;  %v9602_v55 = vsub.f32 %v32294_v30, %v9488_v3  ;;  %v9006_v30 = vsub.f32 %v32323_v24, %v8884_v14  ;;  %v8995_v3 = vand.u32 4294901760, %v8994_v6 }
 0x92d   :  { %v8811_v2 = vadd.f32 %v29874_v56, %v8799_v42  ;;  %v9584_v42 = vand.u32 4294901760, %v9583_v21  ;;  %v8987_v56 = vsub.f32 %v32397_v46, %v8986_v36  ;;  %v9617_v24 = vand.u32 4294901760, %v9616_v37 }
 0x92e   :  { %v9603_v57 = vand.u32 4294901760, %v9602_v55  ;;  %v9007_v26 = vand.u32 4294901760, %v9006_v30 }
 0x92f   :  { %8815 = vrot.lane.b32.xlu1 %v8811_v2, %s29877_s24  ;;  %v9596_v2 = vand.u32 4294901760, %v9595_v18  ;;  %v32428_v9 = vpack.c.bf16 %v9591_v43, %v9584_v42  ;;  %v8988_v48 = vand.u32 4294901760, %v8987_v56  ;;  %v9611_v43 = vsub.f32 %v9609_v61, %v9610_v28 }
 0x930   :  { %v9604_v29 = vsub.f32 %v9602_v55, %v9603_v57  ;;  %v9008_v62 = vsub.f32 %v9006_v30, %v9007_v26  ;;  %v9618_v6 = vsub.f32 %v9616_v37, %v9617_v24  ;;  %v32498_v59 = vpack.c.bf16 %v9617_v24, %v9610_v28 }
 0x931   :  { %v9597_v23 = vsub.f32 %v9595_v18, %v9596_v2  ;;  %v32439_v39 = vpack.c.bf16 %v8995_v3, %v8988_v48  ;;  %v9612_v45 = vand.u32 4294901760, %v9611_v43  ;;  %v32455_v48 = vpack.c.bf16 %v32379_v49, %v32377_v25 }
 0x932   :  { %v9605_v21 = vand.u32 4294901760, %v9604_v29  ;;  %v9009_v56 = vand.u32 4294901760, %v9008_v62  ;;  %v32459_v3 = vpack.c.bf16 %v32386_v47, %v32384_v15  ;;  %v32462_v29 = vpack.c.bf16 %v8992_v20, %v32397_v46 }
 0x933   :  { %8817 = vrot.lane.b32.xlu1 %v8812_v34, %s29877_s24  ;;  %v9000_v34 = vand.u32 4294901760, %v8999_v32  ;;  %v9598_v60 = vand.u32 4294901760, %v9597_v23  ;;  %v9619_v23 = vand.u32 4294901760, %v9618_v6  ;;  %v32474_v62 = vpack.c.bf16 %v8965_v8, %v8958_v58  ;;  %v5229_v8 = vpop.permute.xlu0 %5228  ;;  %v20342_v6 = vld [vmem:[%s34788_s4 + $0xc0] sm:$0xff] }
 0x934   :  { %v32480_v47 = vpack.c.bf16 %v9575_v12, %v9568_v63  ;;  %v32486_v46 = vpack.c.bf16 %v8979_v41, %v8972_v31  ;;  %v35115_v20 = vand.u32 4294901760, %v32384_v15  ;;  %v32494_v40 = vpack.c.bf16 %v9603_v57, %v9596_v2  ;;  %v35116_v63 = vld [vmem:[#allocation35_spill] sm:$0xff]  ;;  %v35117_v31 = vld [vmem:[#allocation34_spill] sm:$0xff] }
 0x935   :  { %v9001_v44 = vsub.f32 %v8999_v32, %v9000_v34  ;;  %v32441_v14 = vpack.c.bf16 %v9605_v21, %v9598_v60  ;;  %v32443_v22 = vpack.c.bf16 %v9619_v23, %v9612_v45  ;;  %v32464_v60 = vpack.c.bf16 %v9602_v55, %v9595_v18  ;;  %v20343_v45 = vld [vmem:[%s34788_s4 + $0xc8] sm:$0xff] }
 0x936   :  { %v32466_v21 = vpack.c.bf16 %v9006_v30, %v8999_v32  ;;  %v32490_v18 = vpack.c.bf16 %v9589_v1, %v35115_v20  ;;  %v32496_v58 = vpack.c.bf16 %v9007_v26, %v9000_v34  ;;  %v29509_v12 = vadd.f32 %v20271_v0, %v35116_v63  ;;  %v20347_v63 = vld [vmem:[%s34788_s4 + $0xe8] sm:$0xff] }
 0x937   :  { %v9002_v42 = vand.u32 4294901760, %v9001_v44  ;;  %v32468_v44 = vpack.c.bf16 %v9616_v37, %v9609_v61  ;;  %v5231_v49 = vpop.permute.xlu0 %5230  ;;  %v29508_v41 = vadd.f32 %v35117_v31, %v20271_v0  ;;  %v10059_v23 = vand.u32 4294901760, %v20342_v6 }
 0x938   :  { %v5234_v25 = vadd.f32 %v29509_v12, %v5229_v8  ;;  %v20346_v8 = vld [vmem:[%s34788_s4 + $0xe0] sm:$0xff] }
 0x939   :  { %v27712_v51 = vpack.c.bf16 %v9009_v56, %v9002_v42  ;;  %v5235_v36 = vadd.f32 %v29508_v41, %v5231_v49  ;;  %v20349_v49 = vld [vmem:[%s34788_s4 + $0xf8] sm:$0xff] }
 0x9a1   :  { %v8816_v15 = vpop.permute.xlu1 %8815 }
 0x9a2   :  { %v32505_v1 = vadd.f32 %v8816_v15, %v5234_v25  ;;  %v20348_v25 = vld [vmem:[%s34788_s4 + $0xf0] sm:$0xff] }
 0x9a4   :  { %v8857_v35 = vsel %vm1039_vm0, %v32505_v1, 0 }
 0x9a5   :  { %v32509_v55 = vand.u32 4294901760, %v8857_v35  ;;  %v8818_v2 = vpop.permute.xlu1 %8817 }
 0x9a6   :  { %v32511_v57 = vadd.f32 %v8818_v2, %v5235_v36 }
 0x9a7   :  { %v8936_v32 = vsub.f32 %v8857_v35, %v32509_v55  ;;  %v10071_v35 = vand.u32 4294901760, %v20346_v8 }
 0x9a8   :  { %v8860_v30 = vsel %vm1039_vm0, %v32511_v57, 0 }
 0x9a9   :  { %v32516_v34 = vand.u32 4294901760, %v8860_v30  ;;  %v8937_v61 = vand.u32 4294901760, %v8936_v32 }
 0x9ab   :  { %v8946_v26 = vsub.f32 %v8860_v30, %v32516_v34  ;;  %v8938_v37 = vsub.f32 %v8936_v32, %v8937_v61  ;;  %v10080_v30 = vand.u32 4294901760, %v20349_v49 }
 0x9ad   :  { %v8939_v28 = vand.u32 4294901760, %v8938_v37  ;;  %v32519_v24 = vand.u32 4294901760, %v8946_v26 }
 0x9af   :  { %24094 = vmatprep.mubr.f32.mxu1 %v8939_v28  ;;  %24208 = vmatprep.mubr.f32.mxu0 %v8939_v28  ;;  %v8948_v42 = vsub.f32 %v8946_v26, %v32519_v24 }
 0x9b1   :  { %v8949_v43 = vand.u32 4294901760, %v8948_v42 }
 0x9b3   :  { %24095 = vmatmul.mubr.f32.vlgmr.msra.gmra.mrb[16].mxu1 %v8949_v43  ;;  %24209 = vmatmul.mubr.f32.vlgmr.msra.gmra.mrb[18].mxu0 %v8949_v43 }
 0x9b4   :  { %27703 = vmatpush3.bf16.msra.mxu1 %v32392_v4  ;;  %27799 = vmatpush3.bf16.msra.mxu0 %v32399_v19  ;;  %v9442_v4 = vrot.slane %v32505_v1, 7 }
 0x9b5   :  { %24113 = vmatprep.mubr.f32.mxu1 %v32509_v55  ;;  %24227 = vmatprep.mubr.f32.mxu0 %v32509_v55 }
 0x9b6   :  { %27705 = vmatprep.subr.bf16.mxu1 %v32423_v53  ;;  %27801 = vmatprep.subr.bf16.mxu0 %v32428_v9 }
 0x9b8   :  { %27707 = vmatpush3.bf16.msra.mxu1 %v32423_v53  ;;  %27803 = vmatpush3.bf16.msra.mxu0 %v32428_v9  ;;  %v9446_v53 = vsel %vm1630_vm1, 0.0, %v9442_v4 }
 0x9b9   :  { %27709 = vmatprep.subr.bf16.mxu1 %v32439_v39  ;;  %27805 = vmatprep.subr.bf16.mxu0 %v32441_v14 }
 0x9bc   :  { %27711 = vmatpush3.bf16.msra.mxu1 %v32439_v39  ;;  %27807 = vmatpush3.bf16.msra.mxu0 %v32441_v14  ;;  %v10053_v39 = vsel %vm1039_vm0, %v9446_v53, 0 }
 0x9bd   :  { %27713 = vmatprep.subr.bf16.mxu1 %v27712_v51  ;;  %27809 = vmatprep.subr.bf16.mxu0 %v32443_v22  ;;  %v32596_v56 = vand.u32 4294901760, %v10053_v39 }
 0x9c0   :  { %27715 = vmatpush3.bf16.msra.mxu1 %v27712_v51  ;;  %27811 = vmatpush3.bf16.msra.mxu0 %v32443_v22  ;;  %v9443_v51 = vrot.slane %v32511_v57, 7 }
 0x9c1   :  { %27717 = vmatprep.subr.bf16.mxu1 %v32447_v17  ;;  %27813 = vmatprep.subr.bf16.mxu0 %v32451_v27 }
 0x9c3   :  { %24114 = vmatmul.mubr.f32.vlgmr.msra.gmra.mrb[16].mxu1 %v32516_v34  ;;  %24228 = vmatmul.mubr.f32.vlgmr.msra.gmra.mrb[18].mxu0 %v32516_v34 }
 0x9c4   :  { %27719 = vmatpush3.bf16.msra.mxu1 %v32447_v17  ;;  %24132 = vmatprep.mubr.f32.mxu1 %v8936_v32  ;;  %v10062_v17 = vand.u32 4294901760, %v20343_v45 }
 0x9c5   :  { %27815 = vmatpush3.bf16.msra.mxu0 %v32451_v27  ;;  %24246 = vmatprep.mubr.f32.mxu0 %v8936_v32  ;;  %v10077_v32 = vand.u32 4294901760, %v20348_v25 }
 0x9c6   :  { %27721 = vmatprep.subr.bf16.mxu1 %v32455_v48  ;;  %27817 = vmatprep.subr.bf16.mxu0 %v32459_v3  ;;  %v32635_v20 = vpack.c.bf16 %v10062_v17, %v10059_v23 }
 0x9c7   :  { %v32687_v4 = vpack.c.bf16 %v10080_v30, %v10077_v32 }
 0x9c8   :  { %27723 = vmatpush3.bf16.msra.mxu1 %v32455_v48 }
 0x9c9   :  { %27819 = vmatpush3.bf16.msra.mxu0 %v32459_v3  ;;  %27725 = vmatprep.subr.bf16.mxu1 %v32462_v29  ;;  %35119 = vst [vmem:[#allocation9_spill] sm:$0xff] %v32687_v4 }
 0x9ca   :  { %27821 = vmatprep.subr.bf16.mxu0 %v32464_v60 }
 0x9cc   :  { %27727 = vmatpush3.bf16.msra.mxu1 %v32462_v29  ;;  %v20344_v29 = vld [vmem:[%s34788_s4 + $0xd0] sm:$0xff] }
 0x9cd   :  { %27823 = vmatpush3.bf16.msra.mxu0 %v32464_v60  ;;  %27729 = vmatprep.subr.bf16.mxu1 %v32466_v21 }
 0x9ce   :  { %27825 = vmatprep.subr.bf16.mxu0 %v32468_v44 }
 0x9d0   :  { %27731 = vmatpush3.bf16.msra.mxu1 %v32466_v21  ;;  %v20345_v21 = vld [vmem:[%s34788_s4 + $0xd8] sm:$0xff] }
 0x9d1   :  { %27827 = vmatpush3.bf16.msra.mxu0 %v32468_v44  ;;  %27733 = vmatprep.subr.bf16.mxu1 %v32246_v52 }
 0x9d2   :  { %27829 = vmatprep.subr.bf16.mxu0 %v32248_v16 }
 0x9d3   :  { %24133 = vmatmul.mubr.f32.vlgmr.msra.gmra.mrb[16].mxu1 %v8946_v26 }
 0x9d4   :  { %24247 = vmatmul.mubr.f32.vlgmr.msra.gmra.mrb[18].mxu0 %v8946_v26  ;;  %27735 = vmatpush3.bf16.msra.mxu1 %v32246_v52 }
 0x9d5   :  { %24151 = vmatprep.mubr.f32.mxu1 %v8937_v61  ;;  %27831 = vmatpush3.bf16.msra.mxu0 %v32248_v16 }
 0x9d6   :  { %24265 = vmatprep.mubr.f32.mxu0 %v8937_v61  ;;  %27737 = vmatprep.subr.bf16.mxu1 %v32269_v10 }
 0x9d7   :  { %27833 = vmatprep.subr.bf16.mxu0 %v32271_v38 }
 0x9d8   :  { %27739 = vmatpush3.bf16.msra.mxu1 %v32269_v10 }
 0x9d9   :  { %27835 = vmatpush3.bf16.msra.mxu0 %v32271_v38  ;;  %27741 = vmatprep.subr.bf16.mxu1 %v32301_v5 }
 0x9da   :  { %27837 = vmatprep.subr.bf16.mxu0 %v32313_v54 }
 0x9dc   :  { %27743 = vmatpush3.bf16.msra.mxu1 %v32301_v5 }
 0x9dd   :  { %27839 = vmatpush3.bf16.msra.mxu0 %v32313_v54  ;;  %27745 = vmatprep.subr.bf16.mxu1 %v32353_v13 }
 0x9de   :  { %27841 = vmatprep.subr.bf16.mxu0 %v32365_v11 }
 0x9e0   :  { %27747 = vmatpush3.bf16.msra.mxu1 %v32353_v13 }
 0x9e1   :  { %27843 = vmatpush3.bf16.msra.mxu0 %v32365_v11  ;;  %27749 = vmatprep.subr.bf16.mxu1 %v32474_v62 }
 0x9e2   :  { %27845 = vmatprep.subr.bf16.mxu0 %v32480_v47 }
 0x9e3   :  { %24152 = vmatmul.mubr.f32.vlgmr.msra.gmra.mrb[16].mxu1 %v32519_v24 }
 0x9e4   :  { %24266 = vmatmul.mubr.f32.vlgmr.msra.gmra.mrb[18].mxu0 %v32519_v24  ;;  %27751 = vmatpush3.bf16.msra.mxu1 %v32474_v62  ;;  %v32628_v62 = vsub.f32 %v20342_v6, %v10059_v23  ;;  %v32677_v24 = vsub.f32 %v20346_v8, %v10071_v35 }
 0x9e5   :  { %24170 = vmatprep.mubr.f32.mxu1 %v32509_v55  ;;  %27847 = vmatpush3.bf16.msra.mxu0 %v32480_v47 }
 0x9e6   :  { %24284 = vmatprep.mubr.f32.mxu0 %v32509_v55  ;;  %27753 = vmatprep.subr.bf16.mxu1 %v32486_v46  ;;  %v10154_v12 = vand.u32 4294901760, %v32628_v62 }
 0x9e7   :  { %27849 = vmatprep.subr.bf16.mxu0 %v32490_v18 }
 0x9e8   :  { %27755 = vmatpush3.bf16.msra.mxu1 %v32486_v46  ;;  %v32632_v46 = vsub.f32 %v20343_v45, %v10062_v17  ;;  %v10155_v61 = vsub.f32 %v32628_v62, %v10154_v12 }
 0x9e9   :  { %27851 = vmatpush3.bf16.msra.mxu0 %v32490_v18  ;;  %27757 = vmatprep.subr.bf16.mxu1 %v32492_v33 }
 0x9ea   :  { %27853 = vmatprep.subr.bf16.mxu0 %v32494_v40  ;;  %v10161_v15 = vand.u32 4294901760, %v32632_v46  ;;  %v10156_v53 = vand.u32 4294901760, %v10155_v61 }
 0x9ec   :  { %27759 = vmatpush3.bf16.msra.mxu1 %v32492_v33  ;;  %v10065_v33 = vand.u32 4294901760, %v20344_v29  ;;  %v10162_v26 = vsub.f32 %v32632_v46, %v10161_v15 }
 0x9ed   :  { %27855 = vmatpush3.bf16.msra.mxu0 %v32494_v40  ;;  %27761 = vmatprep.subr.bf16.mxu1 %v32496_v58 }
 0x9ee   :  { %27857 = vmatprep.subr.bf16.mxu0 %v32498_v59  ;;  %v32657_v31 = vsub.f32 %v20344_v29, %v10065_v33  ;;  %v32700_v29 = vsub.f32 %v20348_v25, %v10077_v32 }
 0x9f0   :  { %27763 = vmatpush3.bf16.msra.mxu1 %v32496_v58  ;;  %v10068_v58 = vand.u32 4294901760, %v20345_v21  ;;  %v10168_v37 = vand.u32 4294901760, %v32657_v31 }
 0x9f1   :  { %27859 = vmatpush3.bf16.msra.mxu0 %v32498_v59  ;;  %27765 = vmatprep.subr.bf16.mxu1 %v32246_v52 }
 0x9f2   :  { %27861 = vmatprep.subr.bf16.mxu0 %v32248_v16  ;;  %v32659_v41 = vsub.f32 %v20345_v21, %v10068_v58  ;;  %v10169_v6 = vsub.f32 %v32657_v31, %v10168_v37  ;;  %v32702_v21 = vsub.f32 %v20349_v49, %v10080_v30 }
 0x9f3   :  { %24171 = vmatmul.mubr.f32.vlgmr.msra.gmra.mrb[16].mxu1 %v32516_v34 }
 0x9f4   :  { %24285 = vmatmul.mubr.f32.vlgmr.msra.gmra.mrb[18].mxu0 %v32516_v34  ;;  %27767 = vmatpush3.bf16.msra.mxu1 %v32246_v52  ;;  %v32612_v52 = vsub.f32 %v10053_v39, %v32596_v56  ;;  %v10175_v28 = vand.u32 4294901760, %v32659_v41  ;;  %v10163_v39 = vand.u32 4294901760, %v10162_v26  ;;  %v10203_v25 = vand.u32 4294901760, %v32702_v21 }
 0x9f5   :  { %24189 = vmatprep.mubr.f32.mxu1 %v32509_v55  ;;  %27863 = vmatpush3.bf16.msra.mxu0 %v32248_v16 }
 0x9f6   :  { %24303 = vmatprep.mubr.f32.mxu0 %v32509_v55  ;;  %27769 = vmatprep.subr.bf16.mxu1 %v32269_v10  ;;  %v10133_v48 = vand.u32 4294901760, %v32612_v52  ;;  %v10074_v55 = vand.u32 4294901760, %v20347_v63  ;;  %v10176_v45 = vsub.f32 %v32659_v41, %v10175_v28  ;;  %v10204_v30 = vsub.f32 %v32702_v21, %v10203_v25 }
 0x9f7   :  { %27865 = vmatprep.subr.bf16.mxu0 %v32271_v38 }
 0x9f8   :  { %27771 = vmatpush3.bf16.msra.mxu1 %v32269_v10  ;;  %v9447_v10 = vsel %vm1630_vm1, 0.0, %v9443_v51  ;;  %v32685_v43 = vsub.f32 %v20347_v63, %v10074_v55  ;;  %v10182_v51 = vand.u32 4294901760, %v32677_v24  ;;  %v10196_v63 = vand.u32 4294901760, %v32700_v29 }
 0x9f9   :  { %27867 = vmatpush3.bf16.msra.mxu0 %v32271_v38  ;;  %27773 = vmatprep.subr.bf16.mxu1 %v32301_v5  ;;  %v10056_v0 = vsel %vm1039_vm0, %v9447_v10, 0  ;;  %v32705_v10 = vpack.c.bf16 %v10163_v39, %v10156_v53  ;;  %v10205_v53 = vand.u32 4294901760, %v10204_v30  ;;  %v20364_v30 = vld [vmem:[%s34788_s4 + $0x170] sm:$0xff] }
 0x9fa   :  { %27869 = vmatprep.subr.bf16.mxu0 %v32313_v54  ;;  %v32661_v36 = vand.u32 4294901760, %v10056_v0  ;;  %v10189_v17 = vand.u32 4294901760, %v32685_v43  ;;  %v10197_v32 = vsub.f32 %v32700_v29, %v10196_v63 }
 0x9fb   :  { %35120 = vst [vmem:[#allocation5_spill] sm:$0xff] %v32705_v10 }
 0x9fc   :  { %27775 = vmatpush3.bf16.msra.mxu1 %v32301_v5  ;;  %v10134_v5 = vsub.f32 %v32612_v52, %v10133_v48  ;;  %v32683_v42 = vsub.f32 %v10056_v0, %v32661_v36  ;;  %v10183_v0 = vsub.f32 %v32677_v24, %v10182_v51  ;;  %v10190_v8 = vsub.f32 %v32685_v43, %v10189_v17 }
 0x9fd   :  { %27871 = vmatpush3.bf16.msra.mxu0 %v32313_v54  ;;  %27777 = vmatprep.subr.bf16.mxu1 %v32353_v13  ;;  %v10198_v26 = vand.u32 4294901760, %v10197_v32 }
 0x9fe   :  { %27873 = vmatprep.subr.bf16.mxu0 %v32365_v11  ;;  %v10135_v2 = vand.u32 4294901760, %v10134_v5  ;;  %v10143_v23 = vand.u32 4294901760, %v32683_v42 }
 0x9ff   :  { %v32730_v39 = vpack.c.bf16 %v10205_v53, %v10198_v26  ;;  %v20365_v26 = vld [vmem:[%s34788_s4 + $0x178] sm:$0xff] }
 0xa00   :  { %27779 = vmatpush3.bf16.msra.mxu1 %v32353_v13  ;;  %v32664_v13 = vpack.c.bf16 %v10068_v58, %v10065_v33  ;;  %v10170_v33 = vand.u32 4294901760, %v10169_v6  ;;  %v10177_v58 = vand.u32 4294901760, %v10176_v45  ;;  %v10144_v5 = vsub.f32 %v32683_v42, %v10143_v23 }
 0xa01   :  { %27875 = vmatpush3.bf16.msra.mxu0 %v32365_v11  ;;  %35123 = vst [vmem:[#allocation7_spill] sm:$0xff] %v32730_v39  ;;  %v32736_v6 = vpack.c.bf16 %v32632_v46, %v32628_v62  ;;  %v32742_v45 = vpack.c.bf16 %v32659_v41, %v32657_v31  ;;  %v9448_v62 = vrot.slane %v32505_v1, 1  ;;  %v32797_v46 = vpack.c.bf16 %v10203_v25, %v10196_v63 }
 0xa02   :  { %27877 = vmatprep.subr.bf16.mxu0 %v32635_v20  ;;  %v32718_v49 = vpack.c.bf16 %v10177_v58, %v10170_v33  ;;  %v32750_v33 = vpack.c.bf16 %v32685_v43, %v32677_v24  ;;  %v32756_v58 = vpack.c.bf16 %v32702_v21, %v32700_v29  ;;  %v9449_v41 = vrot.slane %v32511_v57, 1  ;;  %v20361_v29 = vld [vmem:[%s34788_s4 + $0x158] sm:$0xff] }
 0xa03   :  { %24190 = vmatmul.mubr.f32.vlgmr.msra.gmra.mrb[16].mxu1 %v32516_v34  ;;  %35124 = vst [vmem:[#allocation10_spill] sm:$0xff] %v32736_v6  ;;  %35125 = vst [vmem:[#allocation11_spill] sm:$0xff] %v32742_v45  ;;  %v10663_v25 = vand.u32 4294901760, %v20361_v29 }
 0xa04   :  { %24304 = vmatmul.mubr.f32.vlgmr.msra.gmra.mrb[18].mxu0 %v32516_v34  ;;  %v32680_v34 = vpack.c.bf16 %v10074_v55, %v10071_v35  ;;  %35121 = vst [vmem:[#allocation6_spill] sm:$0xff] %v32718_v49  ;;  %v10184_v35 = vand.u32 4294901760, %v10183_v0  ;;  %v10145_v55 = vand.u32 4294901760, %v10144_v5  ;;  %35126 = vst [vmem:[#allocation12_spill] sm:$0xff] %v32750_v33  ;;  %v9453_v43 = vsel %vm1637_vm2, %v9449_v41, 0.0 }
 0xa05   :  { %27879 = vmatpush3.bf16.msra.mxu0 %v32635_v20  ;;  %24322 = vmatprep.mubr.f32.mxu0 %v10135_v2  ;;  %v10191_v2 = vand.u32 4294901760, %v10190_v8  ;;  %35127 = vst [vmem:[#allocation13_spill] sm:$0xff] %v32756_v58  ;;  %35131 = vst [vmem:[#allocation17_spill] sm:$0xff] %v32797_v46  ;;  %v10651_v21 = vsel %vm1039_vm0, %v9453_v43, 0 }
 0xa06   :  { %27881 = vmatprep.subr.bf16.mxu0 %v32664_v13  ;;  %35118 = vst [vmem:[#allocation4_spill] sm:$0xff] %v32680_v34  ;;  %v32849_v32 = vand.u32 4294901760, %v10651_v21 }
 0xa07   :  { %v32726_v61 = vpack.c.bf16 %v10191_v2, %v10184_v35  ;;  %v20363_v2 = vld [vmem:[%s34788_s4 + $0x168] sm:$0xff] }
 0xa09   :  { %27883 = vmatpush3.bf16.msra.mxu0 %v32664_v13  ;;  %35122 = vst [vmem:[#allocation8_spill] sm:$0xff] %v32726_v61 }
 0xa0a   :  { %27885 = vmatprep.subr.bf16.mxu0 %v32680_v34 }
 0xa0d   :  { %27887 = vmatpush3.bf16.msra.mxu0 %v32680_v34 }
 0xa0e   :  { %27889 = vmatprep.subr.bf16.mxu0 %v32687_v4 }
 0xa11   :  { %27891 = vmatpush3.bf16.msra.mxu0 %v32687_v4 }
 0xa12   :  { %27893 = vmatprep.subr.bf16.mxu0 %v32705_v10 }
 0xa14   :  { %24323 = vmatmul.mubr.f32.vlgmr.msra.gmra.mrb[18].mxu0 %v10145_v55  ;;  %v20362_v55 = vld [vmem:[%s34788_s4 + $0x160] sm:$0xff] }
 0xa15   :  { %27895 = vmatpush3.bf16.msra.mxu0 %v32705_v10  ;;  %24341 = vmatprep.mubr.f32.mxu0 %v32596_v56 }
 0xa16   :  { %27897 = vmatprep.subr.bf16.mxu0 %v32718_v49 }
 0xa19   :  { %27899 = vmatpush3.bf16.msra.mxu0 %v32718_v49 }
 0xa1a   :  { %27901 = vmatprep.subr.bf16.mxu0 %v32726_v61 }
 0xa1d   :  { %27903 = vmatpush3.bf16.msra.mxu0 %v32726_v61 }
 0xa1e   :  { %27905 = vmatprep.subr.bf16.mxu0 %v32730_v39 }
 0xa21   :  { %27907 = vmatpush3.bf16.msra.mxu0 %v32730_v39 }
 0xa22   :  { %27909 = vmatprep.subr.bf16.mxu0 %v32736_v6 }
 0xa24   :  { %24342 = vmatmul.mubr.f32.vlgmr.msra.gmra.mrb[18].mxu0 %v32661_v36 }
 0xa25   :  { %27911 = vmatpush3.bf16.msra.mxu0 %v32736_v6  ;;  %24360 = vmatprep.mubr.f32.mxu0 %v32612_v52  ;;  %v32783_v52 = vpack.c.bf16 %v10175_v28, %v10168_v37  ;;  %v20358_v37 = vld [vmem:[%s34788_s4 + $0x140] sm:$0xff]  ;;  %v20359_v28 = vld [vmem:[%s34788_s4 + $0x148] sm:$0xff] }
 0xa26   :  { %27913 = vmatprep.subr.bf16.mxu0 %v32742_v45 }
 0xa27   :  { %35129 = vst [vmem:[#allocation15_spill] sm:$0xff] %v32783_v52 }
 0xa29   :  { %27915 = vmatpush3.bf16.msra.mxu0 %v32742_v45 }
 0xa2a   :  { %27917 = vmatprep.subr.bf16.mxu0 %v32750_v33 }
 0xa2d   :  { %27919 = vmatpush3.bf16.msra.mxu0 %v32750_v33 }
 0xa2e   :  { %27921 = vmatprep.subr.bf16.mxu0 %v32756_v58 }
 0xa31   :  { %27923 = vmatpush3.bf16.msra.mxu0 %v32756_v58 }
 0xa32   :  { %27925 = vmatprep.subr.bf16.mxu0 %v32635_v20 }
 0xa34   :  { %24361 = vmatmul.mubr.f32.vlgmr.msra.gmra.mrb[18].mxu0 %v32683_v42  ;;  %v32775_v42 = vpack.c.bf16 %v10161_v15, %v10154_v12  ;;  %v9452_v12 = vsel %vm1637_vm2, %v9448_v62, 0.0 }
 0xa35   :  { %27927 = vmatpush3.bf16.msra.mxu0 %v32635_v20  ;;  %24379 = vmatprep.mubr.f32.mxu0 %v10133_v48  ;;  %v32792_v48 = vpack.c.bf16 %v10189_v17, %v10182_v51  ;;  %v10648_v15 = vsel %vm1039_vm0, %v9452_v12, 0  ;;  %v10657_v51 = vand.u32 4294901760, %v20359_v28  ;;  %v20360_v17 = vld [vmem:[%s34788_s4 + $0x150] sm:$0xff] }
 0xa36   :  { %27929 = vmatprep.subr.bf16.mxu0 %v32664_v13  ;;  %35128 = vst [vmem:[#allocation14_spill] sm:$0xff] %v32775_v42  ;;  %v32805_v31 = vand.u32 4294901760, %v10648_v15  ;;  %v10660_v63 = vand.u32 4294901760, %v20360_v17 }
 0xa37   :  { %35130 = vst [vmem:[#allocation16_spill] sm:$0xff] %v32792_v48  ;;  %v32835_v5 = vsub.f32 %v20359_v28, %v10657_v51  ;;  %v10669_v28 = vand.u32 4294901760, %v20363_v2 }
 0xa38   :  { %v32819_v24 = vsub.f32 %v10648_v15, %v32805_v31  ;;  %v32860_v12 = vsub.f32 %v20360_v17, %v10660_v63  ;;  %v32862_v15 = vsub.f32 %v20361_v29, %v10663_v25  ;;  %v32865_v41 = vpack.c.bf16 %v10663_v25, %v10660_v63 }
 0xa39   :  { %27931 = vmatpush3.bf16.msra.mxu0 %v32664_v13  ;;  %v34924_v62 = vand.u32 4294901760, %v32835_v5 }
 0xa3a   :  { %27933 = vmatprep.subr.bf16.mxu0 %v32680_v34  ;;  %35133 = vst [vmem:[#allocation19_spill] sm:$0xff] %v32865_v41  ;;  %v34928_v63 = vand.u32 4294901760, %v32860_v12  ;;  %v35136_v7 = vand.u32 4294901760, %v32862_v15 }
 0xa3b   :  { %v10757_v29 = vsub.f32 %v32835_v5, %v34924_v62 }
 0xa3d   :  { %27935 = vmatpush3.bf16.msra.mxu0 %v32680_v34  ;;  %v10758_v62 = vand.u32 4294901760, %v10757_v29 }
 0xa3e   :  { %27937 = vmatprep.subr.bf16.mxu0 %v32687_v4 }
 0xa41   :  { %27939 = vmatpush3.bf16.msra.mxu0 %v32687_v4 }
 0xa42   :  { %27941 = vmatprep.subr.bf16.mxu0 %v32775_v42 }
 0xa44   :  { %24380 = vmatmul.mubr.f32.vlgmr.msra.gmra.mrb[18].mxu0 %v10143_v23  ;;  %v34921_v23 = vand.u32 4294901760, %v32819_v24 }
 0xa45   :  { %27943 = vmatpush3.bf16.msra.mxu0 %v32775_v42  ;;  %24398 = vmatprep.mubr.f32.mxu0 %v32596_v56 }
 0xa46   :  { %27945 = vmatprep.subr.bf16.mxu0 %v32783_v52  ;;  %v10729_v35 = vsub.f32 %v32819_v24, %v34921_v23  ;;  %v32869_v23 = vsub.f32 %v10651_v21, %v32849_v32 }
 0xa48   :  { %v10730_v43 = vand.u32 4294901760, %v10729_v35  ;;  %v32885_v35 = vsub.f32 %v20363_v2, %v10669_v28 }
 0xa49   :  { %27947 = vmatpush3.bf16.msra.mxu0 %v32783_v52 }
 0xa4a   :  { %27949 = vmatprep.subr.bf16.mxu0 %v32792_v48 }
 0xa4d   :  { %27951 = vmatpush3.bf16.msra.mxu0 %v32792_v48 }
 0xa4e   :  { %27953 = vmatprep.subr.bf16.mxu0 %v32797_v46 }
 0xa51   :  { %27955 = vmatpush3.bf16.msra.mxu0 %v32797_v46  ;;  %v10771_v46 = vsub.f32 %v32862_v15, %v35136_v7 }
 0xa52   :  { %27957 = vmatprep.subr.bf16.mxu0 %v32635_v20 }
 0xa53   :  { %v10772_v7 = vand.u32 4294901760, %v10771_v46 }
 0xa54   :  { %24399 = vmatmul.mubr.f32.vlgmr.msra.gmra.mrb[18].mxu0 %v32661_v36 }
 0xa55   :  { %27959 = vmatpush3.bf16.msra.mxu0 %v32635_v20  ;;  %24417 = vmatprep.mubr.f32.mxu0 %v32596_v56  ;;  %v10654_v56 = vand.u32 4294901760, %v20358_v37 }
 0xa56   :  { %27961 = vmatprep.subr.bf16.mxu0 %v32664_v13 }
 0xa57   :  { %v32833_v0 = vsub.f32 %v20358_v37, %v10654_v56  ;;  %v32838_v8 = vpack.c.bf16 %v10657_v51, %v10654_v56  ;;  %v10666_v37 = vand.u32 4294901760, %v20362_v55  ;;  %v10672_v56 = vand.u32 4294901760, %v20364_v30 }
 0xa58   :  { %v10675_v51 = vand.u32 4294901760, %v20365_v26 }
 0xa59   :  { %27963 = vmatpush3.bf16.msra.mxu0 %v32664_v13  ;;  %35132 = vst [vmem:[#allocation18_spill] sm:$0xff] %v32838_v8  ;;  %v34922_v53 = vand.u32 4294901760, %v32833_v0  ;;  %v32881_v25 = vpack.c.bf16 %v10669_v28, %v10666_v37  ;;  %v32883_v21 = vsub.f32 %v20362_v55, %v10666_v37  ;;  %v32900_v37 = vsub.f32 %v20364_v30, %v10672_v56 }
 0xa5a   :  { %27965 = vmatprep.subr.bf16.mxu0 %v32680_v34  ;;  %v32902_v28 = vsub.f32 %v20365_v26, %v10675_v51  ;;  %v35138_v30 = vand.u32 4294901760, %v32885_v35 }
 0xa5b   :  { %v10750_v17 = vsub.f32 %v32833_v0, %v34922_v53  ;;  %35134 = vst [vmem:[#allocation20_spill] sm:$0xff] %v32881_v25  ;;  %v34929_v53 = vand.u32 4294901760, %v32869_v23  ;;  %v34930_v55 = vand.u32 4294901760, %v32883_v21 }
 0xa5c   :  { %v10785_v26 = vsub.f32 %v32885_v35, %v35138_v30 }
 0xa5d   :  { %27967 = vmatpush3.bf16.msra.mxu0 %v32680_v34  ;;  %v10751_v50 = vand.u32 4294901760, %v10750_v17  ;;  %v10739_v17 = vsub.f32 %v32869_v23, %v34929_v53  ;;  %v10778_v2 = vsub.f32 %v32883_v21, %v34930_v55 }
 0xa5e   :  { %27969 = vmatprep.subr.bf16.mxu0 %v32687_v4 }
 0xa5f   :  { %v32908_v29 = vpack.c.bf16 %v10758_v62, %v10751_v50  ;;  %v10740_v50 = vand.u32 4294901760, %v10739_v17  ;;  %v10779_v46 = vand.u32 4294901760, %v10778_v2 }
 0xa61   :  { %27971 = vmatpush3.bf16.msra.mxu0 %v32687_v4  ;;  %35137 = vst [vmem:[#allocation22_spill] sm:$0xff] %v32908_v29 }
 0xa62   :  { %27973 = vmatprep.subr.bf16.mxu0 %v32838_v8 }
 0xa64   :  { %24418 = vmatmul.mubr.f32.vlgmr.msra.gmra.mrb[18].mxu0 %v32661_v36  ;;  %v10764_v36 = vsub.f32 %v32860_v12, %v34928_v63 }
 0xa65   :  { %27975 = vmatpush3.bf16.msra.mxu0 %v32838_v8  ;;  %24436 = vmatprep.mubr.f32.mxu0 %v10730_v43  ;;  %v32887_v43 = vpack.c.bf16 %v10675_v51, %v10672_v56  ;;  %v10791_v56 = vand.u32 4294901760, %v32900_v37  ;;  %v10798_v51 = vand.u32 4294901760, %v32902_v28 }
 0xa66   :  { %27977 = vmatprep.subr.bf16.mxu0 %v32865_v41  ;;  %v10765_v63 = vand.u32 4294901760, %v10764_v36  ;;  %v10786_v36 = vand.u32 4294901760, %v10785_v26  ;;  %v32958_v26 = vpack.c.bf16 %v32902_v28, %v32900_v37 }
 0xa67   :  { %35135 = vst [vmem:[#allocation21_spill] sm:$0xff] %v32887_v43  ;;  %v10792_v53 = vsub.f32 %v32900_v37, %v10791_v56  ;;  %v10799_v55 = vsub.f32 %v32902_v28, %v10798_v51  ;;  %v35147_v37 = vand.u32 4294901760, %v32833_v0  ;;  %v35148_v28 = vand.u32 4294901760, %v32835_v5 }
 0xa68   :  { %v32920_v62 = vpack.c.bf16 %v10772_v7, %v10765_v63  ;;  %v32928_v30 = vpack.c.bf16 %v10786_v36, %v10779_v46  ;;  %v32938_v7 = vpack.c.bf16 %v32835_v5, %v32833_v0  ;;  %35145 = vst [vmem:[#allocation29_spill] sm:$0xff] %v32958_v26  ;;  %v35151_v36 = vand.u32 4294901760, %v32862_v15 }
 0xa69   :  { %27979 = vmatpush3.bf16.msra.mxu0 %v32865_v41  ;;  %v10793_v17 = vand.u32 4294901760, %v10792_v53  ;;  %v10800_v63 = vand.u32 4294901760, %v10799_v55  ;;  %v32944_v53 = vpack.c.bf16 %v32862_v15, %v32860_v12  ;;  %v32952_v55 = vpack.c.bf16 %v32885_v35, %v32883_v21  ;;  %v20375_v15 = vld [vmem:[%s34790_s6 + $0x1c8] sm:$0xff] }
 0xa6a   :  { %27981 = vmatprep.subr.bf16.mxu0 %v32881_v25  ;;  %35139 = vst [vmem:[#allocation23_spill] sm:$0xff] %v32920_v62  ;;  %35140 = vst [vmem:[#allocation24_spill] sm:$0xff] %v32928_v30  ;;  %v32977_v46 = vpack.c.bf16 %v35148_v28, %v35147_v37  ;;  %v35154_v0 = vand.u32 4294901760, %v32883_v21  ;;  %v35155_v5 = vand.u32 4294901760, %v32885_v35  ;;  %v11279_v35 = vand.u32 4294901760, %v20375_v15  ;;  %v20377_v37 = vld [vmem:[%s34790_s6 + $0x1d8] sm:$0xff] }
 0xa6b   :  { %v32932_v2 = vpack.c.bf16 %v10800_v63, %v10793_v17  ;;  %35142 = vst [vmem:[#allocation26_spill] sm:$0xff] %v32938_v7  ;;  %35143 = vst [vmem:[#allocation27_spill] sm:$0xff] %v32944_v53  ;;  %v35153_v63 = vand.u32 4294901760, %v32869_v23 }
 0xa6c   :  { %35144 = vst [vmem:[#allocation28_spill] sm:$0xff] %v32952_v55  ;;  %35149 = vst [vmem:[#allocation30_spill] sm:$0xff] %v32977_v46 }
 0xa6d   :  { %27983 = vmatpush3.bf16.msra.mxu0 %v32881_v25  ;;  %35141 = vst [vmem:[#allocation25_spill] sm:$0xff] %v32932_v2 }
 0xa6e   :  { %27985 = vmatprep.subr.bf16.mxu0 %v32887_v43 }
 0xa71   :  { %27987 = vmatpush3.bf16.msra.mxu0 %v32887_v43 }
 0xa72   :  { %27989 = vmatprep.subr.bf16.mxu0 %v32908_v29 }
 0xa74   :  { %24437 = vmatmul.mubr.f32.vlgmr.msra.gmra.mrb[18].mxu0 %v10740_v50  ;;  %v35146_v50 = vand.u32 4294901760, %v32819_v24 }
 0xa75   :  { %27991 = vmatpush3.bf16.msra.mxu0 %v32908_v29  ;;  %24455 = vmatprep.mubr.f32.mxu0 %v32805_v31 }
 0xa76   :  { %27993 = vmatprep.subr.bf16.mxu0 %v32920_v62 }
 0xa79   :  { %27995 = vmatpush3.bf16.msra.mxu0 %v32920_v62 }
 0xa7a   :  { %27997 = vmatprep.subr.bf16.mxu0 %v32928_v30 }
 0xa7d   :  { %27999 = vmatpush3.bf16.msra.mxu0 %v32928_v30 }
 0xa7e   :  { %28001 = vmatprep.subr.bf16.mxu0 %v32932_v2 }
 0xa81   :  { %28003 = vmatpush3.bf16.msra.mxu0 %v32932_v2 }
 0xa82   :  { %28005 = vmatprep.subr.bf16.mxu0 %v32938_v7 }
 0xa84   :  { %24456 = vmatmul.mubr.f32.vlgmr.msra.gmra.mrb[18].mxu0 %v32849_v32 }
 0xa85   :  { %28007 = vmatpush3.bf16.msra.mxu0 %v32938_v7  ;;  %24474 = vmatprep.mubr.f32.mxu0 %v32819_v24  ;;  %v35150_v24 = vand.u32 4294901760, %v32860_v12  ;;  %v33000_v12 = vpack.c.bf16 %v10798_v51, %v10791_v56  ;;  %v20376_v51 = vld [vmem:[%s34790_s6 + $0x1d0] sm:$0xff] }
 0xa86   :  { %28009 = vmatprep.subr.bf16.mxu0 %v32944_v53  ;;  %v11282_v28 = vand.u32 4294901760, %v20376_v51 }
 0xa87   :  { %v32985_v17 = vpack.c.bf16 %v35151_v36, %v35150_v24  ;;  %35157 = vst [vmem:[#allocation33_spill] sm:$0xff] %v33000_v12  ;;  %v11285_v24 = vand.u32 4294901760, %v20377_v37 }
 0xa89   :  { %28011 = vmatpush3.bf16.msra.mxu0 %v32944_v53  ;;  %35152 = vst [vmem:[#allocation31_spill] sm:$0xff] %v32985_v17  ;;  %v33045_v36 = vpack.c.bf16 %v11285_v24, %v11282_v28 }
 0xa8a   :  { %28013 = vmatprep.subr.bf16.mxu0 %v32952_v55 }
 0xa8d   :  { %28015 = vmatpush3.bf16.msra.mxu0 %v32952_v55 }
 0xa8e   :  { %28017 = vmatprep.subr.bf16.mxu0 %v32958_v26 }
 0xa91   :  { %28019 = vmatpush3.bf16.msra.mxu0 %v32958_v26 }
 0xa92   :  { %28021 = vmatprep.subr.bf16.mxu0 %v32838_v8 }
 0xa94   :  { %24475 = vmatmul.mubr.f32.vlgmr.msra.gmra.mrb[18].mxu0 %v32869_v23 }
 0xa95   :  { %28023 = vmatpush3.bf16.msra.mxu0 %v32838_v8  ;;  %24493 = vmatprep.mubr.f32.mxu0 %v35146_v50  ;;  %v32996_v50 = vpack.c.bf16 %v35155_v5, %v35154_v0  ;;  %v20379_v0 = vld [vmem:[%s34790_s6 + $0x1e8] sm:$0xff] }
 0xa96   :  { %28025 = vmatprep.subr.bf16.mxu0 %v32865_v41 }
 0xa97   :  { %35156 = vst [vmem:[#allocation32_spill] sm:$0xff] %v32996_v50 }
 0xa99   :  { %28027 = vmatpush3.bf16.msra.mxu0 %v32865_v41 }
 0xa9a   :  { %28029 = vmatprep.subr.bf16.mxu0 %v32881_v25 }
 0xa9d   :  { %28031 = vmatpush3.bf16.msra.mxu0 %v32881_v25 }
 0xa9e   :  { %28033 = vmatprep.subr.bf16.mxu0 %v32887_v43 }
 0xaa1   :  { %28035 = vmatpush3.bf16.msra.mxu0 %v32887_v43 }
 0xaa2   :  { %28037 = vmatprep.subr.bf16.mxu0 %v32977_v46 }
 0xaa4   :  { %24494 = vmatmul.mubr.f32.vlgmr.msra.gmra.mrb[18].mxu0 %v35153_v63  ;;  %v20378_v63 = vld [vmem:[%s34790_s6 + $0x1e0] sm:$0xff] }
 0xaa5   :  { %28039 = vmatpush3.bf16.msra.mxu0 %v32977_v46  ;;  %24512 = vmatprep.mubr.f32.mxu0 %v32805_v31  ;;  %v11288_v5 = vand.u32 4294901760, %v20378_v63  ;;  %v20381_v46 = vld [vmem:[%s34790_s6 + $0x1f8] sm:$0xff] }
 0xaa6   :  { %28041 = vmatprep.subr.bf16.mxu0 %v32985_v17  ;;  %v11297_v55 = vand.u32 4294901760, %v20381_v46 }
 0xaa7   :  { %v11398_v48 = vsub.f32 %v20378_v63, %v11288_v5 }
 0xaa9   :  { %28043 = vmatpush3.bf16.msra.mxu0 %v32985_v17  ;;  %v20380_v17 = vld [vmem:[%s34790_s6 + $0x1f0] sm:$0xff]  ;;  %v11399_v33 = vand.u32 4294901760, %v11398_v48 }
 0xaaa   :  { %28045 = vmatprep.subr.bf16.mxu0 %v32996_v50  ;;  %v11294_v26 = vand.u32 4294901760, %v20380_v17 }
 0xaac   :  { %v33065_v2 = vpack.c.bf16 %v11297_v55, %v11294_v26 }
 0xaad   :  { %28047 = vmatpush3.bf16.msra.mxu0 %v32996_v50  ;;  %v11377_v50 = vsub.f32 %v20375_v15, %v11279_v35 }
 0xaae   :  { %28049 = vmatprep.subr.bf16.mxu0 %v33000_v12 }
 0xaaf   :  { %v11378_v7 = vand.u32 4294901760, %v11377_v50 }
 0xab1   :  { %28051 = vmatpush3.bf16.msra.mxu0 %v33000_v12  ;;  %v11379_v15 = vsub.f32 %v11377_v50, %v11378_v7 }
 0xab2   :  { %28053 = vmatprep.subr.bf16.mxu0 %v32838_v8 }
 0xab3   :  { %v11380_v62 = vand.u32 4294901760, %v11379_v15 }
 0xab4   :  { %24513 = vmatmul.mubr.f32.vlgmr.msra.gmra.mrb[18].mxu0 %v32849_v32 }
 0xab5   :  { %28055 = vmatpush3.bf16.msra.mxu0 %v32838_v8  ;;  %24531 = vmatprep.mubr.f32.mxu0 %v32805_v31 }
 0xab6   :  { %28057 = vmatprep.subr.bf16.mxu0 %v32865_v41 }
 0xab9   :  { %28059 = vmatpush3.bf16.msra.mxu0 %v32865_v41 }
 0xaba   :  { %28061 = vmatprep.subr.bf16.mxu0 %v32881_v25 }
 0xabd   :  { %28063 = vmatpush3.bf16.msra.mxu0 %v32881_v25 }
 0xabe   :  { %28065 = vmatprep.subr.bf16.mxu0 %v32887_v43 }
 0xac1   :  { %28067 = vmatpush3.bf16.msra.mxu0 %v32887_v43 }
 0xac2   :  { %28357 = vmatprep.subr.bf16.mxu0 %v32248_v16 }
 0xac4   :  { %24532 = vmatmul.mubr.f32.vlgmr.msra.gmra.mrb[18].mxu0 %v32849_v32  ;;  %v20374_v32 = vld [vmem:[%s34790_s6 + $0x1c0] sm:$0xff] }
 0xac5   :  { %28359 = vmatpush3.bf16.msra.mxu0 %v32248_v16  ;;  %v11276_v21 = vand.u32 4294901760, %v20374_v32 }
 0xac6   :  { %28361 = vmatprep.subr.bf16.mxu0 %v32271_v38 }
 0xac7   :  { %v33035_v56 = vpack.c.bf16 %v11279_v35, %v11276_v21  ;;  %v11370_v12 = vsub.f32 %v20374_v32, %v11276_v21  ;;  %v11384_v21 = vsub.f32 %v20376_v51, %v11282_v28  ;;  %v11391_v35 = vsub.f32 %v20377_v37, %v11285_v24 }
 0xac8   :  { %v11400_v37 = vsub.f32 %v11398_v48, %v11399_v33  ;;  %v11412_v24 = vsub.f32 %v20380_v17, %v11294_v26 }
 0xac9   :  { %28363 = vmatpush3.bf16.msra.mxu0 %v32271_v38  ;;  %28069 = vmatprep.subr.bf16.mxu1 %v33035_v56  ;;  %v11371_v53 = vand.u32 4294901760, %v11370_v12  ;;  %v11385_v29 = vand.u32 4294901760, %v11384_v21  ;;  %v11392_v43 = vand.u32 4294901760, %v11391_v35 }
 0xaca   :  { %28365 = vmatprep.subr.bf16.mxu0 %v32313_v54  ;;  %28071 = vmatpush3.bf16.msra.mxu1 %v33035_v56  ;;  %v11401_v15 = vand.u32 4294901760, %v11400_v37  ;;  %v11413_v39 = vand.u32 4294901760, %v11412_v24 }
 0xacb   :  { %28073 = vmatprep.subr.bf16.mxu1 %v33045_v36  ;;  %v11372_v32 = vsub.f32 %v11370_v12, %v11371_v53  ;;  %v11386_v41 = vsub.f32 %v11384_v21, %v11385_v29  ;;  %v11393_v8 = vsub.f32 %v11391_v35, %v11392_v43  ;;  %v28132_v4 = vpack.c.bf16 %v11378_v7, %v11371_v53 }
 0xacd   :  { %28367 = vmatpush3.bf16.msra.mxu0 %v32313_v54  ;;  %v11373_v30 = vand.u32 4294901760, %v11372_v32  ;;  %v11387_v42 = vand.u32 4294901760, %v11386_v41  ;;  %v11394_v58 = vand.u32 4294901760, %v11393_v8  ;;  %v11419_v32 = vsub.f32 %v20381_v46, %v11297_v55  ;;  %v20329_v55 = vld [vmem:[%s34791_s5 + $0x1] ss:$0 sm:$0xff] }
 0xace   :  { %28369 = vmatprep.subr.bf16.mxu0 %v32365_v11  ;;  %28075 = vmatpush3.bf16.msra.mxu1 %v33045_v36  ;;  %v28104_v41 = vpack.c.bf16 %v11391_v35, %v11384_v21  ;;  %v20367_v35 = vld [vmem:[%s34790_s6 + $0x188] sm:$0xff] }
 0xacf   :  { %v28084_v25 = vpack.c.bf16 %v11380_v62, %v11373_v30  ;;  %v28088_v51 = vpack.c.bf16 %v11394_v58, %v11387_v42  ;;  %v11420_v61 = vand.u32 4294901760, %v11419_v32  ;;  %v11414_v62 = vsub.f32 %v11412_v24, %v11413_v39 }
 0xad0   :  { %v28136_v58 = vpack.c.bf16 %v11392_v43, %v11385_v29 }
 0xad1   :  { %28371 = vmatpush3.bf16.msra.mxu0 %v32365_v11  ;;  %v11421_v30 = vsub.f32 %v11419_v32, %v11420_v61  ;;  %v11415_v10 = vand.u32 4294901760, %v11414_v62  ;;  %v28144_v34 = vpack.c.bf16 %v11420_v61, %v11413_v39  ;;  %v20369_v62 = vld [vmem:[%s34790_s6 + $0x198] sm:$0xff] }
 0xad2   :  { %28373 = vmatprep.subr.bf16.mxu0 %v32399_v19 }
 0xad3   :  { %v11422_v63 = vand.u32 4294901760, %v11421_v30 }
 0xad6   :  { %v33025_v31 = vpop.f32.mrb[16].mxu1 }
 0xad7   :  { %35158 = vst [vmem:[#allocation35_spill] sm:$0xff] %v33025_v31  ;;  %v33027_v23 = vpop.f32.mrb[17].mxu1 }
 0xad8   :  { %35159 = vst [vmem:[#allocation34_spill] sm:$0xff] %v33027_v23  ;;  %v11291_v23 = vand.u32 4294901760, %v20379_v0 }
 0xada   :  { %v33055_v31 = vpack.c.bf16 %v11291_v23, %v11288_v5  ;;  %v11405_v52 = vsub.f32 %v20379_v0, %v11291_v23  ;;  %v28096_v23 = vpack.c.bf16 %v11422_v63, %v11415_v10  ;;  %v28100_v0 = vpack.c.bf16 %v11377_v50, %v11370_v12 }
 0xadb   :  { %v28112_v5 = vpack.c.bf16 %v11419_v32, %v11412_v24  ;;  %v11865_v24 = vand.u32 4294901760, %v20367_v35 }
 0xadc   :  { %28077 = vmatprep.subr.bf16.mxu1 %v33055_v31  ;;  %v11406_v45 = vand.u32 4294901760, %v11405_v52  ;;  %v28108_v8 = vpack.c.bf16 %v11405_v52, %v11398_v48 }
 0xadd   :  { %28079 = vmatpush3.bf16.msra.mxu1 %v33055_v31 }
 0xade   :  { %28081 = vmatprep.subr.bf16.mxu1 %v33065_v2  ;;  %v11407_v28 = vsub.f32 %v11405_v52, %v11406_v45  ;;  %v28140_v42 = vpack.c.bf16 %v11406_v45, %v11399_v33 }
 0xae0   :  { %v11408_v6 = vand.u32 4294901760, %v11407_v28 }
 0xae1   :  { %28083 = vmatpush3.bf16.msra.mxu1 %v33065_v2 }
 0xae2   :  { %28085 = vmatprep.subr.bf16.mxu1 %v28084_v25  ;;  %v28092_v49 = vpack.c.bf16 %v11408_v6, %v11401_v15  ;;  %v20368_v15 = vld [vmem:[%s34790_s6 + $0x190] sm:$0xff] }
 0xb97   :  { %v24533_v26 = vpop.f32.mrb[18].mxu0 }
 0xb98   :  { %v11236_v46 = vadd.f32 %v24533_v26, %v20329_v55  ;;  %v11223_v6 = vpop.f32.mrb[19].mxu0  ;;  %v20373_v26 = vld [vmem:[%s34790_s6 + $0x1b8] sm:$0xff] }
 0xb99   :  { %v11235_v17 = vadd.f32 %v20329_v55, %v11223_v6  ;;  %v20372_v55 = vld [vmem:[%s34790_s6 + $0x1b0] sm:$0xff] }
 0xb9a   :  { %v33072_v37 = vmax.f32 %v11236_v46, 0.0 }
 0xb9b   :  { %v33074_v28 = vmax.f32 %v11235_v17, 0.0 }
 0xb9c   :  { %v11273_v10 = vsel %vm1039_vm0, %v33072_v37, 0 }
 0xb9d   :  { %v33078_v52 = vand.u32 4294901760, %v11273_v10  ;;  %v11271_v61 = vsel %vm1039_vm0, %v33074_v28, 0 }
 0xb9e   :  { %v11348_v39 = vand.u32 4294901760, %v11271_v61 }
 0xb9f   :  { %v11359_v45 = vsub.f32 %v11273_v10, %v33078_v52 }
 0xba0   :  { %v11349_v33 = vsub.f32 %v11271_v61, %v11348_v39 }
 0xba1   :  { %v11360_v48 = vand.u32 4294901760, %v11359_v45 }
 0xba2   :  { %v11350_v43 = vand.u32 4294901760, %v11349_v33 }
 0xba3   :  { %v11361_v29 = vsub.f32 %v11359_v45, %v11360_v48 }
 0xba4   :  { %v11351_v7 = vsub.f32 %v11349_v33, %v11350_v43 }
 0xba5   :  { %v11362_v50 = vand.u32 4294901760, %v11361_v29 }
 0xba6   :  { %v11352_v53 = vand.u32 4294901760, %v11351_v7 }
 0xba8   :  { %24550 = vmatprep.mubr.f32.mxu1 %v11352_v53 }
 0xba9   :  { %24551 = vmatmul.mubr.f32.vlgmr.msra.gmra.mrb[18].mxu1 %v11362_v50 }
 0xbaa   :  { %28087 = vmatpush3.bf16.msra.mxu1 %v28084_v25  ;;  %24569 = vmatprep.mubr.f32.mxu1 %v11348_v39 }
 0xbab   :  { %28089 = vmatprep.subr.bf16.mxu1 %v28088_v51 }
 0xbae   :  { %28091 = vmatpush3.bf16.msra.mxu1 %v28088_v51  ;;  %v11242_v51 = vrot.slane %v33072_v37, 7 }
 0xbaf   :  { %28093 = vmatprep.subr.bf16.mxu1 %v28092_v49 }
 0xbb0   :  { %v11246_v30 = vsel %vm1630_vm1, 0.0, %v11242_v51 }
 0xbb2   :  { %28095 = vmatpush3.bf16.msra.mxu1 %v28092_v49  ;;  %v11241_v49 = vrot.slane %v33074_v28, 7 }
 0xbb3   :  { %28097 = vmatprep.subr.bf16.mxu1 %v28096_v23 }
 0xbb4   :  { %v11245_v25 = vsel %vm1630_vm1, 0.0, %v11241_v49 }
 0xbb5   :  { %v11856_v12 = vsel %vm1039_vm0, %v11245_v25, 0 }
 0xbb6   :  { %28099 = vmatpush3.bf16.msra.mxu1 %v28096_v23  ;;  %v33096_v21 = vand.u32 4294901760, %v11856_v12 }
 0xbb7   :  { %28101 = vmatprep.subr.bf16.mxu1 %v28100_v0 }
 0xbb9   :  { %24570 = vmatmul.mubr.f32.vlgmr.msra.gmra.mrb[18].mxu1 %v33078_v52 }
 0xbba   :  { %28103 = vmatpush3.bf16.msra.mxu1 %v28100_v0  ;;  %24588 = vmatprep.mubr.f32.mxu1 %v11349_v33  ;;  %v11868_v0 = vand.u32 4294901760, %v20368_v15  ;;  %v11880_v33 = vand.u32 4294901760, %v20372_v55 }
 0xbbb   :  { %28105 = vmatprep.subr.bf16.mxu1 %v28104_v41 }
 0xbbc   :  { %v33148_v6 = vsub.f32 %v20368_v15, %v11868_v0 }
 0xbbe   :  { %28107 = vmatpush3.bf16.msra.mxu1 %v28104_v41  ;;  %v11871_v41 = vand.u32 4294901760, %v20369_v62  ;;  %v11971_v7 = vand.u32 4294901760, %v33148_v6 }
 0xbbf   :  { %28109 = vmatprep.subr.bf16.mxu1 %v28108_v8 }
 0xbc0   :  { %v33150_v17 = vsub.f32 %v20369_v62, %v11871_v41  ;;  %v33155_v61 = vpack.c.bf16 %v11871_v41, %v11868_v0  ;;  %v11972_v51 = vsub.f32 %v33148_v6, %v11971_v7 }
 0xbc2   :  { %28111 = vmatpush3.bf16.msra.mxu1 %v28108_v8  ;;  %v11859_v8 = vsel %vm1039_vm0, %v11246_v30, 0  ;;  %v11978_v53 = vand.u32 4294901760, %v33150_v17  ;;  %v33190_v30 = vsub.f32 %v20372_v55, %v11880_v33 }
 0xbc3   :  { %28113 = vmatprep.subr.bf16.mxu1 %v28112_v5  ;;  %v33152_v10 = vand.u32 4294901760, %v11859_v8 }
 0xbc6   :  { %28115 = vmatpush3.bf16.msra.mxu1 %v28112_v5 }
 0xbc7   :  { %28117 = vmatprep.subr.bf16.mxu1 %v33035_v56 }
 0xbc9   :  { %24589 = vmatmul.mubr.f32.vlgmr.msra.gmra.mrb[18].mxu1 %v11359_v45 }
 0xbca   :  { %28119 = vmatpush3.bf16.msra.mxu1 %v33035_v56  ;;  %24607 = vmatprep.mubr.f32.mxu1 %v11350_v43 }
 0xbcb   :  { %28121 = vmatprep.subr.bf16.mxu1 %v33045_v36 }
 0xbce   :  { %28123 = vmatpush3.bf16.msra.mxu1 %v33045_v36 }
 0xbcf   :  { %28125 = vmatprep.subr.bf16.mxu1 %v33055_v31 }
 0xbd2   :  { %28127 = vmatpush3.bf16.msra.mxu1 %v33055_v31 }
 0xbd3   :  { %28129 = vmatprep.subr.bf16.mxu1 %v33065_v2 }
 0xbd6   :  { %28131 = vmatpush3.bf16.msra.mxu1 %v33065_v2 }
 0xbd7   :  { %28133 = vmatprep.subr.bf16.mxu1 %v28132_v4 }
 0xbd9   :  { %24608 = vmatmul.mubr.f32.vlgmr.msra.gmra.mrb[18].mxu1 %v11360_v48  ;;  %v11883_v48 = vand.u32 4294901760, %v20373_v26 }
 0xbda   :  { %28135 = vmatpush3.bf16.msra.mxu1 %v28132_v4  ;;  %24626 = vmatprep.mubr.f32.mxu1 %v11348_v39  ;;  %v20366_v4 = vld [vmem:[%s34790_s6 + $0x180] sm:$0xff] }
 0xbdb   :  { %28137 = vmatprep.subr.bf16.mxu1 %v28136_v58  ;;  %v33192_v0 = vsub.f32 %v20373_v26, %v11883_v48  ;;  %v11999_v26 = vand.u32 4294901760, %v33190_v30 }
 0xbde   :  { %28139 = vmatpush3.bf16.msra.mxu1 %v28136_v58  ;;  %v20370_v58 = vld [vmem:[%s34790_s6 + $0x1a0] sm:$0xff] }
 0xbdf   :  { %28141 = vmatprep.subr.bf16.mxu1 %v28140_v42 }
 0xbe2   :  { %28143 = vmatpush3.bf16.msra.mxu1 %v28140_v42 }
 0xbe3   :  { %28145 = vmatprep.subr.bf16.mxu1 %v28144_v34 }
 0xbe6   :  { %28147 = vmatpush3.bf16.msra.mxu1 %v28144_v34  ;;  %v33108_v34 = vsub.f32 %v11856_v12, %v33096_v21  ;;  %v33177_v12 = vpack.c.bf16 %v11883_v48, %v11880_v33 }
 0xbe7   :  { %28149 = vmatprep.subr.bf16.mxu1 %v33035_v56 }
 0xbe8   :  { %v11936_v32 = vand.u32 4294901760, %v33108_v34 }
 0xbe9   :  { %24627 = vmatmul.mubr.f32.vlgmr.msra.gmra.mrb[18].mxu1 %v33078_v52 }
 0xbea   :  { %28151 = vmatpush3.bf16.msra.mxu1 %v33035_v56  ;;  %24645 = vmatprep.mubr.f32.mxu1 %v11348_v39  ;;  %v11862_v56 = vand.u32 4294901760, %v20366_v4  ;;  %v11937_v5 = vsub.f32 %v33108_v34, %v11936_v32 }
 0xbeb   :  { %28153 = vmatprep.subr.bf16.mxu1 %v33045_v36 }
 0xbec   :  { %v33121_v63 = vsub.f32 %v20366_v4, %v11862_v56  ;;  %v33127_v23 = vpack.c.bf16 %v11865_v24, %v11862_v56  ;;  %v11938_v45 = vand.u32 4294901760, %v11937_v5  ;;  %v11979_v56 = vsub.f32 %v33150_v17, %v11978_v53 }
 0xbee   :  { %28155 = vmatpush3.bf16.msra.mxu1 %v33045_v36  ;;  %v33124_v36 = vsub.f32 %v20367_v35, %v11865_v24  ;;  %v11957_v42 = vand.u32 4294901760, %v33121_v63  ;;  %v11980_v5 = vand.u32 4294901760, %v11979_v56 }
 0xbef   :  { %28157 = vmatprep.subr.bf16.mxu1 %v33055_v31 }
 0xbf0   :  { %v11964_v46 = vand.u32 4294901760, %v33124_v36  ;;  %v11958_v43 = vsub.f32 %v33121_v63, %v11957_v42 }
 0xbf2   :  { %28159 = vmatpush3.bf16.msra.mxu1 %v33055_v31  ;;  %v20371_v31 = vld [vmem:[%s34790_s6 + $0x1a8] sm:$0xff]  ;;  %v11965_v29 = vsub.f32 %v33124_v36, %v11964_v46  ;;  %v11959_v4 = vand.u32 4294901760, %v11958_v43  ;;  %v12000_v43 = vsub.f32 %v33190_v30, %v11999_v26 }
 0xbf3   :  { %28161 = vmatprep.subr.bf16.mxu1 %v33065_v2  ;;  %v11877_v39 = vand.u32 4294901760, %v20371_v31 }
 0xbf4   :  { %v11966_v35 = vand.u32 4294901760, %v11965_v29 }
 0xbf5   :  { %v33175_v25 = vsub.f32 %v20371_v31, %v11877_v39 }
 0xbf6   :  { %28163 = vmatpush3.bf16.msra.mxu1 %v33065_v2  ;;  %v11874_v2 = vand.u32 4294901760, %v20370_v58  ;;  %v28180_v41 = vpack.c.bf16 %v11966_v35, %v11959_v4  ;;  %v12001_v35 = vand.u32 4294901760, %v12000_v43 }
 0xbf7   :  { %28165 = vmatprep.subr.bf16.mxu1 %v33127_v23  ;;  %v11992_v62 = vand.u32 4294901760, %v33175_v25 }
 0xbf8   :  { %v33167_v50 = vsub.f32 %v20370_v58, %v11874_v2  ;;  %v33173_v49 = vpack.c.bf16 %v11877_v39, %v11874_v2  ;;  %v12006_v2 = vand.u32 4294901760, %v33192_v0 }
 0xbf9   :  { %24646 = vmatmul.mubr.f32.vlgmr.msra.gmra.mrb[18].mxu1 %v33078_v52  ;;  %v33170_v52 = vsub.f32 %v11859_v8, %v33152_v10  ;;  %v11973_v8 = vand.u32 4294901760, %v11972_v51  ;;  %v11993_v55 = vsub.f32 %v33175_v25, %v11992_v62 }
 0xbfa   :  { %28167 = vmatpush3.bf16.msra.mxu1 %v33127_v23  ;;  %24664 = vmatprep.mubr.f32.mxu1 %v11938_v45  ;;  %v11985_v24 = vand.u32 4294901760, %v33167_v50  ;;  %v12007_v29 = vsub.f32 %v33192_v0, %v12006_v2 }
 0xbfb   :  { %28169 = vmatprep.subr.bf16.mxu1 %v33155_v61  ;;  %v11946_v15 = vand.u32 4294901760, %v33170_v52  ;;  %v28184_v39 = vpack.c.bf16 %v11980_v5, %v11973_v8  ;;  %v11994_v48 = vand.u32 4294901760, %v11993_v55  ;;  %v28196_v8 = vpack.c.bf16 %v33124_v36, %v33121_v63 }
 0xbfc   :  { %v11986_v58 = vsub.f32 %v33167_v50, %v11985_v24  ;;  %v12008_v51 = vand.u32 4294901760, %v12007_v29  ;;  %v28200_v5 = vpack.c.bf16 %v33150_v17, %v33148_v6  ;;  %v11247_v63 = vrot.slane %v33074_v28, 1  ;;  %v20382_v17 = vld [vmem:[%s34790_s6 + $0x200] sm:$0xff] }
 0xbfd   :  { %v11947_v31 = vsub.f32 %v33170_v52, %v11946_v15  ;;  %v28240_v36 = vpack.c.bf16 %v12006_v2, %v11999_v26  ;;  %v11248_v28 = vrot.slane %v33072_v37, 1  ;;  %v12457_v37 = vand.u32 4294901760, %v20382_v17  ;;  %v20386_v26 = vld [vmem:[%s34790_s6 + $0x220] sm:$0xff] }
 0xbfe   :  { %28171 = vmatpush3.bf16.msra.mxu1 %v33155_v61  ;;  %v11987_v45 = vand.u32 4294901760, %v11986_v58  ;;  %v28192_v56 = vpack.c.bf16 %v12008_v51, %v12001_v35  ;;  %v28208_v58 = vpack.c.bf16 %v33192_v0, %v33190_v30 }
 0xbff   :  { %28173 = vmatprep.subr.bf16.mxu1 %v33173_v49  ;;  %v11948_v33 = vand.u32 4294901760, %v11947_v31 }
 0xc00   :  { %v28188_v4 = vpack.c.bf16 %v11994_v48, %v11987_v45  ;;  %v20389_v45 = vld [vmem:[%s34790_s6 + $0x238] sm:$0xff] }
 0xc02   :  { %28175 = vmatpush3.bf16.msra.mxu1 %v33173_v49 }
 0xc03   :  { %28177 = vmatprep.subr.bf16.mxu1 %v33177_v12 }
 0xc06   :  { %28179 = vmatpush3.bf16.msra.mxu1 %v33177_v12 }
 0xc07   :  { %28181 = vmatprep.subr.bf16.mxu1 %v28180_v41 }
 0xc09   :  { %24665 = vmatmul.mubr.f32.vlgmr.msra.gmra.mrb[18].mxu1 %v11948_v33 }
 0xc0a   :  { %28183 = vmatpush3.bf16.msra.mxu1 %v28180_v41  ;;  %24683 = vmatprep.mubr.f32.mxu1 %v33096_v21  ;;  %v28204_v41 = vpack.c.bf16 %v33175_v25, %v33167_v50  ;;  %v20384_v25 = vld [vmem:[%s34790_s6 + $0x210] sm:$0xff] }
 0xc0b   :  { %28185 = vmatprep.subr.bf16.mxu1 %v28184_v39  ;;  %v12463_v0 = vand.u32 4294901760, %v20384_v25 }
 0xc0d   :  { %v33302_v43 = vsub.f32 %v20384_v25, %v12463_v0 }
 0xc0e   :  { %28187 = vmatpush3.bf16.msra.mxu1 %v28184_v39  ;;  %v20388_v39 = vld [vmem:[%s34790_s6 + $0x230] sm:$0xff] }
 0xc0f   :  { %28189 = vmatprep.subr.bf16.mxu1 %v28188_v4 }
 0xc12   :  { %28191 = vmatpush3.bf16.msra.mxu1 %v28188_v4 }
 0xc13   :  { %28193 = vmatprep.subr.bf16.mxu1 %v28192_v56 }
 0xc16   :  { %28195 = vmatpush3.bf16.msra.mxu1 %v28192_v56 }
 0xc17   :  { %28197 = vmatprep.subr.bf16.mxu1 %v28196_v8 }
 0xc19   :  { %24684 = vmatmul.mubr.f32.vlgmr.msra.gmra.mrb[18].mxu1 %v33152_v10 }
 0xc1a   :  { %28199 = vmatpush3.bf16.msra.mxu1 %v28196_v8  ;;  %24702 = vmatprep.mubr.f32.mxu1 %v33108_v34  ;;  %v28232_v34 = vpack.c.bf16 %v11978_v53, %v11971_v7  ;;  %v20383_v7 = vld [vmem:[%s34790_s6 + $0x208] sm:$0xff]  ;;  %v12475_v8 = vand.u32 4294901760, %v20388_v39 }
 0xc1b   :  { %28201 = vmatprep.subr.bf16.mxu1 %v28200_v5 }
 0xc1e   :  { %28203 = vmatpush3.bf16.msra.mxu1 %v28200_v5  ;;  %v12478_v5 = vand.u32 4294901760, %v20389_v45 }
 0xc1f   :  { %28205 = vmatprep.subr.bf16.mxu1 %v28204_v41 }
 0xc20   :  { %v33344_v25 = vsub.f32 %v20389_v45, %v12478_v5 }
 0xc22   :  { %28207 = vmatpush3.bf16.msra.mxu1 %v28204_v41 }
 0xc23   :  { %28209 = vmatprep.subr.bf16.mxu1 %v28208_v58 }
 0xc26   :  { %28211 = vmatpush3.bf16.msra.mxu1 %v28208_v58 }
 0xc27   :  { %28213 = vmatprep.subr.bf16.mxu1 %v33127_v23 }
 0xc29   :  { %24703 = vmatmul.mubr.f32.vlgmr.msra.gmra.mrb[18].mxu1 %v33170_v52  ;;  %v28228_v52 = vpack.c.bf16 %v11964_v46, %v11957_v42  ;;  %v11251_v42 = vsel %vm1637_vm2, %v11247_v63, 0.0 }
 0xc2a   :  { %28215 = vmatpush3.bf16.msra.mxu1 %v33127_v23  ;;  %24721 = vmatprep.mubr.f32.mxu1 %v11936_v32  ;;  %v28236_v32 = vpack.c.bf16 %v11992_v62, %v11985_v24  ;;  %v12451_v46 = vsel %vm1039_vm0, %v11251_v42, 0  ;;  %v20385_v24 = vld [vmem:[%s34790_s6 + $0x218] sm:$0xff] }
 0xc2b   :  { %28217 = vmatprep.subr.bf16.mxu1 %v33155_v61  ;;  %v33247_v6 = vand.u32 4294901760, %v12451_v46  ;;  %v12466_v31 = vand.u32 4294901760, %v20385_v24 }
 0xc2d   :  { %v33261_v53 = vsub.f32 %v12451_v46, %v33247_v6  ;;  %v33304_v29 = vsub.f32 %v20385_v24, %v12466_v31  ;;  %v33307_v4 = vpack.c.bf16 %v12466_v31, %v12463_v0 }
 0xc2e   :  { %28219 = vmatpush3.bf16.msra.mxu1 %v33155_v61 }
 0xc2f   :  { %28221 = vmatprep.subr.bf16.mxu1 %v33173_v49  ;;  %v12531_v50 = vand.u32 4294901760, %v33261_v53 }
 0xc31   :  { %v12532_v55 = vsub.f32 %v33261_v53, %v12531_v50 }
 0xc32   :  { %28223 = vmatpush3.bf16.msra.mxu1 %v33173_v49 }
 0xc33   :  { %28225 = vmatprep.subr.bf16.mxu1 %v33177_v12  ;;  %v12533_v51 = vand.u32 4294901760, %v12532_v55 }
 0xc36   :  { %28227 = vmatpush3.bf16.msra.mxu1 %v33177_v12 }
 0xc37   :  { %28229 = vmatprep.subr.bf16.mxu1 %v28228_v52 }
 0xc39   :  { %24722 = vmatmul.mubr.f32.vlgmr.msra.gmra.mrb[18].mxu1 %v11946_v15 }
 0xc3a   :  { %28231 = vmatpush3.bf16.msra.mxu1 %v28228_v52  ;;  %24740 = vmatprep.mubr.f32.mxu1 %v33096_v21  ;;  %v12566_v52 = vand.u32 4294901760, %v33302_v43 }
 0xc3b   :  { %28233 = vmatprep.subr.bf16.mxu1 %v28232_v34 }
 0xc3e   :  { %28235 = vmatpush3.bf16.msra.mxu1 %v28232_v34  ;;  %v12573_v34 = vand.u32 4294901760, %v33304_v29 }
 0xc3f   :  { %28237 = vmatprep.subr.bf16.mxu1 %v28236_v32 }
 0xc42   :  { %28239 = vmatpush3.bf16.msra.mxu1 %v28236_v32 }
 0xc43   :  { %28241 = vmatprep.subr.bf16.mxu1 %v28240_v36 }
 0xc46   :  { %28243 = vmatpush3.bf16.msra.mxu1 %v28240_v36  ;;  %v33329_v36 = vpack.c.bf16 %v12478_v5, %v12475_v8 }
 0xc47   :  { %28245 = vmatprep.subr.bf16.mxu1 %v33127_v23 }
 0xc49   :  { %24741 = vmatmul.mubr.f32.vlgmr.msra.gmra.mrb[18].mxu1 %v33152_v10 }
 0xc4a   :  { %28247 = vmatpush3.bf16.msra.mxu1 %v33127_v23  ;;  %24759 = vmatprep.mubr.f32.mxu1 %v33096_v21  ;;  %v11252_v23 = vsel %vm1637_vm2, %v11248_v28, 0.0  ;;  %v12460_v21 = vand.u32 4294901760, %v20383_v7 }
 0xc4b   :  { %28249 = vmatprep.subr.bf16.mxu1 %v33155_v61  ;;  %v12454_v15 = vsel %vm1039_vm0, %v11252_v23, 0 }
 0xc4c   :  { %v33277_v62 = vsub.f32 %v20383_v7, %v12460_v21  ;;  %v33280_v30 = vpack.c.bf16 %v12460_v21, %v12457_v37  ;;  %v33291_v2 = vand.u32 4294901760, %v12454_v15  ;;  %v12574_v7 = vsub.f32 %v33304_v29, %v12573_v34 }
 0xc4d   :  { %v33342_v21 = vsub.f32 %v20388_v39, %v12475_v8  ;;  %v12601_v39 = vand.u32 4294901760, %v33344_v25 }
 0xc4e   :  { %28251 = vmatpush3.bf16.msra.mxu1 %v33155_v61  ;;  %v33275_v61 = vsub.f32 %v20382_v17, %v12457_v37  ;;  %v12559_v48 = vand.u32 4294901760, %v33277_v62  ;;  %v33310_v56 = vsub.f32 %v12454_v15, %v33291_v2  ;;  %v12567_v17 = vsub.f32 %v33302_v43, %v12566_v52 }
 0xc4f   :  { %28253 = vmatprep.subr.bf16.mxu1 %v33173_v49  ;;  %v12575_v31 = vand.u32 4294901760, %v12574_v7  ;;  %v12602_v5 = vsub.f32 %v33344_v25, %v12601_v39  ;;  %v28296_v7 = vpack.c.bf16 %v33304_v29, %v33302_v43 }
 0xc50   :  { %v12552_v33 = vand.u32 4294901760, %v33275_v61  ;;  %v12560_v58 = vsub.f32 %v33277_v62, %v12559_v48  ;;  %v12541_v42 = vand.u32 4294901760, %v33310_v56  ;;  %v12568_v0 = vand.u32 4294901760, %v12567_v17 }
 0xc51   :  { %v28292_v17 = vpack.c.bf16 %v33277_v62, %v33275_v61  ;;  %v20331_v62 = vld [vmem:[%s34792_s7 + $0x1] ss:$0 sm:$0xff] }
 0xc52   :  { %28255 = vmatpush3.bf16.msra.mxu1 %v33173_v49  ;;  %v20387_v49 = vld [vmem:[%s34790_s6 + $0x228] sm:$0xff]  ;;  %v12553_v41 = vsub.f32 %v33275_v61, %v12552_v33  ;;  %v12561_v28 = vand.u32 4294901760, %v12560_v58  ;;  %v12542_v24 = vsub.f32 %v33310_v56, %v12541_v42 }
 0xc53   :  { %28257 = vmatprep.subr.bf16.mxu1 %v33177_v12  ;;  %v12472_v35 = vand.u32 4294901760, %v20387_v49 }
 0xc54   :  { %v12554_v46 = vand.u32 4294901760, %v12553_v41  ;;  %v12543_v45 = vand.u32 4294901760, %v12542_v24 }
 0xc55   :  { %v33327_v63 = vsub.f32 %v20387_v49, %v12472_v35  ;;  %v12594_v49 = vand.u32 4294901760, %v33342_v21 }
 0xc56   :  { %28259 = vmatpush3.bf16.msra.mxu1 %v33177_v12  ;;  %v12469_v12 = vand.u32 4294901760, %v20386_v26  ;;  %v28276_v15 = vpack.c.bf16 %v12561_v28, %v12554_v46  ;;  %v12603_v46 = vand.u32 4294901760, %v12602_v5 }
 0xc57   :  { %28261 = vmatprep.subr.bf16.mxu1 %v33280_v30  ;;  %v12587_v37 = vand.u32 4294901760, %v33327_v63  ;;  %v12595_v8 = vsub.f32 %v33342_v21, %v12594_v49  ;;  %v28336_v61 = vpack.c.bf16 %v12601_v39, %v12594_v49  ;;  %v35167_v49 = vld [vmem:[#allocation11_spill] sm:$0xff]  ;;  %v35168_v39 = vld [vmem:[#allocation12_spill] sm:$0xff] }
 0xc58   :  { %v33325_v32 = vsub.f32 %v20386_v26, %v12469_v12 }
 0xc59   :  { %24760 = vmatmul.mubr.f32.vlgmr.msra.gmra.mrb[18].mxu1 %v33152_v10  ;;  %v33323_v10 = vpack.c.bf16 %v12472_v35, %v12469_v12  ;;  %v12588_v26 = vsub.f32 %v33327_v63, %v12587_v37  ;;  %v28280_v12 = vpack.c.bf16 %v12575_v31, %v12568_v0  ;;  %v12596_v58 = vand.u32 4294901760, %v12595_v8  ;;  %v35163_v0 = vld [vmem:[#allocation6_spill] sm:$0xff]  ;;  %v35164_v31 = vld [vmem:[#allocation8_spill] sm:$0xff] }
 0xc5a   :  { %28263 = vmatpush3.bf16.msra.mxu1 %v33280_v30  ;;  %24778 = vmatprep.mubr.f32.mxu1 %v12533_v51  ;;  %v12580_v23 = vand.u32 4294901760, %v33325_v32  ;;  %v28300_v24 = vpack.c.bf16 %v33327_v63, %v33325_v32  ;;  %v35172_v8 = vld [vmem:[#allocation16_spill] sm:$0xff] }
 0xc5b   :  { %28265 = vmatprep.subr.bf16.mxu1 %v33307_v4  ;;  %v12589_v51 = vand.u32 4294901760, %v12588_v26  ;;  %v28288_v28 = vpack.c.bf16 %v12603_v46, %v12596_v58  ;;  %v35166_v26 = vld [vmem:[#allocation10_spill] sm:$0xff] }
 0xc5c   :  { %v12581_v55 = vsub.f32 %v33325_v32, %v12580_v23 }
 0xc5e   :  { %28267 = vmatpush3.bf16.msra.mxu1 %v33307_v4  ;;  %v12582_v35 = vand.u32 4294901760, %v12581_v55  ;;  %v35165_v55 = vld [vmem:[#allocation7_spill] sm:$0xff] }
 0xc5f   :  { %28269 = vmatprep.subr.bf16.mxu1 %v33323_v10 }
 0xc60   :  { %v28284_v41 = vpack.c.bf16 %v12589_v51, %v12582_v35  ;;  %v35171_v35 = vld [vmem:[#allocation15_spill] sm:$0xff] }
 0xc62   :  { %28271 = vmatpush3.bf16.msra.mxu1 %v33323_v10 }
 0xc63   :  { %28273 = vmatprep.subr.bf16.mxu1 %v33329_v36 }
 0xc66   :  { %28275 = vmatpush3.bf16.msra.mxu1 %v33329_v36 }
 0xc67   :  { %28277 = vmatprep.subr.bf16.mxu1 %v28276_v15 }
 0xc69   :  { %24779 = vmatmul.mubr.f32.vlgmr.msra.gmra.mrb[18].mxu1 %v12543_v45  ;;  %v35169_v45 = vld [vmem:[#allocation13_spill] sm:$0xff] }
 0xc6a   :  { %28279 = vmatpush3.bf16.msra.mxu1 %v28276_v15  ;;  %24797 = vmatprep.mubr.f32.mxu1 %v33247_v6  ;;  %v28304_v15 = vpack.c.bf16 %v33344_v25, %v33342_v21  ;;  %v28324_v21 = vpack.c.bf16 %v12559_v48, %v12552_v33  ;;  %v35162_v25 = vld [vmem:[#allocation5_spill] sm:$0xff] }
 0xc6b   :  { %28281 = vmatprep.subr.bf16.mxu1 %v28280_v12 }
 0xc6e   :  { %28283 = vmatpush3.bf16.msra.mxu1 %v28280_v12  ;;  %v35170_v12 = vld [vmem:[#allocation14_spill] sm:$0xff] }
 0xc6f   :  { %28285 = vmatprep.subr.bf16.mxu1 %v28284_v41 }
 0xc72   :  { %28287 = vmatpush3.bf16.msra.mxu1 %v28284_v41  ;;  %v35173_v41 = vld [vmem:[#allocation17_spill] sm:$0xff] }
 0xc73   :  { %28289 = vmatprep.subr.bf16.mxu1 %v28288_v28 }
 0xc76   :  { %28291 = vmatpush3.bf16.msra.mxu1 %v28288_v28 }
 0xc77   :  { %28293 = vmatprep.subr.bf16.mxu1 %v28292_v17 }
 0xc79   :  { %24798 = vmatmul.mubr.f32.vlgmr.msra.gmra.mrb[18].mxu1 %v33291_v2 }
 0xc7a   :  { %28295 = vmatpush3.bf16.msra.mxu1 %v28292_v17  ;;  %24816 = vmatprep.mubr.f32.mxu1 %v33261_v53  ;;  %v28328_v53 = vpack.c.bf16 %v12573_v34, %v12566_v52 }
 0xc7b   :  { %28297 = vmatprep.subr.bf16.mxu1 %v28296_v7 }
 0xc7e   :  { %28299 = vmatpush3.bf16.msra.mxu1 %v28296_v7 }
 0xc7f   :  { %28301 = vmatprep.subr.bf16.mxu1 %v28300_v24 }
 0xc82   :  { %28303 = vmatpush3.bf16.msra.mxu1 %v28300_v24 }
 0xc83   :  { %28305 = vmatprep.subr.bf16.mxu1 %v28304_v15 }
 0xc86   :  { %28307 = vmatpush3.bf16.msra.mxu1 %v28304_v15 }
 0xc87   :  { %28309 = vmatprep.subr.bf16.mxu1 %v33280_v30 }
 0xc89   :  { %24817 = vmatmul.mubr.f32.vlgmr.msra.gmra.mrb[18].mxu1 %v33310_v56 }
 0xc8a   :  { %28311 = vmatpush3.bf16.msra.mxu1 %v33280_v30  ;;  %24835 = vmatprep.mubr.f32.mxu1 %v12531_v50  ;;  %v28332_v50 = vpack.c.bf16 %v12587_v37, %v12580_v23 }
 0xc8b   :  { %28313 = vmatprep.subr.bf16.mxu1 %v33307_v4 }
 0xc8e   :  { %28315 = vmatpush3.bf16.msra.mxu1 %v33307_v4 }
 0xc8f   :  { %28317 = vmatprep.subr.bf16.mxu1 %v33323_v10 }
 0xc92   :  { %28319 = vmatpush3.bf16.msra.mxu1 %v33323_v10 }
 0xc93   :  { %28321 = vmatprep.subr.bf16.mxu1 %v33329_v36 }
 0xc96   :  { %28323 = vmatpush3.bf16.msra.mxu1 %v33329_v36 }
 0xc97   :  { %28325 = vmatprep.subr.bf16.mxu1 %v28324_v21 }
 0xc99   :  { %24836 = vmatmul.mubr.f32.vlgmr.msra.gmra.mrb[18].mxu1 %v12541_v42 }
 0xc9a   :  { %28327 = vmatpush3.bf16.msra.mxu1 %v28324_v21  ;;  %24854 = vmatprep.mubr.f32.mxu1 %v33247_v6 }
 0xc9b   :  { %28329 = vmatprep.subr.bf16.mxu1 %v28328_v53 }
 0xc9e   :  { %28331 = vmatpush3.bf16.msra.mxu1 %v28328_v53  ;;  %v35174_v53 = vld [vmem:[#allocation18_spill] sm:$0xff] }
 0xc9f   :  { %28333 = vmatprep.subr.bf16.mxu1 %v28332_v50 }
 0xca2   :  { %28335 = vmatpush3.bf16.msra.mxu1 %v28332_v50 }
 0xca3   :  { %28337 = vmatprep.subr.bf16.mxu1 %v28336_v61 }
 0xca6   :  { %28339 = vmatpush3.bf16.msra.mxu1 %v28336_v61  ;;  %v35175_v61 = vld [vmem:[#allocation19_spill] sm:$0xff] }
 0xca7   :  { %28341 = vmatprep.subr.bf16.mxu1 %v33280_v30 }
 0xca9   :  { %24855 = vmatmul.mubr.f32.vlgmr.msra.gmra.mrb[18].mxu1 %v33291_v2 }
 0xcaa   :  { %28343 = vmatpush3.bf16.msra.mxu1 %v33280_v30  ;;  %24873 = vmatprep.mubr.f32.mxu1 %v33247_v6 }
 0xcab   :  { %28345 = vmatprep.subr.bf16.mxu1 %v33307_v4 }
 0xcae   :  { %28347 = vmatpush3.bf16.msra.mxu1 %v33307_v4 }
 0xcaf   :  { %28349 = vmatprep.subr.bf16.mxu1 %v33323_v10 }
 0xcb2   :  { %28351 = vmatpush3.bf16.msra.mxu1 %v33323_v10 }
 0xcb3   :  { %28353 = vmatprep.subr.bf16.mxu1 %v33329_v36 }
 0xcb6   :  { %28355 = vmatpush3.bf16.msra.mxu1 %v33329_v36 }
 0xcb9   :  { %24874 = vmatmul.mubr.f32.vlgmr.msra.gmra.mrb[18].mxu1 %v33291_v2 }
 0xd8c   :  { %v24875_v30 = vpop.f32.mrb[18].mxu1 }
 0xd8d   :  { %v13039_v6 = vadd.f32 %v24875_v30, %v20331_v62  ;;  %v13026_v33 = vpop.f32.mrb[19].mxu1 }
 0xd8e   :  { %v13038_v48 = vadd.f32 %v20331_v62, %v13026_v33  ;;  %v35176_v62 = vld [vmem:[#allocation20_spill] sm:$0xff] }
 0xd8f   :  { %v33414_v43 = vadd.f32 %v13039_v6, %v32511_v57  ;;  %13046 = vrot.lane.b32.xlu1 %v13039_v6, %s29877_s24  ;;  %v35177_v6 = vld [vmem:[#allocation21_spill] sm:$0xff] }
 0xd90   :  { %v33418_v29 = vadd.f32 %v13038_v48, %v32505_v1  ;;  %13044 = vrot.lane.b32.xlu0 %v13038_v48, %s29877_s24 }
 0xd91   :  { %v13068_v2 = vsel %vm1039_vm0, %v33414_v43, 0  ;;  %v13061_v17 = vrot.slane %v33414_v43, 1 }
 0xd92   :  { %v33423_v4 = vand.u32 4294901760, %v13068_v2  ;;  %v13066_v56 = vsel %vm1039_vm0, %v33418_v29, 0  ;;  %v13060_v51 = vrot.slane %v33418_v29, 1 }
 0xd93   :  { %v13143_v52 = vand.u32 4294901760, %v13066_v56  ;;  %v13065_v24 = vsel %vm1637_vm2, %v13061_v17, 0.0 }
 0xd94   :  { %v13154_v34 = vsub.f32 %v13068_v2, %v33423_v4  ;;  %v13064_v5 = vsel %vm1637_vm2, %v13060_v51, 0.0  ;;  %v35180_v2 = vld [vmem:[#allocation24_spill] sm:$0xff] }
 0xd95   :  { %v13144_v57 = vsub.f32 %v13066_v56, %v13143_v52  ;;  %v14237_v58 = vsel %vm1039_vm0, %v13064_v5, 0  ;;  %v35182_v56 = vld [vmem:[#allocation26_spill] sm:$0xff] }
 0xd96   :  { %v13155_v10 = vand.u32 4294901760, %v13154_v34  ;;  %v33529_v46 = vand.u32 4294901760, %v14237_v58 }
 0xd97   :  { %v13145_v32 = vand.u32 4294901760, %v13144_v57 }
 0xd98   :  { %v13156_v63 = vsub.f32 %v13154_v34, %v13155_v10  ;;  %v14316_v28 = vsub.f32 %v14237_v58, %v33529_v46 }
 0xd99   :  { %v13146_v36 = vsub.f32 %v13144_v57, %v13145_v32 }
 0xd9a   :  { %v13157_v42 = vand.u32 4294901760, %v13156_v63  ;;  %v14317_v7 = vand.u32 4294901760, %v14316_v28  ;;  %v35188_v63 = vld [vmem:[#allocation32_spill] sm:$0xff] }
 0xd9b   :  { %v13147_v1 = vand.u32 4294901760, %v13146_v36  ;;  %v35189_v36 = vld [vmem:[#allocation33_spill] sm:$0xff] }
 0xd9c   :  { %v14318_v15 = vsub.f32 %v14316_v28, %v14317_v7 }
 0xd9d   :  { %24892 = vmatprep.mubr.f32.mxu0 %v13147_v1  ;;  %v20398_v1 = vld [vmem:[%s34790_s6 + $0x280] sm:$0xff] }
 0xd9e   :  { %24893 = vmatmul.mubr.f32.vlgmr.msra.gmra.mrb[20].mxu0 %v13157_v42  ;;  %v14319_v50 = vand.u32 4294901760, %v14318_v15  ;;  %v20399_v42 = vld [vmem:[%s34790_s6 + $0x288] sm:$0xff] }
 0xd9f   :  { %28375 = vmatpush3.bf16.msra.mxu0 %v32399_v19  ;;  %24911 = vmatprep.mubr.f32.mxu0 %v13143_v52 }
 0xda0   :  { %28377 = vmatprep.subr.bf16.mxu0 %v32428_v9 }
 0xda3   :  { %28379 = vmatpush3.bf16.msra.mxu0 %v32428_v9 }
 0xda4   :  { %28381 = vmatprep.subr.bf16.mxu0 %v32441_v14 }
 0xda7   :  { %28383 = vmatpush3.bf16.msra.mxu0 %v32441_v14 }
 0xda8   :  { %28385 = vmatprep.subr.bf16.mxu0 %v32443_v22 }
 0xdab   :  { %28387 = vmatpush3.bf16.msra.mxu0 %v32443_v22  ;;  %v13054_v22 = vrot.slane %v33418_v29, 7  ;;  %v35179_v29 = vld [vmem:[#allocation23_spill] sm:$0xff] }
 0xdac   :  { %28389 = vmatprep.subr.bf16.mxu0 %v32451_v27 }
 0xdad   :  { %v13058_v19 = vsel %vm1630_vm1, 0.0, %v13054_v22  ;;  %v14865_v22 = vand.u32 4294901760, %v20398_v1 }
 0xdae   :  { %24912 = vmatmul.mubr.f32.vlgmr.msra.gmra.mrb[20].mxu0 %v33423_v4  ;;  %v13651_v9 = vsel %vm1039_vm0, %v13058_v19, 0  ;;  %v14868_v19 = vand.u32 4294901760, %v20399_v42 }
 0xdaf   :  { %28391 = vmatpush3.bf16.msra.mxu0 %v32451_v27  ;;  %24930 = vmatprep.mubr.f32.mxu0 %v13144_v57  ;;  %v33464_v14 = vand.u32 4294901760, %v13651_v9  ;;  %v35185_v57 = vld [vmem:[#allocation29_spill] sm:$0xff] }
 0xdb0   :  { %28393 = vmatprep.subr.bf16.mxu0 %v32459_v3 }
 0xdb1   :  { %v13730_v27 = vsub.f32 %v13651_v9, %v33464_v14  ;;  %v33608_v9 = vpack.c.bf16 %v14868_v19, %v14865_v22 }
 0xdb3   :  { %28395 = vmatpush3.bf16.msra.mxu0 %v32459_v3  ;;  %v13055_v3 = vrot.slane %v33414_v43, 7  ;;  %v35178_v43 = vld [vmem:[#allocation22_spill] sm:$0xff]  ;;  %28645 = vmatprep.subr.bf16.mxu1 %v33608_v9 }
 0xdb4   :  { %28397 = vmatprep.subr.bf16.mxu0 %v32464_v60  ;;  %28647 = vmatpush3.bf16.msra.mxu1 %v33608_v9 }
 0xdb7   :  { %28399 = vmatpush3.bf16.msra.mxu0 %v32464_v60  ;;  %v13731_v60 = vand.u32 4294901760, %v13730_v27 }
 0xdb8   :  { %28401 = vmatprep.subr.bf16.mxu0 %v32468_v44 }
 0xdbb   :  { %28403 = vmatpush3.bf16.msra.mxu0 %v32468_v44  ;;  %v13059_v44 = vsel %vm1630_vm1, 0.0, %v13055_v3 }
 0xdbc   :  { %28405 = vmatprep.subr.bf16.mxu0 %v32248_v16 }
 0xdbe   :  { %24931 = vmatmul.mubr.f32.vlgmr.msra.gmra.mrb[20].mxu0 %v13154_v34  ;;  %v35184_v34 = vld [vmem:[#allocation28_spill] sm:$0xff] }
 0xdbf   :  { %28407 = vmatpush3.bf16.msra.mxu0 %v32248_v16  ;;  %24949 = vmatprep.mubr.f32.mxu0 %v13145_v32  ;;  %v35187_v32 = vld [vmem:[#allocation31_spill] sm:$0xff] }
 0xdc0   :  { %28409 = vmatprep.subr.bf16.mxu0 %v32271_v38 }
 0xdc3   :  { %28411 = vmatpush3.bf16.msra.mxu0 %v32271_v38 }
 0xdc4   :  { %28413 = vmatprep.subr.bf16.mxu0 %v32313_v54 }
 0xdc7   :  { %28415 = vmatpush3.bf16.msra.mxu0 %v32313_v54 }
 0xdc8   :  { %28417 = vmatprep.subr.bf16.mxu0 %v32365_v11 }
 0xdcb   :  { %28419 = vmatpush3.bf16.msra.mxu0 %v32365_v11 }
 0xdcc   :  { %28421 = vmatprep.subr.bf16.mxu0 %v32480_v47 }
 0xdce   :  { %24950 = vmatmul.mubr.f32.vlgmr.msra.gmra.mrb[20].mxu0 %v13155_v10  ;;  %v35186_v10 = vld [vmem:[#allocation30_spill] sm:$0xff] }
 0xdcf   :  { %28423 = vmatpush3.bf16.msra.mxu0 %v32480_v47  ;;  %24968 = vmatprep.mubr.f32.mxu0 %v13143_v52  ;;  %v13732_v47 = vsub.f32 %v13730_v27, %v13731_v60 }
 0xdd0   :  { %28425 = vmatprep.subr.bf16.mxu0 %v32490_v18 }
 0xdd3   :  { %28427 = vmatpush3.bf16.msra.mxu0 %v32490_v18 }
 0xdd4   :  { %28429 = vmatprep.subr.bf16.mxu0 %v32494_v40 }
 0xdd7   :  { %28431 = vmatpush3.bf16.msra.mxu0 %v32494_v40  ;;  %v13733_v40 = vand.u32 4294901760, %v13732_v47  ;;  %v20403_v47 = vld [vmem:[%s34790_s6 + $0x2a8] sm:$0xff] }
 0xdd8   :  { %28433 = vmatprep.subr.bf16.mxu0 %v32498_v59 }
 0xddb   :  { %28435 = vmatpush3.bf16.msra.mxu0 %v32498_v59 }
 0xddc   :  { %28437 = vmatprep.subr.bf16.mxu0 %v32248_v16 }
 0xdde   :  { %24969 = vmatmul.mubr.f32.vlgmr.msra.gmra.mrb[20].mxu0 %v33423_v4 }
 0xddf   :  { %28439 = vmatpush3.bf16.msra.mxu0 %v32248_v16  ;;  %24987 = vmatprep.mubr.f32.mxu0 %v13143_v52  ;;  %v13654_v16 = vsel %vm1039_vm0, %v13059_v44, 0  ;;  %v35183_v52 = vld [vmem:[#allocation27_spill] sm:$0xff] }
 0xde0   :  { %28441 = vmatprep.subr.bf16.mxu0 %v32271_v38  ;;  %v33478_v18 = vand.u32 4294901760, %v13654_v16 }
 0xde3   :  { %28443 = vmatpush3.bf16.msra.mxu0 %v32271_v38  ;;  %v13740_v38 = vsub.f32 %v13654_v16, %v33478_v18  ;;  %v20402_v16 = vld [vmem:[%s34790_s6 + $0x2a0] sm:$0xff] }
 0xde4   :  { %28445 = vmatprep.subr.bf16.mxu0 %v32313_v54 }
 0xde5   :  { %v13741_v59 = vand.u32 4294901760, %v13740_v38 }
 0xde7   :  { %28447 = vmatpush3.bf16.msra.mxu0 %v32313_v54  ;;  %v35160_v54 = vld [vmem:[#allocation4_spill] sm:$0xff]  ;;  %v13742_v23 = vsub.f32 %v13740_v38, %v13741_v59 }
 0xde8   :  { %28449 = vmatprep.subr.bf16.mxu0 %v32365_v11 }
 0xde9   :  { %v13743_v37 = vand.u32 4294901760, %v13742_v23  ;;  %v20405_v23 = vld [vmem:[%s34790_s6 + $0x2b8] sm:$0xff] }
 0xdeb   :  { %28451 = vmatpush3.bf16.msra.mxu0 %v32365_v11  ;;  %v35161_v11 = vld [vmem:[#allocation9_spill] sm:$0xff] }
 0xdec   :  { %28453 = vmatprep.subr.bf16.mxu0 %v32635_v20 }
 0xdee   :  { %24988 = vmatmul.mubr.f32.vlgmr.msra.gmra.mrb[20].mxu0 %v33423_v4  ;;  %v35181_v4 = vld [vmem:[#allocation25_spill] sm:$0xff] }
 0xdef   :  { %28455 = vmatpush3.bf16.msra.mxu0 %v32635_v20  ;;  %25006 = vmatprep.mubr.f32.mxu0 %v13733_v40  ;;  %v14880_v40 = vand.u32 4294901760, %v20403_v47 }
 0xdf0   :  { %28457 = vmatprep.subr.bf16.mxu0 %v32664_v13 }
 0xdf3   :  { %28459 = vmatpush3.bf16.msra.mxu0 %v32664_v13 }
 0xdf4   :  { %28461 = vmatprep.subr.bf16.mxu0 %v35160_v54 }
 0xdf7   :  { %28463 = vmatpush3.bf16.msra.mxu0 %v35160_v54 }
 0xdf8   :  { %28465 = vmatprep.subr.bf16.mxu0 %v35161_v11 }
 0xdfb   :  { %28467 = vmatpush3.bf16.msra.mxu0 %v35161_v11 }
 0xdfc   :  { %28469 = vmatprep.subr.bf16.mxu0 %v35162_v25 }
 0xdfe   :  { %25007 = vmatmul.mubr.f32.vlgmr.msra.gmra.mrb[20].mxu0 %v13743_v37 }
 0xdff   :  { %28471 = vmatpush3.bf16.msra.mxu0 %v35162_v25  ;;  %25025 = vmatprep.mubr.f32.mxu0 %v33464_v14  ;;  %v14886_v25 = vand.u32 4294901760, %v20405_v23 }
 0xe00   :  { %28473 = vmatprep.subr.bf16.mxu0 %v35163_v0 }
 0xe03   :  { %28475 = vmatpush3.bf16.msra.mxu0 %v35163_v0 }
 0xe04   :  { %28477 = vmatprep.subr.bf16.mxu0 %v35164_v31 }
 0xe07   :  { %28479 = vmatpush3.bf16.msra.mxu0 %v35164_v31 }
 0xe08   :  { %28481 = vmatprep.subr.bf16.mxu0 %v35165_v55 }
 0xe0b   :  { %28483 = vmatpush3.bf16.msra.mxu0 %v35165_v55 }
 0xe0c   :  { %28485 = vmatprep.subr.bf16.mxu0 %v35166_v26 }
 0xe0e   :  { %25026 = vmatmul.mubr.f32.vlgmr.msra.gmra.mrb[20].mxu0 %v33478_v18 }
 0xe0f   :  { %28487 = vmatpush3.bf16.msra.mxu0 %v35166_v26  ;;  %25044 = vmatprep.mubr.f32.mxu0 %v13730_v27  ;;  %v20401_v27 = vld [vmem:[%s34790_s6 + $0x298] sm:$0xff] }
 0xe10   :  { %28489 = vmatprep.subr.bf16.mxu0 %v35167_v49 }
 0xe13   :  { %28491 = vmatpush3.bf16.msra.mxu0 %v35167_v49 }
 0xe14   :  { %28493 = vmatprep.subr.bf16.mxu0 %v35168_v39 }
 0xe17   :  { %28495 = vmatpush3.bf16.msra.mxu0 %v35168_v39 }
 0xe18   :  { %28497 = vmatprep.subr.bf16.mxu0 %v35169_v45 }
 0xe1b   :  { %28499 = vmatpush3.bf16.msra.mxu0 %v35169_v45 }
 0xe1c   :  { %28501 = vmatprep.subr.bf16.mxu0 %v32635_v20 }
 0xe1e   :  { %25045 = vmatmul.mubr.f32.vlgmr.msra.gmra.mrb[20].mxu0 %v13740_v38 }
 0xe1f   :  { %28503 = vmatpush3.bf16.msra.mxu0 %v32635_v20  ;;  %25063 = vmatprep.mubr.f32.mxu0 %v13731_v60  ;;  %v14874_v60 = vand.u32 4294901760, %v20401_v27 }
 0xe20   :  { %28505 = vmatprep.subr.bf16.mxu0 %v32664_v13 }
 0xe21   :  { %v14980_v45 = vsub.f32 %v20401_v27, %v14874_v60 }
 0xe23   :  { %28507 = vmatpush3.bf16.msra.mxu0 %v32664_v13 }
 0xe24   :  { %28509 = vmatprep.subr.bf16.mxu0 %v35160_v54 }
 0xe27   :  { %28511 = vmatpush3.bf16.msra.mxu0 %v35160_v54 }
 0xe28   :  { %28513 = vmatprep.subr.bf16.mxu0 %v35161_v11 }
 0xe2b   :  { %28515 = vmatpush3.bf16.msra.mxu0 %v35161_v11 }
 0xe2c   :  { %28517 = vmatprep.subr.bf16.mxu0 %v35170_v12 }
 0xe2e   :  { %25064 = vmatmul.mubr.f32.vlgmr.msra.gmra.mrb[20].mxu0 %v13741_v59  ;;  %v14966_v59 = vsub.f32 %v20399_v42, %v14868_v19  ;;  %v29875_v42 = vld [vmem:[%s34791_s5 + $0x1] ss:$0 sm:$0xff] }
 0xe2f   :  { %28519 = vmatpush3.bf16.msra.mxu0 %v35170_v12  ;;  %25082 = vmatprep.mubr.f32.mxu0 %v33464_v14 }
 0xe30   :  { %28521 = vmatprep.subr.bf16.mxu0 %v35171_v35  ;;  %v14967_v31 = vand.u32 4294901760, %v14966_v59 }
 0xe32   :  { %v14968_v49 = vsub.f32 %v14966_v59, %v14967_v31 }
 0xe33   :  { %28523 = vmatpush3.bf16.msra.mxu0 %v35171_v35 }
 0xe34   :  { %28525 = vmatprep.subr.bf16.mxu0 %v35172_v8  ;;  %v14969_v35 = vand.u32 4294901760, %v14968_v49 }
 0xe37   :  { %28527 = vmatpush3.bf16.msra.mxu0 %v35172_v8  ;;  %v14981_v8 = vand.u32 4294901760, %v14980_v45 }
 0xe38   :  { %28529 = vmatprep.subr.bf16.mxu0 %v35173_v41 }
 0xe39   :  { %v14982_v58 = vsub.f32 %v14980_v45, %v14981_v8 }
 0xe3b   :  { %28531 = vmatpush3.bf16.msra.mxu0 %v35173_v41 }
 0xe3c   :  { %28533 = vmatprep.subr.bf16.mxu0 %v32635_v20 }
 0xe3e   :  { %25083 = vmatmul.mubr.f32.vlgmr.msra.gmra.mrb[20].mxu0 %v33478_v18 }
 0xe3f   :  { %28535 = vmatpush3.bf16.msra.mxu0 %v32635_v20  ;;  %25101 = vmatprep.mubr.f32.mxu0 %v33464_v14  ;;  %v14240_v20 = vsel %vm1039_vm0, %v13065_v24, 0  ;;  %v20400_v14 = vld [vmem:[%s34790_s6 + $0x290] sm:$0xff] }
 0xe40   :  { %28537 = vmatprep.subr.bf16.mxu0 %v32664_v13  ;;  %v33544_v21 = vand.u32 4294901760, %v14240_v20  ;;  %v14871_v3 = vand.u32 4294901760, %v20400_v14 }
 0xe42   :  { %v33618_v44 = vpack.c.bf16 %v14874_v60, %v14871_v3  ;;  %v14973_v39 = vsub.f32 %v20400_v14, %v14871_v3 }
 0xe43   :  { %28539 = vmatpush3.bf16.msra.mxu0 %v32664_v13  ;;  %v14326_v13 = vsub.f32 %v14240_v20, %v33544_v21 }
 0xe44   :  { %28541 = vmatprep.subr.bf16.mxu0 %v35160_v54  ;;  %28649 = vmatprep.subr.bf16.mxu1 %v33618_v44  ;;  %v14974_v51 = vand.u32 4294901760, %v14973_v39 }
 0xe45   :  { %v14327_v30 = vand.u32 4294901760, %v14326_v13  ;;  %28651 = vmatpush3.bf16.msra.mxu1 %v33618_v44 }
 0xe46   :  { %v14975_v41 = vsub.f32 %v14973_v39, %v14974_v51 }
 0xe47   :  { %28543 = vmatpush3.bf16.msra.mxu0 %v35160_v54  ;;  %v14328_v33 = vsub.f32 %v14326_v13, %v14327_v30  ;;  %v14959_v54 = vsub.f32 %v20398_v1, %v14865_v22 }
 0xe48   :  { %28545 = vmatprep.subr.bf16.mxu0 %v35161_v11  ;;  %v14976_v17 = vand.u32 4294901760, %v14975_v41  ;;  %v20392_v41 = vld [vmem:[%s34790_s6 + $0x250] sm:$0xff] }
 0xe49   :  { %v14329_v48 = vand.u32 4294901760, %v14328_v33  ;;  %v14960_v0 = vand.u32 4294901760, %v14959_v54 }
 0xe4b   :  { %28547 = vmatpush3.bf16.msra.mxu0 %v35161_v11  ;;  %v20404_v11 = vld [vmem:[%s34790_s6 + $0x2b0] sm:$0xff]  ;;  %v14961_v26 = vsub.f32 %v14959_v54, %v14960_v0 }
 0xe4c   :  { %28549 = vmatprep.subr.bf16.mxu0 %v35174_v53  ;;  %v14883_v37 = vand.u32 4294901760, %v20404_v11 }
 0xe4d   :  { %v14962_v12 = vand.u32 4294901760, %v14961_v26 }
 0xe4e   :  { %25102 = vmatmul.mubr.f32.vlgmr.msra.gmra.mrb[20].mxu0 %v33478_v18  ;;  %v14877_v18 = vand.u32 4294901760, %v20402_v16  ;;  %v33638_v55 = vpack.c.bf16 %v14886_v25, %v14883_v37 }
 0xe4f   :  { %28551 = vmatpush3.bf16.msra.mxu0 %v35174_v53  ;;  %25120 = vmatprep.mubr.f32.mxu0 %v14319_v50  ;;  %v28660_v5 = vpack.c.bf16 %v14969_v35, %v14962_v12  ;;  %v15001_v50 = vsub.f32 %v20404_v11, %v14883_v37  ;;  %v20391_v12 = vld [vmem:[%s34790_s6 + $0x248] sm:$0xff] }
 0xe50   :  { %28553 = vmatprep.subr.bf16.mxu0 %v35175_v61  ;;  %v33628_v38 = vpack.c.bf16 %v14880_v40, %v14877_v18 }
 0xe52   :  { %28653 = vmatprep.subr.bf16.mxu1 %v33628_v38 }
 0xe53   :  { %28555 = vmatpush3.bf16.msra.mxu0 %v35175_v61  ;;  %28655 = vmatpush3.bf16.msra.mxu1 %v33628_v38 }
 0xe54   :  { %28557 = vmatprep.subr.bf16.mxu0 %v35176_v62  ;;  %28657 = vmatprep.subr.bf16.mxu1 %v33638_v55 }
 0xe57   :  { %28559 = vmatpush3.bf16.msra.mxu0 %v35176_v62  ;;  %28659 = vmatpush3.bf16.msra.mxu1 %v33638_v55 }
 0xe58   :  { %28561 = vmatprep.subr.bf16.mxu0 %v35177_v6  ;;  %28661 = vmatprep.subr.bf16.mxu1 %v28660_v5 }
 0xe5b   :  { %28563 = vmatpush3.bf16.msra.mxu0 %v35177_v6 }
 0xe5c   :  { %28565 = vmatprep.subr.bf16.mxu0 %v35178_v43 }
 0xe5e   :  { %25121 = vmatmul.mubr.f32.vlgmr.msra.gmra.mrb[20].mxu0 %v14329_v48 }
 0xe5f   :  { %28567 = vmatpush3.bf16.msra.mxu0 %v35178_v43  ;;  %25139 = vmatprep.mubr.f32.mxu0 %v33529_v46 }
 0xe60   :  { %28569 = vmatprep.subr.bf16.mxu0 %v35179_v29 }
 0xe63   :  { %28571 = vmatpush3.bf16.msra.mxu0 %v35179_v29 }
 0xe64   :  { %28573 = vmatprep.subr.bf16.mxu0 %v35180_v2 }
 0xe67   :  { %28575 = vmatpush3.bf16.msra.mxu0 %v35180_v2 }
 0xe68   :  { %28577 = vmatprep.subr.bf16.mxu0 %v35181_v4 }
 0xe6b   :  { %28579 = vmatpush3.bf16.msra.mxu0 %v35181_v4 }
 0xe6c   :  { %28581 = vmatprep.subr.bf16.mxu0 %v35182_v56 }
 0xe6e   :  { %25140 = vmatmul.mubr.f32.vlgmr.msra.gmra.mrb[20].mxu0 %v33544_v21 }
 0xe6f   :  { %28583 = vmatpush3.bf16.msra.mxu0 %v35182_v56  ;;  %25158 = vmatprep.mubr.f32.mxu0 %v14316_v28  ;;  %v14994_v28 = vsub.f32 %v20403_v47, %v14880_v40  ;;  %v28676_v56 = vpack.c.bf16 %v14966_v59, %v14959_v54 }
 0xe70   :  { %28585 = vmatprep.subr.bf16.mxu0 %v35183_v52 }
 0xe71   :  { %v14995_v20 = vand.u32 4294901760, %v14994_v28 }
 0xe73   :  { %28587 = vmatpush3.bf16.msra.mxu0 %v35183_v52  ;;  %v28680_v52 = vpack.c.bf16 %v14980_v45, %v14973_v39  ;;  %v20390_v45 = vld [vmem:[%s34790_s6 + $0x240] sm:$0xff] }
 0xe74   :  { %28589 = vmatprep.subr.bf16.mxu0 %v35184_v34 }
 0xe77   :  { %28591 = vmatpush3.bf16.msra.mxu0 %v35184_v34 }
 0xe78   :  { %28593 = vmatprep.subr.bf16.mxu0 %v35185_v57 }
 0xe7b   :  { %28595 = vmatpush3.bf16.msra.mxu0 %v35185_v57 }
 0xe7c   :  { %28597 = vmatprep.subr.bf16.mxu0 %v35174_v53 }
 0xe7e   :  { %25159 = vmatmul.mubr.f32.vlgmr.msra.gmra.mrb[20].mxu0 %v14326_v13  ;;  %v15008_v13 = vsub.f32 %v20405_v23, %v14886_v25 }
 0xe7f   :  { %28599 = vmatpush3.bf16.msra.mxu0 %v35174_v53  ;;  %25177 = vmatprep.mubr.f32.mxu0 %v14317_v7  ;;  %v14983_v7 = vand.u32 4294901760, %v14982_v58  ;;  %v20393_v58 = vld [vmem:[%s34790_s6 + $0x258] sm:$0xff] }
 0xe80   :  { %28601 = vmatprep.subr.bf16.mxu0 %v35175_v61  ;;  %v28688_v57 = vpack.c.bf16 %v15008_v13, %v15001_v50 }
 0xe81   :  { %v28664_v15 = vpack.c.bf16 %v14983_v7, %v14976_v17  ;;  %v15457_v7 = vand.u32 4294901760, %v20392_v41 }
 0xe83   :  { %28603 = vmatpush3.bf16.msra.mxu0 %v35175_v61 }
 0xe84   :  { %28605 = vmatprep.subr.bf16.mxu0 %v35176_v62 }
 0xe87   :  { %28607 = vmatpush3.bf16.msra.mxu0 %v35176_v62 }
 0xe88   :  { %28609 = vmatprep.subr.bf16.mxu0 %v35177_v6 }
 0xe8b   :  { %28611 = vmatpush3.bf16.msra.mxu0 %v35177_v6 }
 0xe8c   :  { %28613 = vmatprep.subr.bf16.mxu0 %v35186_v10 }
 0xe8e   :  { %25178 = vmatmul.mubr.f32.vlgmr.msra.gmra.mrb[20].mxu0 %v14327_v30  ;;  %v15002_v30 = vand.u32 4294901760, %v15001_v50 }
 0xe8f   :  { %28615 = vmatpush3.bf16.msra.mxu0 %v35186_v10  ;;  %25196 = vmatprep.mubr.f32.mxu0 %v33529_v46  ;;  %v28708_v10 = vpack.c.bf16 %v14967_v31, %v14960_v0 }
 0xe90   :  { %28617 = vmatprep.subr.bf16.mxu0 %v35187_v32  ;;  %v15003_v48 = vsub.f32 %v15001_v50, %v15002_v30  ;;  %v20396_v50 = vld [vmem:[%s34790_s6 + $0x270] sm:$0xff] }
 0xe92   :  { %v15004_v29 = vand.u32 4294901760, %v15003_v48 }
 0xe93   :  { %28619 = vmatpush3.bf16.msra.mxu0 %v35187_v32  ;;  %v28712_v32 = vpack.c.bf16 %v14981_v8, %v14974_v51  ;;  %v15454_v8 = vand.u32 4294901760, %v20391_v12 }
 0xe94   :  { %28621 = vmatprep.subr.bf16.mxu0 %v35188_v63 }
 0xe97   :  { %28623 = vmatpush3.bf16.msra.mxu0 %v35188_v63 }
 0xe98   :  { %28625 = vmatprep.subr.bf16.mxu0 %v35189_v36 }
 0xe9b   :  { %28627 = vmatpush3.bf16.msra.mxu0 %v35189_v36 }
 0xe9c   :  { %28629 = vmatprep.subr.bf16.mxu0 %v35174_v53 }
 0xe9e   :  { %25197 = vmatmul.mubr.f32.vlgmr.msra.gmra.mrb[20].mxu0 %v33544_v21 }
 0xe9f   :  { %28631 = vmatpush3.bf16.msra.mxu0 %v35174_v53  ;;  %25215 = vmatprep.mubr.f32.mxu0 %v33529_v46  ;;  %v14987_v46 = vsub.f32 %v20402_v16, %v14877_v18  ;;  %v14996_v53 = vsub.f32 %v14994_v28, %v14995_v20 }
 0xea0   :  { %28633 = vmatprep.subr.bf16.mxu0 %v35175_v61 }
 0xea1   :  { %v14988_v24 = vand.u32 4294901760, %v14987_v46  ;;  %v28684_v34 = vpack.c.bf16 %v14994_v28, %v14987_v46 }
 0xea3   :  { %28635 = vmatpush3.bf16.msra.mxu0 %v35175_v61  ;;  %v28716_v63 = vpack.c.bf16 %v14995_v20, %v14988_v24 }
 0xea4   :  { %28637 = vmatprep.subr.bf16.mxu0 %v35176_v62 }
 0xea7   :  { %28639 = vmatpush3.bf16.msra.mxu0 %v35176_v62  ;;  %v14997_v62 = vand.u32 4294901760, %v14996_v53 }
 0xea8   :  { %28641 = vmatprep.subr.bf16.mxu0 %v35177_v6 }
 0xeab   :  { %28643 = vmatpush3.bf16.msra.mxu0 %v35177_v6  ;;  %v15009_v6 = vand.u32 4294901760, %v15008_v13 }
 0xead   :  { %v15010_v43 = vsub.f32 %v15008_v13, %v15009_v6  ;;  %v28720_v36 = vpack.c.bf16 %v15009_v6, %v15002_v30  ;;  %v20397_v13 = vld [vmem:[%s34790_s6 + $0x278] sm:$0xff] }
 0xeae   :  { %25216 = vmatmul.mubr.f32.vlgmr.msra.gmra.mrb[20].mxu0 %v33544_v21  ;;  %v14989_v21 = vsub.f32 %v14987_v46, %v14988_v24  ;;  %v15460_v24 = vand.u32 4294901760, %v20393_v58 }
 0xeaf   :  { %v15011_v2 = vand.u32 4294901760, %v15010_v43 }
 0xeb0   :  { %v14990_v61 = vand.u32 4294901760, %v14989_v21  ;;  %v20394_v21 = vld [vmem:[%s34790_s6 + $0x260] sm:$0xff]  ;;  %v33723_v30 = vsub.f32 %v20393_v58, %v15460_v24 }
 0xeb1   :  { %v28672_v4 = vpack.c.bf16 %v15011_v2, %v15004_v29  ;;  %v15469_v29 = vand.u32 4294901760, %v20396_v50  ;;  %v15472_v2 = vand.u32 4294901760, %v20397_v13 }
 0xeb2   :  { %v28668_v33 = vpack.c.bf16 %v14997_v62, %v14990_v61  ;;  %v33721_v62 = vsub.f32 %v20392_v41, %v15457_v7 }
 0xf81   :  { %v25217_v1 = vpop.f32.mrb[20].mxu0 }
 0xf82   :  { %v14825_v22 = vadd.f32 %v29875_v42, %v25217_v1  ;;  %v14812_v19 = vpop.f32.mrb[21].mxu0 }
 0xf83   :  { %v14824_v14 = vadd.f32 %v29875_v42, %v14812_v19 }
 0xf84   :  { %v33645_v27 = vmax.f32 %v14825_v22, 0.0 }
 0xf85   :  { %v33647_v3 = vmax.f32 %v14824_v14, 0.0 }
 0xf86   :  { %v14862_v60 = vsel %vm1039_vm0, %v33645_v27, 0  ;;  %v14831_v51 = vrot.slane %v33645_v27, 7 }
 0xf87   :  { %v33651_v16 = vand.u32 4294901760, %v14862_v60  ;;  %v14860_v47 = vsel %vm1039_vm0, %v33647_v3, 0  ;;  %v14830_v31 = vrot.slane %v33647_v3, 7 }
 0xf88   :  { %v14937_v18 = vand.u32 4294901760, %v14860_v47  ;;  %v14835_v46 = vsel %vm1630_vm1, 0.0, %v14831_v51 }
 0xf89   :  { %v14948_v40 = vsub.f32 %v14862_v60, %v33651_v16  ;;  %v14834_v26 = vsel %vm1630_vm1, 0.0, %v14830_v31  ;;  %v15448_v20 = vsel %vm1039_vm0, %v14835_v46, 0 }
 0xf8a   :  { %v14938_v54 = vsub.f32 %v14860_v47, %v14937_v18  ;;  %v15445_v49 = vsel %vm1039_vm0, %v14834_v26, 0  ;;  %v33725_v6 = vand.u32 4294901760, %v15448_v20  ;;  %v33763_v47 = vsub.f32 %v20396_v50, %v15469_v29  ;;  %v20406_v50 = vld [vmem:[%s34790_s6 + $0x2c0] sm:$0xff] }
 0xf8b   :  { %v14949_v59 = vand.u32 4294901760, %v14948_v40  ;;  %v33669_v39 = vand.u32 4294901760, %v15445_v49 }
 0xf8c   :  { %v14939_v11 = vand.u32 4294901760, %v14938_v54 }
 0xf8d   :  { %v14950_v23 = vsub.f32 %v14948_v40, %v14949_v59  ;;  %v33681_v35 = vsub.f32 %v15445_v49, %v33669_v39 }
 0xf8e   :  { %v14940_v37 = vsub.f32 %v14938_v54, %v14939_v11 }
 0xf8f   :  { %v14951_v0 = vand.u32 4294901760, %v14950_v23 }
 0xf90   :  { %v14941_v25 = vand.u32 4294901760, %v14940_v37 }
 0xf92   :  { %25234 = vmatprep.mubr.f32.mxu1 %v14941_v25  ;;  %v15588_v25 = vand.u32 4294901760, %v33763_v47 }
 0xf93   :  { %25235 = vmatmul.mubr.f32.vlgmr.msra.gmra.mrb[20].mxu1 %v14951_v0 }
 0xf94   :  { %28663 = vmatpush3.bf16.msra.mxu1 %v28660_v5  ;;  %25253 = vmatprep.mubr.f32.mxu1 %v14937_v18  ;;  %v15525_v5 = vand.u32 4294901760, %v33681_v35 }
 0xf95   :  { %28665 = vmatprep.subr.bf16.mxu1 %v28664_v15 }
 0xf98   :  { %28667 = vmatpush3.bf16.msra.mxu1 %v28664_v15  ;;  %v15526_v15 = vsub.f32 %v33681_v35, %v15525_v5 }
 0xf99   :  { %28669 = vmatprep.subr.bf16.mxu1 %v28668_v33 }
 0xf9a   :  { %v15527_v43 = vand.u32 4294901760, %v15526_v15 }
 0xf9c   :  { %28671 = vmatpush3.bf16.msra.mxu1 %v28668_v33  ;;  %v33728_v33 = vpack.c.bf16 %v15460_v24, %v15457_v7  ;;  %v28776_v7 = vpack.c.bf16 %v33723_v30, %v33721_v62 }
 0xf9d   :  { %28673 = vmatprep.subr.bf16.mxu1 %v28672_v4 }
 0xfa0   :  { %28675 = vmatpush3.bf16.msra.mxu1 %v28672_v4 }
 0xfa1   :  { %28677 = vmatprep.subr.bf16.mxu1 %v28676_v56 }
 0xfa3   :  { %25254 = vmatmul.mubr.f32.vlgmr.msra.gmra.mrb[20].mxu1 %v33651_v16 }
 0xfa4   :  { %28679 = vmatpush3.bf16.msra.mxu1 %v28676_v56  ;;  %25272 = vmatprep.mubr.f32.mxu1 %v14938_v54 }
 0xfa5   :  { %28681 = vmatprep.subr.bf16.mxu1 %v28680_v52 }
 0xfa8   :  { %28683 = vmatpush3.bf16.msra.mxu1 %v28680_v52  ;;  %v15560_v52 = vand.u32 4294901760, %v33721_v62 }
 0xfa9   :  { %28685 = vmatprep.subr.bf16.mxu1 %v28684_v34 }
 0xfaa   :  { %v15561_v22 = vsub.f32 %v33721_v62, %v15560_v52 }
 0xfac   :  { %28687 = vmatpush3.bf16.msra.mxu1 %v28684_v34  ;;  %v15567_v34 = vand.u32 4294901760, %v33723_v30  ;;  %v15562_v54 = vand.u32 4294901760, %v15561_v22 }
 0xfad   :  { %28689 = vmatprep.subr.bf16.mxu1 %v28688_v57 }
 0xfae   :  { %v15568_v19 = vsub.f32 %v33723_v30, %v15567_v34  ;;  %v20408_v30 = vld [vmem:[%s34790_s6 + $0x2d0] sm:$0xff] }
 0xfb0   :  { %28691 = vmatpush3.bf16.msra.mxu1 %v28688_v57 }
 0xfb1   :  { %28693 = vmatprep.subr.bf16.mxu1 %v33608_v9 }
 0xfb3   :  { %25273 = vmatmul.mubr.f32.vlgmr.msra.gmra.mrb[20].mxu1 %v14948_v40 }
 0xfb4   :  { %28695 = vmatpush3.bf16.msra.mxu1 %v33608_v9  ;;  %25291 = vmatprep.mubr.f32.mxu1 %v14939_v11 }
 0xfb5   :  { %28697 = vmatprep.subr.bf16.mxu1 %v33618_v44 }
 0xfb8   :  { %28699 = vmatpush3.bf16.msra.mxu1 %v33618_v44 }
 0xfb9   :  { %28701 = vmatprep.subr.bf16.mxu1 %v33628_v38 }
 0xfbc   :  { %28703 = vmatpush3.bf16.msra.mxu1 %v33628_v38 }
 0xfbd   :  { %28705 = vmatprep.subr.bf16.mxu1 %v33638_v55 }
 0xfc0   :  { %28707 = vmatpush3.bf16.msra.mxu1 %v33638_v55 }
 0xfc1   :  { %28709 = vmatprep.subr.bf16.mxu1 %v28708_v10 }
 0xfc3   :  { %25292 = vmatmul.mubr.f32.vlgmr.msra.gmra.mrb[20].mxu1 %v14949_v59  ;;  %v15569_v59 = vand.u32 4294901760, %v15568_v19 }
 0xfc4   :  { %28711 = vmatpush3.bf16.msra.mxu1 %v28708_v10  ;;  %25310 = vmatprep.mubr.f32.mxu1 %v14937_v18  ;;  %v33743_v10 = vsub.f32 %v15448_v20, %v33725_v6 }
 0xfc5   :  { %28713 = vmatprep.subr.bf16.mxu1 %v28712_v32  ;;  %v28760_v31 = vpack.c.bf16 %v15569_v59, %v15562_v54 }
 0xfc6   :  { %v15535_v60 = vand.u32 4294901760, %v33743_v10 }
 0xfc8   :  { %28715 = vmatpush3.bf16.msra.mxu1 %v28712_v32  ;;  %v15536_v23 = vsub.f32 %v33743_v10, %v15535_v60 }
 0xfc9   :  { %28717 = vmatprep.subr.bf16.mxu1 %v28716_v63 }
 0xfca   :  { %v15537_v49 = vand.u32 4294901760, %v15536_v23 }
 0xfcc   :  { %28719 = vmatpush3.bf16.msra.mxu1 %v28716_v63 }
 0xfcd   :  { %28721 = vmatprep.subr.bf16.mxu1 %v28720_v36 }
 0xfd0   :  { %28723 = vmatpush3.bf16.msra.mxu1 %v28720_v36  ;;  %v33750_v36 = vpack.c.bf16 %v15472_v2, %v15469_v29 }
 0xfd1   :  { %28725 = vmatprep.subr.bf16.mxu1 %v33608_v9 }
 0xfd3   :  { %25311 = vmatmul.mubr.f32.vlgmr.msra.gmra.mrb[20].mxu1 %v33651_v16 }
 0xfd4   :  { %28727 = vmatpush3.bf16.msra.mxu1 %v33608_v9  ;;  %25329 = vmatprep.mubr.f32.mxu1 %v14937_v18  ;;  %v15451_v9 = vand.u32 4294901760, %v20390_v45  ;;  %v33765_v18 = vsub.f32 %v20397_v13, %v15472_v2  ;;  %v20407_v13 = vld [vmem:[%s34790_s6 + $0x2c8] sm:$0xff]  ;;  %v16052_v2 = vand.u32 4294901760, %v20408_v30 }
 0xfd5   :  { %28729 = vmatprep.subr.bf16.mxu1 %v33618_v44 }
 0xfd6   :  { %v33694_v28 = vsub.f32 %v20390_v45, %v15451_v9  ;;  %v33700_v17 = vpack.c.bf16 %v15454_v8, %v15451_v9  ;;  %v15595_v0 = vand.u32 4294901760, %v33765_v18  ;;  %v28784_v20 = vpack.c.bf16 %v33765_v18, %v33763_v47 }
 0xfd8   :  { %28731 = vmatpush3.bf16.msra.mxu1 %v33618_v44  ;;  %v33697_v44 = vsub.f32 %v20391_v12, %v15454_v8  ;;  %v15546_v53 = vand.u32 4294901760, %v33694_v28  ;;  %v15589_v12 = vsub.f32 %v33763_v47, %v15588_v25  ;;  %v15596_v51 = vsub.f32 %v33765_v18, %v15595_v0 }
 0xfd9   :  { %28733 = vmatprep.subr.bf16.mxu1 %v33628_v38 }
 0xfda   :  { %v15553_v61 = vand.u32 4294901760, %v33697_v44  ;;  %v15547_v4 = vsub.f32 %v33694_v28, %v15546_v53  ;;  %v15590_v8 = vand.u32 4294901760, %v15589_v12  ;;  %v15597_v41 = vand.u32 4294901760, %v15596_v51 }
 0xfdb   :  { %v28772_v46 = vpack.c.bf16 %v33697_v44, %v33694_v28  ;;  %v14836_v28 = vrot.slane %v33647_v3, 1  ;;  %v14837_v3 = vrot.slane %v33645_v27, 1  ;;  %v16046_v27 = vand.u32 4294901760, %v20406_v50 }
 0xfdc   :  { %28735 = vmatpush3.bf16.msra.mxu1 %v33628_v38  ;;  %v20395_v38 = vld [vmem:[%s34790_s6 + $0x268] sm:$0xff]  ;;  %v15554_v56 = vsub.f32 %v33697_v44, %v15553_v61  ;;  %v15548_v1 = vand.u32 4294901760, %v15547_v4  ;;  %v28768_v58 = vpack.c.bf16 %v15597_v41, %v15590_v8  ;;  %v28804_v15 = vpack.c.bf16 %v15553_v61, %v15546_v53 }
 0xfdd   :  { %28737 = vmatprep.subr.bf16.mxu1 %v33638_v55  ;;  %v15466_v48 = vand.u32 4294901760, %v20395_v38  ;;  %v28816_v44 = vpack.c.bf16 %v15595_v0, %v15588_v25 }
 0xfde   :  { %v15555_v42 = vand.u32 4294901760, %v15554_v56 }
 0xfdf   :  { %v33748_v63 = vsub.f32 %v20395_v38, %v15466_v48 }
 0xfe0   :  { %28739 = vmatpush3.bf16.msra.mxu1 %v33638_v55  ;;  %v15463_v55 = vand.u32 4294901760, %v20394_v21  ;;  %v28756_v40 = vpack.c.bf16 %v15555_v42, %v15548_v1  ;;  %v33875_v42 = vsub.f32 %v20408_v30, %v16052_v2 }
 0xfe1   :  { %28741 = vmatprep.subr.bf16.mxu1 %v33700_v17 }
 0xfe2   :  { %v33740_v57 = vsub.f32 %v20394_v21, %v15463_v55  ;;  %v33746_v32 = vpack.c.bf16 %v15466_v48, %v15463_v55  ;;  %v14840_v21 = vsel %vm1637_vm2, %v14836_v28, 0.0  ;;  %v20409_v55 = vld [vmem:[%s34790_s6 + $0x2d8] sm:$0xff]  ;;  %v16155_v59 = vand.u32 4294901760, %v33875_v42 }
 0xfe3   :  { %25330 = vmatmul.mubr.f32.vlgmr.msra.gmra.mrb[20].mxu1 %v33651_v16  ;;  %v15581_v16 = vand.u32 4294901760, %v33748_v63  ;;  %v16040_v38 = vsel %vm1039_vm0, %v14840_v21, 0  ;;  %v16055_v4 = vand.u32 4294901760, %v20409_v55 }
 0xfe4   :  { %28743 = vmatpush3.bf16.msra.mxu1 %v33700_v17  ;;  %25348 = vmatprep.mubr.f32.mxu1 %v15527_v43  ;;  %v15574_v14 = vand.u32 4294901760, %v33740_v57  ;;  %v28780_v24 = vpack.c.bf16 %v33748_v63, %v33740_v57  ;;  %v33820_v53 = vand.u32 4294901760, %v16040_v38 }
 0xfe5   :  { %28745 = vmatprep.subr.bf16.mxu1 %v33728_v33  ;;  %v15582_v37 = vsub.f32 %v33748_v63, %v15581_v16  ;;  %v33877_v22 = vsub.f32 %v20409_v55, %v16055_v4  ;;  %v33880_v19 = vpack.c.bf16 %v16055_v4, %v16052_v2 }
 0xfe6   :  { %v15575_v11 = vsub.f32 %v33740_v57, %v15574_v14  ;;  %v33834_v61 = vsub.f32 %v16040_v38, %v33820_v53 }
 0xfe7   :  { %v15583_v45 = vand.u32 4294901760, %v15582_v37  ;;  %v28872_v30 = vpack.c.bf16 %v33877_v22, %v33875_v42 }
 0xfe8   :  { %28747 = vmatpush3.bf16.msra.mxu1 %v33728_v33  ;;  %v15576_v26 = vand.u32 4294901760, %v15575_v11  ;;  %v16120_v62 = vand.u32 4294901760, %v33834_v61  ;;  %v16162_v11 = vand.u32 4294901760, %v33877_v22 }
 0xfe9   :  { %28749 = vmatprep.subr.bf16.mxu1 %v33746_v32 }
 0xfea   :  { %v28764_v9 = vpack.c.bf16 %v15583_v45, %v15576_v26  ;;  %v16121_v56 = vsub.f32 %v33834_v61, %v16120_v62  ;;  %v16163_v45 = vsub.f32 %v33877_v22, %v16162_v11 }
 0xfec   :  { %28751 = vmatpush3.bf16.msra.mxu1 %v33746_v32 }
 0xfed   :  { %28753 = vmatprep.subr.bf16.mxu1 %v33750_v36 }
 0xff0   :  { %28755 = vmatpush3.bf16.msra.mxu1 %v33750_v36 }
 0xff1   :  { %28757 = vmatprep.subr.bf16.mxu1 %v28756_v40 }
 0xff3   :  { %25349 = vmatmul.mubr.f32.vlgmr.msra.gmra.mrb[20].mxu1 %v15537_v49  ;;  %v16156_v49 = vsub.f32 %v33875_v42, %v16155_v59 }
 0xff4   :  { %28759 = vmatpush3.bf16.msra.mxu1 %v28756_v40  ;;  %25367 = vmatprep.mubr.f32.mxu1 %v33669_v39 }
 0xff5   :  { %28761 = vmatprep.subr.bf16.mxu1 %v28760_v31 }
 0xff8   :  { %28763 = vmatpush3.bf16.msra.mxu1 %v28760_v31 }
 0xff9   :  { %28765 = vmatprep.subr.bf16.mxu1 %v28764_v9 }
 0xffc   :  { %28767 = vmatpush3.bf16.msra.mxu1 %v28764_v9 }
 0xffd   :  { %28769 = vmatprep.subr.bf16.mxu1 %v28768_v58 }
0x1000   :  { %28771 = vmatpush3.bf16.msra.mxu1 %v28768_v58 }
0x1001   :  { %28773 = vmatprep.subr.bf16.mxu1 %v28772_v46 }
0x1003   :  { %25368 = vmatmul.mubr.f32.vlgmr.msra.gmra.mrb[20].mxu1 %v33725_v6 }
0x1004   :  { %28775 = vmatpush3.bf16.msra.mxu1 %v28772_v46  ;;  %25386 = vmatprep.mubr.f32.mxu1 %v33681_v35  ;;  %v28808_v35 = vpack.c.bf16 %v15567_v34, %v15560_v52  ;;  %v20410_v52 = vld [vmem:[%s34790_s6 + $0x2e0] sm:$0xff]  ;;  %v20411_v34 = vld [vmem:[%s34790_s6 + $0x2e8] sm:$0xff]  ;;  %v16157_v46 = vand.u32 4294901760, %v16156_v49 }
0x1005   :  { %28777 = vmatprep.subr.bf16.mxu1 %v28776_v7 }
0x1008   :  { %28779 = vmatpush3.bf16.msra.mxu1 %v28776_v7  ;;  %v16164_v7 = vand.u32 4294901760, %v16163_v45 }
0x1009   :  { %28781 = vmatprep.subr.bf16.mxu1 %v28780_v24 }
0x100a   :  { %v28856_v28 = vpack.c.bf16 %v16164_v7, %v16157_v46 }
0x100c   :  { %28783 = vmatpush3.bf16.msra.mxu1 %v28780_v24 }
0x100d   :  { %28785 = vmatprep.subr.bf16.mxu1 %v28784_v20 }
0x1010   :  { %28787 = vmatpush3.bf16.msra.mxu1 %v28784_v20 }
0x1011   :  { %28789 = vmatprep.subr.bf16.mxu1 %v33700_v17 }
0x1013   :  { %25387 = vmatmul.mubr.f32.vlgmr.msra.gmra.mrb[20].mxu1 %v33743_v10  ;;  %v20412_v10 = vld [vmem:[%s34790_s6 + $0x2f0] sm:$0xff] }
0x1014   :  { %28791 = vmatpush3.bf16.msra.mxu1 %v33700_v17  ;;  %25405 = vmatprep.mubr.f32.mxu1 %v15525_v5  ;;  %v28812_v5 = vpack.c.bf16 %v15581_v16, %v15574_v14  ;;  %v16061_v14 = vand.u32 4294901760, %v20411_v34  ;;  %v16064_v47 = vand.u32 4294901760, %v20412_v10 }
0x1015   :  { %28793 = vmatprep.subr.bf16.mxu1 %v33728_v33 }
0x1016   :  { %v33900_v37 = vsub.f32 %v20411_v34, %v16061_v14  ;;  %v33915_v9 = vsub.f32 %v20412_v10, %v16064_v47  ;;  %v20417_v34 = vld [vmem:[%s34794_s10 + $0x58] sm:$0xff] }
0x1017   :  { %v16687_v10 = vand.u32 4294901760, %v20417_v34 }
0x1018   :  { %28795 = vmatpush3.bf16.msra.mxu1 %v33728_v33  ;;  %v16176_v51 = vand.u32 4294901760, %v33900_v37 }
0x1019   :  { %28797 = vmatprep.subr.bf16.mxu1 %v33746_v32  ;;  %v16793_v49 = vsub.f32 %v20417_v34, %v16687_v10  ;;  %v20341_v34 = vld [vmem:[%s34793_s9 + $0x1] ss:$0 sm:$0xff] }
0x101a   :  { %v16177_v20 = vsub.f32 %v33900_v37, %v16176_v51 }
0x101c   :  { %28799 = vmatpush3.bf16.msra.mxu1 %v33746_v32  ;;  %v16178_v21 = vand.u32 4294901760, %v16177_v20 }
0x101d   :  { %28801 = vmatprep.subr.bf16.mxu1 %v33750_v36 }
0x1020   :  { %28803 = vmatpush3.bf16.msra.mxu1 %v33750_v36 }
0x1021   :  { %28805 = vmatprep.subr.bf16.mxu1 %v28804_v15 }
0x1023   :  { %25406 = vmatmul.mubr.f32.vlgmr.msra.gmra.mrb[20].mxu1 %v15535_v60  ;;  %v16122_v60 = vand.u32 4294901760, %v16121_v56 }
0x1024   :  { %28807 = vmatpush3.bf16.msra.mxu1 %v28804_v15  ;;  %25424 = vmatprep.mubr.f32.mxu1 %v33669_v39  ;;  %v16183_v15 = vand.u32 4294901760, %v33915_v9 }
0x1025   :  { %28809 = vmatprep.subr.bf16.mxu1 %v28808_v35 }
0x1026   :  { %v16184_v38 = vsub.f32 %v33915_v9, %v16183_v15 }
0x1028   :  { %28811 = vmatpush3.bf16.msra.mxu1 %v28808_v35 }
0x1029   :  { %28813 = vmatprep.subr.bf16.mxu1 %v28812_v5 }
0x102c   :  { %28815 = vmatpush3.bf16.msra.mxu1 %v28812_v5 }
0x102d   :  { %28817 = vmatprep.subr.bf16.mxu1 %v28816_v44 }
0x1030   :  { %28819 = vmatpush3.bf16.msra.mxu1 %v28816_v44 }
0x1031   :  { %28821 = vmatprep.subr.bf16.mxu1 %v33700_v17 }
0x1033   :  { %25425 = vmatmul.mubr.f32.vlgmr.msra.gmra.mrb[20].mxu1 %v33725_v6 }
0x1034   :  { %28823 = vmatpush3.bf16.msra.mxu1 %v33700_v17  ;;  %25443 = vmatprep.mubr.f32.mxu1 %v33669_v39  ;;  %v14841_v17 = vsel %vm1637_vm2, %v14837_v3, 0.0  ;;  %v16049_v39 = vand.u32 4294901760, %v20407_v13 }
0x1035   :  { %28825 = vmatprep.subr.bf16.mxu1 %v33728_v33  ;;  %v16043_v48 = vsel %vm1039_vm0, %v14841_v17, 0 }
0x1036   :  { %v33850_v43 = vsub.f32 %v20407_v13, %v16049_v39  ;;  %v33853_v29 = vpack.c.bf16 %v16049_v39, %v16046_v27  ;;  %v33864_v57 = vand.u32 4294901760, %v16043_v48  ;;  %v16185_v13 = vand.u32 4294901760, %v16184_v38 }
0x1038   :  { %28827 = vmatpush3.bf16.msra.mxu1 %v33728_v33  ;;  %v33848_v33 = vsub.f32 %v20406_v50, %v16046_v27  ;;  %v16148_v1 = vand.u32 4294901760, %v33850_v43  ;;  %v33883_v16 = vsub.f32 %v16043_v48, %v33864_v57 }
0x1039   :  { %28829 = vmatprep.subr.bf16.mxu1 %v33746_v32 }
0x103a   :  { %v16141_v63 = vand.u32 4294901760, %v33848_v33  ;;  %v16149_v54 = vsub.f32 %v33850_v43, %v16148_v1  ;;  %v16130_v0 = vand.u32 4294901760, %v33883_v16  ;;  %v28868_v39 = vpack.c.bf16 %v33850_v43, %v33848_v33  ;;  %v20414_v43 = vld [vmem:[%s34794_s10 + $0x40] sm:$0xff] }
0x103c   :  { %28831 = vmatpush3.bf16.msra.mxu1 %v33746_v32  ;;  %v20413_v32 = vld [vmem:[%s34790_s6 + $0x2f8] sm:$0xff]  ;;  %v16142_v40 = vsub.f32 %v33848_v33, %v16141_v63  ;;  %v16150_v26 = vand.u32 4294901760, %v16149_v54  ;;  %v16131_v41 = vsub.f32 %v33883_v16, %v16130_v0  ;;  %v28900_v2 = vpack.c.bf16 %v16148_v1, %v16141_v63  ;;  %v20418_v63 = vld [vmem:[%s34794_s10 + $0x60] sm:$0xff]  ;;  %v20419_v1 = vld [vmem:[%s34794_s10 + $0x68] sm:$0xff] }
0x103d   :  { %28833 = vmatprep.subr.bf16.mxu1 %v33750_v36  ;;  %v16067_v18 = vand.u32 4294901760, %v20413_v32  ;;  %v16690_v42 = vand.u32 4294901760, %v20418_v63  ;;  %v16693_v22 = vand.u32 4294901760, %v20419_v1 }
0x103e   :  { %v16143_v31 = vand.u32 4294901760, %v16142_v40  ;;  %v16132_v5 = vand.u32 4294901760, %v16131_v41 }
0x103f   :  { %v33902_v25 = vpack.c.bf16 %v16067_v18, %v16064_v47  ;;  %v33917_v8 = vsub.f32 %v20413_v32, %v16067_v18  ;;  %v16800_v41 = vsub.f32 %v20418_v63, %v16690_v42 }
0x1040   :  { %28835 = vmatpush3.bf16.msra.mxu1 %v33750_v36  ;;  %v16058_v36 = vand.u32 4294901760, %v20410_v52  ;;  %v28852_v58 = vpack.c.bf16 %v16150_v26, %v16143_v31 }
0x1041   :  { %28837 = vmatprep.subr.bf16.mxu1 %v33853_v29  ;;  %v16190_v35 = vand.u32 4294901760, %v33917_v8  ;;  %v28880_v48 = vpack.c.bf16 %v33917_v8, %v33915_v9  ;;  %v16794_v9 = vand.u32 4294901760, %v16793_v49 }
0x1042   :  { %v33898_v23 = vsub.f32 %v20410_v52, %v16058_v36  ;;  %v20416_v52 = vld [vmem:[%s34794_s10 + $0x50] sm:$0xff] }
0x1043   :  { %25444 = vmatmul.mubr.f32.vlgmr.msra.gmra.mrb[20].mxu1 %v33725_v6  ;;  %v33896_v6 = vpack.c.bf16 %v16061_v14, %v16058_v36  ;;  %v16191_v3 = vsub.f32 %v33917_v8, %v16190_v35  ;;  %v28912_v33 = vpack.c.bf16 %v16190_v35, %v16183_v15  ;;  %v16795_v7 = vsub.f32 %v16793_v49, %v16794_v9 }
0x1044   :  { %28839 = vmatpush3.bf16.msra.mxu1 %v33853_v29  ;;  %25462 = vmatprep.mubr.f32.mxu1 %v16122_v60  ;;  %v16169_v12 = vand.u32 4294901760, %v33898_v23  ;;  %v28876_v55 = vpack.c.bf16 %v33900_v37, %v33898_v23  ;;  %v20420_v60 = vld [vmem:[%s34794_s10 + $0x70] sm:$0xff] }
0x1045   :  { %28841 = vmatprep.subr.bf16.mxu1 %v33880_v19  ;;  %v16192_v17 = vand.u32 4294901760, %v16191_v3  ;;  %v16696_v47 = vand.u32 4294901760, %v20420_v60  ;;  %v16796_v35 = vand.u32 4294901760, %v16795_v7 }
0x1046   :  { %v16170_v24 = vsub.f32 %v33898_v23, %v16169_v12 }
0x1047   :  { %v28864_v27 = vpack.c.bf16 %v16192_v17, %v16185_v13 }
0x1048   :  { %28843 = vmatpush3.bf16.msra.mxu1 %v33880_v19  ;;  %v16171_v44 = vand.u32 4294901760, %v16170_v24  ;;  %v16801_v24 = vand.u32 4294901760, %v16800_v41 }
0x1049   :  { %28845 = vmatprep.subr.bf16.mxu1 %v33896_v6 }
0x104a   :  { %v28860_v50 = vpack.c.bf16 %v16178_v21, %v16171_v44  ;;  %v16814_v44 = vsub.f32 %v20420_v60, %v16696_v47 }
0x104c   :  { %28847 = vmatpush3.bf16.msra.mxu1 %v33896_v6  ;;  %v16815_v13 = vand.u32 4294901760, %v16814_v44 }
0x104d   :  { %28849 = vmatprep.subr.bf16.mxu1 %v33902_v25 }
0x1050   :  { %28851 = vmatpush3.bf16.msra.mxu1 %v33902_v25 }
0x1051   :  { %28853 = vmatprep.subr.bf16.mxu1 %v28852_v58 }
0x1053   :  { %25463 = vmatmul.mubr.f32.vlgmr.msra.gmra.mrb[20].mxu1 %v16132_v5  ;;  %v16802_v5 = vsub.f32 %v16800_v41, %v16801_v24 }
0x1054   :  { %28855 = vmatpush3.bf16.msra.mxu1 %v28852_v58  ;;  %25481 = vmatprep.mubr.f32.mxu1 %v33820_v53  ;;  %v16807_v58 = vsub.f32 %v20419_v1, %v16693_v22  ;;  %v13045_v1 = vpop.permute.xlu0 %13044 }
0x1055   :  { %28857 = vmatprep.subr.bf16.mxu1 %v28856_v28  ;;  %v16803_v3 = vand.u32 4294901760, %v16802_v5 }
0x1056   :  { %v16808_v20 = vand.u32 4294901760, %v16807_v58 }
0x1058   :  { %28859 = vmatpush3.bf16.msra.mxu1 %v28856_v28  ;;  %v16809_v28 = vsub.f32 %v16807_v58, %v16808_v20 }
0x1059   :  { %28861 = vmatprep.subr.bf16.mxu1 %v28860_v50 }
0x105c   :  { %28863 = vmatpush3.bf16.msra.mxu1 %v28860_v50  ;;  %v16810_v50 = vand.u32 4294901760, %v16809_v28 }
0x105d   :  { %28865 = vmatprep.subr.bf16.mxu1 %v28864_v27 }
0x1060   :  { %28867 = vmatpush3.bf16.msra.mxu1 %v28864_v27  ;;  %v28956_v27 = vpack.c.bf16 %v16810_v50, %v16803_v3 }
0x1061   :  { %28869 = vmatprep.subr.bf16.mxu1 %v28868_v39 }
0x1063   :  { %25482 = vmatmul.mubr.f32.vlgmr.msra.gmra.mrb[20].mxu1 %v33864_v57 }
0x1064   :  { %28871 = vmatpush3.bf16.msra.mxu1 %v28868_v39  ;;  %25500 = vmatprep.mubr.f32.mxu1 %v33834_v61  ;;  %v28904_v61 = vpack.c.bf16 %v16162_v11, %v16155_v59  ;;  %v29876_v11 = vld [vmem:[%s34792_s7 + $0x1] ss:$0 sm:$0xff]  ;;  %v16816_v39 = vsub.f32 %v16814_v44, %v16815_v13 }
0x1065   :  { %28873 = vmatprep.subr.bf16.mxu1 %v28872_v30 }
0x1068   :  { %28875 = vmatpush3.bf16.msra.mxu1 %v28872_v30 }
0x1069   :  { %28877 = vmatprep.subr.bf16.mxu1 %v28876_v55 }
0x106c   :  { %28879 = vmatpush3.bf16.msra.mxu1 %v28876_v55  ;;  %v16817_v55 = vand.u32 4294901760, %v16816_v39 }
0x106d   :  { %28881 = vmatprep.subr.bf16.mxu1 %v28880_v48 }
0x1070   :  { %28883 = vmatpush3.bf16.msra.mxu1 %v28880_v48 }
0x1071   :  { %28885 = vmatprep.subr.bf16.mxu1 %v33853_v29 }
0x1073   :  { %25501 = vmatmul.mubr.f32.vlgmr.msra.gmra.mrb[20].mxu1 %v33883_v16  ;;  %v20421_v16 = vld [vmem:[%s34794_s10 + $0x78] sm:$0xff] }
0x1074   :  { %28887 = vmatpush3.bf16.msra.mxu1 %v33853_v29  ;;  %25519 = vmatprep.mubr.f32.mxu1 %v16120_v62  ;;  %v28908_v62 = vpack.c.bf16 %v16176_v51, %v16169_v12  ;;  %v16699_v18 = vand.u32 4294901760, %v20421_v16 }
0x1075   :  { %28889 = vmatprep.subr.bf16.mxu1 %v33880_v19 }
0x1076   :  { %v34022_v37 = vpack.c.bf16 %v16699_v18, %v16696_v47  ;;  %v16821_v21 = vsub.f32 %v20421_v16, %v16699_v18 }
0x1078   :  { %28891 = vmatpush3.bf16.msra.mxu1 %v33880_v19  ;;  %v16822_v17 = vand.u32 4294901760, %v16821_v21 }
0x1079   :  { %28893 = vmatprep.subr.bf16.mxu1 %v33896_v6 }
0x107a   :  { %v16823_v30 = vsub.f32 %v16821_v21, %v16822_v17 }
0x107c   :  { %28895 = vmatpush3.bf16.msra.mxu1 %v33896_v6  ;;  %v16824_v48 = vand.u32 4294901760, %v16823_v30  ;;  %v16660_v30 = vld [vmem:[%s34794_s10 + $0x20] sm:$0xff] }
0x107d   :  { %28897 = vmatprep.subr.bf16.mxu1 %v33902_v25 }
0x1080   :  { %28899 = vmatpush3.bf16.msra.mxu1 %v33902_v25 }
0x1081   :  { %28901 = vmatprep.subr.bf16.mxu1 %v28900_v2 }
0x1083   :  { %25520 = vmatmul.mubr.f32.vlgmr.msra.gmra.mrb[20].mxu1 %v16130_v0 }
0x1084   :  { %28903 = vmatpush3.bf16.msra.mxu1 %v28900_v2  ;;  %25538 = vmatprep.mubr.f32.mxu1 %v33820_v53  ;;  %v28960_v2 = vpack.c.bf16 %v16824_v48, %v16817_v55  ;;  %v16662_v48 = vld [vmem:[%s34794_s10 + $0x30] sm:$0xff] }
0x1085   :  { %28905 = vmatprep.subr.bf16.mxu1 %v28904_v61 }
0x1088   :  { %28907 = vmatpush3.bf16.msra.mxu1 %v28904_v61 }
0x1089   :  { %28909 = vmatprep.subr.bf16.mxu1 %v28908_v62 }
0x108c   :  { %28911 = vmatpush3.bf16.msra.mxu1 %v28908_v62 }
0x108d   :  { %28913 = vmatprep.subr.bf16.mxu1 %v28912_v33 }
0x1090   :  { %28915 = vmatpush3.bf16.msra.mxu1 %v28912_v33  ;;  %v28972_v33 = vpack.c.bf16 %v16807_v58, %v16800_v41 }
0x1091   :  { %28917 = vmatprep.subr.bf16.mxu1 %v33853_v29 }
0x1093   :  { %25539 = vmatmul.mubr.f32.vlgmr.msra.gmra.mrb[20].mxu1 %v33864_v57 }
0x1094   :  { %28919 = vmatpush3.bf16.msra.mxu1 %v33853_v29  ;;  %25557 = vmatprep.mubr.f32.mxu1 %v33820_v53  ;;  %v20415_v53 = vld [vmem:[%s34794_s10 + $0x48] sm:$0xff]  ;;  %v16678_v29 = vand.u32 4294901760, %v20414_v43 }
0x1095   :  { %28921 = vmatprep.subr.bf16.mxu1 %v33880_v19  ;;  %v16681_v4 = vand.u32 4294901760, %v20415_v53 }
0x1096   :  { %v16772_v36 = vsub.f32 %v20414_v43, %v16678_v29  ;;  %v28976_v43 = vpack.c.bf16 %v16821_v21, %v16814_v44  ;;  %v16658_v44 = vld [vmem:[%s34794_s10 + $0x10] sm:$0xff]  ;;  %v16659_v21 = vld [vmem:[%s34794_s10 + $0x18] sm:$0xff] }
0x1097   :  { %v33989_v56 = vpack.c.bf16 %v16681_v4, %v16678_v29  ;;  %v16779_v14 = vsub.f32 %v20415_v53, %v16681_v4  ;;  %v34030_v4 = vpack.c.bf16 %v16808_v20, %v16801_v24  ;;  %v16656_v24 = vld [vmem:[%s34794_s10] sm:$0xff]  ;;  %v16657_v20 = vld [vmem:[%s34794_s10 + $0x8] sm:$0xff] }
0x1098   :  { %28923 = vmatpush3.bf16.msra.mxu1 %v33880_v19  ;;  %v34009_v19 = vpack.c.bf16 %v16693_v22, %v16690_v42  ;;  %v16773_v40 = vand.u32 4294901760, %v16772_v36  ;;  %v35191_v42 = vld [vmem:[#allocation34_spill] sm:$0xff]  ;;  %v17267_v5 = vand.u32 4294901760, %v16657_v20 }
0x1099   :  { %28925 = vmatprep.subr.bf16.mxu1 %v33896_v6  ;;  %28933 = vmatprep.subr.bf16.mxu0 %v33989_v56  ;;  %v16780_v54 = vand.u32 4294901760, %v16779_v14  ;;  %v28964_v61 = vpack.c.bf16 %v16779_v14, %v16772_v36  ;;  %v29511_v22 = vadd.f32 %v20341_v34, %v35191_v42 }
0x109a   :  { %28935 = vmatpush3.bf16.msra.mxu0 %v33989_v56 }
0x109b   :  { %v16781_v0 = vsub.f32 %v16779_v14, %v16780_v54  ;;  %v28996_v53 = vpack.c.bf16 %v16780_v54, %v16773_v40  ;;  %v13050_v14 = vadd.f32 %v29511_v22, %v13045_v1 }
0x109c   :  { %28927 = vmatpush3.bf16.msra.mxu1 %v33896_v6 }
0x109d   :  { %28929 = vmatprep.subr.bf16.mxu1 %v33902_v25  ;;  %v16782_v12 = vand.u32 4294901760, %v16781_v0 }
0x10a0   :  { %28931 = vmatpush3.bf16.msra.mxu1 %v33902_v25  ;;  %v16774_v25 = vsub.f32 %v16772_v36, %v16773_v40  ;;  %v35192_v40 = vld [vmem:[#allocation3_spill] sm:$0xff] }
0x10a2   :  { %v16775_v45 = vand.u32 4294901760, %v16774_v25 }
0x10a3   :  { %25558 = vmatmul.mubr.f32.vlgmr.msra.gmra.mrb[20].mxu1 %v33864_v57  ;;  %v16684_v57 = vand.u32 4294901760, %v20416_v52 }
0x10a4   :  { %v28948_v8 = vpack.c.bf16 %v16782_v12, %v16775_v45 }
0x10a5   :  { %v33999_v32 = vpack.c.bf16 %v16687_v10, %v16684_v57  ;;  %v16786_v26 = vsub.f32 %v20416_v52, %v16684_v57  ;;  %v34032_v52 = vpack.c.bf16 %v16822_v17, %v16815_v13  ;;  %v13047_v57 = vpop.permute.xlu1 %13046  ;;  %v35190_v10 = vld [vmem:[#allocation35_spill] sm:$0xff]  ;;  %v17270_v13 = vand.u32 4294901760, %v16658_v44 }
0x10a6   :  { %v29510_v63 = vadd.f32 %v35190_v10, %v20341_v34  ;;  %v17273_v17 = vand.u32 4294901760, %v16659_v21 }
0x10a7   :  { %28937 = vmatprep.subr.bf16.mxu0 %v33999_v32  ;;  %v16787_v51 = vand.u32 4294901760, %v16786_v26  ;;  %v28968_v62 = vpack.c.bf16 %v16793_v49, %v16786_v26 }
0x10a8   :  { %28939 = vmatpush3.bf16.msra.mxu0 %v33999_v32  ;;  %v13051_v36 = vadd.f32 %v29510_v63, %v13047_v57 }
0x10a9   :  { %28941 = vmatprep.subr.bf16.mxu0 %v34009_v19  ;;  %v16788_v46 = vsub.f32 %v16786_v26, %v16787_v51  ;;  %v34028_v29 = vpack.c.bf16 %v16794_v9, %v16787_v51 }
0x10ab   :  { %v16789_v15 = vand.u32 4294901760, %v16788_v46 }
0x10ac   :  { %28943 = vmatpush3.bf16.msra.mxu0 %v34009_v19 }
0x10ad   :  { %28945 = vmatprep.subr.bf16.mxu0 %v34022_v37  ;;  %v28952_v38 = vpack.c.bf16 %v16796_v35, %v16789_v15 }
0x10b0   :  { %28947 = vmatpush3.bf16.msra.mxu0 %v34022_v37 }
0x10b1   :  { %28949 = vmatprep.subr.bf16.mxu0 %v28948_v8 }
0x1176   :  { %v25559_v59 = vpop.f32.mrb[20].mxu1 }
0x1177   :  { %v16628_v6 = vadd.f32 %v29876_v11, %v25559_v59  ;;  %v16615_v23 = vpop.f32.mrb[21].mxu1  ;;  %v35193_v59 = vld [vmem:[#allocation2_spill] sm:$0xff] }
0x1178   :  { %v16627_v31 = vadd.f32 %v29876_v11, %v16615_v23 }
0x1179   :  { %16633 = vrot.lane.b32.xlu1 %v16628_v6, %s29877_s24 }
0x117a   :  { %16631 = vrot.lane.b32.xlu0 %v16627_v31, %s29877_s24 }
0x11eb   :  { %v16634_v60 = vpop.permute.xlu1 %16633 }
0x11ec   :  { %v16638_v16 = vadd.f32 %v16634_v60, %v13051_v36  ;;  %v16632_v47 = vpop.permute.xlu0 %16631 }
0x11ed   :  { %v16637_v18 = vadd.f32 %v16632_v47, %v13050_v14 }
0x11ee   :  { %v34040_v54 = vadd.f32 %v16638_v16, %v35192_v40 }
0x11ef   :  { %v34043_v11 = vadd.f32 %v16637_v18, %v35193_v59 }
0x11f0   :  { %v16675_v6 = vsel %vm1039_vm0, %v34040_v54, 0  ;;  %v16645_v35 = vrot.slane %v34040_v54, 7 }
0x11f1   :  { %v34047_v23 = vand.u32 4294901760, %v16675_v6  ;;  %v16673_v25 = vsel %vm1039_vm0, %v34043_v11, 0 }
0x11f2   :  { %v16750_v0 = vand.u32 4294901760, %v16673_v25 }
0x11f3   :  { %v16761_v31 = vsub.f32 %v16675_v6, %v34047_v23 }
0x11f4   :  { %v16751_v26 = vsub.f32 %v16673_v25, %v16750_v0 }
0x11f5   :  { %v16762_v49 = vand.u32 4294901760, %v16761_v31 }
0x11f6   :  { %v16752_v45 = vand.u32 4294901760, %v16751_v26 }
0x11f7   :  { %v16763_v12 = vsub.f32 %v16761_v31, %v16762_v49 }
0x11f8   :  { %v16753_v51 = vsub.f32 %v16751_v26, %v16752_v45 }
0x11f9   :  { %v16764_v41 = vand.u32 4294901760, %v16763_v12 }
0x11fa   :  { %v16754_v9 = vand.u32 4294901760, %v16753_v51 }
0x11fc   :  { %25576 = vmatprep.mubr.f32.mxu0 %v16754_v9 }
0x11fd   :  { %25577 = vmatmul.mubr.f32.vlgmr.msra.gmra.mrb[22].mxu0 %v16764_v41 }
0x11fe   :  { %28951 = vmatpush3.bf16.msra.mxu0 %v28948_v8  ;;  %25595 = vmatprep.mubr.f32.mxu0 %v16750_v0  ;;  %v16644_v8 = vrot.slane %v34043_v11, 7 }
0x11ff   :  { %28953 = vmatprep.subr.bf16.mxu0 %v28952_v38 }
0x1200   :  { %v16648_v58 = vsel %vm1630_vm1, 0.0, %v16644_v8 }
0x1201   :  { %v17258_v46 = vsel %vm1039_vm0, %v16648_v58, 0 }
0x1202   :  { %28955 = vmatpush3.bf16.msra.mxu0 %v28952_v38  ;;  %v34071_v7 = vand.u32 4294901760, %v17258_v46  ;;  %v16649_v38 = vsel %vm1630_vm1, 0.0, %v16645_v35 }
0x1203   :  { %28957 = vmatprep.subr.bf16.mxu0 %v28956_v27 }
0x1204   :  { %v34083_v15 = vsub.f32 %v17258_v46, %v34071_v7 }
0x1206   :  { %28959 = vmatpush3.bf16.msra.mxu0 %v28956_v27  ;;  %v17338_v28 = vand.u32 4294901760, %v34083_v15  ;;  %v17261_v27 = vsel %vm1039_vm0, %v16649_v38, 0 }
0x1207   :  { %28961 = vmatprep.subr.bf16.mxu0 %v28960_v2 }
0x1208   :  { %v17339_v39 = vsub.f32 %v34083_v15, %v17338_v28 }
0x120a   :  { %28963 = vmatpush3.bf16.msra.mxu0 %v28960_v2  ;;  %v16663_v2 = vld [vmem:[%s34794_s10 + $0x38] sm:$0xff] }
0x120b   :  { %28965 = vmatprep.subr.bf16.mxu0 %v28964_v61  ;;  %v17285_v34 = vand.u32 4294901760, %v16663_v2 }
0x120d   :  { %25596 = vmatmul.mubr.f32.vlgmr.msra.gmra.mrb[22].mxu0 %v34047_v23 }
0x120e   :  { %28967 = vmatpush3.bf16.msra.mxu0 %v28964_v61  ;;  %25614 = vmatprep.mubr.f32.mxu0 %v16751_v26 }
0x120f   :  { %28969 = vmatprep.subr.bf16.mxu0 %v28968_v62 }
0x1212   :  { %28971 = vmatpush3.bf16.msra.mxu0 %v28968_v62  ;;  %v34123_v62 = vsub.f32 %v16658_v44, %v17270_v13 }
0x1213   :  { %28973 = vmatprep.subr.bf16.mxu0 %v28972_v33 }
0x1214   :  { %v17373_v63 = vand.u32 4294901760, %v34123_v62 }
0x1216   :  { %28975 = vmatpush3.bf16.msra.mxu0 %v28972_v33  ;;  %v34125_v33 = vsub.f32 %v16659_v21, %v17273_v17  ;;  %v17374_v18 = vsub.f32 %v34123_v62, %v17373_v63 }
0x1217   :  { %28977 = vmatprep.subr.bf16.mxu0 %v28976_v43 }
0x1218   :  { %v17380_v1 = vand.u32 4294901760, %v34125_v33  ;;  %v17375_v26 = vand.u32 4294901760, %v17374_v18 }
0x121a   :  { %28979 = vmatpush3.bf16.msra.mxu0 %v28976_v43  ;;  %v34127_v43 = vand.u32 4294901760, %v17261_v27  ;;  %v17381_v40 = vsub.f32 %v34125_v33, %v17380_v1 }
0x121b   :  { %28981 = vmatprep.subr.bf16.mxu0 %v33989_v56 }
0x121c   :  { %v34145_v22 = vsub.f32 %v17261_v27, %v34127_v43 }
0x121d   :  { %25615 = vmatmul.mubr.f32.vlgmr.msra.gmra.mrb[22].mxu0 %v16761_v31 }
0x121e   :  { %28983 = vmatpush3.bf16.msra.mxu0 %v33989_v56  ;;  %25633 = vmatprep.mubr.f32.mxu0 %v16752_v45  ;;  %v17348_v6 = vand.u32 4294901760, %v34145_v22 }
0x121f   :  { %28985 = vmatprep.subr.bf16.mxu0 %v33999_v32 }
0x1220   :  { %v17349_v12 = vsub.f32 %v34145_v22, %v17348_v6 }
0x1222   :  { %28987 = vmatpush3.bf16.msra.mxu0 %v33999_v32  ;;  %v17350_v46 = vand.u32 4294901760, %v17349_v12 }
0x1223   :  { %28989 = vmatprep.subr.bf16.mxu0 %v34009_v19 }
0x1226   :  { %28991 = vmatpush3.bf16.msra.mxu0 %v34009_v19 }
0x1227   :  { %28993 = vmatprep.subr.bf16.mxu0 %v34022_v37 }
0x122a   :  { %28995 = vmatpush3.bf16.msra.mxu0 %v34022_v37 }
0x122b   :  { %28997 = vmatprep.subr.bf16.mxu0 %v28996_v53 }
0x122d   :  { %25634 = vmatmul.mubr.f32.vlgmr.msra.gmra.mrb[22].mxu0 %v16762_v49  ;;  %v17382_v49 = vand.u32 4294901760, %v17381_v40 }
0x122e   :  { %28999 = vmatpush3.bf16.msra.mxu0 %v28996_v53  ;;  %25652 = vmatprep.mubr.f32.mxu0 %v16750_v0  ;;  %v34130_v53 = vpack.c.bf16 %v17273_v17, %v17270_v13  ;;  %v29064_v13 = vpack.c.bf16 %v34125_v33, %v34123_v62  ;;  %v20424_v33 = vld [vmem:[%s34794_s10 + $0x90] sm:$0xff] }
0x122f   :  { %29001 = vmatprep.subr.bf16.mxu0 %v34028_v29  ;;  %v29048_v8 = vpack.c.bf16 %v17382_v49, %v17375_v26 }
0x1232   :  { %29003 = vmatpush3.bf16.msra.mxu0 %v34028_v29 }
0x1233   :  { %29005 = vmatprep.subr.bf16.mxu0 %v34030_v4 }
0x1236   :  { %29007 = vmatpush3.bf16.msra.mxu0 %v34030_v4  ;;  %v17340_v4 = vand.u32 4294901760, %v17339_v39 }
0x1237   :  { %29009 = vmatprep.subr.bf16.mxu0 %v34032_v52 }
0x123a   :  { %29011 = vmatpush3.bf16.msra.mxu0 %v34032_v52  ;;  %v17282_v52 = vand.u32 4294901760, %v16662_v48 }
0x123b   :  { %29013 = vmatprep.subr.bf16.mxu0 %v33989_v56 }
0x123c   :  { %v34152_v60 = vpack.c.bf16 %v17285_v34, %v17282_v52  ;;  %v34165_v25 = vsub.f32 %v16662_v48, %v17282_v52  ;;  %v20422_v48 = vld [vmem:[%s34794_s10 + $0x80] sm:$0xff] }
0x123d   :  { %25653 = vmatmul.mubr.f32.vlgmr.msra.gmra.mrb[22].mxu0 %v34047_v23 }
0x123e   :  { %29015 = vmatpush3.bf16.msra.mxu0 %v33989_v56  ;;  %25671 = vmatprep.mubr.f32.mxu0 %v16750_v0  ;;  %v17264_v56 = vand.u32 4294901760, %v16656_v24  ;;  %v34167_v0 = vsub.f32 %v16663_v2, %v17285_v34  ;;  %v17401_v9 = vand.u32 4294901760, %v34165_v25  ;;  %v20423_v2 = vld [vmem:[%s34794_s10 + $0x88] sm:$0xff]  ;;  %v17865_v34 = vand.u32 4294901760, %v20424_v33 }
0x123f   :  { %29017 = vmatprep.subr.bf16.mxu0 %v33999_v32 }
0x1240   :  { %v34096_v3 = vsub.f32 %v16656_v24, %v17264_v56  ;;  %v34102_v50 = vpack.c.bf16 %v17267_v5, %v17264_v56  ;;  %v17408_v41 = vand.u32 4294901760, %v34167_v0  ;;  %v29072_v27 = vpack.c.bf16 %v34167_v0, %v34165_v25 }
0x1242   :  { %29019 = vmatpush3.bf16.msra.mxu0 %v33999_v32  ;;  %v34099_v32 = vsub.f32 %v16657_v20, %v17267_v5  ;;  %v17359_v55 = vand.u32 4294901760, %v34096_v3  ;;  %v17402_v20 = vsub.f32 %v34165_v25, %v17401_v9  ;;  %v17409_v35 = vsub.f32 %v34167_v0, %v17408_v41 }
0x1243   :  { %29021 = vmatprep.subr.bf16.mxu0 %v34009_v19 }
0x1244   :  { %v17366_v61 = vand.u32 4294901760, %v34099_v32  ;;  %v17360_v57 = vsub.f32 %v34096_v3, %v17359_v55  ;;  %v17403_v5 = vand.u32 4294901760, %v17402_v20  ;;  %v17410_v44 = vand.u32 4294901760, %v17409_v35 }
0x1245   :  { %v29060_v38 = vpack.c.bf16 %v34099_v32, %v34096_v3  ;;  %v16650_v3 = vrot.slane %v34043_v11, 1  ;;  %v16651_v11 = vrot.slane %v34040_v54, 1  ;;  %v17859_v54 = vand.u32 4294901760, %v20422_v48 }
0x1246   :  { %29023 = vmatpush3.bf16.msra.mxu0 %v34009_v19  ;;  %v16661_v19 = vld [vmem:[%s34794_s10 + $0x28] sm:$0xff]  ;;  %v17367_v10 = vsub.f32 %v34099_v32, %v17366_v61  ;;  %v17361_v16 = vand.u32 4294901760, %v17360_v57  ;;  %v29056_v21 = vpack.c.bf16 %v17410_v44, %v17403_v5  ;;  %v29092_v39 = vpack.c.bf16 %v17366_v61, %v17359_v55 }
0x1247   :  { %29025 = vmatprep.subr.bf16.mxu0 %v34022_v37  ;;  %v17279_v29 = vand.u32 4294901760, %v16661_v19  ;;  %v29104_v32 = vpack.c.bf16 %v17408_v41, %v17401_v9 }
0x1248   :  { %v17368_v47 = vand.u32 4294901760, %v17367_v10 }
0x1249   :  { %v34150_v14 = vsub.f32 %v16661_v19, %v17279_v29 }
0x124a   :  { %29027 = vmatpush3.bf16.msra.mxu0 %v34022_v37  ;;  %v17276_v37 = vand.u32 4294901760, %v16660_v30  ;;  %v29044_v31 = vpack.c.bf16 %v17368_v47, %v17361_v16  ;;  %v34277_v47 = vsub.f32 %v20424_v33, %v17865_v34 }
0x124b   :  { %29029 = vmatprep.subr.bf16.mxu0 %v34102_v50 }
0x124c   :  { %v34142_v42 = vsub.f32 %v16660_v30, %v17276_v37  ;;  %v34148_v36 = vpack.c.bf16 %v17279_v29, %v17276_v37  ;;  %v16654_v30 = vsel %vm1637_vm2, %v16650_v3, 0.0  ;;  %v20425_v37 = vld [vmem:[%s34794_s10 + $0x98] sm:$0xff]  ;;  %v17968_v49 = vand.u32 4294901760, %v34277_v47 }
0x124d   :  { %25672 = vmatmul.mubr.f32.vlgmr.msra.gmra.mrb[22].mxu0 %v34047_v23  ;;  %v17394_v23 = vand.u32 4294901760, %v34150_v14  ;;  %v17853_v19 = vsel %vm1039_vm0, %v16654_v30, 0  ;;  %v17868_v57 = vand.u32 4294901760, %v20425_v37 }
0x124e   :  { %29031 = vmatpush3.bf16.msra.mxu0 %v34102_v50  ;;  %25690 = vmatprep.mubr.f32.mxu0 %v17340_v4  ;;  %v17387_v59 = vand.u32 4294901760, %v34142_v42  ;;  %v29068_v17 = vpack.c.bf16 %v34150_v14, %v34142_v42  ;;  %v34222_v55 = vand.u32 4294901760, %v17853_v19 }
0x124f   :  { %29033 = vmatprep.subr.bf16.mxu0 %v34130_v53  ;;  %v17395_v51 = vsub.f32 %v34150_v14, %v17394_v23  ;;  %v34279_v18 = vsub.f32 %v20425_v37, %v17868_v57  ;;  %v34282_v40 = vpack.c.bf16 %v17868_v57, %v17865_v34 }
0x1250   :  { %v17388_v45 = vsub.f32 %v34142_v42, %v17387_v59  ;;  %v34236_v61 = vsub.f32 %v17853_v19, %v34222_v55 }
0x1251   :  { %v17396_v24 = vand.u32 4294901760, %v17395_v51  ;;  %v29160_v33 = vpack.c.bf16 %v34279_v18, %v34277_v47 }
0x1252   :  { %29035 = vmatpush3.bf16.msra.mxu0 %v34130_v53  ;;  %v17389_v58 = vand.u32 4294901760, %v17388_v45  ;;  %v17933_v62 = vand.u32 4294901760, %v34236_v61  ;;  %v17975_v45 = vand.u32 4294901760, %v34279_v18 }
0x1253   :  { %29037 = vmatprep.subr.bf16.mxu0 %v34148_v36 }
0x1254   :  { %v29052_v56 = vpack.c.bf16 %v17396_v24, %v17389_v58  ;;  %v17934_v10 = vsub.f32 %v34236_v61, %v17933_v62  ;;  %v17976_v24 = vsub.f32 %v34279_v18, %v17975_v45 }
0x1256   :  { %29039 = vmatpush3.bf16.msra.mxu0 %v34148_v36 }
0x1257   :  { %29041 = vmatprep.subr.bf16.mxu0 %v34152_v60 }
0x125a   :  { %29043 = vmatpush3.bf16.msra.mxu0 %v34152_v60 }
0x125b   :  { %29045 = vmatprep.subr.bf16.mxu0 %v29044_v31 }
0x125d   :  { %25691 = vmatmul.mubr.f32.vlgmr.msra.gmra.mrb[22].mxu0 %v17350_v46  ;;  %v17969_v46 = vsub.f32 %v34277_v47, %v17968_v49 }
0x125e   :  { %29047 = vmatpush3.bf16.msra.mxu0 %v29044_v31  ;;  %25709 = vmatprep.mubr.f32.mxu0 %v34071_v7 }
0x125f   :  { %29049 = vmatprep.subr.bf16.mxu0 %v29048_v8 }
0x1262   :  { %29051 = vmatpush3.bf16.msra.mxu0 %v29048_v8 }
0x1263   :  { %29053 = vmatprep.subr.bf16.mxu0 %v29052_v56 }
0x1266   :  { %29055 = vmatpush3.bf16.msra.mxu0 %v29052_v56 }
0x1267   :  { %29057 = vmatprep.subr.bf16.mxu0 %v29056_v21 }
0x126a   :  { %29059 = vmatpush3.bf16.msra.mxu0 %v29056_v21 }
0x126b   :  { %29061 = vmatprep.subr.bf16.mxu0 %v29060_v38 }
0x126d   :  { %25710 = vmatmul.mubr.f32.vlgmr.msra.gmra.mrb[22].mxu0 %v34127_v43 }
0x126e   :  { %29063 = vmatpush3.bf16.msra.mxu0 %v29060_v38  ;;  %25728 = vmatprep.mubr.f32.mxu0 %v34083_v15  ;;  %v29096_v15 = vpack.c.bf16 %v17380_v1, %v17373_v63  ;;  %v20426_v63 = vld [vmem:[%s34794_s10 + $0xa0] sm:$0xff]  ;;  %v20427_v1 = vld [vmem:[%s34794_s10 + $0xa8] sm:$0xff]  ;;  %v17970_v38 = vand.u32 4294901760, %v17969_v46 }
0x126f   :  { %29065 = vmatprep.subr.bf16.mxu0 %v29064_v13 }
0x1272   :  { %29067 = vmatpush3.bf16.msra.mxu0 %v29064_v13  ;;  %v17977_v13 = vand.u32 4294901760, %v17976_v24 }
0x1273   :  { %29069 = vmatprep.subr.bf16.mxu0 %v29068_v17 }
0x1274   :  { %v29144_v3 = vpack.c.bf16 %v17977_v13, %v17970_v38 }
0x1276   :  { %29071 = vmatpush3.bf16.msra.mxu0 %v29068_v17 }
0x1277   :  { %29073 = vmatprep.subr.bf16.mxu0 %v29072_v27 }
0x127a   :  { %29075 = vmatpush3.bf16.msra.mxu0 %v29072_v27 }
0x127b   :  { %29077 = vmatprep.subr.bf16.mxu0 %v34102_v50 }
0x127d   :  { %25729 = vmatmul.mubr.f32.vlgmr.msra.gmra.mrb[22].mxu0 %v34145_v22  ;;  %v20428_v22 = vld [vmem:[%s34794_s10 + $0xb0] sm:$0xff] }
0x127e   :  { %29079 = vmatpush3.bf16.msra.mxu0 %v34102_v50  ;;  %25747 = vmatprep.mubr.f32.mxu0 %v17338_v28  ;;  %v29100_v28 = vpack.c.bf16 %v17394_v23, %v17387_v59  ;;  %v17874_v59 = vand.u32 4294901760, %v20427_v1  ;;  %v17877_v25 = vand.u32 4294901760, %v20428_v22 }
0x127f   :  { %29081 = vmatprep.subr.bf16.mxu0 %v34130_v53 }
0x1280   :  { %v34302_v51 = vsub.f32 %v20427_v1, %v17874_v59  ;;  %v34317_v56 = vsub.f32 %v20428_v22, %v17877_v25  ;;  %v20434_v1 = vld [vmem:[%s34795_s12 + $0x58] sm:$0xff] }
0x1281   :  { %v18496_v22 = vand.u32 4294901760, %v20434_v1 }
0x1282   :  { %29083 = vmatpush3.bf16.msra.mxu0 %v34130_v53  ;;  %v17989_v35 = vand.u32 4294901760, %v34302_v51 }
0x1283   :  { %29085 = vmatprep.subr.bf16.mxu0 %v34148_v36 }
0x1284   :  { %v17990_v27 = vsub.f32 %v34302_v51, %v17989_v35 }
0x1286   :  { %29087 = vmatpush3.bf16.msra.mxu0 %v34148_v36  ;;  %v17991_v30 = vand.u32 4294901760, %v17990_v27 }
0x1287   :  { %29089 = vmatprep.subr.bf16.mxu0 %v34152_v60 }
0x128a   :  { %29091 = vmatpush3.bf16.msra.mxu0 %v34152_v60 }
0x128b   :  { %29093 = vmatprep.subr.bf16.mxu0 %v29092_v39 }
0x128d   :  { %25748 = vmatmul.mubr.f32.vlgmr.msra.gmra.mrb[22].mxu0 %v17348_v6  ;;  %v17935_v6 = vand.u32 4294901760, %v17934_v10 }
0x128e   :  { %29095 = vmatpush3.bf16.msra.mxu0 %v29092_v39  ;;  %25766 = vmatprep.mubr.f32.mxu0 %v34071_v7  ;;  %v17996_v39 = vand.u32 4294901760, %v34317_v56 }
0x128f   :  { %29097 = vmatprep.subr.bf16.mxu0 %v29096_v15 }
0x1290   :  { %v17997_v19 = vsub.f32 %v34317_v56, %v17996_v39 }
0x1292   :  { %29099 = vmatpush3.bf16.msra.mxu0 %v29096_v15 }
0x1293   :  { %29101 = vmatprep.subr.bf16.mxu0 %v29100_v28 }
0x1296   :  { %29103 = vmatpush3.bf16.msra.mxu0 %v29100_v28 }
0x1297   :  { %29105 = vmatprep.subr.bf16.mxu0 %v29104_v32 }
0x129a   :  { %29107 = vmatpush3.bf16.msra.mxu0 %v29104_v32 }
0x129b   :  { %29109 = vmatprep.subr.bf16.mxu0 %v34102_v50 }
0x129d   :  { %25767 = vmatmul.mubr.f32.vlgmr.msra.gmra.mrb[22].mxu0 %v34127_v43 }
0x129e   :  { %29111 = vmatpush3.bf16.msra.mxu0 %v34102_v50  ;;  %25785 = vmatprep.mubr.f32.mxu0 %v34071_v7  ;;  %v16655_v50 = vsel %vm1637_vm2, %v16651_v11, 0.0  ;;  %v17862_v7 = vand.u32 4294901760, %v20423_v2 }
0x129f   :  { %29113 = vmatprep.subr.bf16.mxu0 %v34130_v53  ;;  %v17856_v29 = vsel %vm1039_vm0, %v16655_v50, 0 }
0x12a0   :  { %v34252_v4 = vsub.f32 %v20423_v2, %v17862_v7  ;;  %v34255_v52 = vpack.c.bf16 %v17862_v7, %v17859_v54  ;;  %v34266_v42 = vand.u32 4294901760, %v17856_v29  ;;  %v17998_v2 = vand.u32 4294901760, %v17997_v19 }
0x12a2   :  { %29115 = vmatpush3.bf16.msra.mxu0 %v34130_v53  ;;  %v34250_v53 = vsub.f32 %v20422_v48, %v17859_v54  ;;  %v17961_v16 = vand.u32 4294901760, %v34252_v4  ;;  %v34285_v23 = vsub.f32 %v17856_v29, %v34266_v42 }
0x12a3   :  { %29117 = vmatprep.subr.bf16.mxu0 %v34148_v36 }
0x12a4   :  { %v17954_v14 = vand.u32 4294901760, %v34250_v53  ;;  %v17962_v26 = vsub.f32 %v34252_v4, %v17961_v16  ;;  %v17943_v41 = vand.u32 4294901760, %v34285_v23  ;;  %v29156_v7 = vpack.c.bf16 %v34252_v4, %v34250_v53  ;;  %v20431_v4 = vld [vmem:[%s34795_s12 + $0x40] sm:$0xff] }
0x12a6   :  { %29119 = vmatpush3.bf16.msra.mxu0 %v34148_v36  ;;  %v20429_v36 = vld [vmem:[%s34794_s10 + $0xb8] sm:$0xff]  ;;  %v17955_v31 = vsub.f32 %v34250_v53, %v17954_v14  ;;  %v17963_v58 = vand.u32 4294901760, %v17962_v26  ;;  %v17944_v44 = vsub.f32 %v34285_v23, %v17943_v41  ;;  %v29188_v34 = vpack.c.bf16 %v17961_v16, %v17954_v14  ;;  %v20435_v14 = vld [vmem:[%s34795_s12 + $0x60] sm:$0xff]  ;;  %v20436_v16 = vld [vmem:[%s34795_s12 + $0x68] sm:$0xff] }
0x12a7   :  { %29121 = vmatprep.subr.bf16.mxu0 %v34152_v60  ;;  %v17880_v0 = vand.u32 4294901760, %v20429_v36  ;;  %v18499_v47 = vand.u32 4294901760, %v20435_v14  ;;  %v18502_v18 = vand.u32 4294901760, %v20436_v16 }
0x12a8   :  { %v17956_v8 = vand.u32 4294901760, %v17955_v31  ;;  %v17945_v28 = vand.u32 4294901760, %v17944_v44 }
0x12a9   :  { %v34304_v9 = vpack.c.bf16 %v17880_v0, %v17877_v25  ;;  %v34319_v5 = vsub.f32 %v20429_v36, %v17880_v0 }
0x12aa   :  { %29123 = vmatpush3.bf16.msra.mxu0 %v34152_v60  ;;  %v17871_v60 = vand.u32 4294901760, %v20426_v63  ;;  %v29140_v21 = vpack.c.bf16 %v17963_v58, %v17956_v8 }
0x12ab   :  { %29125 = vmatprep.subr.bf16.mxu0 %v34255_v52  ;;  %v18003_v15 = vand.u32 4294901760, %v34319_v5  ;;  %v29168_v29 = vpack.c.bf16 %v34319_v5, %v34317_v56  ;;  %v18616_v56 = vsub.f32 %v20436_v16, %v18502_v18 }
0x12ac   :  { %v34300_v12 = vsub.f32 %v20426_v63, %v17871_v60  ;;  %v20433_v63 = vld [vmem:[%s34795_s12 + $0x50] sm:$0xff] }
0x12ad   :  { %25786 = vmatmul.mubr.f32.vlgmr.msra.gmra.mrb[22].mxu0 %v34127_v43  ;;  %v34298_v43 = vpack.c.bf16 %v17874_v59, %v17871_v60  ;;  %v18004_v11 = vsub.f32 %v34319_v5, %v18003_v15  ;;  %v29200_v53 = vpack.c.bf16 %v18003_v15, %v17996_v39  ;;  %v18617_v38 = vand.u32 4294901760, %v18616_v56 }
0x12ae   :  { %29127 = vmatpush3.bf16.msra.mxu0 %v34255_v52  ;;  %25804 = vmatprep.mubr.f32.mxu0 %v17935_v6  ;;  %v17982_v20 = vand.u32 4294901760, %v34300_v12  ;;  %v29164_v37 = vpack.c.bf16 %v34302_v51, %v34300_v12  ;;  %v20437_v6 = vld [vmem:[%s34795_s12 + $0x70] sm:$0xff]  ;;  %v18602_v51 = vsub.f32 %v20434_v1, %v18496_v22 }
0x12af   :  { %29129 = vmatprep.subr.bf16.mxu0 %v34282_v40  ;;  %v18005_v50 = vand.u32 4294901760, %v18004_v11  ;;  %v18505_v25 = vand.u32 4294901760, %v20437_v6  ;;  %v18618_v27 = vsub.f32 %v18616_v56, %v18617_v38 }
0x12b0   :  { %v17983_v17 = vsub.f32 %v34300_v12, %v17982_v20  ;;  %v18603_v58 = vand.u32 4294901760, %v18602_v51 }
0x12b1   :  { %v29152_v54 = vpack.c.bf16 %v18005_v50, %v17998_v2  ;;  %v18623_v39 = vsub.f32 %v20437_v6, %v18505_v25 }
0x12b2   :  { %29131 = vmatpush3.bf16.msra.mxu0 %v34282_v40  ;;  %v17984_v32 = vand.u32 4294901760, %v17983_v17 }
0x12b3   :  { %29133 = vmatprep.subr.bf16.mxu0 %v34298_v43 }
0x12b4   :  { %v29148_v48 = vpack.c.bf16 %v17991_v30, %v17984_v32  ;;  %v18624_v32 = vand.u32 4294901760, %v18623_v39 }
0x12b6   :  { %29135 = vmatpush3.bf16.msra.mxu0 %v34298_v43  ;;  %v18625_v11 = vsub.f32 %v18623_v39, %v18624_v32 }
0x12b7   :  { %29137 = vmatprep.subr.bf16.mxu0 %v34304_v9 }
0x12b8   :  { %v18626_v2 = vand.u32 4294901760, %v18625_v11 }
0x12ba   :  { %29139 = vmatpush3.bf16.msra.mxu0 %v34304_v9 }
0x12bb   :  { %29141 = vmatprep.subr.bf16.mxu0 %v29140_v21 }
0x12bd   :  { %25805 = vmatmul.mubr.f32.vlgmr.msra.gmra.mrb[22].mxu0 %v17945_v28 }
0x12be   :  { %29143 = vmatpush3.bf16.msra.mxu0 %v29140_v21  ;;  %25823 = vmatprep.mubr.f32.mxu0 %v34222_v55 }
0x12bf   :  { %29145 = vmatprep.subr.bf16.mxu0 %v29144_v3 }
0x12c2   :  { %29147 = vmatpush3.bf16.msra.mxu0 %v29144_v3  ;;  %v18619_v3 = vand.u32 4294901760, %v18618_v27 }
0x12c3   :  { %29149 = vmatprep.subr.bf16.mxu0 %v29148_v48 }
0x12c6   :  { %29151 = vmatpush3.bf16.msra.mxu0 %v29148_v48 }
0x12c7   :  { %29153 = vmatprep.subr.bf16.mxu0 %v29152_v54 }
0x12ca   :  { %29155 = vmatpush3.bf16.msra.mxu0 %v29152_v54 }
0x12cb   :  { %29157 = vmatprep.subr.bf16.mxu0 %v29156_v7 }
0x12cd   :  { %25824 = vmatmul.mubr.f32.vlgmr.msra.gmra.mrb[22].mxu0 %v34266_v42 }
0x12ce   :  { %29159 = vmatpush3.bf16.msra.mxu0 %v29156_v7  ;;  %25842 = vmatprep.mubr.f32.mxu0 %v34236_v61  ;;  %v29192_v61 = vpack.c.bf16 %v17975_v45, %v17968_v49 }
0x12cf   :  { %29161 = vmatprep.subr.bf16.mxu0 %v29160_v33 }
0x12d2   :  { %29163 = vmatpush3.bf16.msra.mxu0 %v29160_v33 }
0x12d3   :  { %29165 = vmatprep.subr.bf16.mxu0 %v29164_v37 }
0x12d6   :  { %29167 = vmatpush3.bf16.msra.mxu0 %v29164_v37 }
0x12d7   :  { %29169 = vmatprep.subr.bf16.mxu0 %v29168_v29 }
0x12da   :  { %29171 = vmatpush3.bf16.msra.mxu0 %v29168_v29 }
0x12db   :  { %29173 = vmatprep.subr.bf16.mxu0 %v34255_v52 }
0x12dd   :  { %25843 = vmatmul.mubr.f32.vlgmr.msra.gmra.mrb[22].mxu0 %v34285_v23  ;;  %v20438_v23 = vld [vmem:[%s34795_s12 + $0x78] sm:$0xff] }
0x12de   :  { %29175 = vmatpush3.bf16.msra.mxu0 %v34255_v52  ;;  %25861 = vmatprep.mubr.f32.mxu0 %v17933_v62  ;;  %v29196_v62 = vpack.c.bf16 %v17989_v35, %v17982_v20  ;;  %v18508_v0 = vand.u32 4294901760, %v20438_v23  ;;  %v18604_v20 = vsub.f32 %v18602_v51, %v18603_v58  ;;  %v18609_v35 = vsub.f32 %v20435_v14, %v18499_v47 }
0x12df   :  { %29177 = vmatprep.subr.bf16.mxu0 %v34282_v40 }
0x12e0   :  { %v34421_v49 = vpack.c.bf16 %v18508_v0, %v18505_v25  ;;  %v18605_v44 = vand.u32 4294901760, %v18604_v20  ;;  %v18610_v21 = vand.u32 4294901760, %v18609_v35  ;;  %v18630_v15 = vsub.f32 %v20438_v23, %v18508_v0  ;;  %v18468_v20 = vld [vmem:[%s34795_s12 + $0x18] sm:$0xff] }
0x12e1   :  { %v29260_v37 = vpack.c.bf16 %v18616_v56, %v18609_v35 }
0x12e2   :  { %29179 = vmatpush3.bf16.msra.mxu0 %v34282_v40  ;;  %v18611_v17 = vsub.f32 %v18609_v35, %v18610_v21  ;;  %v18631_v30 = vand.u32 4294901760, %v18630_v15  ;;  %v29264_v29 = vpack.c.bf16 %v18630_v15, %v18623_v39  ;;  %v18471_v39 = vld [vmem:[%s34795_s12 + $0x30] sm:$0xff] }
0x12e3   :  { %29181 = vmatprep.subr.bf16.mxu0 %v34298_v43 }
0x12e4   :  { %v18612_v28 = vand.u32 4294901760, %v18611_v17  ;;  %v18632_v48 = vsub.f32 %v18630_v15, %v18631_v30  ;;  %v18469_v17 = vld [vmem:[%s34795_s12 + $0x20] sm:$0xff]  ;;  %v18472_v15 = vld [vmem:[%s34795_s12 + $0x38] sm:$0xff] }
0x12e6   :  { %29183 = vmatpush3.bf16.msra.mxu0 %v34298_v43  ;;  %v29244_v19 = vpack.c.bf16 %v18619_v3, %v18612_v28  ;;  %v18633_v50 = vand.u32 4294901760, %v18632_v48 }
0x12e7   :  { %29185 = vmatprep.subr.bf16.mxu0 %v34304_v9 }
0x12e8   :  { %v29248_v54 = vpack.c.bf16 %v18633_v50, %v18626_v2  ;;  %v19091_v2 = vand.u32 4294901760, %v18471_v39  ;;  %v19094_v50 = vand.u32 4294901760, %v18472_v15 }
0x12ea   :  { %29187 = vmatpush3.bf16.msra.mxu0 %v34304_v9 }
0x12eb   :  { %29189 = vmatprep.subr.bf16.mxu0 %v29188_v34 }
0x12ed   :  { %25862 = vmatmul.mubr.f32.vlgmr.msra.gmra.mrb[22].mxu0 %v17943_v41 }
0x12ee   :  { %29191 = vmatpush3.bf16.msra.mxu0 %v29188_v34  ;;  %25880 = vmatprep.mubr.f32.mxu0 %v34222_v55 }
0x12ef   :  { %29193 = vmatprep.subr.bf16.mxu0 %v29192_v61 }
0x12f2   :  { %29195 = vmatpush3.bf16.msra.mxu0 %v29192_v61 }
0x12f3   :  { %29197 = vmatprep.subr.bf16.mxu0 %v29196_v62 }
0x12f6   :  { %29199 = vmatpush3.bf16.msra.mxu0 %v29196_v62  ;;  %v29292_v62 = vpack.c.bf16 %v18617_v38, %v18610_v21  ;;  %v19082_v21 = vand.u32 4294901760, %v18468_v20 }
0x12f7   :  { %29201 = vmatprep.subr.bf16.mxu0 %v29200_v53 }
0x12fa   :  { %29203 = vmatpush3.bf16.msra.mxu0 %v29200_v53  ;;  %v34425_v53 = vpack.c.bf16 %v18631_v30, %v18624_v32  ;;  %v34510_v32 = vsub.f32 %v18468_v20, %v19082_v21 }
0x12fb   :  { %29205 = vmatprep.subr.bf16.mxu0 %v34255_v52 }
0x12fd   :  { %25881 = vmatmul.mubr.f32.vlgmr.msra.gmra.mrb[22].mxu0 %v34266_v42 }
0x12fe   :  { %29207 = vmatpush3.bf16.msra.mxu0 %v34255_v52  ;;  %25899 = vmatprep.mubr.f32.mxu0 %v34222_v55  ;;  %v20432_v55 = vld [vmem:[%s34795_s12 + $0x48] sm:$0xff]  ;;  %v18487_v52 = vand.u32 4294901760, %v20431_v4 }
0x12ff   :  { %29209 = vmatprep.subr.bf16.mxu0 %v34282_v40  ;;  %v18490_v57 = vand.u32 4294901760, %v20432_v55 }
0x1300   :  { %v18581_v60 = vsub.f32 %v20431_v4, %v18487_v52  ;;  %v20430_v4 = vld [vmem:[%s34796_s11] ss:$0 sm:$0xff] }
0x1301   :  { %v34391_v10 = vpack.c.bf16 %v18490_v57, %v18487_v52  ;;  %v18588_v59 = vsub.f32 %v20432_v55, %v18490_v57 }
0x1302   :  { %29211 = vmatpush3.bf16.msra.mxu0 %v34282_v40  ;;  %v34411_v40 = vpack.c.bf16 %v18502_v18, %v18499_v47  ;;  %v18582_v31 = vand.u32 4294901760, %v18581_v60 }
0x1303   :  { %29213 = vmatprep.subr.bf16.mxu0 %v34298_v43  ;;  %29221 = vmatprep.subr.bf16.mxu1 %v34391_v10  ;;  %v18589_v26 = vand.u32 4294901760, %v18588_v59  ;;  %v29252_v7 = vpack.c.bf16 %v18588_v59, %v18581_v60 }
0x1304   :  { %29223 = vmatpush3.bf16.msra.mxu1 %v34391_v10  ;;  %v18583_v45 = vsub.f32 %v18581_v60, %v18582_v31 }
0x1305   :  { %v29284_v34 = vpack.c.bf16 %v18589_v26, %v18582_v31 }
0x1306   :  { %29215 = vmatpush3.bf16.msra.mxu0 %v34298_v43  ;;  %v18590_v43 = vsub.f32 %v18588_v59, %v18589_v26 }
0x1307   :  { %29217 = vmatprep.subr.bf16.mxu0 %v34304_v9 }
0x1308   :  { %v18591_v41 = vand.u32 4294901760, %v18590_v43 }
0x130a   :  { %29219 = vmatpush3.bf16.msra.mxu0 %v34304_v9  ;;  %v18584_v9 = vand.u32 4294901760, %v18583_v45 }
0x130c   :  { %v29236_v46 = vpack.c.bf16 %v18591_v41, %v18584_v9  ;;  %v18466_v9 = vld [vmem:[%s34795_s12 + $0x8] sm:$0xff] }
0x130d   :  { %25900 = vmatmul.mubr.f32.vlgmr.msra.gmra.mrb[22].mxu0 %v34266_v42  ;;  %v18493_v42 = vand.u32 4294901760, %v20433_v63 }
0x130f   :  { %v34401_v36 = vpack.c.bf16 %v18496_v22, %v18493_v42  ;;  %v18595_v12 = vsub.f32 %v20433_v63, %v18493_v42 }
0x1311   :  { %29225 = vmatprep.subr.bf16.mxu1 %v34401_v36  ;;  %v18596_v8 = vand.u32 4294901760, %v18595_v12  ;;  %v29256_v33 = vpack.c.bf16 %v18602_v51, %v18595_v12  ;;  %v18465_v51 = vld [vmem:[%s34795_s12] sm:$0xff] }
0x1312   :  { %29227 = vmatpush3.bf16.msra.mxu1 %v34401_v36 }
0x1313   :  { %29229 = vmatprep.subr.bf16.mxu1 %v34411_v40  ;;  %v18597_v24 = vsub.f32 %v18595_v12, %v18596_v8  ;;  %v29288_v61 = vpack.c.bf16 %v18603_v58, %v18596_v8  ;;  %v19076_v58 = vand.u32 4294901760, %v18466_v9 }
0x1315   :  { %v18598_v5 = vand.u32 4294901760, %v18597_v24  ;;  %v18467_v24 = vld [vmem:[%s34795_s12 + $0x10] sm:$0xff] }
0x1316   :  { %29231 = vmatpush3.bf16.msra.mxu1 %v34411_v40 }
0x1317   :  { %29233 = vmatprep.subr.bf16.mxu1 %v34421_v49  ;;  %v29240_v13 = vpack.c.bf16 %v18605_v44, %v18598_v5  ;;  %v19079_v44 = vand.u32 4294901760, %v18467_v24 }
0x1319   :  { %v34508_v3 = vsub.f32 %v18467_v24, %v19079_v44 }
0x131a   :  { %29235 = vmatpush3.bf16.msra.mxu1 %v34421_v49 }
0x131b   :  { %29237 = vmatprep.subr.bf16.mxu1 %v29236_v46 }
0x13e0   :  { %v25901_v55 = vpop.f32.mrb[22].mxu0 }
0x13e1   :  { %v18447_v52 = vadd.f32 %v25901_v55, %v20430_v4  ;;  %v18428_v57 = vpop.f32.mrb[23].mxu0 }
0x13e2   :  { %v18446_v63 = vadd.f32 %v20430_v4, %v18428_v57 }
0x13e3   :  { %v34430_v1 = vmax.f32 %v18447_v52, 0.0 }
0x13e4   :  { %v34432_v42 = vmax.f32 %v18446_v63, 0.0 }
0x13e5   :  { %v18484_v22 = vsel %vm1039_vm0, %v34430_v1, 0  ;;  %v18454_v8 = vrot.slane %v34430_v1, 7 }
0x13e6   :  { %v34436_v14 = vand.u32 4294901760, %v18484_v22  ;;  %v18482_v16 = vsel %vm1039_vm0, %v34432_v42, 0  ;;  %v18453_v26 = vrot.slane %v34432_v42, 7 }
0x13e7   :  { %v18559_v47 = vand.u32 4294901760, %v18482_v16  ;;  %v18458_v35 = vsel %vm1630_vm1, 0.0, %v18454_v8 }
0x13e8   :  { %v18570_v18 = vsub.f32 %v18484_v22, %v34436_v14  ;;  %v18457_v45 = vsel %vm1630_vm1, 0.0, %v18453_v26  ;;  %v19070_v38 = vsel %vm1039_vm0, %v18458_v35, 0 }
0x13e9   :  { %v18560_v60 = vsub.f32 %v18482_v16, %v18559_v47  ;;  %v19067_v43 = vsel %vm1039_vm0, %v18457_v45, 0  ;;  %v34512_v30 = vand.u32 4294901760, %v19070_v38  ;;  %v34550_v16 = vsub.f32 %v18471_v39, %v19091_v2  ;;  %v20439_v39 = vld [vmem:[%s34795_s12 + $0x80] sm:$0xff] }
0x13ea   :  { %v18571_v59 = vand.u32 4294901760, %v18570_v18  ;;  %v34456_v12 = vand.u32 4294901760, %v19067_v43 }
0x13eb   :  { %v18561_v6 = vand.u32 4294901760, %v18560_v60 }
0x13ec   :  { %v18572_v23 = vsub.f32 %v18570_v18, %v18571_v59  ;;  %v34468_v41 = vsub.f32 %v19067_v43, %v34456_v12 }
0x13ed   :  { %v18562_v25 = vsub.f32 %v18560_v60, %v18561_v6 }
0x13ee   :  { %v18573_v31 = vand.u32 4294901760, %v18572_v23 }
0x13ef   :  { %v18563_v0 = vand.u32 4294901760, %v18562_v25 }
0x13f1   :  { %25918 = vmatprep.mubr.f32.mxu1 %v18563_v0  ;;  %v19210_v0 = vand.u32 4294901760, %v34550_v16 }
0x13f2   :  { %25919 = vmatmul.mubr.f32.vlgmr.msra.gmra.mrb[22].mxu1 %v18573_v31 }
0x13f3   :  { %29239 = vmatpush3.bf16.msra.mxu1 %v29236_v46  ;;  %25937 = vmatprep.mubr.f32.mxu1 %v18559_v47  ;;  %v19147_v46 = vand.u32 4294901760, %v34468_v41 }
0x13f4   :  { %29241 = vmatprep.subr.bf16.mxu1 %v29240_v13 }
0x13f7   :  { %29243 = vmatpush3.bf16.msra.mxu1 %v29240_v13  ;;  %v19148_v13 = vsub.f32 %v34468_v41, %v19147_v46 }
0x13f8   :  { %29245 = vmatprep.subr.bf16.mxu1 %v29244_v19 }
0x13f9   :  { %v19149_v48 = vand.u32 4294901760, %v19148_v13 }
0x13fb   :  { %29247 = vmatpush3.bf16.msra.mxu1 %v29244_v19  ;;  %v34515_v19 = vpack.c.bf16 %v19082_v21, %v19079_v44  ;;  %v29352_v44 = vpack.c.bf16 %v34510_v32, %v34508_v3 }
0x13fc   :  { %29249 = vmatprep.subr.bf16.mxu1 %v29248_v54 }
0x13ff   :  { %29251 = vmatpush3.bf16.msra.mxu1 %v29248_v54 }
0x1400   :  { %29253 = vmatprep.subr.bf16.mxu1 %v29252_v7 }
0x1402   :  { %25938 = vmatmul.mubr.f32.vlgmr.msra.gmra.mrb[22].mxu1 %v34436_v14 }
0x1403   :  { %29255 = vmatpush3.bf16.msra.mxu1 %v29252_v7  ;;  %25956 = vmatprep.mubr.f32.mxu1 %v18560_v60 }
0x1404   :  { %29257 = vmatprep.subr.bf16.mxu1 %v29256_v33 }
0x1407   :  { %29259 = vmatpush3.bf16.msra.mxu1 %v29256_v33  ;;  %v19182_v33 = vand.u32 4294901760, %v34508_v3 }
0x1408   :  { %29261 = vmatprep.subr.bf16.mxu1 %v29260_v37 }
0x1409   :  { %v19183_v52 = vsub.f32 %v34508_v3, %v19182_v33 }
0x140b   :  { %29263 = vmatpush3.bf16.msra.mxu1 %v29260_v37  ;;  %v19189_v37 = vand.u32 4294901760, %v34510_v32  ;;  %v19184_v60 = vand.u32 4294901760, %v19183_v52 }
0x140c   :  { %29265 = vmatprep.subr.bf16.mxu1 %v29264_v29 }
0x140d   :  { %v19190_v57 = vsub.f32 %v34510_v32, %v19189_v37  ;;  %v20441_v32 = vld [vmem:[%s34795_s12 + $0x90] sm:$0xff] }
0x140f   :  { %29267 = vmatpush3.bf16.msra.mxu1 %v29264_v29 }
0x1410   :  { %29269 = vmatprep.subr.bf16.mxu1 %v34391_v10 }
0x1412   :  { %25957 = vmatmul.mubr.f32.vlgmr.msra.gmra.mrb[22].mxu1 %v18570_v18 }
0x1413   :  { %29271 = vmatpush3.bf16.msra.mxu1 %v34391_v10  ;;  %25975 = vmatprep.mubr.f32.mxu1 %v18561_v6 }
0x1414   :  { %29273 = vmatprep.subr.bf16.mxu1 %v34401_v36 }
0x1417   :  { %29275 = vmatpush3.bf16.msra.mxu1 %v34401_v36 }
0x1418   :  { %29277 = vmatprep.subr.bf16.mxu1 %v34411_v40 }
0x141b   :  { %29279 = vmatpush3.bf16.msra.mxu1 %v34411_v40 }
0x141c   :  { %29281 = vmatprep.subr.bf16.mxu1 %v34421_v49 }
0x141f   :  { %29283 = vmatpush3.bf16.msra.mxu1 %v34421_v49 }
0x1420   :  { %29285 = vmatprep.subr.bf16.mxu1 %v29284_v34 }
0x1422   :  { %25976 = vmatmul.mubr.f32.vlgmr.msra.gmra.mrb[22].mxu1 %v18571_v59  ;;  %v19191_v59 = vand.u32 4294901760, %v19190_v57 }
0x1423   :  { %29287 = vmatpush3.bf16.msra.mxu1 %v29284_v34  ;;  %25994 = vmatprep.mubr.f32.mxu1 %v18559_v47  ;;  %v34530_v34 = vsub.f32 %v19070_v38, %v34512_v30 }
0x1424   :  { %29289 = vmatprep.subr.bf16.mxu1 %v29288_v61  ;;  %v29336_v26 = vpack.c.bf16 %v19191_v59, %v19184_v60 }
0x1425   :  { %v19157_v22 = vand.u32 4294901760, %v34530_v34 }
0x1427   :  { %29291 = vmatpush3.bf16.msra.mxu1 %v29288_v61  ;;  %v19158_v23 = vsub.f32 %v34530_v34, %v19157_v22 }
0x1428   :  { %29293 = vmatprep.subr.bf16.mxu1 %v29292_v62 }
0x1429   :  { %v19159_v43 = vand.u32 4294901760, %v19158_v23 }
0x142b   :  { %29295 = vmatpush3.bf16.msra.mxu1 %v29292_v62 }
0x142c   :  { %29297 = vmatprep.subr.bf16.mxu1 %v34425_v53 }
0x142f   :  { %29299 = vmatpush3.bf16.msra.mxu1 %v34425_v53  ;;  %v34537_v53 = vpack.c.bf16 %v19094_v50, %v19091_v2 }
0x1430   :  { %29301 = vmatprep.subr.bf16.mxu1 %v34391_v10 }
0x1432   :  { %25995 = vmatmul.mubr.f32.vlgmr.msra.gmra.mrb[22].mxu1 %v34436_v14 }
0x1433   :  { %29303 = vmatpush3.bf16.msra.mxu1 %v34391_v10  ;;  %26013 = vmatprep.mubr.f32.mxu1 %v18559_v47  ;;  %v19073_v10 = vand.u32 4294901760, %v18465_v51  ;;  %v34552_v47 = vsub.f32 %v18472_v15, %v19094_v50  ;;  %v20440_v15 = vld [vmem:[%s34795_s12 + $0x88] sm:$0xff]  ;;  %v19674_v50 = vand.u32 4294901760, %v20441_v32 }
0x1434   :  { %29305 = vmatprep.subr.bf16.mxu1 %v34401_v36 }
0x1435   :  { %v34481_v56 = vsub.f32 %v18465_v51, %v19073_v10  ;;  %v34487_v5 = vpack.c.bf16 %v19076_v58, %v19073_v10  ;;  %v19217_v31 = vand.u32 4294901760, %v34552_v47  ;;  %v29360_v38 = vpack.c.bf16 %v34552_v47, %v34550_v16 }
0x1437   :  { %29307 = vmatpush3.bf16.msra.mxu1 %v34401_v36  ;;  %v34484_v36 = vsub.f32 %v18466_v9, %v19076_v58  ;;  %v19168_v27 = vand.u32 4294901760, %v34481_v56  ;;  %v19211_v9 = vsub.f32 %v34550_v16, %v19210_v0  ;;  %v19218_v8 = vsub.f32 %v34552_v47, %v19217_v31 }
0x1438   :  { %29309 = vmatprep.subr.bf16.mxu1 %v34411_v40 }
0x1439   :  { %v19175_v28 = vand.u32 4294901760, %v34484_v36  ;;  %v19169_v54 = vsub.f32 %v34481_v56, %v19168_v27  ;;  %v19212_v58 = vand.u32 4294901760, %v19211_v9  ;;  %v19219_v24 = vand.u32 4294901760, %v19218_v8 }
0x143a   :  { %v29348_v35 = vpack.c.bf16 %v34484_v36, %v34481_v56  ;;  %v18459_v56 = vrot.slane %v34432_v42, 1  ;;  %v18460_v42 = vrot.slane %v34430_v1, 1  ;;  %v19668_v1 = vand.u32 4294901760, %v20439_v39 }
0x143b   :  { %29311 = vmatpush3.bf16.msra.mxu1 %v34411_v40  ;;  %v18470_v40 = vld [vmem:[%s34795_s12 + $0x28] sm:$0xff]  ;;  %v19176_v7 = vsub.f32 %v34484_v36, %v19175_v28  ;;  %v19170_v4 = vand.u32 4294901760, %v19169_v54  ;;  %v29344_v20 = vpack.c.bf16 %v19219_v24, %v19212_v58  ;;  %v29380_v13 = vpack.c.bf16 %v19175_v28, %v19168_v27 }
0x143c   :  { %29313 = vmatprep.subr.bf16.mxu1 %v34421_v49  ;;  %v19088_v11 = vand.u32 4294901760, %v18470_v40  ;;  %v29392_v36 = vpack.c.bf16 %v19217_v31, %v19210_v0 }
0x143d   :  { %v19177_v55 = vand.u32 4294901760, %v19176_v7 }
0x143e   :  { %v34535_v62 = vsub.f32 %v18470_v40, %v19088_v11 }
0x143f   :  { %29315 = vmatpush3.bf16.msra.mxu1 %v34421_v49  ;;  %v19085_v49 = vand.u32 4294901760, %v18469_v17  ;;  %v29332_v18 = vpack.c.bf16 %v19177_v55, %v19170_v4  ;;  %v34662_v55 = vsub.f32 %v20441_v32, %v19674_v50 }
0x1440   :  { %29317 = vmatprep.subr.bf16.mxu1 %v34487_v5 }
0x1441   :  { %v34527_v29 = vsub.f32 %v18469_v17, %v19085_v49  ;;  %v34533_v61 = vpack.c.bf16 %v19088_v11, %v19085_v49  ;;  %v18463_v17 = vsel %vm1637_vm2, %v18459_v56, 0.0  ;;  %v20442_v49 = vld [vmem:[%s34795_s12 + $0x98] sm:$0xff]  ;;  %v19777_v59 = vand.u32 4294901760, %v34662_v55 }
0x1442   :  { %26014 = vmatmul.mubr.f32.vlgmr.msra.gmra.mrb[22].mxu1 %v34436_v14  ;;  %v19203_v14 = vand.u32 4294901760, %v34535_v62  ;;  %v19662_v40 = vsel %vm1039_vm0, %v18463_v17, 0  ;;  %v19677_v54 = vand.u32 4294901760, %v20442_v49 }
0x1443   :  { %29319 = vmatpush3.bf16.msra.mxu1 %v34487_v5  ;;  %26032 = vmatprep.mubr.f32.mxu1 %v19149_v48  ;;  %v19196_v63 = vand.u32 4294901760, %v34527_v29  ;;  %v29356_v21 = vpack.c.bf16 %v34535_v62, %v34527_v29  ;;  %v34607_v27 = vand.u32 4294901760, %v19662_v40 }
0x1444   :  { %29321 = vmatprep.subr.bf16.mxu1 %v34515_v19  ;;  %v19204_v25 = vsub.f32 %v34535_v62, %v19203_v14  ;;  %v34664_v52 = vsub.f32 %v20442_v49, %v19677_v54  ;;  %v34667_v57 = vpack.c.bf16 %v19677_v54, %v19674_v50 }
0x1445   :  { %v19197_v6 = vsub.f32 %v34527_v29, %v19196_v63  ;;  %v34621_v28 = vsub.f32 %v19662_v40, %v34607_v27 }
0x1446   :  { %v19205_v51 = vand.u32 4294901760, %v19204_v25  ;;  %v29448_v32 = vpack.c.bf16 %v34664_v52, %v34662_v55 }
0x1447   :  { %29323 = vmatpush3.bf16.msra.mxu1 %v34515_v19  ;;  %v19198_v45 = vand.u32 4294901760, %v19197_v6  ;;  %v19742_v3 = vand.u32 4294901760, %v34621_v28  ;;  %v19784_v6 = vand.u32 4294901760, %v34664_v52 }
0x1448   :  { %29325 = vmatprep.subr.bf16.mxu1 %v34533_v61 }
0x1449   :  { %v29340_v10 = vpack.c.bf16 %v19205_v51, %v19198_v45  ;;  %v19743_v7 = vsub.f32 %v34621_v28, %v19742_v3  ;;  %v19785_v51 = vsub.f32 %v34664_v52, %v19784_v6 }
0x144b   :  { %29327 = vmatpush3.bf16.msra.mxu1 %v34533_v61 }
0x144c   :  { %29329 = vmatprep.subr.bf16.mxu1 %v34537_v53 }
0x144f   :  { %29331 = vmatpush3.bf16.msra.mxu1 %v34537_v53 }
0x1450   :  { %29333 = vmatprep.subr.bf16.mxu1 %v29332_v18 }
0x1452   :  { %26033 = vmatmul.mubr.f32.vlgmr.msra.gmra.mrb[22].mxu1 %v19159_v43  ;;  %v19778_v43 = vsub.f32 %v34662_v55, %v19777_v59 }
0x1453   :  { %29335 = vmatpush3.bf16.msra.mxu1 %v29332_v18  ;;  %26051 = vmatprep.mubr.f32.mxu1 %v34456_v12 }
0x1454   :  { %29337 = vmatprep.subr.bf16.mxu1 %v29336_v26 }
0x1457   :  { %29339 = vmatpush3.bf16.msra.mxu1 %v29336_v26 }
0x1458   :  { %29341 = vmatprep.subr.bf16.mxu1 %v29340_v10 }
0x145b   :  { %29343 = vmatpush3.bf16.msra.mxu1 %v29340_v10 }
0x145c   :  { %29345 = vmatprep.subr.bf16.mxu1 %v29344_v20 }
0x145f   :  { %29347 = vmatpush3.bf16.msra.mxu1 %v29344_v20 }
0x1460   :  { %29349 = vmatprep.subr.bf16.mxu1 %v29348_v35 }
0x1462   :  { %26052 = vmatmul.mubr.f32.vlgmr.msra.gmra.mrb[22].mxu1 %v34512_v30 }
0x1463   :  { %29351 = vmatpush3.bf16.msra.mxu1 %v29348_v35  ;;  %26070 = vmatprep.mubr.f32.mxu1 %v34468_v41  ;;  %v29384_v41 = vpack.c.bf16 %v19189_v37, %v19182_v33  ;;  %v20443_v33 = vld [vmem:[%s34795_s12 + $0xa0] sm:$0xff]  ;;  %v20444_v37 = vld [vmem:[%s34795_s12 + $0xa8] sm:$0xff]  ;;  %v19779_v35 = vand.u32 4294901760, %v19778_v43 }
0x1464   :  { %29353 = vmatprep.subr.bf16.mxu1 %v29352_v44 }
0x1467   :  { %29355 = vmatpush3.bf16.msra.mxu1 %v29352_v44  ;;  %v19786_v44 = vand.u32 4294901760, %v19785_v51 }
0x1468   :  { %29357 = vmatprep.subr.bf16.mxu1 %v29356_v21 }
0x1469   :  { %v29432_v56 = vpack.c.bf16 %v19786_v44, %v19779_v35 }
0x146b   :  { %29359 = vmatpush3.bf16.msra.mxu1 %v29356_v21 }
0x146c   :  { %29361 = vmatprep.subr.bf16.mxu1 %v29360_v38 }
0x146f   :  { %29363 = vmatpush3.bf16.msra.mxu1 %v29360_v38 }
0x1470   :  { %29365 = vmatprep.subr.bf16.mxu1 %v34487_v5 }
0x1472   :  { %26071 = vmatmul.mubr.f32.vlgmr.msra.gmra.mrb[22].mxu1 %v34530_v34  ;;  %v20445_v34 = vld [vmem:[%s34795_s12 + $0xb0] sm:$0xff] }
0x1473   :  { %29367 = vmatpush3.bf16.msra.mxu1 %v34487_v5  ;;  %26089 = vmatprep.mubr.f32.mxu1 %v19147_v46  ;;  %v29388_v46 = vpack.c.bf16 %v19203_v14, %v19196_v63  ;;  %v19683_v63 = vand.u32 4294901760, %v20444_v37  ;;  %v19686_v16 = vand.u32 4294901760, %v20445_v34 }
0x1474   :  { %29369 = vmatprep.subr.bf16.mxu1 %v34515_v19 }
0x1475   :  { %v34687_v25 = vsub.f32 %v20444_v37, %v19683_v63  ;;  %v34702_v10 = vsub.f32 %v20445_v34, %v19686_v16 }
0x1477   :  { %29371 = vmatpush3.bf16.msra.mxu1 %v34515_v19  ;;  %v19798_v8 = vand.u32 4294901760, %v34687_v25 }
0x1478   :  { %29373 = vmatprep.subr.bf16.mxu1 %v34533_v61 }
0x1479   :  { %v19799_v38 = vsub.f32 %v34687_v25, %v19798_v8 }
0x147b   :  { %29375 = vmatpush3.bf16.msra.mxu1 %v34533_v61  ;;  %v19800_v17 = vand.u32 4294901760, %v19799_v38 }
0x147c   :  { %29377 = vmatprep.subr.bf16.mxu1 %v34537_v53 }
0x147f   :  { %29379 = vmatpush3.bf16.msra.mxu1 %v34537_v53 }
0x1480   :  { %29381 = vmatprep.subr.bf16.mxu1 %v29380_v13 }
0x1482   :  { %26090 = vmatmul.mubr.f32.vlgmr.msra.gmra.mrb[22].mxu1 %v19157_v22  ;;  %v19744_v22 = vand.u32 4294901760, %v19743_v7 }
0x1483   :  { %29383 = vmatpush3.bf16.msra.mxu1 %v29380_v13  ;;  %26108 = vmatprep.mubr.f32.mxu1 %v34456_v12  ;;  %v19805_v13 = vand.u32 4294901760, %v34702_v10 }
0x1484   :  { %29385 = vmatprep.subr.bf16.mxu1 %v29384_v41 }
0x1485   :  { %v19806_v40 = vsub.f32 %v34702_v10, %v19805_v13 }
0x1487   :  { %29387 = vmatpush3.bf16.msra.mxu1 %v29384_v41 }
0x1488   :  { %29389 = vmatprep.subr.bf16.mxu1 %v29388_v46 }
0x148b   :  { %29391 = vmatpush3.bf16.msra.mxu1 %v29388_v46 }
0x148c   :  { %29393 = vmatprep.subr.bf16.mxu1 %v29392_v36 }
0x148f   :  { %29395 = vmatpush3.bf16.msra.mxu1 %v29392_v36 }
0x1490   :  { %29397 = vmatprep.subr.bf16.mxu1 %v34487_v5 }
0x1492   :  { %26109 = vmatmul.mubr.f32.vlgmr.msra.gmra.mrb[22].mxu1 %v34512_v30 }
0x1493   :  { %29399 = vmatpush3.bf16.msra.mxu1 %v34487_v5  ;;  %26127 = vmatprep.mubr.f32.mxu1 %v34456_v12  ;;  %v18464_v5 = vsel %vm1637_vm2, %v18460_v42, 0.0  ;;  %v19671_v12 = vand.u32 4294901760, %v20440_v15 }
0x1494   :  { %29401 = vmatprep.subr.bf16.mxu1 %v34515_v19  ;;  %v19665_v11 = vsel %vm1039_vm0, %v18464_v5, 0 }
0x1495   :  { %v34637_v48 = vsub.f32 %v20440_v15, %v19671_v12  ;;  %v34640_v2 = vpack.c.bf16 %v19671_v12, %v19668_v1  ;;  %v34651_v29 = vand.u32 4294901760, %v19665_v11  ;;  %v19807_v15 = vand.u32 4294901760, %v19806_v40 }
0x1497   :  { %29403 = vmatpush3.bf16.msra.mxu1 %v34515_v19  ;;  %v34635_v19 = vsub.f32 %v20439_v39, %v19668_v1  ;;  %v19770_v4 = vand.u32 4294901760, %v34637_v48  ;;  %v34670_v14 = vsub.f32 %v19665_v11, %v34651_v29 }
0x1498   :  { %29405 = vmatprep.subr.bf16.mxu1 %v34533_v61 }
0x1499   :  { %v19763_v62 = vand.u32 4294901760, %v34635_v19  ;;  %v19771_v60 = vsub.f32 %v34637_v48, %v19770_v4  ;;  %v19752_v31 = vand.u32 4294901760, %v34670_v14  ;;  %v29444_v12 = vpack.c.bf16 %v34637_v48, %v34635_v19  ;;  %v20447_v48 = vld [vmem:[%s34797_s13] ss:$0 sm:$0xff] }
0x149b   :  { %29407 = vmatpush3.bf16.msra.mxu1 %v34533_v61  ;;  %v20446_v61 = vld [vmem:[%s34795_s12 + $0xb8] sm:$0xff]  ;;  %v19764_v18 = vsub.f32 %v34635_v19, %v19763_v62  ;;  %v19772_v45 = vand.u32 4294901760, %v19771_v60  ;;  %v19753_v24 = vsub.f32 %v34670_v14, %v19752_v31  ;;  %v29476_v50 = vpack.c.bf16 %v19770_v4, %v19763_v62 }
0x149c   :  { %29409 = vmatprep.subr.bf16.mxu1 %v34537_v53  ;;  %v19689_v47 = vand.u32 4294901760, %v20446_v61 }
0x149d   :  { %v19765_v26 = vand.u32 4294901760, %v19764_v18  ;;  %v19754_v46 = vand.u32 4294901760, %v19753_v24 }
0x149e   :  { %v34689_v0 = vpack.c.bf16 %v19689_v47, %v19686_v16  ;;  %v34704_v58 = vsub.f32 %v20446_v61, %v19689_v47 }
0x149f   :  { %29411 = vmatpush3.bf16.msra.mxu1 %v34537_v53  ;;  %v19680_v53 = vand.u32 4294901760, %v20443_v33  ;;  %v29428_v20 = vpack.c.bf16 %v19772_v45, %v19765_v26 }
0x14a0   :  { %29413 = vmatprep.subr.bf16.mxu1 %v34640_v2  ;;  %v19812_v41 = vand.u32 4294901760, %v34704_v58  ;;  %v29456_v11 = vpack.c.bf16 %v34704_v58, %v34702_v10 }
0x14a1   :  { %v34685_v23 = vsub.f32 %v20443_v33, %v19680_v53  ;;  %v20257_v33 = vld [vmem:[%s34798_s1] sm:$0xff] }
0x14a2   :  { %26128 = vmatmul.mubr.f32.vlgmr.msra.gmra.mrb[22].mxu1 %v34512_v30  ;;  %v34683_v30 = vpack.c.bf16 %v19683_v63, %v19680_v53  ;;  %v19813_v42 = vsub.f32 %v34704_v58, %v19812_v41  ;;  %v29488_v19 = vpack.c.bf16 %v19812_v41, %v19805_v13 }
0x14a3   :  { %29415 = vmatpush3.bf16.msra.mxu1 %v34640_v2  ;;  %26146 = vmatprep.mubr.f32.mxu1 %v19744_v22  ;;  %v19791_v9 = vand.u32 4294901760, %v34685_v23  ;;  %v29452_v49 = vpack.c.bf16 %v34687_v25, %v34685_v23 }
0x14a4   :  { %29417 = vmatprep.subr.bf16.mxu1 %v34667_v57  ;;  %v19814_v5 = vand.u32 4294901760, %v19813_v42 }
0x14a5   :  { %v19792_v21 = vsub.f32 %v34685_v23, %v19791_v9 }
0x14a6   :  { %v29440_v1 = vpack.c.bf16 %v19814_v5, %v19807_v15 }
0x14a7   :  { %29419 = vmatpush3.bf16.msra.mxu1 %v34667_v57  ;;  %v19793_v36 = vand.u32 4294901760, %v19792_v21 }
0x14a8   :  { %29421 = vmatprep.subr.bf16.mxu1 %v34683_v30 }
0x14a9   :  { %v29436_v39 = vpack.c.bf16 %v19800_v17, %v19793_v36 }
0x14ab   :  { %29423 = vmatpush3.bf16.msra.mxu1 %v34683_v30 }
0x14ac   :  { %29425 = vmatprep.subr.bf16.mxu1 %v34689_v0 }
0x14af   :  { %29427 = vmatpush3.bf16.msra.mxu1 %v34689_v0 }
0x14b0   :  { %29429 = vmatprep.subr.bf16.mxu1 %v29428_v20 }
0x14b2   :  { %26147 = vmatmul.mubr.f32.vlgmr.msra.gmra.mrb[22].mxu1 %v19754_v46 }
0x14b3   :  { %29431 = vmatpush3.bf16.msra.mxu1 %v29428_v20  ;;  %26165 = vmatprep.mubr.f32.mxu1 %v34607_v27 }
0x14b4   :  { %29433 = vmatprep.subr.bf16.mxu1 %v29432_v56 }
0x14b7   :  { %29435 = vmatpush3.bf16.msra.mxu1 %v29432_v56 }
0x14b8   :  { %29437 = vmatprep.subr.bf16.mxu1 %v29436_v39 }
0x14bb   :  { %29439 = vmatpush3.bf16.msra.mxu1 %v29436_v39 }
0x14bc   :  { %29441 = vmatprep.subr.bf16.mxu1 %v29440_v1 }
0x14bf   :  { %29443 = vmatpush3.bf16.msra.mxu1 %v29440_v1 }
0x14c0   :  { %29445 = vmatprep.subr.bf16.mxu1 %v29444_v12 }
0x14c2   :  { %26166 = vmatmul.mubr.f32.vlgmr.msra.gmra.mrb[22].mxu1 %v34651_v29 }
0x14c3   :  { %29447 = vmatpush3.bf16.msra.mxu1 %v29444_v12  ;;  %26184 = vmatprep.mubr.f32.mxu1 %v34621_v28  ;;  %v29480_v28 = vpack.c.bf16 %v19784_v6, %v19777_v59 }
0x14c4   :  { %29449 = vmatprep.subr.bf16.mxu1 %v29448_v32 }
0x14c7   :  { %29451 = vmatpush3.bf16.msra.mxu1 %v29448_v32 }
0x14c8   :  { %29453 = vmatprep.subr.bf16.mxu1 %v29452_v49 }
0x14cb   :  { %29455 = vmatpush3.bf16.msra.mxu1 %v29452_v49 }
0x14cc   :  { %29457 = vmatprep.subr.bf16.mxu1 %v29456_v11 }
0x14cf   :  { %29459 = vmatpush3.bf16.msra.mxu1 %v29456_v11 }
0x14d0   :  { %29461 = vmatprep.subr.bf16.mxu1 %v34640_v2 }
0x14d2   :  { %26185 = vmatmul.mubr.f32.vlgmr.msra.gmra.mrb[22].mxu1 %v34670_v14 }
0x14d3   :  { %29463 = vmatpush3.bf16.msra.mxu1 %v34640_v2  ;;  %26203 = vmatprep.mubr.f32.mxu1 %v19742_v3  ;;  %v29484_v3 = vpack.c.bf16 %v19798_v8, %v19791_v9 }
0x14d4   :  { %29465 = vmatprep.subr.bf16.mxu1 %v34667_v57 }
0x14d7   :  { %29467 = vmatpush3.bf16.msra.mxu1 %v34667_v57 }
0x14d8   :  { %29469 = vmatprep.subr.bf16.mxu1 %v34683_v30 }
0x14db   :  { %29471 = vmatpush3.bf16.msra.mxu1 %v34683_v30 }
0x14dc   :  { %29473 = vmatprep.subr.bf16.mxu1 %v34689_v0 }
0x14df   :  { %29475 = vmatpush3.bf16.msra.mxu1 %v34689_v0 }
0x14e0   :  { %29477 = vmatprep.subr.bf16.mxu1 %v29476_v50 }
0x14e2   :  { %26204 = vmatmul.mubr.f32.vlgmr.msra.gmra.mrb[22].mxu1 %v19752_v31 }
0x14e3   :  { %29479 = vmatpush3.bf16.msra.mxu1 %v29476_v50  ;;  %26222 = vmatprep.mubr.f32.mxu1 %v34607_v27 }
0x14e4   :  { %29481 = vmatprep.subr.bf16.mxu1 %v29480_v28 }
0x14e7   :  { %29483 = vmatpush3.bf16.msra.mxu1 %v29480_v28 }
0x14e8   :  { %29485 = vmatprep.subr.bf16.mxu1 %v29484_v3 }
0x14eb   :  { %29487 = vmatpush3.bf16.msra.mxu1 %v29484_v3 }
0x14ec   :  { %29489 = vmatprep.subr.bf16.mxu1 %v29488_v19 }
0x14ef   :  { %29491 = vmatpush3.bf16.msra.mxu1 %v29488_v19 }
0x14f0   :  { %29493 = vmatprep.subr.bf16.mxu1 %v34640_v2 }
0x14f2   :  { %26223 = vmatmul.mubr.f32.vlgmr.msra.gmra.mrb[22].mxu1 %v34651_v29 }
0x14f3   :  { %29495 = vmatpush3.bf16.msra.mxu1 %v34640_v2  ;;  %26241 = vmatprep.mubr.f32.mxu1 %v34607_v27  ;;  %v20258_v27 = vld [vmem:[%s34798_s1 + $0x8] sm:$0xff] }
0x14f4   :  { %29497 = vmatprep.subr.bf16.mxu1 %v34667_v57 }
0x14f7   :  { %29499 = vmatpush3.bf16.msra.mxu1 %v34667_v57 }
0x14f8   :  { %29501 = vmatprep.subr.bf16.mxu1 %v34683_v30 }
0x14fb   :  { %29503 = vmatpush3.bf16.msra.mxu1 %v34683_v30 }
0x14fc   :  { %29505 = vmatprep.subr.bf16.mxu1 %v34689_v0 }
0x14ff   :  { %29507 = vmatpush3.bf16.msra.mxu1 %v34689_v0 }
0x1502   :  { %26242 = vmatmul.mubr.f32.vlgmr.msra.gmra.mrb[22].mxu1 %v34651_v29 }
0x15d5   :  { %v26243_v2 = vpop.f32.mrb[22].mxu1 }
0x15d6   :  { %v20256_v54 = vadd.f32 %v26243_v2, %v20447_v48  ;;  %v20237_v7 = vpop.f32.mrb[23].mxu1 }
0x15d7   :  { %v20255_v37 = vadd.f32 %v20447_v48, %v20237_v7 }
0x15d8   :  { %v20260_v34 = vadd.f32 %v20258_v27, %v20256_v54 }
0x15d9   :  { %v20259_v61 = vadd.f32 %v20257_v33, %v20255_v37 }
0x15da   :  { %20263 = vst.msk [vmem:[%s34799_s14 + $0x8] sm:$0xff] %vm20261_vm3, %v20260_v34 }
0x15db   :  { %20262 = vst.msk [vmem:[%s34799_s14] sm:$0xff] %vm20261_vm3, %v20259_v61 }

</bundles_post_ra>
